<compile_context>
chip_gen: v7x
topology: tpu7x:2x2x1
jax: 0.10.0
libtpu: 0.0.40
codegen_flags: <defaults>
</compile_context>

<pallas_src>
import functools

import numpy as np
import jax
import jax.numpy as jnp
from jax.experimental import pallas as pl
from jax.experimental.pallas import tpu as pltpu

# ----- module config (DoG_Loss2D_Config defaults) ----------------------------
CHANNELS = 2
KERNEL_SIZES = (3, 5, 7, 11, 17, 27)
SIGMA = 0.34
NK = len(KERNEL_SIZES)
PADS = tuple(k // 2 for k in KERNEL_SIZES)
PAD_MAX = max(PADS)          # 13


def _gauss_1d(k: int, sigma: float) -> np.ndarray:
    # exp(-(x^2+y^2)/(2s^2)) / sum separates exactly into outer(g, g) with
    # g = exp(-x^2/(2s^2)) / sum(exp(-x^2/(2s^2))).
    coords = np.linspace(-1.0, 1.0, k)
    g = np.exp(-(coords ** 2) / (2.0 * sigma ** 2))
    return g / g.sum()


def _gauss_2d(k: int, sigma: float) -> np.ndarray:
    coords = np.linspace(-1.0, 1.0, k)
    g = np.exp(-(coords[None, :] ** 2 + coords[:, None] ** 2) / (2.0 * sigma ** 2))
    return g / g.sum()


G1D = tuple(_gauss_1d(k, SIGMA) for k in KERNEL_SIZES)      # float64 1D taps
G2D = tuple(_gauss_2d(k, SIGMA) for k in KERNEL_SIZES)      # float64 2D (reference)


def _toeplitz_bank(W: int) -> np.ndarray:
    """(NK, Wp, W) banded matrices: horizontal 'same' conv == v_padded @ T[i]."""
    Wp = W + 2 * PAD_MAX
    bank = np.zeros((NK, Wp, W), np.float32)
    for i, (g, p) in enumerate(zip(G1D, PADS)):
        r0 = PAD_MAX - p
        for w in range(W):
            for j in range(len(g)):
                bank[i, r0 + w + j, w] = np.float32(g[j])
    return bank


# ----- Pallas kernel ----------------------------------------------------------
def _dog_loss_kernel(scal_ref, sample_ref, target_ref, toep_ref,
                     nll_ref, dl_ref, *, H, W):
    """One batch element per grid step.

    scal_ref   : SMEM (2, NK) f32  -- row0 = mse_logvar, row1 = 1/exp(mse_logvar)
    sample_ref : VMEM (1, 2*NK,     Hp, Wp)
    target_ref : VMEM (1, CHANNELS, Hp, Wp)
    toep_ref   : VMEM (NK, Wp, W)
    nll_ref    : VMEM (1, 1, 1)
    dl_ref     : VMEM (1, 1, NK)
    """

    def gauss_conv(src_ref, ch0, scale):
        """Depthwise 'same' Gaussian conv -> list of CHANNELS (H, W) f32 arrays."""
        g = G1D[scale]
        p = PADS[scale]
        r0 = PAD_MAX - p
        # Vertical pass: static ref slices per tap (VMEM loads), f32 VPU accum.
        acc = float(g[0]) * src_ref[0, ch0:ch0 + CHANNELS, r0:r0 + H, :]
        for t in range(1, len(g)):
            acc = acc + float(g[t]) * src_ref[0, ch0:ch0 + CHANNELS,
                                              r0 + t:r0 + t + H, :]
        # Horizontal pass: banded-Toeplitz matmul on the MXU.
        tmat = toep_ref[scale]                                       # (Wp, W)
        return [jnp.dot(acc[c], tmat, preferred_element_type=jnp.float32)
                for c in range(CHANNELS)]

    inv_n = 1.0 / float(CHANNELS * H * W)
    lane = jax.lax.broadcasted_iota(jnp.int32, (1, NK), 1)

    nll = jnp.zeros((1, 1), jnp.float32)
    dl_vec = jnp.zeros((1, NK), jnp.float32)

    # Rolling target DoG pyramid: only two filtered targets live at a time.
    t_cur = gauss_conv(target_ref, 0, 0)
    for i in range(NK):
        if i < NK - 1:
            t_next = gauss_conv(target_ref, 0, i + 1)
            t_dog = [a - b for a, b in zip(t_cur, t_next)]
        else:
            t_next = None
            t_dog = t_cur

        s_a = gauss_conv(sample_ref, 2 * i, i)
        if i < NK - 1:
            s_b = gauss_conv(sample_ref, 2 * i, i + 1)
            s_dog = [a - b for a, b in zip(s_a, s_b)]
        else:
            s_dog = s_a

        sq = jnp.zeros((), jnp.float32)
        for c in range(CHANNELS):
            d = s_dog[c] - t_dog[c]
            sq = sq + jnp.sum(d * d)
        dog_loss = sq * inv_n                         # mean over (C, H, W)

        dl_vec = dl_vec + jnp.where(lane == i, dog_loss, 0.0)
        lv = scal_ref[0, i]                           # SMEM scalar reads
        inv_var = scal_ref[1, i]
        nll = nll + dog_loss * inv_var + lv

        if i < NK - 1:
            t_cur = t_next

    nll_ref[0] = nll                                  # single stores at the end
    dl_ref[0] = dl_vec


# ----- wrapper ----------------------------------------------------------------
def dog_loss_2d(sample, target, mse_logvar):
    """Forward of DoG_Loss2D.  Returns (nll_loss[B], [dog_loss[B]] * NK)."""
    B, c12, H, W = sample.shape
    assert c12 == 2 * NK
    assert target.shape == (B, CHANNELS, H, W)
    Hp, Wp = H + 2 * PAD_MAX, W + 2 * PAD_MAX

    pad = ((0, 0), (0, 0), (PAD_MAX, PAD_MAX), (PAD_MAX, PAD_MAX))
    sample_p = jnp.pad(sample.astype(jnp.float32), pad, mode="reflect")
    target_p = jnp.pad(target.astype(jnp.float32), pad, mode="reflect")

    lv = mse_logvar.astype(jnp.float32)
    scal = jnp.stack([lv, 1.0 / jnp.exp(lv)], axis=0)            # (2, NK) SMEM
    toep = jnp.asarray(_toeplitz_bank(W))                        # (NK, Wp, W)

    kernel = functools.partial(_dog_loss_kernel, H=H, W=W)

    # rough advisory cost: 207 vertical taps + 17 horizontal matmuls per element
    n_taps = sum(KERNEL_SIZES) * 2 + sum(KERNEL_SIZES[1:])
    flops = B * (2 * CHANNELS * H * Wp * n_taps +
                 2 * CHANNELS * H * Wp * W * (2 * NK - 1))
    cost = pl.CostEstimate(
        flops=int(flops), transcendentals=0,
        bytes_accessed=int((sample_p.size + target_p.size + toep.size) * 4))

    nll3, dl3 = pl.pallas_call(
        kernel,
        out_shape=(
            jax.ShapeDtypeStruct((B, 1, 1), jnp.float32),
            jax.ShapeDtypeStruct((B, 1, NK), jnp.float32),
        ),
        grid=(B,),
        in_specs=[
            pl.BlockSpec(memory_space=pltpu.MemorySpace.SMEM),           # scal
            pl.BlockSpec((1, 2 * NK, Hp, Wp), lambda b: (b, 0, 0, 0)),   # sample
            pl.BlockSpec((1, CHANNELS, Hp, Wp), lambda b: (b, 0, 0, 0)), # target
            pl.BlockSpec((NK, Wp, W), lambda b: (0, 0, 0)),              # toeplitz
        ],
        out_specs=(
            pl.BlockSpec((1, 1, 1), lambda b: (b, 0, 0)),
            pl.BlockSpec((1, 1, NK), lambda b: (b, 0, 0)),
        ),
        compiler_params=pltpu.CompilerParams(
            dimension_semantics=("parallel",)),
        cost_estimate=cost,
    )(scal, sample_p, target_p, toep)

    nll = nll3[:, 0, 0]
    dog_losses = [dl3[:, 0, i] for i in range(NK)]
    return nll, dog_losses


# ----- pure-numpy float64 reference (mirrors the PyTorch module) --------------
def _reference_np(sample, target, mse_logvar):
    sample = np.asarray(sample, np.float64)
    target = np.asarray(target, np.float64)
    lv = np.asarray(mse_logvar, np.float64)

    def conv(x, k2d, p):
        k = k2d.shape[0]
        H, W = x.shape[2], x.shape[3]
        xp = np.pad(x, ((0, 0), (0, 0), (p, p), (p, p)), mode="reflect")
        out = np.zeros_like(x)
        for dy in range(k):
            for dx in range(k):
                out += k2d[dy, dx] * xp[:, :, dy:dy + H, dx:dx + W]
        return out

    filt = [conv(target, G2D[i], PADS[i]) for i in range(NK)]
    tdogs = [filt[i] - filt[i + 1] for i in range(NK - 1)] + [filt[-1]]

    nll = np.zeros(sample.shape[0])
    dls = []
    for i, td in enumerate(tdogs):
        sl = sample[:, 2 * i:2 * i + 2]
        if i < NK - 1:
            sd = conv(sl, G2D[i], PADS[i]) - conv(sl, G2D[i + 1], PADS[i + 1])
        else:
            sd = conv(sl, G2D[i], PADS[i])
        dl = ((sd - td) ** 2).mean(axis=(1, 2, 3))
        nll = nll + dl / np.exp(lv[i]) + lv[i]
        dls.append(dl)
    return nll, dls


# ----- demo -------------------------------------------------------------------
if __name__ == "__main__":
    B, H, W = 2, 16, 16
    key = jax.random.PRNGKey(0)
    k1, k2 = jax.random.split(key)
    sample = jax.random.normal(k1, (B, 2 * NK, H, W), dtype=jnp.float32)
    target = jax.random.normal(k2, (B, CHANNELS, H, W), dtype=jnp.float32)
    # nn.Parameter(torch.zeros(len(kernel_sizes))) -> deterministic zeros
    mse_logvar = jnp.zeros((NK,), jnp.float32)

    nll, dog_losses = dog_loss_2d(sample, target, mse_logvar)
    nll = jax.block_until_ready(nll)
    dog_losses = [jax.block_until_ready(d) for d in dog_losses]

    ref_nll, ref_dls = _reference_np(np.asarray(sample), np.asarray(target),
                                     np.asarray(mse_logvar))
    assert np.allclose(np.asarray(nll), ref_nll, rtol=2e-2, atol=1e-5), \
        "nll mismatch"
    for a, b in zip(dog_losses, ref_dls):
        assert np.allclose(np.asarray(a), b, rtol=2e-2, atol=1e-5), \
            "dog_loss mismatch"

    print("KERNEL_OK")
</pallas_src>

<mosaic_0001>
module attributes {stable_mosaic.version = 11 : i64} {
  func.func @_dog_loss_kernel(%arg0: i32, %arg1: memref<2x6xf32, #tpu.memory_space<smem>>, %arg2: memref<1x12x42x42xf32, #tpu.memory_space<vmem>>, %arg3: memref<1x2x42x42xf32, #tpu.memory_space<vmem>>, %arg4: memref<6x42x16xf32, #tpu.memory_space<vmem>>, %arg5: memref<1x1x1xf32, #tpu.memory_space<vmem>>, %arg6: memref<1x1x6xf32, #tpu.memory_space<vmem>>) attributes {dimension_semantics = [#tpu.dimension_semantics<parallel>], iteration_bounds = array<i64: 2>, scalar_prefetch = 0 : i64, scratch_operands = 0 : i64, tpu.core_type = #tpu.core_type<tc>, window_params = [{transform_indices = @transform_0, window_bounds = array<i64: 2, 6>}, {transform_indices = @transform_1, window_bounds = array<i64: 1, 12, 42, 42>}, {transform_indices = @transform_2, window_bounds = array<i64: 1, 2, 42, 42>}, {pipeline_mode = #tpu.pipeline_mode<synchronous>, transform_indices = @transform_3, window_bounds = array<i64: 6, 42, 16>}, {transform_indices = @transform_4, window_bounds = array<i64: 1, 1, 1>}, {transform_indices = @transform_5, window_bounds = array<i64: 1, 1, 6>}]} {
    %0 = tpu.iota {dimensions = array<i32: 1>} : vector<1x6xi32>
    %cst = arith.constant 0.000000e+00 : f32
    %1 = vector.broadcast %cst : f32 to vector<1x1xf32>
    %cst_0 = arith.constant 0.000000e+00 : f32
    %2 = vector.broadcast %cst_0 : f32 to vector<1x6xf32>
    %c0 = arith.constant 0 : index
    %c0_1 = arith.constant 0 : index
    %c12 = arith.constant 12 : index
    %c0_2 = arith.constant 0 : index
    %3 = vector.load %arg3[%c0, %c0_1, %c12, %c0_2] : memref<1x2x42x42xf32, #tpu.memory_space<vmem>>, vector<1x2x16x42xf32>
    %4 = vector.shape_cast %3 : vector<1x2x16x42xf32> to vector<2x16x42xf32>
    %cst_3 = arith.constant 0.0128890686 : f32
    %5 = vector.broadcast %cst_3 : f32 to vector<2x16x42xf32>
    %6 = arith.mulf %5, %4 : vector<2x16x42xf32>
    %c0_4 = arith.constant 0 : index
    %c0_5 = arith.constant 0 : index
    %c13 = arith.constant 13 : index
    %c0_6 = arith.constant 0 : index
    %7 = vector.load %arg3[%c0_4, %c0_5, %c13, %c0_6] : memref<1x2x42x42xf32, #tpu.memory_space<vmem>>, vector<1x2x16x42xf32>
    %8 = vector.shape_cast %7 : vector<1x2x16x42xf32> to vector<2x16x42xf32>
    %cst_7 = arith.constant 0.974221885 : f32
    %9 = vector.broadcast %cst_7 : f32 to vector<2x16x42xf32>
    %10 = arith.mulf %9, %8 : vector<2x16x42xf32>
    %11 = arith.addf %6, %10 : vector<2x16x42xf32>
    %c0_8 = arith.constant 0 : index
    %c0_9 = arith.constant 0 : index
    %c14 = arith.constant 14 : index
    %c0_10 = arith.constant 0 : index
    %12 = vector.load %arg3[%c0_8, %c0_9, %c14, %c0_10] : memref<1x2x42x42xf32, #tpu.memory_space<vmem>>, vector<1x2x16x42xf32>
    %13 = vector.shape_cast %12 : vector<1x2x16x42xf32> to vector<2x16x42xf32>
    %cst_11 = arith.constant 0.0128890686 : f32
    %14 = vector.broadcast %cst_11 : f32 to vector<2x16x42xf32>
    %15 = arith.mulf %14, %13 : vector<2x16x42xf32>
    %16 = arith.addf %11, %15 : vector<2x16x42xf32>
    %c0_12 = arith.constant 0 : index
    %c0_13 = arith.constant 0 : index
    %c0_14 = arith.constant 0 : index
    %17 = vector.load %arg4[%c0_12, %c0_13, %c0_14] : memref<6x42x16xf32, #tpu.memory_space<vmem>>, vector<1x42x16xf32>
    %18 = vector.shape_cast %17 : vector<1x42x16xf32> to vector<42x16xf32>
    %19 = vector.extract_strided_slice %16 {offsets = [0, 0, 0], sizes = [1, 16, 42], strides = [1, 1, 1]} : vector<2x16x42xf32> to vector<1x16x42xf32>
    %20 = vector.shape_cast %19 : vector<1x16x42xf32> to vector<16x42xf32>
    %cst_15 = arith.constant dense<0.000000e+00> : vector<16x16xf32>
    %21 = tpu.matmul %20, %18, %cst_15 {dimension_numbers = #tpu.dot_dimension_numbers<[1], [0], [0], [1], [0, 0, 1, 1], [], []>} : vector<16x42xf32>, vector<42x16xf32>, vector<16x16xf32> -> vector<16x16xf32>
    %22 = vector.extract_strided_slice %16 {offsets = [1, 0, 0], sizes = [1, 16, 42], strides = [1, 1, 1]} : vector<2x16x42xf32> to vector<1x16x42xf32>
    %23 = vector.shape_cast %22 : vector<1x16x42xf32> to vector<16x42xf32>
    %cst_16 = arith.constant dense<0.000000e+00> : vector<16x16xf32>
    %24 = tpu.matmul %23, %18, %cst_16 {dimension_numbers = #tpu.dot_dimension_numbers<[1], [0], [0], [1], [0, 0, 1, 1], [], []>} : vector<16x42xf32>, vector<42x16xf32>, vector<16x16xf32> -> vector<16x16xf32>
    %c0_17 = arith.constant 0 : index
    %c0_18 = arith.constant 0 : index
    %c11 = arith.constant 11 : index
    %c0_19 = arith.constant 0 : index
    %25 = vector.load %arg3[%c0_17, %c0_18, %c11, %c0_19] : memref<1x2x42x42xf32, #tpu.memory_space<vmem>>, vector<1x2x16x42xf32>
    %26 = vector.shape_cast %25 : vector<1x2x16x42xf32> to vector<2x16x42xf32>
    %cst_20 = arith.constant 0.00776069658 : f32
    %27 = vector.broadcast %cst_20 : f32 to vector<2x16x42xf32>
    %28 = arith.mulf %27, %26 : vector<2x16x42xf32>
    %c0_21 = arith.constant 0 : index
    %c0_22 = arith.constant 0 : index
    %c12_23 = arith.constant 12 : index
    %c0_24 = arith.constant 0 : index
    %29 = vector.load %arg3[%c0_21, %c0_22, %c12_23, %c0_24] : memref<1x2x42x42xf32, #tpu.memory_space<vmem>>, vector<1x2x16x42xf32>
    %30 = vector.shape_cast %29 : vector<1x2x16x42xf32> to vector<2x16x42xf32>
    %cst_25 = arith.constant 0.198942676 : f32
    %31 = vector.broadcast %cst_25 : f32 to vector<2x16x42xf32>
    %32 = arith.mulf %31, %30 : vector<2x16x42xf32>
    %33 = arith.addf %28, %32 : vector<2x16x42xf32>
    %c0_26 = arith.constant 0 : index
    %c0_27 = arith.constant 0 : index
    %c13_28 = arith.constant 13 : index
    %c0_29 = arith.constant 0 : index
    %34 = vector.load %arg3[%c0_26, %c0_27, %c13_28, %c0_29] : memref<1x2x42x42xf32, #tpu.memory_space<vmem>>, vector<1x2x16x42xf32>
    %35 = vector.shape_cast %34 : vector<1x2x16x42xf32> to vector<2x16x42xf32>
    %cst_30 = arith.constant 0.58659327 : f32
    %36 = vector.broadcast %cst_30 : f32 to vector<2x16x42xf32>
    %37 = arith.mulf %36, %35 : vector<2x16x42xf32>
    %38 = arith.addf %33, %37 : vector<2x16x42xf32>
    %c0_31 = arith.constant 0 : index
    %c0_32 = arith.constant 0 : index
    %c14_33 = arith.constant 14 : index
    %c0_34 = arith.constant 0 : index
    %39 = vector.load %arg3[%c0_31, %c0_32, %c14_33, %c0_34] : memref<1x2x42x42xf32, #tpu.memory_space<vmem>>, vector<1x2x16x42xf32>
    %40 = vector.shape_cast %39 : vector<1x2x16x42xf32> to vector<2x16x42xf32>
    %cst_35 = arith.constant 0.198942676 : f32
    %41 = vector.broadcast %cst_35 : f32 to vector<2x16x42xf32>
    %42 = arith.mulf %41, %40 : vector<2x16x42xf32>
    %43 = arith.addf %38, %42 : vector<2x16x42xf32>
    %c0_36 = arith.constant 0 : index
    %c0_37 = arith.constant 0 : index
    %c15 = arith.constant 15 : index
    %c0_38 = arith.constant 0 : index
    %44 = vector.load %arg3[%c0_36, %c0_37, %c15, %c0_38] : memref<1x2x42x42xf32, #tpu.memory_space<vmem>>, vector<1x2x16x42xf32>
    %45 = vector.shape_cast %44 : vector<1x2x16x42xf32> to vector<2x16x42xf32>
    %cst_39 = arith.constant 0.00776069658 : f32
    %46 = vector.broadcast %cst_39 : f32 to vector<2x16x42xf32>
    %47 = arith.mulf %46, %45 : vector<2x16x42xf32>
    %48 = arith.addf %43, %47 : vector<2x16x42xf32>
    %c1 = arith.constant 1 : index
    %c0_40 = arith.constant 0 : index
    %c0_41 = arith.constant 0 : index
    %49 = vector.load %arg4[%c1, %c0_40, %c0_41] : memref<6x42x16xf32, #tpu.memory_space<vmem>>, vector<1x42x16xf32>
    %50 = vector.shape_cast %49 : vector<1x42x16xf32> to vector<42x16xf32>
    %51 = vector.extract_strided_slice %48 {offsets = [0, 0, 0], sizes = [1, 16, 42], strides = [1, 1, 1]} : vector<2x16x42xf32> to vector<1x16x42xf32>
    %52 = vector.shape_cast %51 : vector<1x16x42xf32> to vector<16x42xf32>
    %cst_42 = arith.constant dense<0.000000e+00> : vector<16x16xf32>
    %53 = tpu.matmul %52, %50, %cst_42 {dimension_numbers = #tpu.dot_dimension_numbers<[1], [0], [0], [1], [0, 0, 1, 1], [], []>} : vector<16x42xf32>, vector<42x16xf32>, vector<16x16xf32> -> vector<16x16xf32>
    %54 = vector.extract_strided_slice %48 {offsets = [1, 0, 0], sizes = [1, 16, 42], strides = [1, 1, 1]} : vector<2x16x42xf32> to vector<1x16x42xf32>
    %55 = vector.shape_cast %54 : vector<1x16x42xf32> to vector<16x42xf32>
    %cst_43 = arith.constant dense<0.000000e+00> : vector<16x16xf32>
    %56 = tpu.matmul %55, %50, %cst_43 {dimension_numbers = #tpu.dot_dimension_numbers<[1], [0], [0], [1], [0, 0, 1, 1], [], []>} : vector<16x42xf32>, vector<42x16xf32>, vector<16x16xf32> -> vector<16x16xf32>
    %57 = arith.subf %21, %53 : vector<16x16xf32>
    %58 = arith.subf %24, %56 : vector<16x16xf32>
    %c0_44 = arith.constant 0 : index
    %c0_45 = arith.constant 0 : index
    %c12_46 = arith.constant 12 : index
    %c0_47 = arith.constant 0 : index
    %59 = vector.load %arg2[%c0_44, %c0_45, %c12_46, %c0_47] : memref<1x12x42x42xf32, #tpu.memory_space<vmem>>, vector<1x2x16x42xf32>
    %60 = vector.shape_cast %59 : vector<1x2x16x42xf32> to vector<2x16x42xf32>
    %cst_48 = arith.constant 0.0128890686 : f32
    %61 = vector.broadcast %cst_48 : f32 to vector<2x16x42xf32>
    %62 = arith.mulf %61, %60 : vector<2x16x42xf32>
    %c0_49 = arith.constant 0 : index
    %c0_50 = arith.constant 0 : index
    %c13_51 = arith.constant 13 : index
    %c0_52 = arith.constant 0 : index
    %63 = vector.load %arg2[%c0_49, %c0_50, %c13_51, %c0_52] : memref<1x12x42x42xf32, #tpu.memory_space<vmem>>, vector<1x2x16x42xf32>
    %64 = vector.shape_cast %63 : vector<1x2x16x42xf32> to vector<2x16x42xf32>
    %cst_53 = arith.constant 0.974221885 : f32
    %65 = vector.broadcast %cst_53 : f32 to vector<2x16x42xf32>
    %66 = arith.mulf %65, %64 : vector<2x16x42xf32>
    %67 = arith.addf %62, %66 : vector<2x16x42xf32>
    %c0_54 = arith.constant 0 : index
    %c0_55 = arith.constant 0 : index
    %c14_56 = arith.constant 14 : index
    %c0_57 = arith.constant 0 : index
    %68 = vector.load %arg2[%c0_54, %c0_55, %c14_56, %c0_57] : memref<1x12x42x42xf32, #tpu.memory_space<vmem>>, vector<1x2x16x42xf32>
    %69 = vector.shape_cast %68 : vector<1x2x16x42xf32> to vector<2x16x42xf32>
    %cst_58 = arith.constant 0.0128890686 : f32
    %70 = vector.broadcast %cst_58 : f32 to vector<2x16x42xf32>
    %71 = arith.mulf %70, %69 : vector<2x16x42xf32>
    %72 = arith.addf %67, %71 : vector<2x16x42xf32>
    %c0_59 = arith.constant 0 : index
    %c0_60 = arith.constant 0 : index
    %c0_61 = arith.constant 0 : index
    %73 = vector.load %arg4[%c0_59, %c0_60, %c0_61] : memref<6x42x16xf32, #tpu.memory_space<vmem>>, vector<1x42x16xf32>
    %74 = vector.shape_cast %73 : vector<1x42x16xf32> to vector<42x16xf32>
    %75 = vector.extract_strided_slice %72 {offsets = [0, 0, 0], sizes = [1, 16, 42], strides = [1, 1, 1]} : vector<2x16x42xf32> to vector<1x16x42xf32>
    %76 = vector.shape_cast %75 : vector<1x16x42xf32> to vector<16x42xf32>
    %cst_62 = arith.constant dense<0.000000e+00> : vector<16x16xf32>
    %77 = tpu.matmul %76, %74, %cst_62 {dimension_numbers = #tpu.dot_dimension_numbers<[1], [0], [0], [1], [0, 0, 1, 1], [], []>} : vector<16x42xf32>, vector<42x16xf32>, vector<16x16xf32> -> vector<16x16xf32>
    %78 = vector.extract_strided_slice %72 {offsets = [1, 0, 0], sizes = [1, 16, 42], strides = [1, 1, 1]} : vector<2x16x42xf32> to vector<1x16x42xf32>
    %79 = vector.shape_cast %78 : vector<1x16x42xf32> to vector<16x42xf32>
    %cst_63 = arith.constant dense<0.000000e+00> : vector<16x16xf32>
    %80 = tpu.matmul %79, %74, %cst_63 {dimension_numbers = #tpu.dot_dimension_numbers<[1], [0], [0], [1], [0, 0, 1, 1], [], []>} : vector<16x42xf32>, vector<42x16xf32>, vector<16x16xf32> -> vector<16x16xf32>
    %c0_64 = arith.constant 0 : index
    %c0_65 = arith.constant 0 : index
    %c11_66 = arith.constant 11 : index
    %c0_67 = arith.constant 0 : index
    %81 = vector.load %arg2[%c0_64, %c0_65, %c11_66, %c0_67] : memref<1x12x42x42xf32, #tpu.memory_space<vmem>>, vector<1x2x16x42xf32>
    %82 = vector.shape_cast %81 : vector<1x2x16x42xf32> to vector<2x16x42xf32>
    %cst_68 = arith.constant 0.00776069658 : f32
    %83 = vector.broadcast %cst_68 : f32 to vector<2x16x42xf32>
    %84 = arith.mulf %83, %82 : vector<2x16x42xf32>
    %c0_69 = arith.constant 0 : index
    %c0_70 = arith.constant 0 : index
    %c12_71 = arith.constant 12 : index
    %c0_72 = arith.constant 0 : index
    %85 = vector.load %arg2[%c0_69, %c0_70, %c12_71, %c0_72] : memref<1x12x42x42xf32, #tpu.memory_space<vmem>>, vector<1x2x16x42xf32>
    %86 = vector.shape_cast %85 : vector<1x2x16x42xf32> to vector<2x16x42xf32>
    %cst_73 = arith.constant 0.198942676 : f32
    %87 = vector.broadcast %cst_73 : f32 to vector<2x16x42xf32>
    %88 = arith.mulf %87, %86 : vector<2x16x42xf32>
    %89 = arith.addf %84, %88 : vector<2x16x42xf32>
    %c0_74 = arith.constant 0 : index
    %c0_75 = arith.constant 0 : index
    %c13_76 = arith.constant 13 : index
    %c0_77 = arith.constant 0 : index
    %90 = vector.load %arg2[%c0_74, %c0_75, %c13_76, %c0_77] : memref<1x12x42x42xf32, #tpu.memory_space<vmem>>, vector<1x2x16x42xf32>
    %91 = vector.shape_cast %90 : vector<1x2x16x42xf32> to vector<2x16x42xf32>
    %cst_78 = arith.constant 0.58659327 : f32
    %92 = vector.broadcast %cst_78 : f32 to vector<2x16x42xf32>
    %93 = arith.mulf %92, %91 : vector<2x16x42xf32>
    %94 = arith.addf %89, %93 : vector<2x16x42xf32>
    %c0_79 = arith.constant 0 : index
    %c0_80 = arith.constant 0 : index
    %c14_81 = arith.constant 14 : index
    %c0_82 = arith.constant 0 : index
    %95 = vector.load %arg2[%c0_79, %c0_80, %c14_81, %c0_82] : memref<1x12x42x42xf32, #tpu.memory_space<vmem>>, vector<1x2x16x42xf32>
    %96 = vector.shape_cast %95 : vector<1x2x16x42xf32> to vector<2x16x42xf32>
    %cst_83 = arith.constant 0.198942676 : f32
    %97 = vector.broadcast %cst_83 : f32 to vector<2x16x42xf32>
    %98 = arith.mulf %97, %96 : vector<2x16x42xf32>
    %99 = arith.addf %94, %98 : vector<2x16x42xf32>
    %c0_84 = arith.constant 0 : index
    %c0_85 = arith.constant 0 : index
    %c15_86 = arith.constant 15 : index
    %c0_87 = arith.constant 0 : index
    %100 = vector.load %arg2[%c0_84, %c0_85, %c15_86, %c0_87] : memref<1x12x42x42xf32, #tpu.memory_space<vmem>>, vector<1x2x16x42xf32>
    %101 = vector.shape_cast %100 : vector<1x2x16x42xf32> to vector<2x16x42xf32>
    %cst_88 = arith.constant 0.00776069658 : f32
    %102 = vector.broadcast %cst_88 : f32 to vector<2x16x42xf32>
    %103 = arith.mulf %102, %101 : vector<2x16x42xf32>
    %104 = arith.addf %99, %103 : vector<2x16x42xf32>
    %c1_89 = arith.constant 1 : index
    %c0_90 = arith.constant 0 : index
    %c0_91 = arith.constant 0 : index
    %105 = vector.load %arg4[%c1_89, %c0_90, %c0_91] : memref<6x42x16xf32, #tpu.memory_space<vmem>>, vector<1x42x16xf32>
    %106 = vector.shape_cast %105 : vector<1x42x16xf32> to vector<42x16xf32>
    %107 = vector.extract_strided_slice %104 {offsets = [0, 0, 0], sizes = [1, 16, 42], strides = [1, 1, 1]} : vector<2x16x42xf32> to vector<1x16x42xf32>
    %108 = vector.shape_cast %107 : vector<1x16x42xf32> to vector<16x42xf32>
    %cst_92 = arith.constant dense<0.000000e+00> : vector<16x16xf32>
    %109 = tpu.matmul %108, %106, %cst_92 {dimension_numbers = #tpu.dot_dimension_numbers<[1], [0], [0], [1], [0, 0, 1, 1], [], []>} : vector<16x42xf32>, vector<42x16xf32>, vector<16x16xf32> -> vector<16x16xf32>
    %110 = vector.extract_strided_slice %104 {offsets = [1, 0, 0], sizes = [1, 16, 42], strides = [1, 1, 1]} : vector<2x16x42xf32> to vector<1x16x42xf32>
    %111 = vector.shape_cast %110 : vector<1x16x42xf32> to vector<16x42xf32>
    %cst_93 = arith.constant dense<0.000000e+00> : vector<16x16xf32>
    %112 = tpu.matmul %111, %106, %cst_93 {dimension_numbers = #tpu.dot_dimension_numbers<[1], [0], [0], [1], [0, 0, 1, 1], [], []>} : vector<16x42xf32>, vector<42x16xf32>, vector<16x16xf32> -> vector<16x16xf32>
    %113 = arith.subf %77, %109 : vector<16x16xf32>
    %114 = arith.subf %80, %112 : vector<16x16xf32>
    %115 = arith.subf %113, %57 : vector<16x16xf32>
    %116 = arith.mulf %115, %115 : vector<16x16xf32>
    %117 = vector.shape_cast %116 : vector<16x16xf32> to vector<1x16x16xf32>
    %cst_94 = arith.constant dense<0.000000e+00> : vector<1xf32>
    %118 = vector.multi_reduction <add>, %117, %cst_94 [1, 2] : vector<1x16x16xf32> to vector<1xf32>
    %119 = vector.shape_cast %118 : vector<1xf32> to vector<1x1x1xf32>
    %120 = vector.extract %119[0, 0, 0] : f32 from vector<1x1x1xf32>
    %cst_95 = arith.constant 0.000000e+00 : f32
    %121 = arith.addf %cst_95, %120 : f32
    %122 = arith.subf %114, %58 : vector<16x16xf32>
    %123 = arith.mulf %122, %122 : vector<16x16xf32>
    %124 = vector.shape_cast %123 : vector<16x16xf32> to vector<1x16x16xf32>
    %cst_96 = arith.constant dense<0.000000e+00> : vector<1xf32>
    %125 = vector.multi_reduction <add>, %124, %cst_96 [1, 2] : vector<1x16x16xf32> to vector<1xf32>
    %126 = vector.shape_cast %125 : vector<1xf32> to vector<1x1x1xf32>
    %127 = vector.extract %126[0, 0, 0] : f32 from vector<1x1x1xf32>
    %128 = arith.addf %121, %127 : f32
    %cst_97 = arith.constant 0.001953125 : f32
    %129 = arith.mulf %128, %cst_97 : f32
    %c0_i32 = arith.constant 0 : i32
    %130 = vector.broadcast %c0_i32 : i32 to vector<1x6xi32>
    %131 = arith.cmpi eq, %0, %130 : vector<1x6xi32>
    %cst_98 = arith.constant 0.000000e+00 : f32
    %132 = vector.broadcast %129 : f32 to vector<1x6xf32>
    %133 = vector.broadcast %cst_98 : f32 to vector<1x6xf32>
    %134 = arith.select %131, %132, %133 : vector<1x6xi1>, vector<1x6xf32>
    %135 = arith.addf %2, %134 : vector<1x6xf32>
    %c0_99 = arith.constant 0 : index
    %c0_100 = arith.constant 0 : index
    %136 = memref.load %arg1[%c0_99, %c0_100] : memref<2x6xf32, #tpu.memory_space<smem>>
    %c1_101 = arith.constant 1 : index
    %c0_102 = arith.constant 0 : index
    %137 = memref.load %arg1[%c1_101, %c0_102] : memref<2x6xf32, #tpu.memory_space<smem>>
    %138 = arith.mulf %129, %137 : f32
    %139 = vector.broadcast %138 : f32 to vector<1x1xf32>
    %140 = arith.addf %1, %139 : vector<1x1xf32>
    %141 = vector.broadcast %136 : f32 to vector<1x1xf32>
    %142 = arith.addf %140, %141 : vector<1x1xf32>
    %c0_103 = arith.constant 0 : index
    %c0_104 = arith.constant 0 : index
    %c10 = arith.constant 10 : index
    %c0_105 = arith.constant 0 : index
    %143 = vector.load %arg3[%c0_103, %c0_104, %c10, %c0_105] : memref<1x2x42x42xf32, #tpu.memory_space<vmem>>, vector<1x2x16x42xf32>
    %144 = vector.shape_cast %143 : vector<1x2x16x42xf32> to vector<2x16x42xf32>
    %cst_106 = arith.constant 0.00517643942 : f32
    %145 = vector.broadcast %cst_106 : f32 to vector<2x16x42xf32>
    %146 = arith.mulf %145, %144 : vector<2x16x42xf32>
    %c0_107 = arith.constant 0 : index
    %c0_108 = arith.constant 0 : index
    %c11_109 = arith.constant 11 : index
    %c0_110 = arith.constant 0 : index
    %147 = vector.load %arg3[%c0_107, %c0_108, %c11_109, %c0_110] : memref<1x2x42x42xf32, #tpu.memory_space<vmem>>, vector<1x2x16x42xf32>
    %148 = vector.shape_cast %147 : vector<1x2x16x42xf32> to vector<2x16x42xf32>
    %cst_111 = arith.constant 0.0572277755 : f32
    %149 = vector.broadcast %cst_111 : f32 to vector<2x16x42xf32>
    %150 = arith.mulf %149, %148 : vector<2x16x42xf32>
    %151 = arith.addf %146, %150 : vector<2x16x42xf32>
    %c0_112 = arith.constant 0 : index
    %c0_113 = arith.constant 0 : index
    %c12_114 = arith.constant 12 : index
    %c0_115 = arith.constant 0 : index
    %152 = vector.load %arg3[%c0_112, %c0_113, %c12_114, %c0_115] : memref<1x2x42x42xf32, #tpu.memory_space<vmem>>, vector<1x2x16x42xf32>
    %153 = vector.shape_cast %152 : vector<1x2x16x42xf32> to vector<2x16x42xf32>
    %cst_116 = arith.constant 0.241964877 : f32
    %154 = vector.broadcast %cst_116 : f32 to vector<2x16x42xf32>
    %155 = arith.mulf %154, %153 : vector<2x16x42xf32>
    %156 = arith.addf %151, %155 : vector<2x16x42xf32>
    %c0_117 = arith.constant 0 : index
    %c0_118 = arith.constant 0 : index
    %c13_119 = arith.constant 13 : index
    %c0_120 = arith.constant 0 : index
    %157 = vector.load %arg3[%c0_117, %c0_118, %c13_119, %c0_120] : memref<1x2x42x42xf32, #tpu.memory_space<vmem>>, vector<1x2x16x42xf32>
    %158 = vector.shape_cast %157 : vector<1x2x16x42xf32> to vector<2x16x42xf32>
    %cst_121 = arith.constant 0.391261816 : f32
    %159 = vector.broadcast %cst_121 : f32 to vector<2x16x42xf32>
    %160 = arith.mulf %159, %158 : vector<2x16x42xf32>
    %161 = arith.addf %156, %160 : vector<2x16x42xf32>
    %c0_122 = arith.constant 0 : index
    %c0_123 = arith.constant 0 : index
    %c14_124 = arith.constant 14 : index
    %c0_125 = arith.constant 0 : index
    %162 = vector.load %arg3[%c0_122, %c0_123, %c14_124, %c0_125] : memref<1x2x42x42xf32, #tpu.memory_space<vmem>>, vector<1x2x16x42xf32>
    %163 = vector.shape_cast %162 : vector<1x2x16x42xf32> to vector<2x16x42xf32>
    %cst_126 = arith.constant 0.241964877 : f32
    %164 = vector.broadcast %cst_126 : f32 to vector<2x16x42xf32>
    %165 = arith.mulf %164, %163 : vector<2x16x42xf32>
    %166 = arith.addf %161, %165 : vector<2x16x42xf32>
    %c0_127 = arith.constant 0 : index
    %c0_128 = arith.constant 0 : index
    %c15_129 = arith.constant 15 : index
    %c0_130 = arith.constant 0 : index
    %167 = vector.load %arg3[%c0_127, %c0_128, %c15_129, %c0_130] : memref<1x2x42x42xf32, #tpu.memory_space<vmem>>, vector<1x2x16x42xf32>
    %168 = vector.shape_cast %167 : vector<1x2x16x42xf32> to vector<2x16x42xf32>
    %cst_131 = arith.constant 0.0572277755 : f32
    %169 = vector.broadcast %cst_131 : f32 to vector<2x16x42xf32>
    %170 = arith.mulf %169, %168 : vector<2x16x42xf32>
    %171 = arith.addf %166, %170 : vector<2x16x42xf32>
    %c0_132 = arith.constant 0 : index
    %c0_133 = arith.constant 0 : index
    %c16 = arith.constant 16 : index
    %c0_134 = arith.constant 0 : index
    %172 = vector.load %arg3[%c0_132, %c0_133, %c16, %c0_134] : memref<1x2x42x42xf32, #tpu.memory_space<vmem>>, vector<1x2x16x42xf32>
    %173 = vector.shape_cast %172 : vector<1x2x16x42xf32> to vector<2x16x42xf32>
    %cst_135 = arith.constant 0.00517643942 : f32
    %174 = vector.broadcast %cst_135 : f32 to vector<2x16x42xf32>
    %175 = arith.mulf %174, %173 : vector<2x16x42xf32>
    %176 = arith.addf %171, %175 : vector<2x16x42xf32>
    %c2 = arith.constant 2 : index
    %c0_136 = arith.constant 0 : index
    %c0_137 = arith.constant 0 : index
    %177 = vector.load %arg4[%c2, %c0_136, %c0_137] : memref<6x42x16xf32, #tpu.memory_space<vmem>>, vector<1x42x16xf32>
    %178 = vector.shape_cast %177 : vector<1x42x16xf32> to vector<42x16xf32>
    %179 = vector.extract_strided_slice %176 {offsets = [0, 0, 0], sizes = [1, 16, 42], strides = [1, 1, 1]} : vector<2x16x42xf32> to vector<1x16x42xf32>
    %180 = vector.shape_cast %179 : vector<1x16x42xf32> to vector<16x42xf32>
    %cst_138 = arith.constant dense<0.000000e+00> : vector<16x16xf32>
    %181 = tpu.matmul %180, %178, %cst_138 {dimension_numbers = #tpu.dot_dimension_numbers<[1], [0], [0], [1], [0, 0, 1, 1], [], []>} : vector<16x42xf32>, vector<42x16xf32>, vector<16x16xf32> -> vector<16x16xf32>
    %182 = vector.extract_strided_slice %176 {offsets = [1, 0, 0], sizes = [1, 16, 42], strides = [1, 1, 1]} : vector<2x16x42xf32> to vector<1x16x42xf32>
    %183 = vector.shape_cast %182 : vector<1x16x42xf32> to vector<16x42xf32>
    %cst_139 = arith.constant dense<0.000000e+00> : vector<16x16xf32>
    %184 = tpu.matmul %183, %178, %cst_139 {dimension_numbers = #tpu.dot_dimension_numbers<[1], [0], [0], [1], [0, 0, 1, 1], [], []>} : vector<16x42xf32>, vector<42x16xf32>, vector<16x16xf32> -> vector<16x16xf32>
    %185 = arith.subf %53, %181 : vector<16x16xf32>
    %186 = arith.subf %56, %184 : vector<16x16xf32>
    %c0_140 = arith.constant 0 : index
    %c2_141 = arith.constant 2 : index
    %c11_142 = arith.constant 11 : index
    %c0_143 = arith.constant 0 : index
    %187 = vector.load %arg2[%c0_140, %c2_141, %c11_142, %c0_143] : memref<1x12x42x42xf32, #tpu.memory_space<vmem>>, vector<1x2x16x42xf32>
    %188 = vector.shape_cast %187 : vector<1x2x16x42xf32> to vector<2x16x42xf32>
    %cst_144 = arith.constant 0.00776069658 : f32
    %189 = vector.broadcast %cst_144 : f32 to vector<2x16x42xf32>
    %190 = arith.mulf %189, %188 : vector<2x16x42xf32>
    %c0_145 = arith.constant 0 : index
    %c2_146 = arith.constant 2 : index
    %c12_147 = arith.constant 12 : index
    %c0_148 = arith.constant 0 : index
    %191 = vector.load %arg2[%c0_145, %c2_146, %c12_147, %c0_148] : memref<1x12x42x42xf32, #tpu.memory_space<vmem>>, vector<1x2x16x42xf32>
    %192 = vector.shape_cast %191 : vector<1x2x16x42xf32> to vector<2x16x42xf32>
    %cst_149 = arith.constant 0.198942676 : f32
    %193 = vector.broadcast %cst_149 : f32 to vector<2x16x42xf32>
    %194 = arith.mulf %193, %192 : vector<2x16x42xf32>
    %195 = arith.addf %190, %194 : vector<2x16x42xf32>
    %c0_150 = arith.constant 0 : index
    %c2_151 = arith.constant 2 : index
    %c13_152 = arith.constant 13 : index
    %c0_153 = arith.constant 0 : index
    %196 = vector.load %arg2[%c0_150, %c2_151, %c13_152, %c0_153] : memref<1x12x42x42xf32, #tpu.memory_space<vmem>>, vector<1x2x16x42xf32>
    %197 = vector.shape_cast %196 : vector<1x2x16x42xf32> to vector<2x16x42xf32>
    %cst_154 = arith.constant 0.58659327 : f32
    %198 = vector.broadcast %cst_154 : f32 to vector<2x16x42xf32>
    %199 = arith.mulf %198, %197 : vector<2x16x42xf32>
    %200 = arith.addf %195, %199 : vector<2x16x42xf32>
    %c0_155 = arith.constant 0 : index
    %c2_156 = arith.constant 2 : index
    %c14_157 = arith.constant 14 : index
    %c0_158 = arith.constant 0 : index
    %201 = vector.load %arg2[%c0_155, %c2_156, %c14_157, %c0_158] : memref<1x12x42x42xf32, #tpu.memory_space<vmem>>, vector<1x2x16x42xf32>
    %202 = vector.shape_cast %201 : vector<1x2x16x42xf32> to vector<2x16x42xf32>
    %cst_159 = arith.constant 0.198942676 : f32
    %203 = vector.broadcast %cst_159 : f32 to vector<2x16x42xf32>
    %204 = arith.mulf %203, %202 : vector<2x16x42xf32>
    %205 = arith.addf %200, %204 : vector<2x16x42xf32>
    %c0_160 = arith.constant 0 : index
    %c2_161 = arith.constant 2 : index
    %c15_162 = arith.constant 15 : index
    %c0_163 = arith.constant 0 : index
    %206 = vector.load %arg2[%c0_160, %c2_161, %c15_162, %c0_163] : memref<1x12x42x42xf32, #tpu.memory_space<vmem>>, vector<1x2x16x42xf32>
    %207 = vector.shape_cast %206 : vector<1x2x16x42xf32> to vector<2x16x42xf32>
    %cst_164 = arith.constant 0.00776069658 : f32
    %208 = vector.broadcast %cst_164 : f32 to vector<2x16x42xf32>
    %209 = arith.mulf %208, %207 : vector<2x16x42xf32>
    %210 = arith.addf %205, %209 : vector<2x16x42xf32>
    %c1_165 = arith.constant 1 : index
    %c0_166 = arith.constant 0 : index
    %c0_167 = arith.constant 0 : index
    %211 = vector.load %arg4[%c1_165, %c0_166, %c0_167] : memref<6x42x16xf32, #tpu.memory_space<vmem>>, vector<1x42x16xf32>
    %212 = vector.shape_cast %211 : vector<1x42x16xf32> to vector<42x16xf32>
    %213 = vector.extract_strided_slice %210 {offsets = [0, 0, 0], sizes = [1, 16, 42], strides = [1, 1, 1]} : vector<2x16x42xf32> to vector<1x16x42xf32>
    %214 = vector.shape_cast %213 : vector<1x16x42xf32> to vector<16x42xf32>
    %cst_168 = arith.constant dense<0.000000e+00> : vector<16x16xf32>
    %215 = tpu.matmul %214, %212, %cst_168 {dimension_numbers = #tpu.dot_dimension_numbers<[1], [0], [0], [1], [0, 0, 1, 1], [], []>} : vector<16x42xf32>, vector<42x16xf32>, vector<16x16xf32> -> vector<16x16xf32>
    %216 = vector.extract_strided_slice %210 {offsets = [1, 0, 0], sizes = [1, 16, 42], strides = [1, 1, 1]} : vector<2x16x42xf32> to vector<1x16x42xf32>
    %217 = vector.shape_cast %216 : vector<1x16x42xf32> to vector<16x42xf32>
    %cst_169 = arith.constant dense<0.000000e+00> : vector<16x16xf32>
    %218 = tpu.matmul %217, %212, %cst_169 {dimension_numbers = #tpu.dot_dimension_numbers<[1], [0], [0], [1], [0, 0, 1, 1], [], []>} : vector<16x42xf32>, vector<42x16xf32>, vector<16x16xf32> -> vector<16x16xf32>
    %c0_170 = arith.constant 0 : index
    %c2_171 = arith.constant 2 : index
    %c10_172 = arith.constant 10 : index
    %c0_173 = arith.constant 0 : index
    %219 = vector.load %arg2[%c0_170, %c2_171, %c10_172, %c0_173] : memref<1x12x42x42xf32, #tpu.memory_space<vmem>>, vector<1x2x16x42xf32>
    %220 = vector.shape_cast %219 : vector<1x2x16x42xf32> to vector<2x16x42xf32>
    %cst_174 = arith.constant 0.00517643942 : f32
    %221 = vector.broadcast %cst_174 : f32 to vector<2x16x42xf32>
    %222 = arith.mulf %221, %220 : vector<2x16x42xf32>
    %c0_175 = arith.constant 0 : index
    %c2_176 = arith.constant 2 : index
    %c11_177 = arith.constant 11 : index
    %c0_178 = arith.constant 0 : index
    %223 = vector.load %arg2[%c0_175, %c2_176, %c11_177, %c0_178] : memref<1x12x42x42xf32, #tpu.memory_space<vmem>>, vector<1x2x16x42xf32>
    %224 = vector.shape_cast %223 : vector<1x2x16x42xf32> to vector<2x16x42xf32>
    %cst_179 = arith.constant 0.0572277755 : f32
    %225 = vector.broadcast %cst_179 : f32 to vector<2x16x42xf32>
    %226 = arith.mulf %225, %224 : vector<2x16x42xf32>
    %227 = arith.addf %222, %226 : vector<2x16x42xf32>
    %c0_180 = arith.constant 0 : index
    %c2_181 = arith.constant 2 : index
    %c12_182 = arith.constant 12 : index
    %c0_183 = arith.constant 0 : index
    %228 = vector.load %arg2[%c0_180, %c2_181, %c12_182, %c0_183] : memref<1x12x42x42xf32, #tpu.memory_space<vmem>>, vector<1x2x16x42xf32>
    %229 = vector.shape_cast %228 : vector<1x2x16x42xf32> to vector<2x16x42xf32>
    %cst_184 = arith.constant 0.241964877 : f32
    %230 = vector.broadcast %cst_184 : f32 to vector<2x16x42xf32>
    %231 = arith.mulf %230, %229 : vector<2x16x42xf32>
    %232 = arith.addf %227, %231 : vector<2x16x42xf32>
    %c0_185 = arith.constant 0 : index
    %c2_186 = arith.constant 2 : index
    %c13_187 = arith.constant 13 : index
    %c0_188 = arith.constant 0 : index
    %233 = vector.load %arg2[%c0_185, %c2_186, %c13_187, %c0_188] : memref<1x12x42x42xf32, #tpu.memory_space<vmem>>, vector<1x2x16x42xf32>
    %234 = vector.shape_cast %233 : vector<1x2x16x42xf32> to vector<2x16x42xf32>
    %cst_189 = arith.constant 0.391261816 : f32
    %235 = vector.broadcast %cst_189 : f32 to vector<2x16x42xf32>
    %236 = arith.mulf %235, %234 : vector<2x16x42xf32>
    %237 = arith.addf %232, %236 : vector<2x16x42xf32>
    %c0_190 = arith.constant 0 : index
    %c2_191 = arith.constant 2 : index
    %c14_192 = arith.constant 14 : index
    %c0_193 = arith.constant 0 : index
    %238 = vector.load %arg2[%c0_190, %c2_191, %c14_192, %c0_193] : memref<1x12x42x42xf32, #tpu.memory_space<vmem>>, vector<1x2x16x42xf32>
    %239 = vector.shape_cast %238 : vector<1x2x16x42xf32> to vector<2x16x42xf32>
    %cst_194 = arith.constant 0.241964877 : f32
    %240 = vector.broadcast %cst_194 : f32 to vector<2x16x42xf32>
    %241 = arith.mulf %240, %239 : vector<2x16x42xf32>
    %242 = arith.addf %237, %241 : vector<2x16x42xf32>
    %c0_195 = arith.constant 0 : index
    %c2_196 = arith.constant 2 : index
    %c15_197 = arith.constant 15 : index
    %c0_198 = arith.constant 0 : index
    %243 = vector.load %arg2[%c0_195, %c2_196, %c15_197, %c0_198] : memref<1x12x42x42xf32, #tpu.memory_space<vmem>>, vector<1x2x16x42xf32>
    %244 = vector.shape_cast %243 : vector<1x2x16x42xf32> to vector<2x16x42xf32>
    %cst_199 = arith.constant 0.0572277755 : f32
    %245 = vector.broadcast %cst_199 : f32 to vector<2x16x42xf32>
    %246 = arith.mulf %245, %244 : vector<2x16x42xf32>
    %247 = arith.addf %242, %246 : vector<2x16x42xf32>
    %c0_200 = arith.constant 0 : index
    %c2_201 = arith.constant 2 : index
    %c16_202 = arith.constant 16 : index
    %c0_203 = arith.constant 0 : index
    %248 = vector.load %arg2[%c0_200, %c2_201, %c16_202, %c0_203] : memref<1x12x42x42xf32, #tpu.memory_space<vmem>>, vector<1x2x16x42xf32>
    %249 = vector.shape_cast %248 : vector<1x2x16x42xf32> to vector<2x16x42xf32>
    %cst_204 = arith.constant 0.00517643942 : f32
    %250 = vector.broadcast %cst_204 : f32 to vector<2x16x42xf32>
    %251 = arith.mulf %250, %249 : vector<2x16x42xf32>
    %252 = arith.addf %247, %251 : vector<2x16x42xf32>
    %c2_205 = arith.constant 2 : index
    %c0_206 = arith.constant 0 : index
    %c0_207 = arith.constant 0 : index
    %253 = vector.load %arg4[%c2_205, %c0_206, %c0_207] : memref<6x42x16xf32, #tpu.memory_space<vmem>>, vector<1x42x16xf32>
    %254 = vector.shape_cast %253 : vector<1x42x16xf32> to vector<42x16xf32>
    %255 = vector.extract_strided_slice %252 {offsets = [0, 0, 0], sizes = [1, 16, 42], strides = [1, 1, 1]} : vector<2x16x42xf32> to vector<1x16x42xf32>
    %256 = vector.shape_cast %255 : vector<1x16x42xf32> to vector<16x42xf32>
    %cst_208 = arith.constant dense<0.000000e+00> : vector<16x16xf32>
    %257 = tpu.matmul %256, %254, %cst_208 {dimension_numbers = #tpu.dot_dimension_numbers<[1], [0], [0], [1], [0, 0, 1, 1], [], []>} : vector<16x42xf32>, vector<42x16xf32>, vector<16x16xf32> -> vector<16x16xf32>
    %258 = vector.extract_strided_slice %252 {offsets = [1, 0, 0], sizes = [1, 16, 42], strides = [1, 1, 1]} : vector<2x16x42xf32> to vector<1x16x42xf32>
    %259 = vector.shape_cast %258 : vector<1x16x42xf32> to vector<16x42xf32>
    %cst_209 = arith.constant dense<0.000000e+00> : vector<16x16xf32>
    %260 = tpu.matmul %259, %254, %cst_209 {dimension_numbers = #tpu.dot_dimension_numbers<[1], [0], [0], [1], [0, 0, 1, 1], [], []>} : vector<16x42xf32>, vector<42x16xf32>, vector<16x16xf32> -> vector<16x16xf32>
    %261 = arith.subf %215, %257 : vector<16x16xf32>
    %262 = arith.subf %218, %260 : vector<16x16xf32>
    %263 = arith.subf %261, %185 : vector<16x16xf32>
    %264 = arith.mulf %263, %263 : vector<16x16xf32>
    %265 = vector.shape_cast %264 : vector<16x16xf32> to vector<1x16x16xf32>
    %cst_210 = arith.constant dense<0.000000e+00> : vector<1xf32>
    %266 = vector.multi_reduction <add>, %265, %cst_210 [1, 2] : vector<1x16x16xf32> to vector<1xf32>
    %267 = vector.shape_cast %266 : vector<1xf32> to vector<1x1x1xf32>
    %268 = vector.extract %267[0, 0, 0] : f32 from vector<1x1x1xf32>
    %cst_211 = arith.constant 0.000000e+00 : f32
    %269 = arith.addf %cst_211, %268 : f32
    %270 = arith.subf %262, %186 : vector<16x16xf32>
    %271 = arith.mulf %270, %270 : vector<16x16xf32>
    %272 = vector.shape_cast %271 : vector<16x16xf32> to vector<1x16x16xf32>
    %cst_212 = arith.constant dense<0.000000e+00> : vector<1xf32>
    %273 = vector.multi_reduction <add>, %272, %cst_212 [1, 2] : vector<1x16x16xf32> to vector<1xf32>
    %274 = vector.shape_cast %273 : vector<1xf32> to vector<1x1x1xf32>
    %275 = vector.extract %274[0, 0, 0] : f32 from vector<1x1x1xf32>
    %276 = arith.addf %269, %275 : f32
    %cst_213 = arith.constant 0.001953125 : f32
    %277 = arith.mulf %276, %cst_213 : f32
    %c1_i32 = arith.constant 1 : i32
    %278 = vector.broadcast %c1_i32 : i32 to vector<1x6xi32>
    %279 = arith.cmpi eq, %0, %278 : vector<1x6xi32>
    %cst_214 = arith.constant 0.000000e+00 : f32
    %280 = vector.broadcast %277 : f32 to vector<1x6xf32>
    %281 = vector.broadcast %cst_214 : f32 to vector<1x6xf32>
    %282 = arith.select %279, %280, %281 : vector<1x6xi1>, vector<1x6xf32>
    %283 = arith.addf %135, %282 : vector<1x6xf32>
    %c0_215 = arith.constant 0 : index
    %c1_216 = arith.constant 1 : index
    %284 = memref.load %arg1[%c0_215, %c1_216] : memref<2x6xf32, #tpu.memory_space<smem>>
    %c1_217 = arith.constant 1 : index
    %c1_218 = arith.constant 1 : index
    %285 = memref.load %arg1[%c1_217, %c1_218] : memref<2x6xf32, #tpu.memory_space<smem>>
    %286 = arith.mulf %277, %285 : f32
    %287 = vector.broadcast %286 : f32 to vector<1x1xf32>
    %288 = arith.addf %142, %287 : vector<1x1xf32>
    %289 = vector.broadcast %284 : f32 to vector<1x1xf32>
    %290 = arith.addf %288, %289 : vector<1x1xf32>
    %c0_219 = arith.constant 0 : index
    %c0_220 = arith.constant 0 : index
    %c8 = arith.constant 8 : index
    %c0_221 = arith.constant 0 : index
    %291 = vector.load %arg3[%c0_219, %c0_220, %c8, %c0_221] : memref<1x2x42x42xf32, #tpu.memory_space<vmem>>, vector<1x2x16x42xf32>
    %292 = vector.shape_cast %291 : vector<1x2x16x42xf32> to vector<2x16x42xf32>
    %cst_222 = arith.constant 0.00310794194 : f32
    %293 = vector.broadcast %cst_222 : f32 to vector<2x16x42xf32>
    %294 = arith.mulf %293, %292 : vector<2x16x42xf32>
    %c0_223 = arith.constant 0 : index
    %c0_224 = arith.constant 0 : index
    %c9 = arith.constant 9 : index
    %c0_225 = arith.constant 0 : index
    %295 = vector.load %arg3[%c0_223, %c0_224, %c9, %c0_225] : memref<1x2x42x42xf32, #tpu.memory_space<vmem>>, vector<1x2x16x42xf32>
    %296 = vector.shape_cast %295 : vector<1x2x16x42xf32> to vector<2x16x42xf32>
    %cst_226 = arith.constant 0.0147472136 : f32
    %297 = vector.broadcast %cst_226 : f32 to vector<2x16x42xf32>
    %298 = arith.mulf %297, %296 : vector<2x16x42xf32>
    %299 = arith.addf %294, %298 : vector<2x16x42xf32>
    %c0_227 = arith.constant 0 : index
    %c0_228 = arith.constant 0 : index
    %c10_229 = arith.constant 10 : index
    %c0_230 = arith.constant 0 : index
    %300 = vector.load %arg3[%c0_227, %c0_228, %c10_229, %c0_230] : memref<1x2x42x42xf32, #tpu.memory_space<vmem>>, vector<1x2x16x42xf32>
    %301 = vector.shape_cast %300 : vector<1x2x16x42xf32> to vector<2x16x42xf32>
    %cst_231 = arith.constant 0.0495076291 : f32
    %302 = vector.broadcast %cst_231 : f32 to vector<2x16x42xf32>
    %303 = arith.mulf %302, %301 : vector<2x16x42xf32>
    %304 = arith.addf %299, %303 : vector<2x16x42xf32>
    %c0_232 = arith.constant 0 : index
    %c0_233 = arith.constant 0 : index
    %c11_234 = arith.constant 11 : index
    %c0_235 = arith.constant 0 : index
    %305 = vector.load %arg3[%c0_232, %c0_233, %c11_234, %c0_235] : memref<1x2x42x42xf32, #tpu.memory_space<vmem>>, vector<1x2x16x42xf32>
    %306 = vector.shape_cast %305 : vector<1x2x16x42xf32> to vector<2x16x42xf32>
    %cst_236 = arith.constant 0.11758703 : f32
    %307 = vector.broadcast %cst_236 : f32 to vector<2x16x42xf32>
    %308 = arith.mulf %307, %306 : vector<2x16x42xf32>
    %309 = arith.addf %304, %308 : vector<2x16x42xf32>
    %c0_237 = arith.constant 0 : index
    %c0_238 = arith.constant 0 : index
    %c12_239 = arith.constant 12 : index
    %c0_240 = arith.constant 0 : index
    %310 = vector.load %arg3[%c0_237, %c0_238, %c12_239, %c0_240] : memref<1x2x42x42xf32, #tpu.memory_space<vmem>>, vector<1x2x16x42xf32>
    %311 = vector.shape_cast %310 : vector<1x2x16x42xf32> to vector<2x16x42xf32>
    %cst_241 = arith.constant 0.197593093 : f32
    %312 = vector.broadcast %cst_241 : f32 to vector<2x16x42xf32>
    %313 = arith.mulf %312, %311 : vector<2x16x42xf32>
    %314 = arith.addf %309, %313 : vector<2x16x42xf32>
    %c0_242 = arith.constant 0 : index
    %c0_243 = arith.constant 0 : index
    %c13_244 = arith.constant 13 : index
    %c0_245 = arith.constant 0 : index
    %315 = vector.load %arg3[%c0_242, %c0_243, %c13_244, %c0_245] : memref<1x2x42x42xf32, #tpu.memory_space<vmem>>, vector<1x2x16x42xf32>
    %316 = vector.shape_cast %315 : vector<1x2x16x42xf32> to vector<2x16x42xf32>
    %cst_246 = arith.constant 0.234914169 : f32
    %317 = vector.broadcast %cst_246 : f32 to vector<2x16x42xf32>
    %318 = arith.mulf %317, %316 : vector<2x16x42xf32>
    %319 = arith.addf %314, %318 : vector<2x16x42xf32>
    %c0_247 = arith.constant 0 : index
    %c0_248 = arith.constant 0 : index
    %c14_249 = arith.constant 14 : index
    %c0_250 = arith.constant 0 : index
    %320 = vector.load %arg3[%c0_247, %c0_248, %c14_249, %c0_250] : memref<1x2x42x42xf32, #tpu.memory_space<vmem>>, vector<1x2x16x42xf32>
    %321 = vector.shape_cast %320 : vector<1x2x16x42xf32> to vector<2x16x42xf32>
    %cst_251 = arith.constant 0.197593093 : f32
    %322 = vector.broadcast %cst_251 : f32 to vector<2x16x42xf32>
    %323 = arith.mulf %322, %321 : vector<2x16x42xf32>
    %324 = arith.addf %319, %323 : vector<2x16x42xf32>
    %c0_252 = arith.constant 0 : index
    %c0_253 = arith.constant 0 : index
    %c15_254 = arith.constant 15 : index
    %c0_255 = arith.constant 0 : index
    %325 = vector.load %arg3[%c0_252, %c0_253, %c15_254, %c0_255] : memref<1x2x42x42xf32, #tpu.memory_space<vmem>>, vector<1x2x16x42xf32>
    %326 = vector.shape_cast %325 : vector<1x2x16x42xf32> to vector<2x16x42xf32>
    %cst_256 = arith.constant 0.11758703 : f32
    %327 = vector.broadcast %cst_256 : f32 to vector<2x16x42xf32>
    %328 = arith.mulf %327, %326 : vector<2x16x42xf32>
    %329 = arith.addf %324, %328 : vector<2x16x42xf32>
    %c0_257 = arith.constant 0 : index
    %c0_258 = arith.constant 0 : index
    %c16_259 = arith.constant 16 : index
    %c0_260 = arith.constant 0 : index
    %330 = vector.load %arg3[%c0_257, %c0_258, %c16_259, %c0_260] : memref<1x2x42x42xf32, #tpu.memory_space<vmem>>, vector<1x2x16x42xf32>
    %331 = vector.shape_cast %330 : vector<1x2x16x42xf32> to vector<2x16x42xf32>
    %cst_261 = arith.constant 0.0495076291 : f32
    %332 = vector.broadcast %cst_261 : f32 to vector<2x16x42xf32>
    %333 = arith.mulf %332, %331 : vector<2x16x42xf32>
    %334 = arith.addf %329, %333 : vector<2x16x42xf32>
    %c0_262 = arith.constant 0 : index
    %c0_263 = arith.constant 0 : index
    %c17 = arith.constant 17 : index
    %c0_264 = arith.constant 0 : index
    %335 = vector.load %arg3[%c0_262, %c0_263, %c17, %c0_264] : memref<1x2x42x42xf32, #tpu.memory_space<vmem>>, vector<1x2x16x42xf32>
    %336 = vector.shape_cast %335 : vector<1x2x16x42xf32> to vector<2x16x42xf32>
    %cst_265 = arith.constant 0.0147472136 : f32
    %337 = vector.broadcast %cst_265 : f32 to vector<2x16x42xf32>
    %338 = arith.mulf %337, %336 : vector<2x16x42xf32>
    %339 = arith.addf %334, %338 : vector<2x16x42xf32>
    %c0_266 = arith.constant 0 : index
    %c0_267 = arith.constant 0 : index
    %c18 = arith.constant 18 : index
    %c0_268 = arith.constant 0 : index
    %340 = vector.load %arg3[%c0_266, %c0_267, %c18, %c0_268] : memref<1x2x42x42xf32, #tpu.memory_space<vmem>>, vector<1x2x16x42xf32>
    %341 = vector.shape_cast %340 : vector<1x2x16x42xf32> to vector<2x16x42xf32>
    %cst_269 = arith.constant 0.00310794194 : f32
    %342 = vector.broadcast %cst_269 : f32 to vector<2x16x42xf32>
    %343 = arith.mulf %342, %341 : vector<2x16x42xf32>
    %344 = arith.addf %339, %343 : vector<2x16x42xf32>
    %c3 = arith.constant 3 : index
    %c0_270 = arith.constant 0 : index
    %c0_271 = arith.constant 0 : index
    %345 = vector.load %arg4[%c3, %c0_270, %c0_271] : memref<6x42x16xf32, #tpu.memory_space<vmem>>, vector<1x42x16xf32>
    %346 = vector.shape_cast %345 : vector<1x42x16xf32> to vector<42x16xf32>
    %347 = vector.extract_strided_slice %344 {offsets = [0, 0, 0], sizes = [1, 16, 42], strides = [1, 1, 1]} : vector<2x16x42xf32> to vector<1x16x42xf32>
    %348 = vector.shape_cast %347 : vector<1x16x42xf32> to vector<16x42xf32>
    %cst_272 = arith.constant dense<0.000000e+00> : vector<16x16xf32>
    %349 = tpu.matmul %348, %346, %cst_272 {dimension_numbers = #tpu.dot_dimension_numbers<[1], [0], [0], [1], [0, 0, 1, 1], [], []>} : vector<16x42xf32>, vector<42x16xf32>, vector<16x16xf32> -> vector<16x16xf32>
    %350 = vector.extract_strided_slice %344 {offsets = [1, 0, 0], sizes = [1, 16, 42], strides = [1, 1, 1]} : vector<2x16x42xf32> to vector<1x16x42xf32>
    %351 = vector.shape_cast %350 : vector<1x16x42xf32> to vector<16x42xf32>
    %cst_273 = arith.constant dense<0.000000e+00> : vector<16x16xf32>
    %352 = tpu.matmul %351, %346, %cst_273 {dimension_numbers = #tpu.dot_dimension_numbers<[1], [0], [0], [1], [0, 0, 1, 1], [], []>} : vector<16x42xf32>, vector<42x16xf32>, vector<16x16xf32> -> vector<16x16xf32>
    %353 = arith.subf %181, %349 : vector<16x16xf32>
    %354 = arith.subf %184, %352 : vector<16x16xf32>
    %c0_274 = arith.constant 0 : index
    %c4 = arith.constant 4 : index
    %c10_275 = arith.constant 10 : index
    %c0_276 = arith.constant 0 : index
    %355 = vector.load %arg2[%c0_274, %c4, %c10_275, %c0_276] : memref<1x12x42x42xf32, #tpu.memory_space<vmem>>, vector<1x2x16x42xf32>
    %356 = vector.shape_cast %355 : vector<1x2x16x42xf32> to vector<2x16x42xf32>
    %cst_277 = arith.constant 0.00517643942 : f32
    %357 = vector.broadcast %cst_277 : f32 to vector<2x16x42xf32>
    %358 = arith.mulf %357, %356 : vector<2x16x42xf32>
    %c0_278 = arith.constant 0 : index
    %c4_279 = arith.constant 4 : index
    %c11_280 = arith.constant 11 : index
    %c0_281 = arith.constant 0 : index
    %359 = vector.load %arg2[%c0_278, %c4_279, %c11_280, %c0_281] : memref<1x12x42x42xf32, #tpu.memory_space<vmem>>, vector<1x2x16x42xf32>
    %360 = vector.shape_cast %359 : vector<1x2x16x42xf32> to vector<2x16x42xf32>
    %cst_282 = arith.constant 0.0572277755 : f32
    %361 = vector.broadcast %cst_282 : f32 to vector<2x16x42xf32>
    %362 = arith.mulf %361, %360 : vector<2x16x42xf32>
    %363 = arith.addf %358, %362 : vector<2x16x42xf32>
    %c0_283 = arith.constant 0 : index
    %c4_284 = arith.constant 4 : index
    %c12_285 = arith.constant 12 : index
    %c0_286 = arith.constant 0 : index
    %364 = vector.load %arg2[%c0_283, %c4_284, %c12_285, %c0_286] : memref<1x12x42x42xf32, #tpu.memory_space<vmem>>, vector<1x2x16x42xf32>
    %365 = vector.shape_cast %364 : vector<1x2x16x42xf32> to vector<2x16x42xf32>
    %cst_287 = arith.constant 0.241964877 : f32
    %366 = vector.broadcast %cst_287 : f32 to vector<2x16x42xf32>
    %367 = arith.mulf %366, %365 : vector<2x16x42xf32>
    %368 = arith.addf %363, %367 : vector<2x16x42xf32>
    %c0_288 = arith.constant 0 : index
    %c4_289 = arith.constant 4 : index
    %c13_290 = arith.constant 13 : index
    %c0_291 = arith.constant 0 : index
    %369 = vector.load %arg2[%c0_288, %c4_289, %c13_290, %c0_291] : memref<1x12x42x42xf32, #tpu.memory_space<vmem>>, vector<1x2x16x42xf32>
    %370 = vector.shape_cast %369 : vector<1x2x16x42xf32> to vector<2x16x42xf32>
    %cst_292 = arith.constant 0.391261816 : f32
    %371 = vector.broadcast %cst_292 : f32 to vector<2x16x42xf32>
    %372 = arith.mulf %371, %370 : vector<2x16x42xf32>
    %373 = arith.addf %368, %372 : vector<2x16x42xf32>
    %c0_293 = arith.constant 0 : index
    %c4_294 = arith.constant 4 : index
    %c14_295 = arith.constant 14 : index
    %c0_296 = arith.constant 0 : index
    %374 = vector.load %arg2[%c0_293, %c4_294, %c14_295, %c0_296] : memref<1x12x42x42xf32, #tpu.memory_space<vmem>>, vector<1x2x16x42xf32>
    %375 = vector.shape_cast %374 : vector<1x2x16x42xf32> to vector<2x16x42xf32>
    %cst_297 = arith.constant 0.241964877 : f32
    %376 = vector.broadcast %cst_297 : f32 to vector<2x16x42xf32>
    %377 = arith.mulf %376, %375 : vector<2x16x42xf32>
    %378 = arith.addf %373, %377 : vector<2x16x42xf32>
    %c0_298 = arith.constant 0 : index
    %c4_299 = arith.constant 4 : index
    %c15_300 = arith.constant 15 : index
    %c0_301 = arith.constant 0 : index
    %379 = vector.load %arg2[%c0_298, %c4_299, %c15_300, %c0_301] : memref<1x12x42x42xf32, #tpu.memory_space<vmem>>, vector<1x2x16x42xf32>
    %380 = vector.shape_cast %379 : vector<1x2x16x42xf32> to vector<2x16x42xf32>
    %cst_302 = arith.constant 0.0572277755 : f32
    %381 = vector.broadcast %cst_302 : f32 to vector<2x16x42xf32>
    %382 = arith.mulf %381, %380 : vector<2x16x42xf32>
    %383 = arith.addf %378, %382 : vector<2x16x42xf32>
    %c0_303 = arith.constant 0 : index
    %c4_304 = arith.constant 4 : index
    %c16_305 = arith.constant 16 : index
    %c0_306 = arith.constant 0 : index
    %384 = vector.load %arg2[%c0_303, %c4_304, %c16_305, %c0_306] : memref<1x12x42x42xf32, #tpu.memory_space<vmem>>, vector<1x2x16x42xf32>
    %385 = vector.shape_cast %384 : vector<1x2x16x42xf32> to vector<2x16x42xf32>
    %cst_307 = arith.constant 0.00517643942 : f32
    %386 = vector.broadcast %cst_307 : f32 to vector<2x16x42xf32>
    %387 = arith.mulf %386, %385 : vector<2x16x42xf32>
    %388 = arith.addf %383, %387 : vector<2x16x42xf32>
    %c2_308 = arith.constant 2 : index
    %c0_309 = arith.constant 0 : index
    %c0_310 = arith.constant 0 : index
    %389 = vector.load %arg4[%c2_308, %c0_309, %c0_310] : memref<6x42x16xf32, #tpu.memory_space<vmem>>, vector<1x42x16xf32>
    %390 = vector.shape_cast %389 : vector<1x42x16xf32> to vector<42x16xf32>
    %391 = vector.extract_strided_slice %388 {offsets = [0, 0, 0], sizes = [1, 16, 42], strides = [1, 1, 1]} : vector<2x16x42xf32> to vector<1x16x42xf32>
    %392 = vector.shape_cast %391 : vector<1x16x42xf32> to vector<16x42xf32>
    %cst_311 = arith.constant dense<0.000000e+00> : vector<16x16xf32>
    %393 = tpu.matmul %392, %390, %cst_311 {dimension_numbers = #tpu.dot_dimension_numbers<[1], [0], [0], [1], [0, 0, 1, 1], [], []>} : vector<16x42xf32>, vector<42x16xf32>, vector<16x16xf32> -> vector<16x16xf32>
    %394 = vector.extract_strided_slice %388 {offsets = [1, 0, 0], sizes = [1, 16, 42], strides = [1, 1, 1]} : vector<2x16x42xf32> to vector<1x16x42xf32>
    %395 = vector.shape_cast %394 : vector<1x16x42xf32> to vector<16x42xf32>
    %cst_312 = arith.constant dense<0.000000e+00> : vector<16x16xf32>
    %396 = tpu.matmul %395, %390, %cst_312 {dimension_numbers = #tpu.dot_dimension_numbers<[1], [0], [0], [1], [0, 0, 1, 1], [], []>} : vector<16x42xf32>, vector<42x16xf32>, vector<16x16xf32> -> vector<16x16xf32>
    %c0_313 = arith.constant 0 : index
    %c4_314 = arith.constant 4 : index
    %c8_315 = arith.constant 8 : index
    %c0_316 = arith.constant 0 : index
    %397 = vector.load %arg2[%c0_313, %c4_314, %c8_315, %c0_316] : memref<1x12x42x42xf32, #tpu.memory_space<vmem>>, vector<1x2x16x42xf32>
    %398 = vector.shape_cast %397 : vector<1x2x16x42xf32> to vector<2x16x42xf32>
    %cst_317 = arith.constant 0.00310794194 : f32
    %399 = vector.broadcast %cst_317 : f32 to vector<2x16x42xf32>
    %400 = arith.mulf %399, %398 : vector<2x16x42xf32>
    %c0_318 = arith.constant 0 : index
    %c4_319 = arith.constant 4 : index
    %c9_320 = arith.constant 9 : index
    %c0_321 = arith.constant 0 : index
    %401 = vector.load %arg2[%c0_318, %c4_319, %c9_320, %c0_321] : memref<1x12x42x42xf32, #tpu.memory_space<vmem>>, vector<1x2x16x42xf32>
    %402 = vector.shape_cast %401 : vector<1x2x16x42xf32> to vector<2x16x42xf32>
    %cst_322 = arith.constant 0.0147472136 : f32
    %403 = vector.broadcast %cst_322 : f32 to vector<2x16x42xf32>
    %404 = arith.mulf %403, %402 : vector<2x16x42xf32>
    %405 = arith.addf %400, %404 : vector<2x16x42xf32>
    %c0_323 = arith.constant 0 : index
    %c4_324 = arith.constant 4 : index
    %c10_325 = arith.constant 10 : index
    %c0_326 = arith.constant 0 : index
    %406 = vector.load %arg2[%c0_323, %c4_324, %c10_325, %c0_326] : memref<1x12x42x42xf32, #tpu.memory_space<vmem>>, vector<1x2x16x42xf32>
    %407 = vector.shape_cast %406 : vector<1x2x16x42xf32> to vector<2x16x42xf32>
    %cst_327 = arith.constant 0.0495076291 : f32
    %408 = vector.broadcast %cst_327 : f32 to vector<2x16x42xf32>
    %409 = arith.mulf %408, %407 : vector<2x16x42xf32>
    %410 = arith.addf %405, %409 : vector<2x16x42xf32>
    %c0_328 = arith.constant 0 : index
    %c4_329 = arith.constant 4 : index
    %c11_330 = arith.constant 11 : index
    %c0_331 = arith.constant 0 : index
    %411 = vector.load %arg2[%c0_328, %c4_329, %c11_330, %c0_331] : memref<1x12x42x42xf32, #tpu.memory_space<vmem>>, vector<1x2x16x42xf32>
    %412 = vector.shape_cast %411 : vector<1x2x16x42xf32> to vector<2x16x42xf32>
    %cst_332 = arith.constant 0.11758703 : f32
    %413 = vector.broadcast %cst_332 : f32 to vector<2x16x42xf32>
    %414 = arith.mulf %413, %412 : vector<2x16x42xf32>
    %415 = arith.addf %410, %414 : vector<2x16x42xf32>
    %c0_333 = arith.constant 0 : index
    %c4_334 = arith.constant 4 : index
    %c12_335 = arith.constant 12 : index
    %c0_336 = arith.constant 0 : index
    %416 = vector.load %arg2[%c0_333, %c4_334, %c12_335, %c0_336] : memref<1x12x42x42xf32, #tpu.memory_space<vmem>>, vector<1x2x16x42xf32>
    %417 = vector.shape_cast %416 : vector<1x2x16x42xf32> to vector<2x16x42xf32>
    %cst_337 = arith.constant 0.197593093 : f32
    %418 = vector.broadcast %cst_337 : f32 to vector<2x16x42xf32>
    %419 = arith.mulf %418, %417 : vector<2x16x42xf32>
    %420 = arith.addf %415, %419 : vector<2x16x42xf32>
    %c0_338 = arith.constant 0 : index
    %c4_339 = arith.constant 4 : index
    %c13_340 = arith.constant 13 : index
    %c0_341 = arith.constant 0 : index
    %421 = vector.load %arg2[%c0_338, %c4_339, %c13_340, %c0_341] : memref<1x12x42x42xf32, #tpu.memory_space<vmem>>, vector<1x2x16x42xf32>
    %422 = vector.shape_cast %421 : vector<1x2x16x42xf32> to vector<2x16x42xf32>
    %cst_342 = arith.constant 0.234914169 : f32
    %423 = vector.broadcast %cst_342 : f32 to vector<2x16x42xf32>
    %424 = arith.mulf %423, %422 : vector<2x16x42xf32>
    %425 = arith.addf %420, %424 : vector<2x16x42xf32>
    %c0_343 = arith.constant 0 : index
    %c4_344 = arith.constant 4 : index
    %c14_345 = arith.constant 14 : index
    %c0_346 = arith.constant 0 : index
    %426 = vector.load %arg2[%c0_343, %c4_344, %c14_345, %c0_346] : memref<1x12x42x42xf32, #tpu.memory_space<vmem>>, vector<1x2x16x42xf32>
    %427 = vector.shape_cast %426 : vector<1x2x16x42xf32> to vector<2x16x42xf32>
    %cst_347 = arith.constant 0.197593093 : f32
    %428 = vector.broadcast %cst_347 : f32 to vector<2x16x42xf32>
    %429 = arith.mulf %428, %427 : vector<2x16x42xf32>
    %430 = arith.addf %425, %429 : vector<2x16x42xf32>
    %c0_348 = arith.constant 0 : index
    %c4_349 = arith.constant 4 : index
    %c15_350 = arith.constant 15 : index
    %c0_351 = arith.constant 0 : index
    %431 = vector.load %arg2[%c0_348, %c4_349, %c15_350, %c0_351] : memref<1x12x42x42xf32, #tpu.memory_space<vmem>>, vector<1x2x16x42xf32>
    %432 = vector.shape_cast %431 : vector<1x2x16x42xf32> to vector<2x16x42xf32>
    %cst_352 = arith.constant 0.11758703 : f32
    %433 = vector.broadcast %cst_352 : f32 to vector<2x16x42xf32>
    %434 = arith.mulf %433, %432 : vector<2x16x42xf32>
    %435 = arith.addf %430, %434 : vector<2x16x42xf32>
    %c0_353 = arith.constant 0 : index
    %c4_354 = arith.constant 4 : index
    %c16_355 = arith.constant 16 : index
    %c0_356 = arith.constant 0 : index
    %436 = vector.load %arg2[%c0_353, %c4_354, %c16_355, %c0_356] : memref<1x12x42x42xf32, #tpu.memory_space<vmem>>, vector<1x2x16x42xf32>
    %437 = vector.shape_cast %436 : vector<1x2x16x42xf32> to vector<2x16x42xf32>
    %cst_357 = arith.constant 0.0495076291 : f32
    %438 = vector.broadcast %cst_357 : f32 to vector<2x16x42xf32>
    %439 = arith.mulf %438, %437 : vector<2x16x42xf32>
    %440 = arith.addf %435, %439 : vector<2x16x42xf32>
    %c0_358 = arith.constant 0 : index
    %c4_359 = arith.constant 4 : index
    %c17_360 = arith.constant 17 : index
    %c0_361 = arith.constant 0 : index
    %441 = vector.load %arg2[%c0_358, %c4_359, %c17_360, %c0_361] : memref<1x12x42x42xf32, #tpu.memory_space<vmem>>, vector<1x2x16x42xf32>
    %442 = vector.shape_cast %441 : vector<1x2x16x42xf32> to vector<2x16x42xf32>
    %cst_362 = arith.constant 0.0147472136 : f32
    %443 = vector.broadcast %cst_362 : f32 to vector<2x16x42xf32>
    %444 = arith.mulf %443, %442 : vector<2x16x42xf32>
    %445 = arith.addf %440, %444 : vector<2x16x42xf32>
    %c0_363 = arith.constant 0 : index
    %c4_364 = arith.constant 4 : index
    %c18_365 = arith.constant 18 : index
    %c0_366 = arith.constant 0 : index
    %446 = vector.load %arg2[%c0_363, %c4_364, %c18_365, %c0_366] : memref<1x12x42x42xf32, #tpu.memory_space<vmem>>, vector<1x2x16x42xf32>
    %447 = vector.shape_cast %446 : vector<1x2x16x42xf32> to vector<2x16x42xf32>
    %cst_367 = arith.constant 0.00310794194 : f32
    %448 = vector.broadcast %cst_367 : f32 to vector<2x16x42xf32>
    %449 = arith.mulf %448, %447 : vector<2x16x42xf32>
    %450 = arith.addf %445, %449 : vector<2x16x42xf32>
    %c3_368 = arith.constant 3 : index
    %c0_369 = arith.constant 0 : index
    %c0_370 = arith.constant 0 : index
    %451 = vector.load %arg4[%c3_368, %c0_369, %c0_370] : memref<6x42x16xf32, #tpu.memory_space<vmem>>, vector<1x42x16xf32>
    %452 = vector.shape_cast %451 : vector<1x42x16xf32> to vector<42x16xf32>
    %453 = vector.extract_strided_slice %450 {offsets = [0, 0, 0], sizes = [1, 16, 42], strides = [1, 1, 1]} : vector<2x16x42xf32> to vector<1x16x42xf32>
    %454 = vector.shape_cast %453 : vector<1x16x42xf32> to vector<16x42xf32>
    %cst_371 = arith.constant dense<0.000000e+00> : vector<16x16xf32>
    %455 = tpu.matmul %454, %452, %cst_371 {dimension_numbers = #tpu.dot_dimension_numbers<[1], [0], [0], [1], [0, 0, 1, 1], [], []>} : vector<16x42xf32>, vector<42x16xf32>, vector<16x16xf32> -> vector<16x16xf32>
    %456 = vector.extract_strided_slice %450 {offsets = [1, 0, 0], sizes = [1, 16, 42], strides = [1, 1, 1]} : vector<2x16x42xf32> to vector<1x16x42xf32>
    %457 = vector.shape_cast %456 : vector<1x16x42xf32> to vector<16x42xf32>
    %cst_372 = arith.constant dense<0.000000e+00> : vector<16x16xf32>
    %458 = tpu.matmul %457, %452, %cst_372 {dimension_numbers = #tpu.dot_dimension_numbers<[1], [0], [0], [1], [0, 0, 1, 1], [], []>} : vector<16x42xf32>, vector<42x16xf32>, vector<16x16xf32> -> vector<16x16xf32>
    %459 = arith.subf %393, %455 : vector<16x16xf32>
    %460 = arith.subf %396, %458 : vector<16x16xf32>
    %461 = arith.subf %459, %353 : vector<16x16xf32>
    %462 = arith.mulf %461, %461 : vector<16x16xf32>
    %463 = vector.shape_cast %462 : vector<16x16xf32> to vector<1x16x16xf32>
    %cst_373 = arith.constant dense<0.000000e+00> : vector<1xf32>
    %464 = vector.multi_reduction <add>, %463, %cst_373 [1, 2] : vector<1x16x16xf32> to vector<1xf32>
    %465 = vector.shape_cast %464 : vector<1xf32> to vector<1x1x1xf32>
    %466 = vector.extract %465[0, 0, 0] : f32 from vector<1x1x1xf32>
    %cst_374 = arith.constant 0.000000e+00 : f32
    %467 = arith.addf %cst_374, %466 : f32
    %468 = arith.subf %460, %354 : vector<16x16xf32>
    %469 = arith.mulf %468, %468 : vector<16x16xf32>
    %470 = vector.shape_cast %469 : vector<16x16xf32> to vector<1x16x16xf32>
    %cst_375 = arith.constant dense<0.000000e+00> : vector<1xf32>
    %471 = vector.multi_reduction <add>, %470, %cst_375 [1, 2] : vector<1x16x16xf32> to vector<1xf32>
    %472 = vector.shape_cast %471 : vector<1xf32> to vector<1x1x1xf32>
    %473 = vector.extract %472[0, 0, 0] : f32 from vector<1x1x1xf32>
    %474 = arith.addf %467, %473 : f32
    %cst_376 = arith.constant 0.001953125 : f32
    %475 = arith.mulf %474, %cst_376 : f32
    %c2_i32 = arith.constant 2 : i32
    %476 = vector.broadcast %c2_i32 : i32 to vector<1x6xi32>
    %477 = arith.cmpi eq, %0, %476 : vector<1x6xi32>
    %cst_377 = arith.constant 0.000000e+00 : f32
    %478 = vector.broadcast %475 : f32 to vector<1x6xf32>
    %479 = vector.broadcast %cst_377 : f32 to vector<1x6xf32>
    %480 = arith.select %477, %478, %479 : vector<1x6xi1>, vector<1x6xf32>
    %481 = arith.addf %283, %480 : vector<1x6xf32>
    %c0_378 = arith.constant 0 : index
    %c2_379 = arith.constant 2 : index
    %482 = memref.load %arg1[%c0_378, %c2_379] : memref<2x6xf32, #tpu.memory_space<smem>>
    %c1_380 = arith.constant 1 : index
    %c2_381 = arith.constant 2 : index
    %483 = memref.load %arg1[%c1_380, %c2_381] : memref<2x6xf32, #tpu.memory_space<smem>>
    %484 = arith.mulf %475, %483 : f32
    %485 = vector.broadcast %484 : f32 to vector<1x1xf32>
    %486 = arith.addf %290, %485 : vector<1x1xf32>
    %487 = vector.broadcast %482 : f32 to vector<1x1xf32>
    %488 = arith.addf %486, %487 : vector<1x1xf32>
    %c0_382 = arith.constant 0 : index
    %c0_383 = arith.constant 0 : index
    %c5 = arith.constant 5 : index
    %c0_384 = arith.constant 0 : index
    %489 = vector.load %arg3[%c0_382, %c0_383, %c5, %c0_384] : memref<1x2x42x42xf32, #tpu.memory_space<vmem>>, vector<1x2x16x42xf32>
    %490 = vector.shape_cast %489 : vector<1x2x16x42xf32> to vector<2x16x42xf32>
    %cst_385 = arith.constant 0.00194371527 : f32
    %491 = vector.broadcast %cst_385 : f32 to vector<2x16x42xf32>
    %492 = arith.mulf %491, %490 : vector<2x16x42xf32>
    %c0_386 = arith.constant 0 : index
    %c0_387 = arith.constant 0 : index
    %c6 = arith.constant 6 : index
    %c0_388 = arith.constant 0 : index
    %493 = vector.load %arg3[%c0_386, %c0_387, %c6, %c0_388] : memref<1x2x42x42xf32, #tpu.memory_space<vmem>>, vector<1x2x16x42xf32>
    %494 = vector.shape_cast %493 : vector<1x2x16x42xf32> to vector<2x16x42xf32>
    %cst_389 = arith.constant 0.00535662426 : f32
    %495 = vector.broadcast %cst_389 : f32 to vector<2x16x42xf32>
    %496 = arith.mulf %495, %494 : vector<2x16x42xf32>
    %497 = arith.addf %492, %496 : vector<2x16x42xf32>
    %c0_390 = arith.constant 0 : index
    %c0_391 = arith.constant 0 : index
    %c7 = arith.constant 7 : index
    %c0_392 = arith.constant 0 : index
    %498 = vector.load %arg3[%c0_390, %c0_391, %c7, %c0_392] : memref<1x2x42x42xf32, #tpu.memory_space<vmem>>, vector<1x2x16x42xf32>
    %499 = vector.shape_cast %498 : vector<1x2x16x42xf32> to vector<2x16x42xf32>
    %cst_393 = arith.constant 0.0128958076 : f32
    %500 = vector.broadcast %cst_393 : f32 to vector<2x16x42xf32>
    %501 = arith.mulf %500, %499 : vector<2x16x42xf32>
    %502 = arith.addf %497, %501 : vector<2x16x42xf32>
    %c0_394 = arith.constant 0 : index
    %c0_395 = arith.constant 0 : index
    %c8_396 = arith.constant 8 : index
    %c0_397 = arith.constant 0 : index
    %503 = vector.load %arg3[%c0_394, %c0_395, %c8_396, %c0_397] : memref<1x2x42x42xf32, #tpu.memory_space<vmem>>, vector<1x2x16x42xf32>
    %504 = vector.shape_cast %503 : vector<1x2x16x42xf32> to vector<2x16x42xf32>
    %cst_398 = arith.constant 0.0271209441 : f32
    %505 = vector.broadcast %cst_398 : f32 to vector<2x16x42xf32>
    %506 = arith.mulf %505, %504 : vector<2x16x42xf32>
    %507 = arith.addf %502, %506 : vector<2x16x42xf32>
    %c0_399 = arith.constant 0 : index
    %c0_400 = arith.constant 0 : index
    %c9_401 = arith.constant 9 : index
    %c0_402 = arith.constant 0 : index
    %508 = vector.load %arg3[%c0_399, %c0_400, %c9_401, %c0_402] : memref<1x2x42x42xf32, #tpu.memory_space<vmem>>, vector<1x2x16x42xf32>
    %509 = vector.shape_cast %508 : vector<1x2x16x42xf32> to vector<2x16x42xf32>
    %cst_403 = arith.constant 0.0498264469 : f32
    %510 = vector.broadcast %cst_403 : f32 to vector<2x16x42xf32>
    %511 = arith.mulf %510, %509 : vector<2x16x42xf32>
    %512 = arith.addf %507, %511 : vector<2x16x42xf32>
    %c0_404 = arith.constant 0 : index
    %c0_405 = arith.constant 0 : index
    %c10_406 = arith.constant 10 : index
    %c0_407 = arith.constant 0 : index
    %513 = vector.load %arg3[%c0_404, %c0_405, %c10_406, %c0_407] : memref<1x2x42x42xf32, #tpu.memory_space<vmem>>, vector<1x2x16x42xf32>
    %514 = vector.shape_cast %513 : vector<1x2x16x42xf32> to vector<2x16x42xf32>
    %cst_408 = arith.constant 0.0799675658 : f32
    %515 = vector.broadcast %cst_408 : f32 to vector<2x16x42xf32>
    %516 = arith.mulf %515, %514 : vector<2x16x42xf32>
    %517 = arith.addf %512, %516 : vector<2x16x42xf32>
    %c0_409 = arith.constant 0 : index
    %c0_410 = arith.constant 0 : index
    %c11_411 = arith.constant 11 : index
    %c0_412 = arith.constant 0 : index
    %518 = vector.load %arg3[%c0_409, %c0_410, %c11_411, %c0_412] : memref<1x2x42x42xf32, #tpu.memory_space<vmem>>, vector<1x2x16x42xf32>
    %519 = vector.shape_cast %518 : vector<1x2x16x42xf32> to vector<2x16x42xf32>
    %cst_413 = arith.constant 0.112115778 : f32
    %520 = vector.broadcast %cst_413 : f32 to vector<2x16x42xf32>
    %521 = arith.mulf %520, %519 : vector<2x16x42xf32>
    %522 = arith.addf %517, %521 : vector<2x16x42xf32>
    %c0_414 = arith.constant 0 : index
    %c0_415 = arith.constant 0 : index
    %c12_416 = arith.constant 12 : index
    %c0_417 = arith.constant 0 : index
    %523 = vector.load %arg3[%c0_414, %c0_415, %c12_416, %c0_417] : memref<1x2x42x42xf32, #tpu.memory_space<vmem>>, vector<1x2x16x42xf32>
    %524 = vector.shape_cast %523 : vector<1x2x16x42xf32> to vector<2x16x42xf32>
    %cst_418 = arith.constant 0.137315139 : f32
    %525 = vector.broadcast %cst_418 : f32 to vector<2x16x42xf32>
    %526 = arith.mulf %525, %524 : vector<2x16x42xf32>
    %527 = arith.addf %522, %526 : vector<2x16x42xf32>
    %c0_419 = arith.constant 0 : index
    %c0_420 = arith.constant 0 : index
    %c13_421 = arith.constant 13 : index
    %c0_422 = arith.constant 0 : index
    %528 = vector.load %arg3[%c0_419, %c0_420, %c13_421, %c0_422] : memref<1x2x42x42xf32, #tpu.memory_space<vmem>>, vector<1x2x16x42xf32>
    %529 = vector.shape_cast %528 : vector<1x2x16x42xf32> to vector<2x16x42xf32>
    %cst_423 = arith.constant 0.146915972 : f32
    %530 = vector.broadcast %cst_423 : f32 to vector<2x16x42xf32>
    %531 = arith.mulf %530, %529 : vector<2x16x42xf32>
    %532 = arith.addf %527, %531 : vector<2x16x42xf32>
    %c0_424 = arith.constant 0 : index
    %c0_425 = arith.constant 0 : index
    %c14_426 = arith.constant 14 : index
    %c0_427 = arith.constant 0 : index
    %533 = vector.load %arg3[%c0_424, %c0_425, %c14_426, %c0_427] : memref<1x2x42x42xf32, #tpu.memory_space<vmem>>, vector<1x2x16x42xf32>
    %534 = vector.shape_cast %533 : vector<1x2x16x42xf32> to vector<2x16x42xf32>
    %cst_428 = arith.constant 0.137315139 : f32
    %535 = vector.broadcast %cst_428 : f32 to vector<2x16x42xf32>
    %536 = arith.mulf %535, %534 : vector<2x16x42xf32>
    %537 = arith.addf %532, %536 : vector<2x16x42xf32>
    %c0_429 = arith.constant 0 : index
    %c0_430 = arith.constant 0 : index
    %c15_431 = arith.constant 15 : index
    %c0_432 = arith.constant 0 : index
    %538 = vector.load %arg3[%c0_429, %c0_430, %c15_431, %c0_432] : memref<1x2x42x42xf32, #tpu.memory_space<vmem>>, vector<1x2x16x42xf32>
    %539 = vector.shape_cast %538 : vector<1x2x16x42xf32> to vector<2x16x42xf32>
    %cst_433 = arith.constant 0.112115778 : f32
    %540 = vector.broadcast %cst_433 : f32 to vector<2x16x42xf32>
    %541 = arith.mulf %540, %539 : vector<2x16x42xf32>
    %542 = arith.addf %537, %541 : vector<2x16x42xf32>
    %c0_434 = arith.constant 0 : index
    %c0_435 = arith.constant 0 : index
    %c16_436 = arith.constant 16 : index
    %c0_437 = arith.constant 0 : index
    %543 = vector.load %arg3[%c0_434, %c0_435, %c16_436, %c0_437] : memref<1x2x42x42xf32, #tpu.memory_space<vmem>>, vector<1x2x16x42xf32>
    %544 = vector.shape_cast %543 : vector<1x2x16x42xf32> to vector<2x16x42xf32>
    %cst_438 = arith.constant 0.0799675658 : f32
    %545 = vector.broadcast %cst_438 : f32 to vector<2x16x42xf32>
    %546 = arith.mulf %545, %544 : vector<2x16x42xf32>
    %547 = arith.addf %542, %546 : vector<2x16x42xf32>
    %c0_439 = arith.constant 0 : index
    %c0_440 = arith.constant 0 : index
    %c17_441 = arith.constant 17 : index
    %c0_442 = arith.constant 0 : index
    %548 = vector.load %arg3[%c0_439, %c0_440, %c17_441, %c0_442] : memref<1x2x42x42xf32, #tpu.memory_space<vmem>>, vector<1x2x16x42xf32>
    %549 = vector.shape_cast %548 : vector<1x2x16x42xf32> to vector<2x16x42xf32>
    %cst_443 = arith.constant 0.0498264469 : f32
    %550 = vector.broadcast %cst_443 : f32 to vector<2x16x42xf32>
    %551 = arith.mulf %550, %549 : vector<2x16x42xf32>
    %552 = arith.addf %547, %551 : vector<2x16x42xf32>
    %c0_444 = arith.constant 0 : index
    %c0_445 = arith.constant 0 : index
    %c18_446 = arith.constant 18 : index
    %c0_447 = arith.constant 0 : index
    %553 = vector.load %arg3[%c0_444, %c0_445, %c18_446, %c0_447] : memref<1x2x42x42xf32, #tpu.memory_space<vmem>>, vector<1x2x16x42xf32>
    %554 = vector.shape_cast %553 : vector<1x2x16x42xf32> to vector<2x16x42xf32>
    %cst_448 = arith.constant 0.0271209441 : f32
    %555 = vector.broadcast %cst_448 : f32 to vector<2x16x42xf32>
    %556 = arith.mulf %555, %554 : vector<2x16x42xf32>
    %557 = arith.addf %552, %556 : vector<2x16x42xf32>
    %c0_449 = arith.constant 0 : index
    %c0_450 = arith.constant 0 : index
    %c19 = arith.constant 19 : index
    %c0_451 = arith.constant 0 : index
    %558 = vector.load %arg3[%c0_449, %c0_450, %c19, %c0_451] : memref<1x2x42x42xf32, #tpu.memory_space<vmem>>, vector<1x2x16x42xf32>
    %559 = vector.shape_cast %558 : vector<1x2x16x42xf32> to vector<2x16x42xf32>
    %cst_452 = arith.constant 0.0128958076 : f32
    %560 = vector.broadcast %cst_452 : f32 to vector<2x16x42xf32>
    %561 = arith.mulf %560, %559 : vector<2x16x42xf32>
    %562 = arith.addf %557, %561 : vector<2x16x42xf32>
    %c0_453 = arith.constant 0 : index
    %c0_454 = arith.constant 0 : index
    %c20 = arith.constant 20 : index
    %c0_455 = arith.constant 0 : index
    %563 = vector.load %arg3[%c0_453, %c0_454, %c20, %c0_455] : memref<1x2x42x42xf32, #tpu.memory_space<vmem>>, vector<1x2x16x42xf32>
    %564 = vector.shape_cast %563 : vector<1x2x16x42xf32> to vector<2x16x42xf32>
    %cst_456 = arith.constant 0.00535662426 : f32
    %565 = vector.broadcast %cst_456 : f32 to vector<2x16x42xf32>
    %566 = arith.mulf %565, %564 : vector<2x16x42xf32>
    %567 = arith.addf %562, %566 : vector<2x16x42xf32>
    %c0_457 = arith.constant 0 : index
    %c0_458 = arith.constant 0 : index
    %c21 = arith.constant 21 : index
    %c0_459 = arith.constant 0 : index
    %568 = vector.load %arg3[%c0_457, %c0_458, %c21, %c0_459] : memref<1x2x42x42xf32, #tpu.memory_space<vmem>>, vector<1x2x16x42xf32>
    %569 = vector.shape_cast %568 : vector<1x2x16x42xf32> to vector<2x16x42xf32>
    %cst_460 = arith.constant 0.00194371527 : f32
    %570 = vector.broadcast %cst_460 : f32 to vector<2x16x42xf32>
    %571 = arith.mulf %570, %569 : vector<2x16x42xf32>
    %572 = arith.addf %567, %571 : vector<2x16x42xf32>
    %c4_461 = arith.constant 4 : index
    %c0_462 = arith.constant 0 : index
    %c0_463 = arith.constant 0 : index
    %573 = vector.load %arg4[%c4_461, %c0_462, %c0_463] : memref<6x42x16xf32, #tpu.memory_space<vmem>>, vector<1x42x16xf32>
    %574 = vector.shape_cast %573 : vector<1x42x16xf32> to vector<42x16xf32>
    %575 = vector.extract_strided_slice %572 {offsets = [0, 0, 0], sizes = [1, 16, 42], strides = [1, 1, 1]} : vector<2x16x42xf32> to vector<1x16x42xf32>
    %576 = vector.shape_cast %575 : vector<1x16x42xf32> to vector<16x42xf32>
    %cst_464 = arith.constant dense<0.000000e+00> : vector<16x16xf32>
    %577 = tpu.matmul %576, %574, %cst_464 {dimension_numbers = #tpu.dot_dimension_numbers<[1], [0], [0], [1], [0, 0, 1, 1], [], []>} : vector<16x42xf32>, vector<42x16xf32>, vector<16x16xf32> -> vector<16x16xf32>
    %578 = vector.extract_strided_slice %572 {offsets = [1, 0, 0], sizes = [1, 16, 42], strides = [1, 1, 1]} : vector<2x16x42xf32> to vector<1x16x42xf32>
    %579 = vector.shape_cast %578 : vector<1x16x42xf32> to vector<16x42xf32>
    %cst_465 = arith.constant dense<0.000000e+00> : vector<16x16xf32>
    %580 = tpu.matmul %579, %574, %cst_465 {dimension_numbers = #tpu.dot_dimension_numbers<[1], [0], [0], [1], [0, 0, 1, 1], [], []>} : vector<16x42xf32>, vector<42x16xf32>, vector<16x16xf32> -> vector<16x16xf32>
    %581 = arith.subf %349, %577 : vector<16x16xf32>
    %582 = arith.subf %352, %580 : vector<16x16xf32>
    %c0_466 = arith.constant 0 : index
    %c6_467 = arith.constant 6 : index
    %c8_468 = arith.constant 8 : index
    %c0_469 = arith.constant 0 : index
    %583 = vector.load %arg2[%c0_466, %c6_467, %c8_468, %c0_469] : memref<1x12x42x42xf32, #tpu.memory_space<vmem>>, vector<1x2x16x42xf32>
    %584 = vector.shape_cast %583 : vector<1x2x16x42xf32> to vector<2x16x42xf32>
    %cst_470 = arith.constant 0.00310794194 : f32
    %585 = vector.broadcast %cst_470 : f32 to vector<2x16x42xf32>
    %586 = arith.mulf %585, %584 : vector<2x16x42xf32>
    %c0_471 = arith.constant 0 : index
    %c6_472 = arith.constant 6 : index
    %c9_473 = arith.constant 9 : index
    %c0_474 = arith.constant 0 : index
    %587 = vector.load %arg2[%c0_471, %c6_472, %c9_473, %c0_474] : memref<1x12x42x42xf32, #tpu.memory_space<vmem>>, vector<1x2x16x42xf32>
    %588 = vector.shape_cast %587 : vector<1x2x16x42xf32> to vector<2x16x42xf32>
    %cst_475 = arith.constant 0.0147472136 : f32
    %589 = vector.broadcast %cst_475 : f32 to vector<2x16x42xf32>
    %590 = arith.mulf %589, %588 : vector<2x16x42xf32>
    %591 = arith.addf %586, %590 : vector<2x16x42xf32>
    %c0_476 = arith.constant 0 : index
    %c6_477 = arith.constant 6 : index
    %c10_478 = arith.constant 10 : index
    %c0_479 = arith.constant 0 : index
    %592 = vector.load %arg2[%c0_476, %c6_477, %c10_478, %c0_479] : memref<1x12x42x42xf32, #tpu.memory_space<vmem>>, vector<1x2x16x42xf32>
    %593 = vector.shape_cast %592 : vector<1x2x16x42xf32> to vector<2x16x42xf32>
    %cst_480 = arith.constant 0.0495076291 : f32
    %594 = vector.broadcast %cst_480 : f32 to vector<2x16x42xf32>
    %595 = arith.mulf %594, %593 : vector<2x16x42xf32>
    %596 = arith.addf %591, %595 : vector<2x16x42xf32>
    %c0_481 = arith.constant 0 : index
    %c6_482 = arith.constant 6 : index
    %c11_483 = arith.constant 11 : index
    %c0_484 = arith.constant 0 : index
    %597 = vector.load %arg2[%c0_481, %c6_482, %c11_483, %c0_484] : memref<1x12x42x42xf32, #tpu.memory_space<vmem>>, vector<1x2x16x42xf32>
    %598 = vector.shape_cast %597 : vector<1x2x16x42xf32> to vector<2x16x42xf32>
    %cst_485 = arith.constant 0.11758703 : f32
    %599 = vector.broadcast %cst_485 : f32 to vector<2x16x42xf32>
    %600 = arith.mulf %599, %598 : vector<2x16x42xf32>
    %601 = arith.addf %596, %600 : vector<2x16x42xf32>
    %c0_486 = arith.constant 0 : index
    %c6_487 = arith.constant 6 : index
    %c12_488 = arith.constant 12 : index
    %c0_489 = arith.constant 0 : index
    %602 = vector.load %arg2[%c0_486, %c6_487, %c12_488, %c0_489] : memref<1x12x42x42xf32, #tpu.memory_space<vmem>>, vector<1x2x16x42xf32>
    %603 = vector.shape_cast %602 : vector<1x2x16x42xf32> to vector<2x16x42xf32>
    %cst_490 = arith.constant 0.197593093 : f32
    %604 = vector.broadcast %cst_490 : f32 to vector<2x16x42xf32>
    %605 = arith.mulf %604, %603 : vector<2x16x42xf32>
    %606 = arith.addf %601, %605 : vector<2x16x42xf32>
    %c0_491 = arith.constant 0 : index
    %c6_492 = arith.constant 6 : index
    %c13_493 = arith.constant 13 : index
    %c0_494 = arith.constant 0 : index
    %607 = vector.load %arg2[%c0_491, %c6_492, %c13_493, %c0_494] : memref<1x12x42x42xf32, #tpu.memory_space<vmem>>, vector<1x2x16x42xf32>
    %608 = vector.shape_cast %607 : vector<1x2x16x42xf32> to vector<2x16x42xf32>
    %cst_495 = arith.constant 0.234914169 : f32
    %609 = vector.broadcast %cst_495 : f32 to vector<2x16x42xf32>
    %610 = arith.mulf %609, %608 : vector<2x16x42xf32>
    %611 = arith.addf %606, %610 : vector<2x16x42xf32>
    %c0_496 = arith.constant 0 : index
    %c6_497 = arith.constant 6 : index
    %c14_498 = arith.constant 14 : index
    %c0_499 = arith.constant 0 : index
    %612 = vector.load %arg2[%c0_496, %c6_497, %c14_498, %c0_499] : memref<1x12x42x42xf32, #tpu.memory_space<vmem>>, vector<1x2x16x42xf32>
    %613 = vector.shape_cast %612 : vector<1x2x16x42xf32> to vector<2x16x42xf32>
    %cst_500 = arith.constant 0.197593093 : f32
    %614 = vector.broadcast %cst_500 : f32 to vector<2x16x42xf32>
    %615 = arith.mulf %614, %613 : vector<2x16x42xf32>
    %616 = arith.addf %611, %615 : vector<2x16x42xf32>
    %c0_501 = arith.constant 0 : index
    %c6_502 = arith.constant 6 : index
    %c15_503 = arith.constant 15 : index
    %c0_504 = arith.constant 0 : index
    %617 = vector.load %arg2[%c0_501, %c6_502, %c15_503, %c0_504] : memref<1x12x42x42xf32, #tpu.memory_space<vmem>>, vector<1x2x16x42xf32>
    %618 = vector.shape_cast %617 : vector<1x2x16x42xf32> to vector<2x16x42xf32>
    %cst_505 = arith.constant 0.11758703 : f32
    %619 = vector.broadcast %cst_505 : f32 to vector<2x16x42xf32>
    %620 = arith.mulf %619, %618 : vector<2x16x42xf32>
    %621 = arith.addf %616, %620 : vector<2x16x42xf32>
    %c0_506 = arith.constant 0 : index
    %c6_507 = arith.constant 6 : index
    %c16_508 = arith.constant 16 : index
    %c0_509 = arith.constant 0 : index
    %622 = vector.load %arg2[%c0_506, %c6_507, %c16_508, %c0_509] : memref<1x12x42x42xf32, #tpu.memory_space<vmem>>, vector<1x2x16x42xf32>
    %623 = vector.shape_cast %622 : vector<1x2x16x42xf32> to vector<2x16x42xf32>
    %cst_510 = arith.constant 0.0495076291 : f32
    %624 = vector.broadcast %cst_510 : f32 to vector<2x16x42xf32>
    %625 = arith.mulf %624, %623 : vector<2x16x42xf32>
    %626 = arith.addf %621, %625 : vector<2x16x42xf32>
    %c0_511 = arith.constant 0 : index
    %c6_512 = arith.constant 6 : index
    %c17_513 = arith.constant 17 : index
    %c0_514 = arith.constant 0 : index
    %627 = vector.load %arg2[%c0_511, %c6_512, %c17_513, %c0_514] : memref<1x12x42x42xf32, #tpu.memory_space<vmem>>, vector<1x2x16x42xf32>
    %628 = vector.shape_cast %627 : vector<1x2x16x42xf32> to vector<2x16x42xf32>
    %cst_515 = arith.constant 0.0147472136 : f32
    %629 = vector.broadcast %cst_515 : f32 to vector<2x16x42xf32>
    %630 = arith.mulf %629, %628 : vector<2x16x42xf32>
    %631 = arith.addf %626, %630 : vector<2x16x42xf32>
    %c0_516 = arith.constant 0 : index
    %c6_517 = arith.constant 6 : index
    %c18_518 = arith.constant 18 : index
    %c0_519 = arith.constant 0 : index
    %632 = vector.load %arg2[%c0_516, %c6_517, %c18_518, %c0_519] : memref<1x12x42x42xf32, #tpu.memory_space<vmem>>, vector<1x2x16x42xf32>
    %633 = vector.shape_cast %632 : vector<1x2x16x42xf32> to vector<2x16x42xf32>
    %cst_520 = arith.constant 0.00310794194 : f32
    %634 = vector.broadcast %cst_520 : f32 to vector<2x16x42xf32>
    %635 = arith.mulf %634, %633 : vector<2x16x42xf32>
    %636 = arith.addf %631, %635 : vector<2x16x42xf32>
    %c3_521 = arith.constant 3 : index
    %c0_522 = arith.constant 0 : index
    %c0_523 = arith.constant 0 : index
    %637 = vector.load %arg4[%c3_521, %c0_522, %c0_523] : memref<6x42x16xf32, #tpu.memory_space<vmem>>, vector<1x42x16xf32>
    %638 = vector.shape_cast %637 : vector<1x42x16xf32> to vector<42x16xf32>
    %639 = vector.extract_strided_slice %636 {offsets = [0, 0, 0], sizes = [1, 16, 42], strides = [1, 1, 1]} : vector<2x16x42xf32> to vector<1x16x42xf32>
    %640 = vector.shape_cast %639 : vector<1x16x42xf32> to vector<16x42xf32>
    %cst_524 = arith.constant dense<0.000000e+00> : vector<16x16xf32>
    %641 = tpu.matmul %640, %638, %cst_524 {dimension_numbers = #tpu.dot_dimension_numbers<[1], [0], [0], [1], [0, 0, 1, 1], [], []>} : vector<16x42xf32>, vector<42x16xf32>, vector<16x16xf32> -> vector<16x16xf32>
    %642 = vector.extract_strided_slice %636 {offsets = [1, 0, 0], sizes = [1, 16, 42], strides = [1, 1, 1]} : vector<2x16x42xf32> to vector<1x16x42xf32>
    %643 = vector.shape_cast %642 : vector<1x16x42xf32> to vector<16x42xf32>
    %cst_525 = arith.constant dense<0.000000e+00> : vector<16x16xf32>
    %644 = tpu.matmul %643, %638, %cst_525 {dimension_numbers = #tpu.dot_dimension_numbers<[1], [0], [0], [1], [0, 0, 1, 1], [], []>} : vector<16x42xf32>, vector<42x16xf32>, vector<16x16xf32> -> vector<16x16xf32>
    %c0_526 = arith.constant 0 : index
    %c6_527 = arith.constant 6 : index
    %c5_528 = arith.constant 5 : index
    %c0_529 = arith.constant 0 : index
    %645 = vector.load %arg2[%c0_526, %c6_527, %c5_528, %c0_529] : memref<1x12x42x42xf32, #tpu.memory_space<vmem>>, vector<1x2x16x42xf32>
    %646 = vector.shape_cast %645 : vector<1x2x16x42xf32> to vector<2x16x42xf32>
    %cst_530 = arith.constant 0.00194371527 : f32
    %647 = vector.broadcast %cst_530 : f32 to vector<2x16x42xf32>
    %648 = arith.mulf %647, %646 : vector<2x16x42xf32>
    %c0_531 = arith.constant 0 : index
    %c6_532 = arith.constant 6 : index
    %c6_533 = arith.constant 6 : index
    %c0_534 = arith.constant 0 : index
    %649 = vector.load %arg2[%c0_531, %c6_532, %c6_533, %c0_534] : memref<1x12x42x42xf32, #tpu.memory_space<vmem>>, vector<1x2x16x42xf32>
    %650 = vector.shape_cast %649 : vector<1x2x16x42xf32> to vector<2x16x42xf32>
    %cst_535 = arith.constant 0.00535662426 : f32
    %651 = vector.broadcast %cst_535 : f32 to vector<2x16x42xf32>
    %652 = arith.mulf %651, %650 : vector<2x16x42xf32>
    %653 = arith.addf %648, %652 : vector<2x16x42xf32>
    %c0_536 = arith.constant 0 : index
    %c6_537 = arith.constant 6 : index
    %c7_538 = arith.constant 7 : index
    %c0_539 = arith.constant 0 : index
    %654 = vector.load %arg2[%c0_536, %c6_537, %c7_538, %c0_539] : memref<1x12x42x42xf32, #tpu.memory_space<vmem>>, vector<1x2x16x42xf32>
    %655 = vector.shape_cast %654 : vector<1x2x16x42xf32> to vector<2x16x42xf32>
    %cst_540 = arith.constant 0.0128958076 : f32
    %656 = vector.broadcast %cst_540 : f32 to vector<2x16x42xf32>
    %657 = arith.mulf %656, %655 : vector<2x16x42xf32>
    %658 = arith.addf %653, %657 : vector<2x16x42xf32>
    %c0_541 = arith.constant 0 : index
    %c6_542 = arith.constant 6 : index
    %c8_543 = arith.constant 8 : index
    %c0_544 = arith.constant 0 : index
    %659 = vector.load %arg2[%c0_541, %c6_542, %c8_543, %c0_544] : memref<1x12x42x42xf32, #tpu.memory_space<vmem>>, vector<1x2x16x42xf32>
    %660 = vector.shape_cast %659 : vector<1x2x16x42xf32> to vector<2x16x42xf32>
    %cst_545 = arith.constant 0.0271209441 : f32
    %661 = vector.broadcast %cst_545 : f32 to vector<2x16x42xf32>
    %662 = arith.mulf %661, %660 : vector<2x16x42xf32>
    %663 = arith.addf %658, %662 : vector<2x16x42xf32>
    %c0_546 = arith.constant 0 : index
    %c6_547 = arith.constant 6 : index
    %c9_548 = arith.constant 9 : index
    %c0_549 = arith.constant 0 : index
    %664 = vector.load %arg2[%c0_546, %c6_547, %c9_548, %c0_549] : memref<1x12x42x42xf32, #tpu.memory_space<vmem>>, vector<1x2x16x42xf32>
    %665 = vector.shape_cast %664 : vector<1x2x16x42xf32> to vector<2x16x42xf32>
    %cst_550 = arith.constant 0.0498264469 : f32
    %666 = vector.broadcast %cst_550 : f32 to vector<2x16x42xf32>
    %667 = arith.mulf %666, %665 : vector<2x16x42xf32>
    %668 = arith.addf %663, %667 : vector<2x16x42xf32>
    %c0_551 = arith.constant 0 : index
    %c6_552 = arith.constant 6 : index
    %c10_553 = arith.constant 10 : index
    %c0_554 = arith.constant 0 : index
    %669 = vector.load %arg2[%c0_551, %c6_552, %c10_553, %c0_554] : memref<1x12x42x42xf32, #tpu.memory_space<vmem>>, vector<1x2x16x42xf32>
    %670 = vector.shape_cast %669 : vector<1x2x16x42xf32> to vector<2x16x42xf32>
    %cst_555 = arith.constant 0.0799675658 : f32
    %671 = vector.broadcast %cst_555 : f32 to vector<2x16x42xf32>
    %672 = arith.mulf %671, %670 : vector<2x16x42xf32>
    %673 = arith.addf %668, %672 : vector<2x16x42xf32>
    %c0_556 = arith.constant 0 : index
    %c6_557 = arith.constant 6 : index
    %c11_558 = arith.constant 11 : index
    %c0_559 = arith.constant 0 : index
    %674 = vector.load %arg2[%c0_556, %c6_557, %c11_558, %c0_559] : memref<1x12x42x42xf32, #tpu.memory_space<vmem>>, vector<1x2x16x42xf32>
    %675 = vector.shape_cast %674 : vector<1x2x16x42xf32> to vector<2x16x42xf32>
    %cst_560 = arith.constant 0.112115778 : f32
    %676 = vector.broadcast %cst_560 : f32 to vector<2x16x42xf32>
    %677 = arith.mulf %676, %675 : vector<2x16x42xf32>
    %678 = arith.addf %673, %677 : vector<2x16x42xf32>
    %c0_561 = arith.constant 0 : index
    %c6_562 = arith.constant 6 : index
    %c12_563 = arith.constant 12 : index
    %c0_564 = arith.constant 0 : index
    %679 = vector.load %arg2[%c0_561, %c6_562, %c12_563, %c0_564] : memref<1x12x42x42xf32, #tpu.memory_space<vmem>>, vector<1x2x16x42xf32>
    %680 = vector.shape_cast %679 : vector<1x2x16x42xf32> to vector<2x16x42xf32>
    %cst_565 = arith.constant 0.137315139 : f32
    %681 = vector.broadcast %cst_565 : f32 to vector<2x16x42xf32>
    %682 = arith.mulf %681, %680 : vector<2x16x42xf32>
    %683 = arith.addf %678, %682 : vector<2x16x42xf32>
    %c0_566 = arith.constant 0 : index
    %c6_567 = arith.constant 6 : index
    %c13_568 = arith.constant 13 : index
    %c0_569 = arith.constant 0 : index
    %684 = vector.load %arg2[%c0_566, %c6_567, %c13_568, %c0_569] : memref<1x12x42x42xf32, #tpu.memory_space<vmem>>, vector<1x2x16x42xf32>
    %685 = vector.shape_cast %684 : vector<1x2x16x42xf32> to vector<2x16x42xf32>
    %cst_570 = arith.constant 0.146915972 : f32
    %686 = vector.broadcast %cst_570 : f32 to vector<2x16x42xf32>
    %687 = arith.mulf %686, %685 : vector<2x16x42xf32>
    %688 = arith.addf %683, %687 : vector<2x16x42xf32>
    %c0_571 = arith.constant 0 : index
    %c6_572 = arith.constant 6 : index
    %c14_573 = arith.constant 14 : index
    %c0_574 = arith.constant 0 : index
    %689 = vector.load %arg2[%c0_571, %c6_572, %c14_573, %c0_574] : memref<1x12x42x42xf32, #tpu.memory_space<vmem>>, vector<1x2x16x42xf32>
    %690 = vector.shape_cast %689 : vector<1x2x16x42xf32> to vector<2x16x42xf32>
    %cst_575 = arith.constant 0.137315139 : f32
    %691 = vector.broadcast %cst_575 : f32 to vector<2x16x42xf32>
    %692 = arith.mulf %691, %690 : vector<2x16x42xf32>
    %693 = arith.addf %688, %692 : vector<2x16x42xf32>
    %c0_576 = arith.constant 0 : index
    %c6_577 = arith.constant 6 : index
    %c15_578 = arith.constant 15 : index
    %c0_579 = arith.constant 0 : index
    %694 = vector.load %arg2[%c0_576, %c6_577, %c15_578, %c0_579] : memref<1x12x42x42xf32, #tpu.memory_space<vmem>>, vector<1x2x16x42xf32>
    %695 = vector.shape_cast %694 : vector<1x2x16x42xf32> to vector<2x16x42xf32>
    %cst_580 = arith.constant 0.112115778 : f32
    %696 = vector.broadcast %cst_580 : f32 to vector<2x16x42xf32>
    %697 = arith.mulf %696, %695 : vector<2x16x42xf32>
    %698 = arith.addf %693, %697 : vector<2x16x42xf32>
    %c0_581 = arith.constant 0 : index
    %c6_582 = arith.constant 6 : index
    %c16_583 = arith.constant 16 : index
    %c0_584 = arith.constant 0 : index
    %699 = vector.load %arg2[%c0_581, %c6_582, %c16_583, %c0_584] : memref<1x12x42x42xf32, #tpu.memory_space<vmem>>, vector<1x2x16x42xf32>
    %700 = vector.shape_cast %699 : vector<1x2x16x42xf32> to vector<2x16x42xf32>
    %cst_585 = arith.constant 0.0799675658 : f32
    %701 = vector.broadcast %cst_585 : f32 to vector<2x16x42xf32>
    %702 = arith.mulf %701, %700 : vector<2x16x42xf32>
    %703 = arith.addf %698, %702 : vector<2x16x42xf32>
    %c0_586 = arith.constant 0 : index
    %c6_587 = arith.constant 6 : index
    %c17_588 = arith.constant 17 : index
    %c0_589 = arith.constant 0 : index
    %704 = vector.load %arg2[%c0_586, %c6_587, %c17_588, %c0_589] : memref<1x12x42x42xf32, #tpu.memory_space<vmem>>, vector<1x2x16x42xf32>
    %705 = vector.shape_cast %704 : vector<1x2x16x42xf32> to vector<2x16x42xf32>
    %cst_590 = arith.constant 0.0498264469 : f32
    %706 = vector.broadcast %cst_590 : f32 to vector<2x16x42xf32>
    %707 = arith.mulf %706, %705 : vector<2x16x42xf32>
    %708 = arith.addf %703, %707 : vector<2x16x42xf32>
    %c0_591 = arith.constant 0 : index
    %c6_592 = arith.constant 6 : index
    %c18_593 = arith.constant 18 : index
    %c0_594 = arith.constant 0 : index
    %709 = vector.load %arg2[%c0_591, %c6_592, %c18_593, %c0_594] : memref<1x12x42x42xf32, #tpu.memory_space<vmem>>, vector<1x2x16x42xf32>
    %710 = vector.shape_cast %709 : vector<1x2x16x42xf32> to vector<2x16x42xf32>
    %cst_595 = arith.constant 0.0271209441 : f32
    %711 = vector.broadcast %cst_595 : f32 to vector<2x16x42xf32>
    %712 = arith.mulf %711, %710 : vector<2x16x42xf32>
    %713 = arith.addf %708, %712 : vector<2x16x42xf32>
    %c0_596 = arith.constant 0 : index
    %c6_597 = arith.constant 6 : index
    %c19_598 = arith.constant 19 : index
    %c0_599 = arith.constant 0 : index
    %714 = vector.load %arg2[%c0_596, %c6_597, %c19_598, %c0_599] : memref<1x12x42x42xf32, #tpu.memory_space<vmem>>, vector<1x2x16x42xf32>
    %715 = vector.shape_cast %714 : vector<1x2x16x42xf32> to vector<2x16x42xf32>
    %cst_600 = arith.constant 0.0128958076 : f32
    %716 = vector.broadcast %cst_600 : f32 to vector<2x16x42xf32>
    %717 = arith.mulf %716, %715 : vector<2x16x42xf32>
    %718 = arith.addf %713, %717 : vector<2x16x42xf32>
    %c0_601 = arith.constant 0 : index
    %c6_602 = arith.constant 6 : index
    %c20_603 = arith.constant 20 : index
    %c0_604 = arith.constant 0 : index
    %719 = vector.load %arg2[%c0_601, %c6_602, %c20_603, %c0_604] : memref<1x12x42x42xf32, #tpu.memory_space<vmem>>, vector<1x2x16x42xf32>
    %720 = vector.shape_cast %719 : vector<1x2x16x42xf32> to vector<2x16x42xf32>
    %cst_605 = arith.constant 0.00535662426 : f32
    %721 = vector.broadcast %cst_605 : f32 to vector<2x16x42xf32>
    %722 = arith.mulf %721, %720 : vector<2x16x42xf32>
    %723 = arith.addf %718, %722 : vector<2x16x42xf32>
    %c0_606 = arith.constant 0 : index
    %c6_607 = arith.constant 6 : index
    %c21_608 = arith.constant 21 : index
    %c0_609 = arith.constant 0 : index
    %724 = vector.load %arg2[%c0_606, %c6_607, %c21_608, %c0_609] : memref<1x12x42x42xf32, #tpu.memory_space<vmem>>, vector<1x2x16x42xf32>
    %725 = vector.shape_cast %724 : vector<1x2x16x42xf32> to vector<2x16x42xf32>
    %cst_610 = arith.constant 0.00194371527 : f32
    %726 = vector.broadcast %cst_610 : f32 to vector<2x16x42xf32>
    %727 = arith.mulf %726, %725 : vector<2x16x42xf32>
    %728 = arith.addf %723, %727 : vector<2x16x42xf32>
    %c4_611 = arith.constant 4 : index
    %c0_612 = arith.constant 0 : index
    %c0_613 = arith.constant 0 : index
    %729 = vector.load %arg4[%c4_611, %c0_612, %c0_613] : memref<6x42x16xf32, #tpu.memory_space<vmem>>, vector<1x42x16xf32>
    %730 = vector.shape_cast %729 : vector<1x42x16xf32> to vector<42x16xf32>
    %731 = vector.extract_strided_slice %728 {offsets = [0, 0, 0], sizes = [1, 16, 42], strides = [1, 1, 1]} : vector<2x16x42xf32> to vector<1x16x42xf32>
    %732 = vector.shape_cast %731 : vector<1x16x42xf32> to vector<16x42xf32>
    %cst_614 = arith.constant dense<0.000000e+00> : vector<16x16xf32>
    %733 = tpu.matmul %732, %730, %cst_614 {dimension_numbers = #tpu.dot_dimension_numbers<[1], [0], [0], [1], [0, 0, 1, 1], [], []>} : vector<16x42xf32>, vector<42x16xf32>, vector<16x16xf32> -> vector<16x16xf32>
    %734 = vector.extract_strided_slice %728 {offsets = [1, 0, 0], sizes = [1, 16, 42], strides = [1, 1, 1]} : vector<2x16x42xf32> to vector<1x16x42xf32>
    %735 = vector.shape_cast %734 : vector<1x16x42xf32> to vector<16x42xf32>
    %cst_615 = arith.constant dense<0.000000e+00> : vector<16x16xf32>
    %736 = tpu.matmul %735, %730, %cst_615 {dimension_numbers = #tpu.dot_dimension_numbers<[1], [0], [0], [1], [0, 0, 1, 1], [], []>} : vector<16x42xf32>, vector<42x16xf32>, vector<16x16xf32> -> vector<16x16xf32>
    %737 = arith.subf %641, %733 : vector<16x16xf32>
    %738 = arith.subf %644, %736 : vector<16x16xf32>
    %739 = arith.subf %737, %581 : vector<16x16xf32>
    %740 = arith.mulf %739, %739 : vector<16x16xf32>
    %741 = vector.shape_cast %740 : vector<16x16xf32> to vector<1x16x16xf32>
    %cst_616 = arith.constant dense<0.000000e+00> : vector<1xf32>
    %742 = vector.multi_reduction <add>, %741, %cst_616 [1, 2] : vector<1x16x16xf32> to vector<1xf32>
    %743 = vector.shape_cast %742 : vector<1xf32> to vector<1x1x1xf32>
    %744 = vector.extract %743[0, 0, 0] : f32 from vector<1x1x1xf32>
    %cst_617 = arith.constant 0.000000e+00 : f32
    %745 = arith.addf %cst_617, %744 : f32
    %746 = arith.subf %738, %582 : vector<16x16xf32>
    %747 = arith.mulf %746, %746 : vector<16x16xf32>
    %748 = vector.shape_cast %747 : vector<16x16xf32> to vector<1x16x16xf32>
    %cst_618 = arith.constant dense<0.000000e+00> : vector<1xf32>
    %749 = vector.multi_reduction <add>, %748, %cst_618 [1, 2] : vector<1x16x16xf32> to vector<1xf32>
    %750 = vector.shape_cast %749 : vector<1xf32> to vector<1x1x1xf32>
    %751 = vector.extract %750[0, 0, 0] : f32 from vector<1x1x1xf32>
    %752 = arith.addf %745, %751 : f32
    %cst_619 = arith.constant 0.001953125 : f32
    %753 = arith.mulf %752, %cst_619 : f32
    %c3_i32 = arith.constant 3 : i32
    %754 = vector.broadcast %c3_i32 : i32 to vector<1x6xi32>
    %755 = arith.cmpi eq, %0, %754 : vector<1x6xi32>
    %cst_620 = arith.constant 0.000000e+00 : f32
    %756 = vector.broadcast %753 : f32 to vector<1x6xf32>
    %757 = vector.broadcast %cst_620 : f32 to vector<1x6xf32>
    %758 = arith.select %755, %756, %757 : vector<1x6xi1>, vector<1x6xf32>
    %759 = arith.addf %481, %758 : vector<1x6xf32>
    %c0_621 = arith.constant 0 : index
    %c3_622 = arith.constant 3 : index
    %760 = memref.load %arg1[%c0_621, %c3_622] : memref<2x6xf32, #tpu.memory_space<smem>>
    %c1_623 = arith.constant 1 : index
    %c3_624 = arith.constant 3 : index
    %761 = memref.load %arg1[%c1_623, %c3_624] : memref<2x6xf32, #tpu.memory_space<smem>>
    %762 = arith.mulf %753, %761 : f32
    %763 = vector.broadcast %762 : f32 to vector<1x1xf32>
    %764 = arith.addf %488, %763 : vector<1x1xf32>
    %765 = vector.broadcast %760 : f32 to vector<1x1xf32>
    %766 = arith.addf %764, %765 : vector<1x1xf32>
    %c0_625 = arith.constant 0 : index
    %c0_626 = arith.constant 0 : index
    %c0_627 = arith.constant 0 : index
    %c0_628 = arith.constant 0 : index
    %767 = vector.load %arg3[%c0_625, %c0_626, %c0_627, %c0_628] : memref<1x2x42x42xf32, #tpu.memory_space<vmem>>, vector<1x2x16x42xf32>
    %768 = vector.shape_cast %767 : vector<1x2x16x42xf32> to vector<2x16x42xf32>
    %cst_629 = arith.constant 0.00119677128 : f32
    %769 = vector.broadcast %cst_629 : f32 to vector<2x16x42xf32>
    %770 = arith.mulf %769, %768 : vector<2x16x42xf32>
    %c0_630 = arith.constant 0 : index
    %c0_631 = arith.constant 0 : index
    %c1_632 = arith.constant 1 : index
    %c0_633 = arith.constant 0 : index
    %771 = vector.load %arg3[%c0_630, %c0_631, %c1_632, %c0_633] : memref<1x2x42x42xf32, #tpu.memory_space<vmem>>, vector<1x2x16x42xf32>
    %772 = vector.shape_cast %771 : vector<1x2x16x42xf32> to vector<2x16x42xf32>
    %cst_634 = arith.constant 0.00226927106 : f32
    %773 = vector.broadcast %cst_634 : f32 to vector<2x16x42xf32>
    %774 = arith.mulf %773, %772 : vector<2x16x42xf32>
    %775 = arith.addf %770, %774 : vector<2x16x42xf32>
    %c0_635 = arith.constant 0 : index
    %c0_636 = arith.constant 0 : index
    %c2_637 = arith.constant 2 : index
    %c0_638 = arith.constant 0 : index
    %776 = vector.load %arg3[%c0_635, %c0_636, %c2_637, %c0_638] : memref<1x2x42x42xf32, #tpu.memory_space<vmem>>, vector<1x2x16x42xf32>
    %777 = vector.shape_cast %776 : vector<1x2x16x42xf32> to vector<2x16x42xf32>
    %cst_639 = arith.constant 0.00408819458 : f32
    %778 = vector.broadcast %cst_639 : f32 to vector<2x16x42xf32>
    %779 = arith.mulf %778, %777 : vector<2x16x42xf32>
    %780 = arith.addf %775, %779 : vector<2x16x42xf32>
    %c0_640 = arith.constant 0 : index
    %c0_641 = arith.constant 0 : index
    %c3_642 = arith.constant 3 : index
    %c0_643 = arith.constant 0 : index
    %781 = vector.load %arg3[%c0_640, %c0_641, %c3_642, %c0_643] : memref<1x2x42x42xf32, #tpu.memory_space<vmem>>, vector<1x2x16x42xf32>
    %782 = vector.shape_cast %781 : vector<1x2x16x42xf32> to vector<2x16x42xf32>
    %cst_644 = arith.constant 0.00699756108 : f32
    %783 = vector.broadcast %cst_644 : f32 to vector<2x16x42xf32>
    %784 = arith.mulf %783, %782 : vector<2x16x42xf32>
    %785 = arith.addf %780, %784 : vector<2x16x42xf32>
    %c0_645 = arith.constant 0 : index
    %c0_646 = arith.constant 0 : index
    %c4_647 = arith.constant 4 : index
    %c0_648 = arith.constant 0 : index
    %786 = vector.load %arg3[%c0_645, %c0_646, %c4_647, %c0_648] : memref<1x2x42x42xf32, #tpu.memory_space<vmem>>, vector<1x2x16x42xf32>
    %787 = vector.shape_cast %786 : vector<1x2x16x42xf32> to vector<2x16x42xf32>
    %cst_649 = arith.constant 0.0113797272 : f32
    %788 = vector.broadcast %cst_649 : f32 to vector<2x16x42xf32>
    %789 = arith.mulf %788, %787 : vector<2x16x42xf32>
    %790 = arith.addf %785, %789 : vector<2x16x42xf32>
    %c0_650 = arith.constant 0 : index
    %c0_651 = arith.constant 0 : index
    %c5_652 = arith.constant 5 : index
    %c0_653 = arith.constant 0 : index
    %791 = vector.load %arg3[%c0_650, %c0_651, %c5_652, %c0_653] : memref<1x2x42x42xf32, #tpu.memory_space<vmem>>, vector<1x2x16x42xf32>
    %792 = vector.shape_cast %791 : vector<1x2x16x42xf32> to vector<2x16x42xf32>
    %cst_654 = arith.constant 0.0175827574 : f32
    %793 = vector.broadcast %cst_654 : f32 to vector<2x16x42xf32>
    %794 = arith.mulf %793, %792 : vector<2x16x42xf32>
    %795 = arith.addf %790, %794 : vector<2x16x42xf32>
    %c0_655 = arith.constant 0 : index
    %c0_656 = arith.constant 0 : index
    %c6_657 = arith.constant 6 : index
    %c0_658 = arith.constant 0 : index
    %796 = vector.load %arg3[%c0_655, %c0_656, %c6_657, %c0_658] : memref<1x2x42x42xf32, #tpu.memory_space<vmem>>, vector<1x2x16x42xf32>
    %797 = vector.shape_cast %796 : vector<1x2x16x42xf32> to vector<2x16x42xf32>
    %cst_659 = arith.constant 0.0258114319 : f32
    %798 = vector.broadcast %cst_659 : f32 to vector<2x16x42xf32>
    %799 = arith.mulf %798, %797 : vector<2x16x42xf32>
    %800 = arith.addf %795, %799 : vector<2x16x42xf32>
    %c0_660 = arith.constant 0 : index
    %c0_661 = arith.constant 0 : index
    %c7_662 = arith.constant 7 : index
    %c0_663 = arith.constant 0 : index
    %801 = vector.load %arg3[%c0_660, %c0_661, %c7_662, %c0_663] : memref<1x2x42x42xf32, #tpu.memory_space<vmem>>, vector<1x2x16x42xf32>
    %802 = vector.shape_cast %801 : vector<1x2x16x42xf32> to vector<2x16x42xf32>
    %cst_664 = arith.constant 0.0360003896 : f32
    %803 = vector.broadcast %cst_664 : f32 to vector<2x16x42xf32>
    %804 = arith.mulf %803, %802 : vector<2x16x42xf32>
    %805 = arith.addf %800, %804 : vector<2x16x42xf32>
    %c0_665 = arith.constant 0 : index
    %c0_666 = arith.constant 0 : index
    %c8_667 = arith.constant 8 : index
    %c0_668 = arith.constant 0 : index
    %806 = vector.load %arg3[%c0_665, %c0_666, %c8_667, %c0_668] : memref<1x2x42x42xf32, #tpu.memory_space<vmem>>, vector<1x2x16x42xf32>
    %807 = vector.shape_cast %806 : vector<1x2x16x42xf32> to vector<2x16x42xf32>
    %cst_669 = arith.constant 0.0477059223 : f32
    %808 = vector.broadcast %cst_669 : f32 to vector<2x16x42xf32>
    %809 = arith.mulf %808, %807 : vector<2x16x42xf32>
    %810 = arith.addf %805, %809 : vector<2x16x42xf32>
    %c0_670 = arith.constant 0 : index
    %c0_671 = arith.constant 0 : index
    %c9_672 = arith.constant 9 : index
    %c0_673 = arith.constant 0 : index
    %811 = vector.load %arg3[%c0_670, %c0_671, %c9_672, %c0_673] : memref<1x2x42x42xf32, #tpu.memory_space<vmem>>, vector<1x2x16x42xf32>
    %812 = vector.shape_cast %811 : vector<1x2x16x42xf32> to vector<2x16x42xf32>
    %cst_674 = arith.constant 0.0600630492 : f32
    %813 = vector.broadcast %cst_674 : f32 to vector<2x16x42xf32>
    %814 = arith.mulf %813, %812 : vector<2x16x42xf32>
    %815 = arith.addf %810, %814 : vector<2x16x42xf32>
    %c0_675 = arith.constant 0 : index
    %c0_676 = arith.constant 0 : index
    %c10_677 = arith.constant 10 : index
    %c0_678 = arith.constant 0 : index
    %816 = vector.load %arg3[%c0_675, %c0_676, %c10_677, %c0_678] : memref<1x2x42x42xf32, #tpu.memory_space<vmem>>, vector<1x2x16x42xf32>
    %817 = vector.shape_cast %816 : vector<1x2x16x42xf32> to vector<2x16x42xf32>
    %cst_679 = arith.constant 0.0718476251 : f32
    %818 = vector.broadcast %cst_679 : f32 to vector<2x16x42xf32>
    %819 = arith.mulf %818, %817 : vector<2x16x42xf32>
    %820 = arith.addf %815, %819 : vector<2x16x42xf32>
    %c0_680 = arith.constant 0 : index
    %c0_681 = arith.constant 0 : index
    %c11_682 = arith.constant 11 : index
    %c0_683 = arith.constant 0 : index
    %821 = vector.load %arg3[%c0_680, %c0_681, %c11_682, %c0_683] : memref<1x2x42x42xf32, #tpu.memory_space<vmem>>, vector<1x2x16x42xf32>
    %822 = vector.shape_cast %821 : vector<1x2x16x42xf32> to vector<2x16x42xf32>
    %cst_684 = arith.constant 0.0816558822 : f32
    %823 = vector.broadcast %cst_684 : f32 to vector<2x16x42xf32>
    %824 = arith.mulf %823, %822 : vector<2x16x42xf32>
    %825 = arith.addf %820, %824 : vector<2x16x42xf32>
    %c0_685 = arith.constant 0 : index
    %c0_686 = arith.constant 0 : index
    %c12_687 = arith.constant 12 : index
    %c0_688 = arith.constant 0 : index
    %826 = vector.load %arg3[%c0_685, %c0_686, %c12_687, %c0_688] : memref<1x2x42x42xf32, #tpu.memory_space<vmem>>, vector<1x2x16x42xf32>
    %827 = vector.shape_cast %826 : vector<1x2x16x42xf32> to vector<2x16x42xf32>
    %cst_689 = arith.constant 0.0881723613 : f32
    %828 = vector.broadcast %cst_689 : f32 to vector<2x16x42xf32>
    %829 = arith.mulf %828, %827 : vector<2x16x42xf32>
    %830 = arith.addf %825, %829 : vector<2x16x42xf32>
    %c0_690 = arith.constant 0 : index
    %c0_691 = arith.constant 0 : index
    %c13_692 = arith.constant 13 : index
    %c0_693 = arith.constant 0 : index
    %831 = vector.load %arg3[%c0_690, %c0_691, %c13_692, %c0_693] : memref<1x2x42x42xf32, #tpu.memory_space<vmem>>, vector<1x2x16x42xf32>
    %832 = vector.shape_cast %831 : vector<1x2x16x42xf32> to vector<2x16x42xf32>
    %cst_694 = arith.constant 0.09045811 : f32
    %833 = vector.broadcast %cst_694 : f32 to vector<2x16x42xf32>
    %834 = arith.mulf %833, %832 : vector<2x16x42xf32>
    %835 = arith.addf %830, %834 : vector<2x16x42xf32>
    %c0_695 = arith.constant 0 : index
    %c0_696 = arith.constant 0 : index
    %c14_697 = arith.constant 14 : index
    %c0_698 = arith.constant 0 : index
    %836 = vector.load %arg3[%c0_695, %c0_696, %c14_697, %c0_698] : memref<1x2x42x42xf32, #tpu.memory_space<vmem>>, vector<1x2x16x42xf32>
    %837 = vector.shape_cast %836 : vector<1x2x16x42xf32> to vector<2x16x42xf32>
    %cst_699 = arith.constant 0.0881723613 : f32
    %838 = vector.broadcast %cst_699 : f32 to vector<2x16x42xf32>
    %839 = arith.mulf %838, %837 : vector<2x16x42xf32>
    %840 = arith.addf %835, %839 : vector<2x16x42xf32>
    %c0_700 = arith.constant 0 : index
    %c0_701 = arith.constant 0 : index
    %c15_702 = arith.constant 15 : index
    %c0_703 = arith.constant 0 : index
    %841 = vector.load %arg3[%c0_700, %c0_701, %c15_702, %c0_703] : memref<1x2x42x42xf32, #tpu.memory_space<vmem>>, vector<1x2x16x42xf32>
    %842 = vector.shape_cast %841 : vector<1x2x16x42xf32> to vector<2x16x42xf32>
    %cst_704 = arith.constant 0.0816558822 : f32
    %843 = vector.broadcast %cst_704 : f32 to vector<2x16x42xf32>
    %844 = arith.mulf %843, %842 : vector<2x16x42xf32>
    %845 = arith.addf %840, %844 : vector<2x16x42xf32>
    %c0_705 = arith.constant 0 : index
    %c0_706 = arith.constant 0 : index
    %c16_707 = arith.constant 16 : index
    %c0_708 = arith.constant 0 : index
    %846 = vector.load %arg3[%c0_705, %c0_706, %c16_707, %c0_708] : memref<1x2x42x42xf32, #tpu.memory_space<vmem>>, vector<1x2x16x42xf32>
    %847 = vector.shape_cast %846 : vector<1x2x16x42xf32> to vector<2x16x42xf32>
    %cst_709 = arith.constant 0.0718476251 : f32
    %848 = vector.broadcast %cst_709 : f32 to vector<2x16x42xf32>
    %849 = arith.mulf %848, %847 : vector<2x16x42xf32>
    %850 = arith.addf %845, %849 : vector<2x16x42xf32>
    %c0_710 = arith.constant 0 : index
    %c0_711 = arith.constant 0 : index
    %c17_712 = arith.constant 17 : index
    %c0_713 = arith.constant 0 : index
    %851 = vector.load %arg3[%c0_710, %c0_711, %c17_712, %c0_713] : memref<1x2x42x42xf32, #tpu.memory_space<vmem>>, vector<1x2x16x42xf32>
    %852 = vector.shape_cast %851 : vector<1x2x16x42xf32> to vector<2x16x42xf32>
    %cst_714 = arith.constant 0.0600630492 : f32
    %853 = vector.broadcast %cst_714 : f32 to vector<2x16x42xf32>
    %854 = arith.mulf %853, %852 : vector<2x16x42xf32>
    %855 = arith.addf %850, %854 : vector<2x16x42xf32>
    %c0_715 = arith.constant 0 : index
    %c0_716 = arith.constant 0 : index
    %c18_717 = arith.constant 18 : index
    %c0_718 = arith.constant 0 : index
    %856 = vector.load %arg3[%c0_715, %c0_716, %c18_717, %c0_718] : memref<1x2x42x42xf32, #tpu.memory_space<vmem>>, vector<1x2x16x42xf32>
    %857 = vector.shape_cast %856 : vector<1x2x16x42xf32> to vector<2x16x42xf32>
    %cst_719 = arith.constant 0.0477059223 : f32
    %858 = vector.broadcast %cst_719 : f32 to vector<2x16x42xf32>
    %859 = arith.mulf %858, %857 : vector<2x16x42xf32>
    %860 = arith.addf %855, %859 : vector<2x16x42xf32>
    %c0_720 = arith.constant 0 : index
    %c0_721 = arith.constant 0 : index
    %c19_722 = arith.constant 19 : index
    %c0_723 = arith.constant 0 : index
    %861 = vector.load %arg3[%c0_720, %c0_721, %c19_722, %c0_723] : memref<1x2x42x42xf32, #tpu.memory_space<vmem>>, vector<1x2x16x42xf32>
    %862 = vector.shape_cast %861 : vector<1x2x16x42xf32> to vector<2x16x42xf32>
    %cst_724 = arith.constant 0.0360003896 : f32
    %863 = vector.broadcast %cst_724 : f32 to vector<2x16x42xf32>
    %864 = arith.mulf %863, %862 : vector<2x16x42xf32>
    %865 = arith.addf %860, %864 : vector<2x16x42xf32>
    %c0_725 = arith.constant 0 : index
    %c0_726 = arith.constant 0 : index
    %c20_727 = arith.constant 20 : index
    %c0_728 = arith.constant 0 : index
    %866 = vector.load %arg3[%c0_725, %c0_726, %c20_727, %c0_728] : memref<1x2x42x42xf32, #tpu.memory_space<vmem>>, vector<1x2x16x42xf32>
    %867 = vector.shape_cast %866 : vector<1x2x16x42xf32> to vector<2x16x42xf32>
    %cst_729 = arith.constant 0.0258114319 : f32
    %868 = vector.broadcast %cst_729 : f32 to vector<2x16x42xf32>
    %869 = arith.mulf %868, %867 : vector<2x16x42xf32>
    %870 = arith.addf %865, %869 : vector<2x16x42xf32>
    %c0_730 = arith.constant 0 : index
    %c0_731 = arith.constant 0 : index
    %c21_732 = arith.constant 21 : index
    %c0_733 = arith.constant 0 : index
    %871 = vector.load %arg3[%c0_730, %c0_731, %c21_732, %c0_733] : memref<1x2x42x42xf32, #tpu.memory_space<vmem>>, vector<1x2x16x42xf32>
    %872 = vector.shape_cast %871 : vector<1x2x16x42xf32> to vector<2x16x42xf32>
    %cst_734 = arith.constant 0.0175827574 : f32
    %873 = vector.broadcast %cst_734 : f32 to vector<2x16x42xf32>
    %874 = arith.mulf %873, %872 : vector<2x16x42xf32>
    %875 = arith.addf %870, %874 : vector<2x16x42xf32>
    %c0_735 = arith.constant 0 : index
    %c0_736 = arith.constant 0 : index
    %c22 = arith.constant 22 : index
    %c0_737 = arith.constant 0 : index
    %876 = vector.load %arg3[%c0_735, %c0_736, %c22, %c0_737] : memref<1x2x42x42xf32, #tpu.memory_space<vmem>>, vector<1x2x16x42xf32>
    %877 = vector.shape_cast %876 : vector<1x2x16x42xf32> to vector<2x16x42xf32>
    %cst_738 = arith.constant 0.0113797272 : f32
    %878 = vector.broadcast %cst_738 : f32 to vector<2x16x42xf32>
    %879 = arith.mulf %878, %877 : vector<2x16x42xf32>
    %880 = arith.addf %875, %879 : vector<2x16x42xf32>
    %c0_739 = arith.constant 0 : index
    %c0_740 = arith.constant 0 : index
    %c23 = arith.constant 23 : index
    %c0_741 = arith.constant 0 : index
    %881 = vector.load %arg3[%c0_739, %c0_740, %c23, %c0_741] : memref<1x2x42x42xf32, #tpu.memory_space<vmem>>, vector<1x2x16x42xf32>
    %882 = vector.shape_cast %881 : vector<1x2x16x42xf32> to vector<2x16x42xf32>
    %cst_742 = arith.constant 0.00699756108 : f32
    %883 = vector.broadcast %cst_742 : f32 to vector<2x16x42xf32>
    %884 = arith.mulf %883, %882 : vector<2x16x42xf32>
    %885 = arith.addf %880, %884 : vector<2x16x42xf32>
    %c0_743 = arith.constant 0 : index
    %c0_744 = arith.constant 0 : index
    %c24 = arith.constant 24 : index
    %c0_745 = arith.constant 0 : index
    %886 = vector.load %arg3[%c0_743, %c0_744, %c24, %c0_745] : memref<1x2x42x42xf32, #tpu.memory_space<vmem>>, vector<1x2x16x42xf32>
    %887 = vector.shape_cast %886 : vector<1x2x16x42xf32> to vector<2x16x42xf32>
    %cst_746 = arith.constant 0.00408819458 : f32
    %888 = vector.broadcast %cst_746 : f32 to vector<2x16x42xf32>
    %889 = arith.mulf %888, %887 : vector<2x16x42xf32>
    %890 = arith.addf %885, %889 : vector<2x16x42xf32>
    %c0_747 = arith.constant 0 : index
    %c0_748 = arith.constant 0 : index
    %c25 = arith.constant 25 : index
    %c0_749 = arith.constant 0 : index
    %891 = vector.load %arg3[%c0_747, %c0_748, %c25, %c0_749] : memref<1x2x42x42xf32, #tpu.memory_space<vmem>>, vector<1x2x16x42xf32>
    %892 = vector.shape_cast %891 : vector<1x2x16x42xf32> to vector<2x16x42xf32>
    %cst_750 = arith.constant 0.00226927106 : f32
    %893 = vector.broadcast %cst_750 : f32 to vector<2x16x42xf32>
    %894 = arith.mulf %893, %892 : vector<2x16x42xf32>
    %895 = arith.addf %890, %894 : vector<2x16x42xf32>
    %c0_751 = arith.constant 0 : index
    %c0_752 = arith.constant 0 : index
    %c26 = arith.constant 26 : index
    %c0_753 = arith.constant 0 : index
    %896 = vector.load %arg3[%c0_751, %c0_752, %c26, %c0_753] : memref<1x2x42x42xf32, #tpu.memory_space<vmem>>, vector<1x2x16x42xf32>
    %897 = vector.shape_cast %896 : vector<1x2x16x42xf32> to vector<2x16x42xf32>
    %cst_754 = arith.constant 0.00119677128 : f32
    %898 = vector.broadcast %cst_754 : f32 to vector<2x16x42xf32>
    %899 = arith.mulf %898, %897 : vector<2x16x42xf32>
    %900 = arith.addf %895, %899 : vector<2x16x42xf32>
    %c5_755 = arith.constant 5 : index
    %c0_756 = arith.constant 0 : index
    %c0_757 = arith.constant 0 : index
    %901 = vector.load %arg4[%c5_755, %c0_756, %c0_757] : memref<6x42x16xf32, #tpu.memory_space<vmem>>, vector<1x42x16xf32>
    %902 = vector.shape_cast %901 : vector<1x42x16xf32> to vector<42x16xf32>
    %903 = vector.extract_strided_slice %900 {offsets = [0, 0, 0], sizes = [1, 16, 42], strides = [1, 1, 1]} : vector<2x16x42xf32> to vector<1x16x42xf32>
    %904 = vector.shape_cast %903 : vector<1x16x42xf32> to vector<16x42xf32>
    %cst_758 = arith.constant dense<0.000000e+00> : vector<16x16xf32>
    %905 = tpu.matmul %904, %902, %cst_758 {dimension_numbers = #tpu.dot_dimension_numbers<[1], [0], [0], [1], [0, 0, 1, 1], [], []>} : vector<16x42xf32>, vector<42x16xf32>, vector<16x16xf32> -> vector<16x16xf32>
    %906 = vector.extract_strided_slice %900 {offsets = [1, 0, 0], sizes = [1, 16, 42], strides = [1, 1, 1]} : vector<2x16x42xf32> to vector<1x16x42xf32>
    %907 = vector.shape_cast %906 : vector<1x16x42xf32> to vector<16x42xf32>
    %cst_759 = arith.constant dense<0.000000e+00> : vector<16x16xf32>
    %908 = tpu.matmul %907, %902, %cst_759 {dimension_numbers = #tpu.dot_dimension_numbers<[1], [0], [0], [1], [0, 0, 1, 1], [], []>} : vector<16x42xf32>, vector<42x16xf32>, vector<16x16xf32> -> vector<16x16xf32>
    %909 = arith.subf %577, %905 : vector<16x16xf32>
    %910 = arith.subf %580, %908 : vector<16x16xf32>
    %c0_760 = arith.constant 0 : index
    %c8_761 = arith.constant 8 : index
    %c5_762 = arith.constant 5 : index
    %c0_763 = arith.constant 0 : index
    %911 = vector.load %arg2[%c0_760, %c8_761, %c5_762, %c0_763] : memref<1x12x42x42xf32, #tpu.memory_space<vmem>>, vector<1x2x16x42xf32>
    %912 = vector.shape_cast %911 : vector<1x2x16x42xf32> to vector<2x16x42xf32>
    %cst_764 = arith.constant 0.00194371527 : f32
    %913 = vector.broadcast %cst_764 : f32 to vector<2x16x42xf32>
    %914 = arith.mulf %913, %912 : vector<2x16x42xf32>
    %c0_765 = arith.constant 0 : index
    %c8_766 = arith.constant 8 : index
    %c6_767 = arith.constant 6 : index
    %c0_768 = arith.constant 0 : index
    %915 = vector.load %arg2[%c0_765, %c8_766, %c6_767, %c0_768] : memref<1x12x42x42xf32, #tpu.memory_space<vmem>>, vector<1x2x16x42xf32>
    %916 = vector.shape_cast %915 : vector<1x2x16x42xf32> to vector<2x16x42xf32>
    %cst_769 = arith.constant 0.00535662426 : f32
    %917 = vector.broadcast %cst_769 : f32 to vector<2x16x42xf32>
    %918 = arith.mulf %917, %916 : vector<2x16x42xf32>
    %919 = arith.addf %914, %918 : vector<2x16x42xf32>
    %c0_770 = arith.constant 0 : index
    %c8_771 = arith.constant 8 : index
    %c7_772 = arith.constant 7 : index
    %c0_773 = arith.constant 0 : index
    %920 = vector.load %arg2[%c0_770, %c8_771, %c7_772, %c0_773] : memref<1x12x42x42xf32, #tpu.memory_space<vmem>>, vector<1x2x16x42xf32>
    %921 = vector.shape_cast %920 : vector<1x2x16x42xf32> to vector<2x16x42xf32>
    %cst_774 = arith.constant 0.0128958076 : f32
    %922 = vector.broadcast %cst_774 : f32 to vector<2x16x42xf32>
    %923 = arith.mulf %922, %921 : vector<2x16x42xf32>
    %924 = arith.addf %919, %923 : vector<2x16x42xf32>
    %c0_775 = arith.constant 0 : index
    %c8_776 = arith.constant 8 : index
    %c8_777 = arith.constant 8 : index
    %c0_778 = arith.constant 0 : index
    %925 = vector.load %arg2[%c0_775, %c8_776, %c8_777, %c0_778] : memref<1x12x42x42xf32, #tpu.memory_space<vmem>>, vector<1x2x16x42xf32>
    %926 = vector.shape_cast %925 : vector<1x2x16x42xf32> to vector<2x16x42xf32>
    %cst_779 = arith.constant 0.0271209441 : f32
    %927 = vector.broadcast %cst_779 : f32 to vector<2x16x42xf32>
    %928 = arith.mulf %927, %926 : vector<2x16x42xf32>
    %929 = arith.addf %924, %928 : vector<2x16x42xf32>
    %c0_780 = arith.constant 0 : index
    %c8_781 = arith.constant 8 : index
    %c9_782 = arith.constant 9 : index
    %c0_783 = arith.constant 0 : index
    %930 = vector.load %arg2[%c0_780, %c8_781, %c9_782, %c0_783] : memref<1x12x42x42xf32, #tpu.memory_space<vmem>>, vector<1x2x16x42xf32>
    %931 = vector.shape_cast %930 : vector<1x2x16x42xf32> to vector<2x16x42xf32>
    %cst_784 = arith.constant 0.0498264469 : f32
    %932 = vector.broadcast %cst_784 : f32 to vector<2x16x42xf32>
    %933 = arith.mulf %932, %931 : vector<2x16x42xf32>
    %934 = arith.addf %929, %933 : vector<2x16x42xf32>
    %c0_785 = arith.constant 0 : index
    %c8_786 = arith.constant 8 : index
    %c10_787 = arith.constant 10 : index
    %c0_788 = arith.constant 0 : index
    %935 = vector.load %arg2[%c0_785, %c8_786, %c10_787, %c0_788] : memref<1x12x42x42xf32, #tpu.memory_space<vmem>>, vector<1x2x16x42xf32>
    %936 = vector.shape_cast %935 : vector<1x2x16x42xf32> to vector<2x16x42xf32>
    %cst_789 = arith.constant 0.0799675658 : f32
    %937 = vector.broadcast %cst_789 : f32 to vector<2x16x42xf32>
    %938 = arith.mulf %937, %936 : vector<2x16x42xf32>
    %939 = arith.addf %934, %938 : vector<2x16x42xf32>
    %c0_790 = arith.constant 0 : index
    %c8_791 = arith.constant 8 : index
    %c11_792 = arith.constant 11 : index
    %c0_793 = arith.constant 0 : index
    %940 = vector.load %arg2[%c0_790, %c8_791, %c11_792, %c0_793] : memref<1x12x42x42xf32, #tpu.memory_space<vmem>>, vector<1x2x16x42xf32>
    %941 = vector.shape_cast %940 : vector<1x2x16x42xf32> to vector<2x16x42xf32>
    %cst_794 = arith.constant 0.112115778 : f32
    %942 = vector.broadcast %cst_794 : f32 to vector<2x16x42xf32>
    %943 = arith.mulf %942, %941 : vector<2x16x42xf32>
    %944 = arith.addf %939, %943 : vector<2x16x42xf32>
    %c0_795 = arith.constant 0 : index
    %c8_796 = arith.constant 8 : index
    %c12_797 = arith.constant 12 : index
    %c0_798 = arith.constant 0 : index
    %945 = vector.load %arg2[%c0_795, %c8_796, %c12_797, %c0_798] : memref<1x12x42x42xf32, #tpu.memory_space<vmem>>, vector<1x2x16x42xf32>
    %946 = vector.shape_cast %945 : vector<1x2x16x42xf32> to vector<2x16x42xf32>
    %cst_799 = arith.constant 0.137315139 : f32
    %947 = vector.broadcast %cst_799 : f32 to vector<2x16x42xf32>
    %948 = arith.mulf %947, %946 : vector<2x16x42xf32>
    %949 = arith.addf %944, %948 : vector<2x16x42xf32>
    %c0_800 = arith.constant 0 : index
    %c8_801 = arith.constant 8 : index
    %c13_802 = arith.constant 13 : index
    %c0_803 = arith.constant 0 : index
    %950 = vector.load %arg2[%c0_800, %c8_801, %c13_802, %c0_803] : memref<1x12x42x42xf32, #tpu.memory_space<vmem>>, vector<1x2x16x42xf32>
    %951 = vector.shape_cast %950 : vector<1x2x16x42xf32> to vector<2x16x42xf32>
    %cst_804 = arith.constant 0.146915972 : f32
    %952 = vector.broadcast %cst_804 : f32 to vector<2x16x42xf32>
    %953 = arith.mulf %952, %951 : vector<2x16x42xf32>
    %954 = arith.addf %949, %953 : vector<2x16x42xf32>
    %c0_805 = arith.constant 0 : index
    %c8_806 = arith.constant 8 : index
    %c14_807 = arith.constant 14 : index
    %c0_808 = arith.constant 0 : index
    %955 = vector.load %arg2[%c0_805, %c8_806, %c14_807, %c0_808] : memref<1x12x42x42xf32, #tpu.memory_space<vmem>>, vector<1x2x16x42xf32>
    %956 = vector.shape_cast %955 : vector<1x2x16x42xf32> to vector<2x16x42xf32>
    %cst_809 = arith.constant 0.137315139 : f32
    %957 = vector.broadcast %cst_809 : f32 to vector<2x16x42xf32>
    %958 = arith.mulf %957, %956 : vector<2x16x42xf32>
    %959 = arith.addf %954, %958 : vector<2x16x42xf32>
    %c0_810 = arith.constant 0 : index
    %c8_811 = arith.constant 8 : index
    %c15_812 = arith.constant 15 : index
    %c0_813 = arith.constant 0 : index
    %960 = vector.load %arg2[%c0_810, %c8_811, %c15_812, %c0_813] : memref<1x12x42x42xf32, #tpu.memory_space<vmem>>, vector<1x2x16x42xf32>
    %961 = vector.shape_cast %960 : vector<1x2x16x42xf32> to vector<2x16x42xf32>
    %cst_814 = arith.constant 0.112115778 : f32
    %962 = vector.broadcast %cst_814 : f32 to vector<2x16x42xf32>
    %963 = arith.mulf %962, %961 : vector<2x16x42xf32>
    %964 = arith.addf %959, %963 : vector<2x16x42xf32>
    %c0_815 = arith.constant 0 : index
    %c8_816 = arith.constant 8 : index
    %c16_817 = arith.constant 16 : index
    %c0_818 = arith.constant 0 : index
    %965 = vector.load %arg2[%c0_815, %c8_816, %c16_817, %c0_818] : memref<1x12x42x42xf32, #tpu.memory_space<vmem>>, vector<1x2x16x42xf32>
    %966 = vector.shape_cast %965 : vector<1x2x16x42xf32> to vector<2x16x42xf32>
    %cst_819 = arith.constant 0.0799675658 : f32
    %967 = vector.broadcast %cst_819 : f32 to vector<2x16x42xf32>
    %968 = arith.mulf %967, %966 : vector<2x16x42xf32>
    %969 = arith.addf %964, %968 : vector<2x16x42xf32>
    %c0_820 = arith.constant 0 : index
    %c8_821 = arith.constant 8 : index
    %c17_822 = arith.constant 17 : index
    %c0_823 = arith.constant 0 : index
    %970 = vector.load %arg2[%c0_820, %c8_821, %c17_822, %c0_823] : memref<1x12x42x42xf32, #tpu.memory_space<vmem>>, vector<1x2x16x42xf32>
    %971 = vector.shape_cast %970 : vector<1x2x16x42xf32> to vector<2x16x42xf32>
    %cst_824 = arith.constant 0.0498264469 : f32
    %972 = vector.broadcast %cst_824 : f32 to vector<2x16x42xf32>
    %973 = arith.mulf %972, %971 : vector<2x16x42xf32>
    %974 = arith.addf %969, %973 : vector<2x16x42xf32>
    %c0_825 = arith.constant 0 : index
    %c8_826 = arith.constant 8 : index
    %c18_827 = arith.constant 18 : index
    %c0_828 = arith.constant 0 : index
    %975 = vector.load %arg2[%c0_825, %c8_826, %c18_827, %c0_828] : memref<1x12x42x42xf32, #tpu.memory_space<vmem>>, vector<1x2x16x42xf32>
    %976 = vector.shape_cast %975 : vector<1x2x16x42xf32> to vector<2x16x42xf32>
    %cst_829 = arith.constant 0.0271209441 : f32
    %977 = vector.broadcast %cst_829 : f32 to vector<2x16x42xf32>
    %978 = arith.mulf %977, %976 : vector<2x16x42xf32>
    %979 = arith.addf %974, %978 : vector<2x16x42xf32>
    %c0_830 = arith.constant 0 : index
    %c8_831 = arith.constant 8 : index
    %c19_832 = arith.constant 19 : index
    %c0_833 = arith.constant 0 : index
    %980 = vector.load %arg2[%c0_830, %c8_831, %c19_832, %c0_833] : memref<1x12x42x42xf32, #tpu.memory_space<vmem>>, vector<1x2x16x42xf32>
    %981 = vector.shape_cast %980 : vector<1x2x16x42xf32> to vector<2x16x42xf32>
    %cst_834 = arith.constant 0.0128958076 : f32
    %982 = vector.broadcast %cst_834 : f32 to vector<2x16x42xf32>
    %983 = arith.mulf %982, %981 : vector<2x16x42xf32>
    %984 = arith.addf %979, %983 : vector<2x16x42xf32>
    %c0_835 = arith.constant 0 : index
    %c8_836 = arith.constant 8 : index
    %c20_837 = arith.constant 20 : index
    %c0_838 = arith.constant 0 : index
    %985 = vector.load %arg2[%c0_835, %c8_836, %c20_837, %c0_838] : memref<1x12x42x42xf32, #tpu.memory_space<vmem>>, vector<1x2x16x42xf32>
    %986 = vector.shape_cast %985 : vector<1x2x16x42xf32> to vector<2x16x42xf32>
    %cst_839 = arith.constant 0.00535662426 : f32
    %987 = vector.broadcast %cst_839 : f32 to vector<2x16x42xf32>
    %988 = arith.mulf %987, %986 : vector<2x16x42xf32>
    %989 = arith.addf %984, %988 : vector<2x16x42xf32>
    %c0_840 = arith.constant 0 : index
    %c8_841 = arith.constant 8 : index
    %c21_842 = arith.constant 21 : index
    %c0_843 = arith.constant 0 : index
    %990 = vector.load %arg2[%c0_840, %c8_841, %c21_842, %c0_843] : memref<1x12x42x42xf32, #tpu.memory_space<vmem>>, vector<1x2x16x42xf32>
    %991 = vector.shape_cast %990 : vector<1x2x16x42xf32> to vector<2x16x42xf32>
    %cst_844 = arith.constant 0.00194371527 : f32
    %992 = vector.broadcast %cst_844 : f32 to vector<2x16x42xf32>
    %993 = arith.mulf %992, %991 : vector<2x16x42xf32>
    %994 = arith.addf %989, %993 : vector<2x16x42xf32>
    %c4_845 = arith.constant 4 : index
    %c0_846 = arith.constant 0 : index
    %c0_847 = arith.constant 0 : index
    %995 = vector.load %arg4[%c4_845, %c0_846, %c0_847] : memref<6x42x16xf32, #tpu.memory_space<vmem>>, vector<1x42x16xf32>
    %996 = vector.shape_cast %995 : vector<1x42x16xf32> to vector<42x16xf32>
    %997 = vector.extract_strided_slice %994 {offsets = [0, 0, 0], sizes = [1, 16, 42], strides = [1, 1, 1]} : vector<2x16x42xf32> to vector<1x16x42xf32>
    %998 = vector.shape_cast %997 : vector<1x16x42xf32> to vector<16x42xf32>
    %cst_848 = arith.constant dense<0.000000e+00> : vector<16x16xf32>
    %999 = tpu.matmul %998, %996, %cst_848 {dimension_numbers = #tpu.dot_dimension_numbers<[1], [0], [0], [1], [0, 0, 1, 1], [], []>} : vector<16x42xf32>, vector<42x16xf32>, vector<16x16xf32> -> vector<16x16xf32>
    %1000 = vector.extract_strided_slice %994 {offsets = [1, 0, 0], sizes = [1, 16, 42], strides = [1, 1, 1]} : vector<2x16x42xf32> to vector<1x16x42xf32>
    %1001 = vector.shape_cast %1000 : vector<1x16x42xf32> to vector<16x42xf32>
    %cst_849 = arith.constant dense<0.000000e+00> : vector<16x16xf32>
    %1002 = tpu.matmul %1001, %996, %cst_849 {dimension_numbers = #tpu.dot_dimension_numbers<[1], [0], [0], [1], [0, 0, 1, 1], [], []>} : vector<16x42xf32>, vector<42x16xf32>, vector<16x16xf32> -> vector<16x16xf32>
    %c0_850 = arith.constant 0 : index
    %c8_851 = arith.constant 8 : index
    %c0_852 = arith.constant 0 : index
    %c0_853 = arith.constant 0 : index
    %1003 = vector.load %arg2[%c0_850, %c8_851, %c0_852, %c0_853] : memref<1x12x42x42xf32, #tpu.memory_space<vmem>>, vector<1x2x16x42xf32>
    %1004 = vector.shape_cast %1003 : vector<1x2x16x42xf32> to vector<2x16x42xf32>
    %cst_854 = arith.constant 0.00119677128 : f32
    %1005 = vector.broadcast %cst_854 : f32 to vector<2x16x42xf32>
    %1006 = arith.mulf %1005, %1004 : vector<2x16x42xf32>
    %c0_855 = arith.constant 0 : index
    %c8_856 = arith.constant 8 : index
    %c1_857 = arith.constant 1 : index
    %c0_858 = arith.constant 0 : index
    %1007 = vector.load %arg2[%c0_855, %c8_856, %c1_857, %c0_858] : memref<1x12x42x42xf32, #tpu.memory_space<vmem>>, vector<1x2x16x42xf32>
    %1008 = vector.shape_cast %1007 : vector<1x2x16x42xf32> to vector<2x16x42xf32>
    %cst_859 = arith.constant 0.00226927106 : f32
    %1009 = vector.broadcast %cst_859 : f32 to vector<2x16x42xf32>
    %1010 = arith.mulf %1009, %1008 : vector<2x16x42xf32>
    %1011 = arith.addf %1006, %1010 : vector<2x16x42xf32>
    %c0_860 = arith.constant 0 : index
    %c8_861 = arith.constant 8 : index
    %c2_862 = arith.constant 2 : index
    %c0_863 = arith.constant 0 : index
    %1012 = vector.load %arg2[%c0_860, %c8_861, %c2_862, %c0_863] : memref<1x12x42x42xf32, #tpu.memory_space<vmem>>, vector<1x2x16x42xf32>
    %1013 = vector.shape_cast %1012 : vector<1x2x16x42xf32> to vector<2x16x42xf32>
    %cst_864 = arith.constant 0.00408819458 : f32
    %1014 = vector.broadcast %cst_864 : f32 to vector<2x16x42xf32>
    %1015 = arith.mulf %1014, %1013 : vector<2x16x42xf32>
    %1016 = arith.addf %1011, %1015 : vector<2x16x42xf32>
    %c0_865 = arith.constant 0 : index
    %c8_866 = arith.constant 8 : index
    %c3_867 = arith.constant 3 : index
    %c0_868 = arith.constant 0 : index
    %1017 = vector.load %arg2[%c0_865, %c8_866, %c3_867, %c0_868] : memref<1x12x42x42xf32, #tpu.memory_space<vmem>>, vector<1x2x16x42xf32>
    %1018 = vector.shape_cast %1017 : vector<1x2x16x42xf32> to vector<2x16x42xf32>
    %cst_869 = arith.constant 0.00699756108 : f32
    %1019 = vector.broadcast %cst_869 : f32 to vector<2x16x42xf32>
    %1020 = arith.mulf %1019, %1018 : vector<2x16x42xf32>
    %1021 = arith.addf %1016, %1020 : vector<2x16x42xf32>
    %c0_870 = arith.constant 0 : index
    %c8_871 = arith.constant 8 : index
    %c4_872 = arith.constant 4 : index
    %c0_873 = arith.constant 0 : index
    %1022 = vector.load %arg2[%c0_870, %c8_871, %c4_872, %c0_873] : memref<1x12x42x42xf32, #tpu.memory_space<vmem>>, vector<1x2x16x42xf32>
    %1023 = vector.shape_cast %1022 : vector<1x2x16x42xf32> to vector<2x16x42xf32>
    %cst_874 = arith.constant 0.0113797272 : f32
    %1024 = vector.broadcast %cst_874 : f32 to vector<2x16x42xf32>
    %1025 = arith.mulf %1024, %1023 : vector<2x16x42xf32>
    %1026 = arith.addf %1021, %1025 : vector<2x16x42xf32>
    %c0_875 = arith.constant 0 : index
    %c8_876 = arith.constant 8 : index
    %c5_877 = arith.constant 5 : index
    %c0_878 = arith.constant 0 : index
    %1027 = vector.load %arg2[%c0_875, %c8_876, %c5_877, %c0_878] : memref<1x12x42x42xf32, #tpu.memory_space<vmem>>, vector<1x2x16x42xf32>
    %1028 = vector.shape_cast %1027 : vector<1x2x16x42xf32> to vector<2x16x42xf32>
    %cst_879 = arith.constant 0.0175827574 : f32
    %1029 = vector.broadcast %cst_879 : f32 to vector<2x16x42xf32>
    %1030 = arith.mulf %1029, %1028 : vector<2x16x42xf32>
    %1031 = arith.addf %1026, %1030 : vector<2x16x42xf32>
    %c0_880 = arith.constant 0 : index
    %c8_881 = arith.constant 8 : index
    %c6_882 = arith.constant 6 : index
    %c0_883 = arith.constant 0 : index
    %1032 = vector.load %arg2[%c0_880, %c8_881, %c6_882, %c0_883] : memref<1x12x42x42xf32, #tpu.memory_space<vmem>>, vector<1x2x16x42xf32>
    %1033 = vector.shape_cast %1032 : vector<1x2x16x42xf32> to vector<2x16x42xf32>
    %cst_884 = arith.constant 0.0258114319 : f32
    %1034 = vector.broadcast %cst_884 : f32 to vector<2x16x42xf32>
    %1035 = arith.mulf %1034, %1033 : vector<2x16x42xf32>
    %1036 = arith.addf %1031, %1035 : vector<2x16x42xf32>
    %c0_885 = arith.constant 0 : index
    %c8_886 = arith.constant 8 : index
    %c7_887 = arith.constant 7 : index
    %c0_888 = arith.constant 0 : index
    %1037 = vector.load %arg2[%c0_885, %c8_886, %c7_887, %c0_888] : memref<1x12x42x42xf32, #tpu.memory_space<vmem>>, vector<1x2x16x42xf32>
    %1038 = vector.shape_cast %1037 : vector<1x2x16x42xf32> to vector<2x16x42xf32>
    %cst_889 = arith.constant 0.0360003896 : f32
    %1039 = vector.broadcast %cst_889 : f32 to vector<2x16x42xf32>
    %1040 = arith.mulf %1039, %1038 : vector<2x16x42xf32>
    %1041 = arith.addf %1036, %1040 : vector<2x16x42xf32>
    %c0_890 = arith.constant 0 : index
    %c8_891 = arith.constant 8 : index
    %c8_892 = arith.constant 8 : index
    %c0_893 = arith.constant 0 : index
    %1042 = vector.load %arg2[%c0_890, %c8_891, %c8_892, %c0_893] : memref<1x12x42x42xf32, #tpu.memory_space<vmem>>, vector<1x2x16x42xf32>
    %1043 = vector.shape_cast %1042 : vector<1x2x16x42xf32> to vector<2x16x42xf32>
    %cst_894 = arith.constant 0.0477059223 : f32
    %1044 = vector.broadcast %cst_894 : f32 to vector<2x16x42xf32>
    %1045 = arith.mulf %1044, %1043 : vector<2x16x42xf32>
    %1046 = arith.addf %1041, %1045 : vector<2x16x42xf32>
    %c0_895 = arith.constant 0 : index
    %c8_896 = arith.constant 8 : index
    %c9_897 = arith.constant 9 : index
    %c0_898 = arith.constant 0 : index
    %1047 = vector.load %arg2[%c0_895, %c8_896, %c9_897, %c0_898] : memref<1x12x42x42xf32, #tpu.memory_space<vmem>>, vector<1x2x16x42xf32>
    %1048 = vector.shape_cast %1047 : vector<1x2x16x42xf32> to vector<2x16x42xf32>
    %cst_899 = arith.constant 0.0600630492 : f32
    %1049 = vector.broadcast %cst_899 : f32 to vector<2x16x42xf32>
    %1050 = arith.mulf %1049, %1048 : vector<2x16x42xf32>
    %1051 = arith.addf %1046, %1050 : vector<2x16x42xf32>
    %c0_900 = arith.constant 0 : index
    %c8_901 = arith.constant 8 : index
    %c10_902 = arith.constant 10 : index
    %c0_903 = arith.constant 0 : index
    %1052 = vector.load %arg2[%c0_900, %c8_901, %c10_902, %c0_903] : memref<1x12x42x42xf32, #tpu.memory_space<vmem>>, vector<1x2x16x42xf32>
    %1053 = vector.shape_cast %1052 : vector<1x2x16x42xf32> to vector<2x16x42xf32>
    %cst_904 = arith.constant 0.0718476251 : f32
    %1054 = vector.broadcast %cst_904 : f32 to vector<2x16x42xf32>
    %1055 = arith.mulf %1054, %1053 : vector<2x16x42xf32>
    %1056 = arith.addf %1051, %1055 : vector<2x16x42xf32>
    %c0_905 = arith.constant 0 : index
    %c8_906 = arith.constant 8 : index
    %c11_907 = arith.constant 11 : index
    %c0_908 = arith.constant 0 : index
    %1057 = vector.load %arg2[%c0_905, %c8_906, %c11_907, %c0_908] : memref<1x12x42x42xf32, #tpu.memory_space<vmem>>, vector<1x2x16x42xf32>
    %1058 = vector.shape_cast %1057 : vector<1x2x16x42xf32> to vector<2x16x42xf32>
    %cst_909 = arith.constant 0.0816558822 : f32
    %1059 = vector.broadcast %cst_909 : f32 to vector<2x16x42xf32>
    %1060 = arith.mulf %1059, %1058 : vector<2x16x42xf32>
    %1061 = arith.addf %1056, %1060 : vector<2x16x42xf32>
    %c0_910 = arith.constant 0 : index
    %c8_911 = arith.constant 8 : index
    %c12_912 = arith.constant 12 : index
    %c0_913 = arith.constant 0 : index
    %1062 = vector.load %arg2[%c0_910, %c8_911, %c12_912, %c0_913] : memref<1x12x42x42xf32, #tpu.memory_space<vmem>>, vector<1x2x16x42xf32>
    %1063 = vector.shape_cast %1062 : vector<1x2x16x42xf32> to vector<2x16x42xf32>
    %cst_914 = arith.constant 0.0881723613 : f32
    %1064 = vector.broadcast %cst_914 : f32 to vector<2x16x42xf32>
    %1065 = arith.mulf %1064, %1063 : vector<2x16x42xf32>
    %1066 = arith.addf %1061, %1065 : vector<2x16x42xf32>
    %c0_915 = arith.constant 0 : index
    %c8_916 = arith.constant 8 : index
    %c13_917 = arith.constant 13 : index
    %c0_918 = arith.constant 0 : index
    %1067 = vector.load %arg2[%c0_915, %c8_916, %c13_917, %c0_918] : memref<1x12x42x42xf32, #tpu.memory_space<vmem>>, vector<1x2x16x42xf32>
    %1068 = vector.shape_cast %1067 : vector<1x2x16x42xf32> to vector<2x16x42xf32>
    %cst_919 = arith.constant 0.09045811 : f32
    %1069 = vector.broadcast %cst_919 : f32 to vector<2x16x42xf32>
    %1070 = arith.mulf %1069, %1068 : vector<2x16x42xf32>
    %1071 = arith.addf %1066, %1070 : vector<2x16x42xf32>
    %c0_920 = arith.constant 0 : index
    %c8_921 = arith.constant 8 : index
    %c14_922 = arith.constant 14 : index
    %c0_923 = arith.constant 0 : index
    %1072 = vector.load %arg2[%c0_920, %c8_921, %c14_922, %c0_923] : memref<1x12x42x42xf32, #tpu.memory_space<vmem>>, vector<1x2x16x42xf32>
    %1073 = vector.shape_cast %1072 : vector<1x2x16x42xf32> to vector<2x16x42xf32>
    %cst_924 = arith.constant 0.0881723613 : f32
    %1074 = vector.broadcast %cst_924 : f32 to vector<2x16x42xf32>
    %1075 = arith.mulf %1074, %1073 : vector<2x16x42xf32>
    %1076 = arith.addf %1071, %1075 : vector<2x16x42xf32>
    %c0_925 = arith.constant 0 : index
    %c8_926 = arith.constant 8 : index
    %c15_927 = arith.constant 15 : index
    %c0_928 = arith.constant 0 : index
    %1077 = vector.load %arg2[%c0_925, %c8_926, %c15_927, %c0_928] : memref<1x12x42x42xf32, #tpu.memory_space<vmem>>, vector<1x2x16x42xf32>
    %1078 = vector.shape_cast %1077 : vector<1x2x16x42xf32> to vector<2x16x42xf32>
    %cst_929 = arith.constant 0.0816558822 : f32
    %1079 = vector.broadcast %cst_929 : f32 to vector<2x16x42xf32>
    %1080 = arith.mulf %1079, %1078 : vector<2x16x42xf32>
    %1081 = arith.addf %1076, %1080 : vector<2x16x42xf32>
    %c0_930 = arith.constant 0 : index
    %c8_931 = arith.constant 8 : index
    %c16_932 = arith.constant 16 : index
    %c0_933 = arith.constant 0 : index
    %1082 = vector.load %arg2[%c0_930, %c8_931, %c16_932, %c0_933] : memref<1x12x42x42xf32, #tpu.memory_space<vmem>>, vector<1x2x16x42xf32>
    %1083 = vector.shape_cast %1082 : vector<1x2x16x42xf32> to vector<2x16x42xf32>
    %cst_934 = arith.constant 0.0718476251 : f32
    %1084 = vector.broadcast %cst_934 : f32 to vector<2x16x42xf32>
    %1085 = arith.mulf %1084, %1083 : vector<2x16x42xf32>
    %1086 = arith.addf %1081, %1085 : vector<2x16x42xf32>
    %c0_935 = arith.constant 0 : index
    %c8_936 = arith.constant 8 : index
    %c17_937 = arith.constant 17 : index
    %c0_938 = arith.constant 0 : index
    %1087 = vector.load %arg2[%c0_935, %c8_936, %c17_937, %c0_938] : memref<1x12x42x42xf32, #tpu.memory_space<vmem>>, vector<1x2x16x42xf32>
    %1088 = vector.shape_cast %1087 : vector<1x2x16x42xf32> to vector<2x16x42xf32>
    %cst_939 = arith.constant 0.0600630492 : f32
    %1089 = vector.broadcast %cst_939 : f32 to vector<2x16x42xf32>
    %1090 = arith.mulf %1089, %1088 : vector<2x16x42xf32>
    %1091 = arith.addf %1086, %1090 : vector<2x16x42xf32>
    %c0_940 = arith.constant 0 : index
    %c8_941 = arith.constant 8 : index
    %c18_942 = arith.constant 18 : index
    %c0_943 = arith.constant 0 : index
    %1092 = vector.load %arg2[%c0_940, %c8_941, %c18_942, %c0_943] : memref<1x12x42x42xf32, #tpu.memory_space<vmem>>, vector<1x2x16x42xf32>
    %1093 = vector.shape_cast %1092 : vector<1x2x16x42xf32> to vector<2x16x42xf32>
    %cst_944 = arith.constant 0.0477059223 : f32
    %1094 = vector.broadcast %cst_944 : f32 to vector<2x16x42xf32>
    %1095 = arith.mulf %1094, %1093 : vector<2x16x42xf32>
    %1096 = arith.addf %1091, %1095 : vector<2x16x42xf32>
    %c0_945 = arith.constant 0 : index
    %c8_946 = arith.constant 8 : index
    %c19_947 = arith.constant 19 : index
    %c0_948 = arith.constant 0 : index
    %1097 = vector.load %arg2[%c0_945, %c8_946, %c19_947, %c0_948] : memref<1x12x42x42xf32, #tpu.memory_space<vmem>>, vector<1x2x16x42xf32>
    %1098 = vector.shape_cast %1097 : vector<1x2x16x42xf32> to vector<2x16x42xf32>
    %cst_949 = arith.constant 0.0360003896 : f32
    %1099 = vector.broadcast %cst_949 : f32 to vector<2x16x42xf32>
    %1100 = arith.mulf %1099, %1098 : vector<2x16x42xf32>
    %1101 = arith.addf %1096, %1100 : vector<2x16x42xf32>
    %c0_950 = arith.constant 0 : index
    %c8_951 = arith.constant 8 : index
    %c20_952 = arith.constant 20 : index
    %c0_953 = arith.constant 0 : index
    %1102 = vector.load %arg2[%c0_950, %c8_951, %c20_952, %c0_953] : memref<1x12x42x42xf32, #tpu.memory_space<vmem>>, vector<1x2x16x42xf32>
    %1103 = vector.shape_cast %1102 : vector<1x2x16x42xf32> to vector<2x16x42xf32>
    %cst_954 = arith.constant 0.0258114319 : f32
    %1104 = vector.broadcast %cst_954 : f32 to vector<2x16x42xf32>
    %1105 = arith.mulf %1104, %1103 : vector<2x16x42xf32>
    %1106 = arith.addf %1101, %1105 : vector<2x16x42xf32>
    %c0_955 = arith.constant 0 : index
    %c8_956 = arith.constant 8 : index
    %c21_957 = arith.constant 21 : index
    %c0_958 = arith.constant 0 : index
    %1107 = vector.load %arg2[%c0_955, %c8_956, %c21_957, %c0_958] : memref<1x12x42x42xf32, #tpu.memory_space<vmem>>, vector<1x2x16x42xf32>
    %1108 = vector.shape_cast %1107 : vector<1x2x16x42xf32> to vector<2x16x42xf32>
    %cst_959 = arith.constant 0.0175827574 : f32
    %1109 = vector.broadcast %cst_959 : f32 to vector<2x16x42xf32>
    %1110 = arith.mulf %1109, %1108 : vector<2x16x42xf32>
    %1111 = arith.addf %1106, %1110 : vector<2x16x42xf32>
    %c0_960 = arith.constant 0 : index
    %c8_961 = arith.constant 8 : index
    %c22_962 = arith.constant 22 : index
    %c0_963 = arith.constant 0 : index
    %1112 = vector.load %arg2[%c0_960, %c8_961, %c22_962, %c0_963] : memref<1x12x42x42xf32, #tpu.memory_space<vmem>>, vector<1x2x16x42xf32>
    %1113 = vector.shape_cast %1112 : vector<1x2x16x42xf32> to vector<2x16x42xf32>
    %cst_964 = arith.constant 0.0113797272 : f32
    %1114 = vector.broadcast %cst_964 : f32 to vector<2x16x42xf32>
    %1115 = arith.mulf %1114, %1113 : vector<2x16x42xf32>
    %1116 = arith.addf %1111, %1115 : vector<2x16x42xf32>
    %c0_965 = arith.constant 0 : index
    %c8_966 = arith.constant 8 : index
    %c23_967 = arith.constant 23 : index
    %c0_968 = arith.constant 0 : index
    %1117 = vector.load %arg2[%c0_965, %c8_966, %c23_967, %c0_968] : memref<1x12x42x42xf32, #tpu.memory_space<vmem>>, vector<1x2x16x42xf32>
    %1118 = vector.shape_cast %1117 : vector<1x2x16x42xf32> to vector<2x16x42xf32>
    %cst_969 = arith.constant 0.00699756108 : f32
    %1119 = vector.broadcast %cst_969 : f32 to vector<2x16x42xf32>
    %1120 = arith.mulf %1119, %1118 : vector<2x16x42xf32>
    %1121 = arith.addf %1116, %1120 : vector<2x16x42xf32>
    %c0_970 = arith.constant 0 : index
    %c8_971 = arith.constant 8 : index
    %c24_972 = arith.constant 24 : index
    %c0_973 = arith.constant 0 : index
    %1122 = vector.load %arg2[%c0_970, %c8_971, %c24_972, %c0_973] : memref<1x12x42x42xf32, #tpu.memory_space<vmem>>, vector<1x2x16x42xf32>
    %1123 = vector.shape_cast %1122 : vector<1x2x16x42xf32> to vector<2x16x42xf32>
    %cst_974 = arith.constant 0.00408819458 : f32
    %1124 = vector.broadcast %cst_974 : f32 to vector<2x16x42xf32>
    %1125 = arith.mulf %1124, %1123 : vector<2x16x42xf32>
    %1126 = arith.addf %1121, %1125 : vector<2x16x42xf32>
    %c0_975 = arith.constant 0 : index
    %c8_976 = arith.constant 8 : index
    %c25_977 = arith.constant 25 : index
    %c0_978 = arith.constant 0 : index
    %1127 = vector.load %arg2[%c0_975, %c8_976, %c25_977, %c0_978] : memref<1x12x42x42xf32, #tpu.memory_space<vmem>>, vector<1x2x16x42xf32>
    %1128 = vector.shape_cast %1127 : vector<1x2x16x42xf32> to vector<2x16x42xf32>
    %cst_979 = arith.constant 0.00226927106 : f32
    %1129 = vector.broadcast %cst_979 : f32 to vector<2x16x42xf32>
    %1130 = arith.mulf %1129, %1128 : vector<2x16x42xf32>
    %1131 = arith.addf %1126, %1130 : vector<2x16x42xf32>
    %c0_980 = arith.constant 0 : index
    %c8_981 = arith.constant 8 : index
    %c26_982 = arith.constant 26 : index
    %c0_983 = arith.constant 0 : index
    %1132 = vector.load %arg2[%c0_980, %c8_981, %c26_982, %c0_983] : memref<1x12x42x42xf32, #tpu.memory_space<vmem>>, vector<1x2x16x42xf32>
    %1133 = vector.shape_cast %1132 : vector<1x2x16x42xf32> to vector<2x16x42xf32>
    %cst_984 = arith.constant 0.00119677128 : f32
    %1134 = vector.broadcast %cst_984 : f32 to vector<2x16x42xf32>
    %1135 = arith.mulf %1134, %1133 : vector<2x16x42xf32>
    %1136 = arith.addf %1131, %1135 : vector<2x16x42xf32>
    %c5_985 = arith.constant 5 : index
    %c0_986 = arith.constant 0 : index
    %c0_987 = arith.constant 0 : index
    %1137 = vector.load %arg4[%c5_985, %c0_986, %c0_987] : memref<6x42x16xf32, #tpu.memory_space<vmem>>, vector<1x42x16xf32>
    %1138 = vector.shape_cast %1137 : vector<1x42x16xf32> to vector<42x16xf32>
    %1139 = vector.extract_strided_slice %1136 {offsets = [0, 0, 0], sizes = [1, 16, 42], strides = [1, 1, 1]} : vector<2x16x42xf32> to vector<1x16x42xf32>
    %1140 = vector.shape_cast %1139 : vector<1x16x42xf32> to vector<16x42xf32>
    %cst_988 = arith.constant dense<0.000000e+00> : vector<16x16xf32>
    %1141 = tpu.matmul %1140, %1138, %cst_988 {dimension_numbers = #tpu.dot_dimension_numbers<[1], [0], [0], [1], [0, 0, 1, 1], [], []>} : vector<16x42xf32>, vector<42x16xf32>, vector<16x16xf32> -> vector<16x16xf32>
    %1142 = vector.extract_strided_slice %1136 {offsets = [1, 0, 0], sizes = [1, 16, 42], strides = [1, 1, 1]} : vector<2x16x42xf32> to vector<1x16x42xf32>
    %1143 = vector.shape_cast %1142 : vector<1x16x42xf32> to vector<16x42xf32>
    %cst_989 = arith.constant dense<0.000000e+00> : vector<16x16xf32>
    %1144 = tpu.matmul %1143, %1138, %cst_989 {dimension_numbers = #tpu.dot_dimension_numbers<[1], [0], [0], [1], [0, 0, 1, 1], [], []>} : vector<16x42xf32>, vector<42x16xf32>, vector<16x16xf32> -> vector<16x16xf32>
    %1145 = arith.subf %999, %1141 : vector<16x16xf32>
    %1146 = arith.subf %1002, %1144 : vector<16x16xf32>
    %1147 = arith.subf %1145, %909 : vector<16x16xf32>
    %1148 = arith.mulf %1147, %1147 : vector<16x16xf32>
    %1149 = vector.shape_cast %1148 : vector<16x16xf32> to vector<1x16x16xf32>
    %cst_990 = arith.constant dense<0.000000e+00> : vector<1xf32>
    %1150 = vector.multi_reduction <add>, %1149, %cst_990 [1, 2] : vector<1x16x16xf32> to vector<1xf32>
    %1151 = vector.shape_cast %1150 : vector<1xf32> to vector<1x1x1xf32>
    %1152 = vector.extract %1151[0, 0, 0] : f32 from vector<1x1x1xf32>
    %cst_991 = arith.constant 0.000000e+00 : f32
    %1153 = arith.addf %cst_991, %1152 : f32
    %1154 = arith.subf %1146, %910 : vector<16x16xf32>
    %1155 = arith.mulf %1154, %1154 : vector<16x16xf32>
    %1156 = vector.shape_cast %1155 : vector<16x16xf32> to vector<1x16x16xf32>
    %cst_992 = arith.constant dense<0.000000e+00> : vector<1xf32>
    %1157 = vector.multi_reduction <add>, %1156, %cst_992 [1, 2] : vector<1x16x16xf32> to vector<1xf32>
    %1158 = vector.shape_cast %1157 : vector<1xf32> to vector<1x1x1xf32>
    %1159 = vector.extract %1158[0, 0, 0] : f32 from vector<1x1x1xf32>
    %1160 = arith.addf %1153, %1159 : f32
    %cst_993 = arith.constant 0.001953125 : f32
    %1161 = arith.mulf %1160, %cst_993 : f32
    %c4_i32 = arith.constant 4 : i32
    %1162 = vector.broadcast %c4_i32 : i32 to vector<1x6xi32>
    %1163 = arith.cmpi eq, %0, %1162 : vector<1x6xi32>
    %cst_994 = arith.constant 0.000000e+00 : f32
    %1164 = vector.broadcast %1161 : f32 to vector<1x6xf32>
    %1165 = vector.broadcast %cst_994 : f32 to vector<1x6xf32>
    %1166 = arith.select %1163, %1164, %1165 : vector<1x6xi1>, vector<1x6xf32>
    %1167 = arith.addf %759, %1166 : vector<1x6xf32>
    %c0_995 = arith.constant 0 : index
    %c4_996 = arith.constant 4 : index
    %1168 = memref.load %arg1[%c0_995, %c4_996] : memref<2x6xf32, #tpu.memory_space<smem>>
    %c1_997 = arith.constant 1 : index
    %c4_998 = arith.constant 4 : index
    %1169 = memref.load %arg1[%c1_997, %c4_998] : memref<2x6xf32, #tpu.memory_space<smem>>
    %1170 = arith.mulf %1161, %1169 : f32
    %1171 = vector.broadcast %1170 : f32 to vector<1x1xf32>
    %1172 = arith.addf %766, %1171 : vector<1x1xf32>
    %1173 = vector.broadcast %1168 : f32 to vector<1x1xf32>
    %1174 = arith.addf %1172, %1173 : vector<1x1xf32>
    %c0_999 = arith.constant 0 : index
    %c10_1000 = arith.constant 10 : index
    %c0_1001 = arith.constant 0 : index
    %c0_1002 = arith.constant 0 : index
    %1175 = vector.load %arg2[%c0_999, %c10_1000, %c0_1001, %c0_1002] : memref<1x12x42x42xf32, #tpu.memory_space<vmem>>, vector<1x2x16x42xf32>
    %1176 = vector.shape_cast %1175 : vector<1x2x16x42xf32> to vector<2x16x42xf32>
    %cst_1003 = arith.constant 0.00119677128 : f32
    %1177 = vector.broadcast %cst_1003 : f32 to vector<2x16x42xf32>
    %1178 = arith.mulf %1177, %1176 : vector<2x16x42xf32>
    %c0_1004 = arith.constant 0 : index
    %c10_1005 = arith.constant 10 : index
    %c1_1006 = arith.constant 1 : index
    %c0_1007 = arith.constant 0 : index
    %1179 = vector.load %arg2[%c0_1004, %c10_1005, %c1_1006, %c0_1007] : memref<1x12x42x42xf32, #tpu.memory_space<vmem>>, vector<1x2x16x42xf32>
    %1180 = vector.shape_cast %1179 : vector<1x2x16x42xf32> to vector<2x16x42xf32>
    %cst_1008 = arith.constant 0.00226927106 : f32
    %1181 = vector.broadcast %cst_1008 : f32 to vector<2x16x42xf32>
    %1182 = arith.mulf %1181, %1180 : vector<2x16x42xf32>
    %1183 = arith.addf %1178, %1182 : vector<2x16x42xf32>
    %c0_1009 = arith.constant 0 : index
    %c10_1010 = arith.constant 10 : index
    %c2_1011 = arith.constant 2 : index
    %c0_1012 = arith.constant 0 : index
    %1184 = vector.load %arg2[%c0_1009, %c10_1010, %c2_1011, %c0_1012] : memref<1x12x42x42xf32, #tpu.memory_space<vmem>>, vector<1x2x16x42xf32>
    %1185 = vector.shape_cast %1184 : vector<1x2x16x42xf32> to vector<2x16x42xf32>
    %cst_1013 = arith.constant 0.00408819458 : f32
    %1186 = vector.broadcast %cst_1013 : f32 to vector<2x16x42xf32>
    %1187 = arith.mulf %1186, %1185 : vector<2x16x42xf32>
    %1188 = arith.addf %1183, %1187 : vector<2x16x42xf32>
    %c0_1014 = arith.constant 0 : index
    %c10_1015 = arith.constant 10 : index
    %c3_1016 = arith.constant 3 : index
    %c0_1017 = arith.constant 0 : index
    %1189 = vector.load %arg2[%c0_1014, %c10_1015, %c3_1016, %c0_1017] : memref<1x12x42x42xf32, #tpu.memory_space<vmem>>, vector<1x2x16x42xf32>
    %1190 = vector.shape_cast %1189 : vector<1x2x16x42xf32> to vector<2x16x42xf32>
    %cst_1018 = arith.constant 0.00699756108 : f32
    %1191 = vector.broadcast %cst_1018 : f32 to vector<2x16x42xf32>
    %1192 = arith.mulf %1191, %1190 : vector<2x16x42xf32>
    %1193 = arith.addf %1188, %1192 : vector<2x16x42xf32>
    %c0_1019 = arith.constant 0 : index
    %c10_1020 = arith.constant 10 : index
    %c4_1021 = arith.constant 4 : index
    %c0_1022 = arith.constant 0 : index
    %1194 = vector.load %arg2[%c0_1019, %c10_1020, %c4_1021, %c0_1022] : memref<1x12x42x42xf32, #tpu.memory_space<vmem>>, vector<1x2x16x42xf32>
    %1195 = vector.shape_cast %1194 : vector<1x2x16x42xf32> to vector<2x16x42xf32>
    %cst_1023 = arith.constant 0.0113797272 : f32
    %1196 = vector.broadcast %cst_1023 : f32 to vector<2x16x42xf32>
    %1197 = arith.mulf %1196, %1195 : vector<2x16x42xf32>
    %1198 = arith.addf %1193, %1197 : vector<2x16x42xf32>
    %c0_1024 = arith.constant 0 : index
    %c10_1025 = arith.constant 10 : index
    %c5_1026 = arith.constant 5 : index
    %c0_1027 = arith.constant 0 : index
    %1199 = vector.load %arg2[%c0_1024, %c10_1025, %c5_1026, %c0_1027] : memref<1x12x42x42xf32, #tpu.memory_space<vmem>>, vector<1x2x16x42xf32>
    %1200 = vector.shape_cast %1199 : vector<1x2x16x42xf32> to vector<2x16x42xf32>
    %cst_1028 = arith.constant 0.0175827574 : f32
    %1201 = vector.broadcast %cst_1028 : f32 to vector<2x16x42xf32>
    %1202 = arith.mulf %1201, %1200 : vector<2x16x42xf32>
    %1203 = arith.addf %1198, %1202 : vector<2x16x42xf32>
    %c0_1029 = arith.constant 0 : index
    %c10_1030 = arith.constant 10 : index
    %c6_1031 = arith.constant 6 : index
    %c0_1032 = arith.constant 0 : index
    %1204 = vector.load %arg2[%c0_1029, %c10_1030, %c6_1031, %c0_1032] : memref<1x12x42x42xf32, #tpu.memory_space<vmem>>, vector<1x2x16x42xf32>
    %1205 = vector.shape_cast %1204 : vector<1x2x16x42xf32> to vector<2x16x42xf32>
    %cst_1033 = arith.constant 0.0258114319 : f32
    %1206 = vector.broadcast %cst_1033 : f32 to vector<2x16x42xf32>
    %1207 = arith.mulf %1206, %1205 : vector<2x16x42xf32>
    %1208 = arith.addf %1203, %1207 : vector<2x16x42xf32>
    %c0_1034 = arith.constant 0 : index
    %c10_1035 = arith.constant 10 : index
    %c7_1036 = arith.constant 7 : index
    %c0_1037 = arith.constant 0 : index
    %1209 = vector.load %arg2[%c0_1034, %c10_1035, %c7_1036, %c0_1037] : memref<1x12x42x42xf32, #tpu.memory_space<vmem>>, vector<1x2x16x42xf32>
    %1210 = vector.shape_cast %1209 : vector<1x2x16x42xf32> to vector<2x16x42xf32>
    %cst_1038 = arith.constant 0.0360003896 : f32
    %1211 = vector.broadcast %cst_1038 : f32 to vector<2x16x42xf32>
    %1212 = arith.mulf %1211, %1210 : vector<2x16x42xf32>
    %1213 = arith.addf %1208, %1212 : vector<2x16x42xf32>
    %c0_1039 = arith.constant 0 : index
    %c10_1040 = arith.constant 10 : index
    %c8_1041 = arith.constant 8 : index
    %c0_1042 = arith.constant 0 : index
    %1214 = vector.load %arg2[%c0_1039, %c10_1040, %c8_1041, %c0_1042] : memref<1x12x42x42xf32, #tpu.memory_space<vmem>>, vector<1x2x16x42xf32>
    %1215 = vector.shape_cast %1214 : vector<1x2x16x42xf32> to vector<2x16x42xf32>
    %cst_1043 = arith.constant 0.0477059223 : f32
    %1216 = vector.broadcast %cst_1043 : f32 to vector<2x16x42xf32>
    %1217 = arith.mulf %1216, %1215 : vector<2x16x42xf32>
    %1218 = arith.addf %1213, %1217 : vector<2x16x42xf32>
    %c0_1044 = arith.constant 0 : index
    %c10_1045 = arith.constant 10 : index
    %c9_1046 = arith.constant 9 : index
    %c0_1047 = arith.constant 0 : index
    %1219 = vector.load %arg2[%c0_1044, %c10_1045, %c9_1046, %c0_1047] : memref<1x12x42x42xf32, #tpu.memory_space<vmem>>, vector<1x2x16x42xf32>
    %1220 = vector.shape_cast %1219 : vector<1x2x16x42xf32> to vector<2x16x42xf32>
    %cst_1048 = arith.constant 0.0600630492 : f32
    %1221 = vector.broadcast %cst_1048 : f32 to vector<2x16x42xf32>
    %1222 = arith.mulf %1221, %1220 : vector<2x16x42xf32>
    %1223 = arith.addf %1218, %1222 : vector<2x16x42xf32>
    %c0_1049 = arith.constant 0 : index
    %c10_1050 = arith.constant 10 : index
    %c10_1051 = arith.constant 10 : index
    %c0_1052 = arith.constant 0 : index
    %1224 = vector.load %arg2[%c0_1049, %c10_1050, %c10_1051, %c0_1052] : memref<1x12x42x42xf32, #tpu.memory_space<vmem>>, vector<1x2x16x42xf32>
    %1225 = vector.shape_cast %1224 : vector<1x2x16x42xf32> to vector<2x16x42xf32>
    %cst_1053 = arith.constant 0.0718476251 : f32
    %1226 = vector.broadcast %cst_1053 : f32 to vector<2x16x42xf32>
    %1227 = arith.mulf %1226, %1225 : vector<2x16x42xf32>
    %1228 = arith.addf %1223, %1227 : vector<2x16x42xf32>
    %c0_1054 = arith.constant 0 : index
    %c10_1055 = arith.constant 10 : index
    %c11_1056 = arith.constant 11 : index
    %c0_1057 = arith.constant 0 : index
    %1229 = vector.load %arg2[%c0_1054, %c10_1055, %c11_1056, %c0_1057] : memref<1x12x42x42xf32, #tpu.memory_space<vmem>>, vector<1x2x16x42xf32>
    %1230 = vector.shape_cast %1229 : vector<1x2x16x42xf32> to vector<2x16x42xf32>
    %cst_1058 = arith.constant 0.0816558822 : f32
    %1231 = vector.broadcast %cst_1058 : f32 to vector<2x16x42xf32>
    %1232 = arith.mulf %1231, %1230 : vector<2x16x42xf32>
    %1233 = arith.addf %1228, %1232 : vector<2x16x42xf32>
    %c0_1059 = arith.constant 0 : index
    %c10_1060 = arith.constant 10 : index
    %c12_1061 = arith.constant 12 : index
    %c0_1062 = arith.constant 0 : index
    %1234 = vector.load %arg2[%c0_1059, %c10_1060, %c12_1061, %c0_1062] : memref<1x12x42x42xf32, #tpu.memory_space<vmem>>, vector<1x2x16x42xf32>
    %1235 = vector.shape_cast %1234 : vector<1x2x16x42xf32> to vector<2x16x42xf32>
    %cst_1063 = arith.constant 0.0881723613 : f32
    %1236 = vector.broadcast %cst_1063 : f32 to vector<2x16x42xf32>
    %1237 = arith.mulf %1236, %1235 : vector<2x16x42xf32>
    %1238 = arith.addf %1233, %1237 : vector<2x16x42xf32>
    %c0_1064 = arith.constant 0 : index
    %c10_1065 = arith.constant 10 : index
    %c13_1066 = arith.constant 13 : index
    %c0_1067 = arith.constant 0 : index
    %1239 = vector.load %arg2[%c0_1064, %c10_1065, %c13_1066, %c0_1067] : memref<1x12x42x42xf32, #tpu.memory_space<vmem>>, vector<1x2x16x42xf32>
    %1240 = vector.shape_cast %1239 : vector<1x2x16x42xf32> to vector<2x16x42xf32>
    %cst_1068 = arith.constant 0.09045811 : f32
    %1241 = vector.broadcast %cst_1068 : f32 to vector<2x16x42xf32>
    %1242 = arith.mulf %1241, %1240 : vector<2x16x42xf32>
    %1243 = arith.addf %1238, %1242 : vector<2x16x42xf32>
    %c0_1069 = arith.constant 0 : index
    %c10_1070 = arith.constant 10 : index
    %c14_1071 = arith.constant 14 : index
    %c0_1072 = arith.constant 0 : index
    %1244 = vector.load %arg2[%c0_1069, %c10_1070, %c14_1071, %c0_1072] : memref<1x12x42x42xf32, #tpu.memory_space<vmem>>, vector<1x2x16x42xf32>
    %1245 = vector.shape_cast %1244 : vector<1x2x16x42xf32> to vector<2x16x42xf32>
    %cst_1073 = arith.constant 0.0881723613 : f32
    %1246 = vector.broadcast %cst_1073 : f32 to vector<2x16x42xf32>
    %1247 = arith.mulf %1246, %1245 : vector<2x16x42xf32>
    %1248 = arith.addf %1243, %1247 : vector<2x16x42xf32>
    %c0_1074 = arith.constant 0 : index
    %c10_1075 = arith.constant 10 : index
    %c15_1076 = arith.constant 15 : index
    %c0_1077 = arith.constant 0 : index
    %1249 = vector.load %arg2[%c0_1074, %c10_1075, %c15_1076, %c0_1077] : memref<1x12x42x42xf32, #tpu.memory_space<vmem>>, vector<1x2x16x42xf32>
    %1250 = vector.shape_cast %1249 : vector<1x2x16x42xf32> to vector<2x16x42xf32>
    %cst_1078 = arith.constant 0.0816558822 : f32
    %1251 = vector.broadcast %cst_1078 : f32 to vector<2x16x42xf32>
    %1252 = arith.mulf %1251, %1250 : vector<2x16x42xf32>
    %1253 = arith.addf %1248, %1252 : vector<2x16x42xf32>
    %c0_1079 = arith.constant 0 : index
    %c10_1080 = arith.constant 10 : index
    %c16_1081 = arith.constant 16 : index
    %c0_1082 = arith.constant 0 : index
    %1254 = vector.load %arg2[%c0_1079, %c10_1080, %c16_1081, %c0_1082] : memref<1x12x42x42xf32, #tpu.memory_space<vmem>>, vector<1x2x16x42xf32>
    %1255 = vector.shape_cast %1254 : vector<1x2x16x42xf32> to vector<2x16x42xf32>
    %cst_1083 = arith.constant 0.0718476251 : f32
    %1256 = vector.broadcast %cst_1083 : f32 to vector<2x16x42xf32>
    %1257 = arith.mulf %1256, %1255 : vector<2x16x42xf32>
    %1258 = arith.addf %1253, %1257 : vector<2x16x42xf32>
    %c0_1084 = arith.constant 0 : index
    %c10_1085 = arith.constant 10 : index
    %c17_1086 = arith.constant 17 : index
    %c0_1087 = arith.constant 0 : index
    %1259 = vector.load %arg2[%c0_1084, %c10_1085, %c17_1086, %c0_1087] : memref<1x12x42x42xf32, #tpu.memory_space<vmem>>, vector<1x2x16x42xf32>
    %1260 = vector.shape_cast %1259 : vector<1x2x16x42xf32> to vector<2x16x42xf32>
    %cst_1088 = arith.constant 0.0600630492 : f32
    %1261 = vector.broadcast %cst_1088 : f32 to vector<2x16x42xf32>
    %1262 = arith.mulf %1261, %1260 : vector<2x16x42xf32>
    %1263 = arith.addf %1258, %1262 : vector<2x16x42xf32>
    %c0_1089 = arith.constant 0 : index
    %c10_1090 = arith.constant 10 : index
    %c18_1091 = arith.constant 18 : index
    %c0_1092 = arith.constant 0 : index
    %1264 = vector.load %arg2[%c0_1089, %c10_1090, %c18_1091, %c0_1092] : memref<1x12x42x42xf32, #tpu.memory_space<vmem>>, vector<1x2x16x42xf32>
    %1265 = vector.shape_cast %1264 : vector<1x2x16x42xf32> to vector<2x16x42xf32>
    %cst_1093 = arith.constant 0.0477059223 : f32
    %1266 = vector.broadcast %cst_1093 : f32 to vector<2x16x42xf32>
    %1267 = arith.mulf %1266, %1265 : vector<2x16x42xf32>
    %1268 = arith.addf %1263, %1267 : vector<2x16x42xf32>
    %c0_1094 = arith.constant 0 : index
    %c10_1095 = arith.constant 10 : index
    %c19_1096 = arith.constant 19 : index
    %c0_1097 = arith.constant 0 : index
    %1269 = vector.load %arg2[%c0_1094, %c10_1095, %c19_1096, %c0_1097] : memref<1x12x42x42xf32, #tpu.memory_space<vmem>>, vector<1x2x16x42xf32>
    %1270 = vector.shape_cast %1269 : vector<1x2x16x42xf32> to vector<2x16x42xf32>
    %cst_1098 = arith.constant 0.0360003896 : f32
    %1271 = vector.broadcast %cst_1098 : f32 to vector<2x16x42xf32>
    %1272 = arith.mulf %1271, %1270 : vector<2x16x42xf32>
    %1273 = arith.addf %1268, %1272 : vector<2x16x42xf32>
    %c0_1099 = arith.constant 0 : index
    %c10_1100 = arith.constant 10 : index
    %c20_1101 = arith.constant 20 : index
    %c0_1102 = arith.constant 0 : index
    %1274 = vector.load %arg2[%c0_1099, %c10_1100, %c20_1101, %c0_1102] : memref<1x12x42x42xf32, #tpu.memory_space<vmem>>, vector<1x2x16x42xf32>
    %1275 = vector.shape_cast %1274 : vector<1x2x16x42xf32> to vector<2x16x42xf32>
    %cst_1103 = arith.constant 0.0258114319 : f32
    %1276 = vector.broadcast %cst_1103 : f32 to vector<2x16x42xf32>
    %1277 = arith.mulf %1276, %1275 : vector<2x16x42xf32>
    %1278 = arith.addf %1273, %1277 : vector<2x16x42xf32>
    %c0_1104 = arith.constant 0 : index
    %c10_1105 = arith.constant 10 : index
    %c21_1106 = arith.constant 21 : index
    %c0_1107 = arith.constant 0 : index
    %1279 = vector.load %arg2[%c0_1104, %c10_1105, %c21_1106, %c0_1107] : memref<1x12x42x42xf32, #tpu.memory_space<vmem>>, vector<1x2x16x42xf32>
    %1280 = vector.shape_cast %1279 : vector<1x2x16x42xf32> to vector<2x16x42xf32>
    %cst_1108 = arith.constant 0.0175827574 : f32
    %1281 = vector.broadcast %cst_1108 : f32 to vector<2x16x42xf32>
    %1282 = arith.mulf %1281, %1280 : vector<2x16x42xf32>
    %1283 = arith.addf %1278, %1282 : vector<2x16x42xf32>
    %c0_1109 = arith.constant 0 : index
    %c10_1110 = arith.constant 10 : index
    %c22_1111 = arith.constant 22 : index
    %c0_1112 = arith.constant 0 : index
    %1284 = vector.load %arg2[%c0_1109, %c10_1110, %c22_1111, %c0_1112] : memref<1x12x42x42xf32, #tpu.memory_space<vmem>>, vector<1x2x16x42xf32>
    %1285 = vector.shape_cast %1284 : vector<1x2x16x42xf32> to vector<2x16x42xf32>
    %cst_1113 = arith.constant 0.0113797272 : f32
    %1286 = vector.broadcast %cst_1113 : f32 to vector<2x16x42xf32>
    %1287 = arith.mulf %1286, %1285 : vector<2x16x42xf32>
    %1288 = arith.addf %1283, %1287 : vector<2x16x42xf32>
    %c0_1114 = arith.constant 0 : index
    %c10_1115 = arith.constant 10 : index
    %c23_1116 = arith.constant 23 : index
    %c0_1117 = arith.constant 0 : index
    %1289 = vector.load %arg2[%c0_1114, %c10_1115, %c23_1116, %c0_1117] : memref<1x12x42x42xf32, #tpu.memory_space<vmem>>, vector<1x2x16x42xf32>
    %1290 = vector.shape_cast %1289 : vector<1x2x16x42xf32> to vector<2x16x42xf32>
    %cst_1118 = arith.constant 0.00699756108 : f32
    %1291 = vector.broadcast %cst_1118 : f32 to vector<2x16x42xf32>
    %1292 = arith.mulf %1291, %1290 : vector<2x16x42xf32>
    %1293 = arith.addf %1288, %1292 : vector<2x16x42xf32>
    %c0_1119 = arith.constant 0 : index
    %c10_1120 = arith.constant 10 : index
    %c24_1121 = arith.constant 24 : index
    %c0_1122 = arith.constant 0 : index
    %1294 = vector.load %arg2[%c0_1119, %c10_1120, %c24_1121, %c0_1122] : memref<1x12x42x42xf32, #tpu.memory_space<vmem>>, vector<1x2x16x42xf32>
    %1295 = vector.shape_cast %1294 : vector<1x2x16x42xf32> to vector<2x16x42xf32>
    %cst_1123 = arith.constant 0.00408819458 : f32
    %1296 = vector.broadcast %cst_1123 : f32 to vector<2x16x42xf32>
    %1297 = arith.mulf %1296, %1295 : vector<2x16x42xf32>
    %1298 = arith.addf %1293, %1297 : vector<2x16x42xf32>
    %c0_1124 = arith.constant 0 : index
    %c10_1125 = arith.constant 10 : index
    %c25_1126 = arith.constant 25 : index
    %c0_1127 = arith.constant 0 : index
    %1299 = vector.load %arg2[%c0_1124, %c10_1125, %c25_1126, %c0_1127] : memref<1x12x42x42xf32, #tpu.memory_space<vmem>>, vector<1x2x16x42xf32>
    %1300 = vector.shape_cast %1299 : vector<1x2x16x42xf32> to vector<2x16x42xf32>
    %cst_1128 = arith.constant 0.00226927106 : f32
    %1301 = vector.broadcast %cst_1128 : f32 to vector<2x16x42xf32>
    %1302 = arith.mulf %1301, %1300 : vector<2x16x42xf32>
    %1303 = arith.addf %1298, %1302 : vector<2x16x42xf32>
    %c0_1129 = arith.constant 0 : index
    %c10_1130 = arith.constant 10 : index
    %c26_1131 = arith.constant 26 : index
    %c0_1132 = arith.constant 0 : index
    %1304 = vector.load %arg2[%c0_1129, %c10_1130, %c26_1131, %c0_1132] : memref<1x12x42x42xf32, #tpu.memory_space<vmem>>, vector<1x2x16x42xf32>
    %1305 = vector.shape_cast %1304 : vector<1x2x16x42xf32> to vector<2x16x42xf32>
    %cst_1133 = arith.constant 0.00119677128 : f32
    %1306 = vector.broadcast %cst_1133 : f32 to vector<2x16x42xf32>
    %1307 = arith.mulf %1306, %1305 : vector<2x16x42xf32>
    %1308 = arith.addf %1303, %1307 : vector<2x16x42xf32>
    %c5_1134 = arith.constant 5 : index
    %c0_1135 = arith.constant 0 : index
    %c0_1136 = arith.constant 0 : index
    %1309 = vector.load %arg4[%c5_1134, %c0_1135, %c0_1136] : memref<6x42x16xf32, #tpu.memory_space<vmem>>, vector<1x42x16xf32>
    %1310 = vector.shape_cast %1309 : vector<1x42x16xf32> to vector<42x16xf32>
    %1311 = vector.extract_strided_slice %1308 {offsets = [0, 0, 0], sizes = [1, 16, 42], strides = [1, 1, 1]} : vector<2x16x42xf32> to vector<1x16x42xf32>
    %1312 = vector.shape_cast %1311 : vector<1x16x42xf32> to vector<16x42xf32>
    %cst_1137 = arith.constant dense<0.000000e+00> : vector<16x16xf32>
    %1313 = tpu.matmul %1312, %1310, %cst_1137 {dimension_numbers = #tpu.dot_dimension_numbers<[1], [0], [0], [1], [0, 0, 1, 1], [], []>} : vector<16x42xf32>, vector<42x16xf32>, vector<16x16xf32> -> vector<16x16xf32>
    %1314 = vector.extract_strided_slice %1308 {offsets = [1, 0, 0], sizes = [1, 16, 42], strides = [1, 1, 1]} : vector<2x16x42xf32> to vector<1x16x42xf32>
    %1315 = vector.shape_cast %1314 : vector<1x16x42xf32> to vector<16x42xf32>
    %cst_1138 = arith.constant dense<0.000000e+00> : vector<16x16xf32>
    %1316 = tpu.matmul %1315, %1310, %cst_1138 {dimension_numbers = #tpu.dot_dimension_numbers<[1], [0], [0], [1], [0, 0, 1, 1], [], []>} : vector<16x42xf32>, vector<42x16xf32>, vector<16x16xf32> -> vector<16x16xf32>
    %1317 = arith.subf %1313, %905 : vector<16x16xf32>
    %1318 = arith.mulf %1317, %1317 : vector<16x16xf32>
    %1319 = vector.shape_cast %1318 : vector<16x16xf32> to vector<1x16x16xf32>
    %cst_1139 = arith.constant dense<0.000000e+00> : vector<1xf32>
    %1320 = vector.multi_reduction <add>, %1319, %cst_1139 [1, 2] : vector<1x16x16xf32> to vector<1xf32>
    %1321 = vector.shape_cast %1320 : vector<1xf32> to vector<1x1x1xf32>
    %1322 = vector.extract %1321[0, 0, 0] : f32 from vector<1x1x1xf32>
    %cst_1140 = arith.constant 0.000000e+00 : f32
    %1323 = arith.addf %cst_1140, %1322 : f32
    %1324 = arith.subf %1316, %908 : vector<16x16xf32>
    %1325 = arith.mulf %1324, %1324 : vector<16x16xf32>
    %1326 = vector.shape_cast %1325 : vector<16x16xf32> to vector<1x16x16xf32>
    %cst_1141 = arith.constant dense<0.000000e+00> : vector<1xf32>
    %1327 = vector.multi_reduction <add>, %1326, %cst_1141 [1, 2] : vector<1x16x16xf32> to vector<1xf32>
    %1328 = vector.shape_cast %1327 : vector<1xf32> to vector<1x1x1xf32>
    %1329 = vector.extract %1328[0, 0, 0] : f32 from vector<1x1x1xf32>
    %1330 = arith.addf %1323, %1329 : f32
    %cst_1142 = arith.constant 0.001953125 : f32
    %1331 = arith.mulf %1330, %cst_1142 : f32
    %c5_i32 = arith.constant 5 : i32
    %1332 = vector.broadcast %c5_i32 : i32 to vector<1x6xi32>
    %1333 = arith.cmpi eq, %0, %1332 : vector<1x6xi32>
    %cst_1143 = arith.constant 0.000000e+00 : f32
    %1334 = vector.broadcast %1331 : f32 to vector<1x6xf32>
    %1335 = vector.broadcast %cst_1143 : f32 to vector<1x6xf32>
    %1336 = arith.select %1333, %1334, %1335 : vector<1x6xi1>, vector<1x6xf32>
    %1337 = arith.addf %1167, %1336 : vector<1x6xf32>
    %c0_1144 = arith.constant 0 : index
    %c5_1145 = arith.constant 5 : index
    %1338 = memref.load %arg1[%c0_1144, %c5_1145] : memref<2x6xf32, #tpu.memory_space<smem>>
    %c1_1146 = arith.constant 1 : index
    %c5_1147 = arith.constant 5 : index
    %1339 = memref.load %arg1[%c1_1146, %c5_1147] : memref<2x6xf32, #tpu.memory_space<smem>>
    %1340 = arith.mulf %1331, %1339 : f32
    %1341 = vector.broadcast %1340 : f32 to vector<1x1xf32>
    %1342 = arith.addf %1174, %1341 : vector<1x1xf32>
    %1343 = vector.broadcast %1338 : f32 to vector<1x1xf32>
    %1344 = arith.addf %1342, %1343 : vector<1x1xf32>
    %c0_1148 = arith.constant 0 : index
    %c0_1149 = arith.constant 0 : index
    %c0_1150 = arith.constant 0 : index
    %1345 = vector.load %arg5[%c0_1148, %c0_1149, %c0_1150] : memref<1x1x1xf32, #tpu.memory_space<vmem>>, vector<1x1x1xf32>
    %1346 = vector.shape_cast %1345 : vector<1x1x1xf32> to vector<1x1xf32>
    %1347 = vector.shape_cast %1344 : vector<1x1xf32> to vector<1x1x1xf32>
    tpu.vector_store %arg5[%c0_1148, %c0_1149, %c0_1150], %1347 {strides = array<i32>} : memref<1x1x1xf32, #tpu.memory_space<vmem>>, vector<1x1x1xf32>,
    %c0_1151 = arith.constant 0 : index
    %c0_1152 = arith.constant 0 : index
    %c0_1153 = arith.constant 0 : index
    %1348 = vector.load %arg6[%c0_1151, %c0_1152, %c0_1153] : memref<1x1x6xf32, #tpu.memory_space<vmem>>, vector<1x1x6xf32>
    %1349 = vector.shape_cast %1348 : vector<1x1x6xf32> to vector<1x6xf32>
    %1350 = vector.shape_cast %1337 : vector<1x6xf32> to vector<1x1x6xf32>
    tpu.vector_store %arg6[%c0_1151, %c0_1152, %c0_1153], %1350 {strides = array<i32>} : memref<1x1x6xf32, #tpu.memory_space<vmem>>, vector<1x1x6xf32>,
    return
  }
  func.func @transform_0(%arg0: i32) -> (i32, i32) {
    %c0_i32 = arith.constant 0 : i32
    %c0_i32_0 = arith.constant 0 : i32
    %c0_i32_1 = arith.constant 0 : i32
    return %c0_i32, %c0_i32_0 : i32, i32
  }
  func.func @transform_1(%arg0: i32) -> (i32, i32, i32, i32) {
    %c0_i32 = arith.constant 0 : i32
    %c0_i32_0 = arith.constant 0 : i32
    %c0_i32_1 = arith.constant 0 : i32
    %c0_i32_2 = arith.constant 0 : i32
    return %arg0, %c0_i32, %c0_i32_0, %c0_i32_1 : i32, i32, i32, i32
  }
  func.func @transform_2(%arg0: i32) -> (i32, i32, i32, i32) {
    %c0_i32 = arith.constant 0 : i32
    %c0_i32_0 = arith.constant 0 : i32
    %c0_i32_1 = arith.constant 0 : i32
    %c0_i32_2 = arith.constant 0 : i32
    return %arg0, %c0_i32, %c0_i32_0, %c0_i32_1 : i32, i32, i32, i32
  }
  func.func @transform_3(%arg0: i32) -> (i32, i32, i32) {
    %c0_i32 = arith.constant 0 : i32
    %c0_i32_0 = arith.constant 0 : i32
    %c0_i32_1 = arith.constant 0 : i32
    %c0_i32_2 = arith.constant 0 : i32
    return %c0_i32, %c0_i32_0, %c0_i32_1 : i32, i32, i32
  }
  func.func @transform_4(%arg0: i32) -> (i32, i32, i32) {
    %c0_i32 = arith.constant 0 : i32
    %c0_i32_0 = arith.constant 0 : i32
    %c0_i32_1 = arith.constant 0 : i32
    return %arg0, %c0_i32, %c0_i32_0 : i32, i32, i32
  }
  func.func @transform_5(%arg0: i32) -> (i32, i32, i32) {
    %c0_i32 = arith.constant 0 : i32
    %c0_i32_0 = arith.constant 0 : i32
    %c0_i32_1 = arith.constant 0 : i32
    return %arg0, %c0_i32, %c0_i32_0 : i32, i32, i32
  }
}

</mosaic_0001>

<bundles_post_ra>
// kernel: tpu_custom_call.1
= control target key start
LH: loop header
LB: loop body
LE: loop exit
PB: predicated region body
PF: predicated region fallthrough
CT: control target
= control target key end

     0   :  { %s10363_s0 = inlined_call_operand.vmem [shape: f32[2,6], index: 0, kind: input, shape index: {}]   ;;  %s10364_s1 = inlined_call_operand.vmem [shape: f32[2,12,42,42], index: 1, kind: input, shape index: {}]   ;;  %s10365_s2 = inlined_call_operand.vmem [shape: f32[2,2,42,42], index: 2, kind: input, shape index: {}]   ;;  %s10366_s3 = inlined_call_operand.vmem [shape: f32[6,42,16], index: 3, kind: input, shape index: {}]   ;;  %s10367_s4 = inlined_call_operand.vmem [shape: f32[2,1,1], index: 4, kind: output, shape index: {0}]   ;;  %s10368_s5 = inlined_call_operand.hbm [shape: f32[2,1,6], index: 5, kind: output, shape index: {1}]  }
   0x1   :  { %10391 = sst [smem:[#allocation44_spill]] %s10363_s0 }
   0x2   :  { %10392 = sst [smem:[#allocation45_spill]] %s10364_s1 }
   0x3   :  { %10393 = sst [smem:[#allocation46_spill]] %s10365_s2 }
   0x4   :  { %10394 = sst [smem:[#allocation47_spill]] %s10366_s3 }
   0x5   :  { %11 = vsyncpa [#allocation4], 0 }
   0x6   :  { %12 = vsyncpa [#allocation3], 0 }
   0x7   :  { %14 = vsyncpa [#allocation3 + $0x1], 0  ;;  %s7439_s18 = smov 0   ;;  %s7441_s19 = smov 0  }
   0x8   :  { %s7443_s20 = smov 0   ;;  %s7445_s21 = smov 0  }
   0x9 LB: > { %s7460_s22 = sadd.s32 4294967295, %s7404_s21   ;;  %s5513_s23 = sadd.s32 4294967294, %s7404_s21   ;;  %s7404_s21 = sphi %s7445_s21, %s10583_s21   ;;  %s7400_s20 = sphi %s7443_s20, %s10582_s20   ;;  %s7396_s19 = sphi %s7441_s19, %s10581_s19   ;;  %s7392_s18 = sphi %s7439_s18, %s10580_s18  }
   0xa   : > { %s7464_s24 = sadd.s32 1, %s7404_s21   ;;  %s147_s25 = sadd.s32 1, %s7400_s20 }
   0xb   : > { %s144_s26 = ssub.s32 %s7404_s21, %s7464_s24  ;;  %p157_p0 = scmp.ne.s32.totalorder %s7400_s20, %s7396_s19 }
   0xc   : > { %p145_p1 = scmp.eq.s32.totalorder %s144_s26, 0  ;;  %p158_p2 = scmp.eq.s32.totalorder %s7460_s22, 1 }
   0xd   : > { %p163_p3 = scmp.ne.s32.totalorder %s7396_s19, %s7392_s18  ;;  %p164_p4 = scmp.eq.s32.totalorder %s5513_s23, 1 }
   0xe   : > { %s7475_s27 = scalar_select %p145_p1, %s7400_s20, %s147_s25  }
   0xf   : > { %p7477_p5 = por %p158_p2, %p157_p0  ;;  %p7481_p6 = por %p164_p4, %p163_p3 }
  0x10   : > { %10395 = sst [smem:[#allocation8_spill]] %s7475_s27  ;;  %p5514_p7 = scmp.ge.s32.totalorder %s7404_s21, 1 }
  0x11   : > { %p171_p8 = scmp.lt.s32.totalorder %s7404_s21, 3  ;;  %p7257_p9 = scmp.eq.s32.totalorder %s7460_s22, 0 }
  0x12   : > { %s10399_s0 = sld [smem:[#allocation44_spill]] }
  0x13   : > { %p7488_p10 = pnand %p5514_p7, %p171_p8 }
  0x15   : > { %p7249_p11 = pneg %p7488_p10 }
  0x17   : > { %p7250_p12 = pnand %p7257_p9, %p7249_p11 }
  0x18   : > { %s184_s8 = sshll.u32 %s10399_s0, 4  ;;  %s185_s8 = int_to_ptr.vmem [resolvable:$true] %s184_s8 }
  0x19   : > { %s7323_s9 = scalar_lea.vmem %s185_s8, 32  ;;  %p7325_p0 = pneg %p7250_p12 }
  0x1a   : > { %p7324_p13 = scmp.ne.s32.totalorder %s185_s8, %s7323_s9  ;;  %p7331_p3 = scmp.lt.s32.totalorder %s185_s8, %s185_s8 }
  0x1b   : > { %p7332_p4 = scmp.lt.s32.totalorder %s7323_s9, %s7323_s9 }
  0x1c   : > { %p7326_p1 = pnand %p7325_p0, %p7324_p13 }
  0x1d   : > { %p7333_p7 = por %p7332_p4, %p7331_p3 }
  0x1e   : > { %p7327_p2 = pneg %p7326_p1 }
  0x20   : > { %p7334_p8 = pnand %p7333_p7, %p7327_p2 }
  0x22   : > { %7337 = shalt.err (!%p7334_p8)
}
  0x23   : > { %s7406_s10 = smov [#allocation2]   ;;  %216 = sbr.rel (%p7488_p10) target bundleno = 942 (0x3ae), region = 36 }
  0x24   : > { %7252 = dma.vmem_to_smem (!%p7250_p12), %s185_s8, 32, %s7406_s10, [#allocation4]  }
  0x2a   : > { %7383 = dma.done.wait (%p7257_p9), [#allocation4], 32  }
  0x2b   : > { %7385 = vsyncadd (%p7257_p9), [#allocation4], 4294967264 }
  0x2c   : > { %222 = sfence }
  0x2d   : > { %s10400_s3 = sld [smem:[#allocation47_spill]]  ;;  %p252_p10 = scmp.lt.s32.totalorder %s7460_s22, 1  ;;  %vm312_vm0 = vcmask 1041408   ;;  %vm7407_vm1 = vmmov 1   ;;  %v10401_v9 = vmov 0  ;;  %vm305_vm3 = vcmask 343040  }
  0x2e   : > { %vm7541_vm2 = vmpackc.low %vm312_vm0, %vm7407_vm1  ;;  %s10404_s1 = sld [smem:[#allocation45_spill]]  ;;  %s10405_s2 = sld [smem:[#allocation46_spill]]  ;;  %vm1100_vm4 = vcmask 130048   ;;  %vm5394_vm11 = vcmask 40960   ;;  %vm5392_vm12 = vcmask 0  }
  0x2f   : > { %s7529_s7 = scalar_select %p252_p10, %s7460_s22, 1  ;;  %v10402_v9 = vsel %vm7541_vm2, 4294967295, %v10401_v9 }
  0x30   : > { %10403 = vst [vmem:[#allocation9_spill] sm:$0xff] %v10402_v9  ;;  %s5551_s13 = sld [smem:[#allocation2 + $0x80]]  ;;  %s5605_s15 = sld [smem:[#allocation2 + $0x81]] }
  0x31   : > { %s7217_s8 = smul.u32 576, %s7529_s7  ;;  %s1136_s23 = sld [smem:[#allocation2]] }
  0x32   : > { %s7218_s9 = smul.u32 96, %s7529_s7  ;;  %s5673_s6 = sld [smem:[#allocation2 + $0x82]] }
  0x33   : > { %v299_v0 = vld [vmem:[%s10400_s3] sm:$0xff]  ;;  %v300_v1 = vld [vmem:[%s10400_s3 + $0x8] sm:$0xff]  ;;  %v301_v2 = vld [vmem:[%s10400_s3 + $0x10] sm:$0xff] }
  0x34   : > { %v7515_v3 = vpack.c.bf16 %v300_v1, %v299_v0  ;;  %v302_v4 = vld [vmem:[%s10400_s3 + $0x18] sm:$0xff]  ;;  %v303_v6 = vld [vmem:[%s10400_s3 + $0x20] sm:$0xff]  ;;  %v304_v7 = vld [vmem:[%s10400_s3 + $0x28] sm:$0x3]  ;;  %s7548_s12 = scalar_lea.vmem %s10404_s1, %s7217_s8  ;;  %s7559_s25 = scalar_lea.vmem %s10405_s2, %s7218_s9 }
  0x35   : > { %v7520_v5 = vpack.c.bf16 %v302_v4, %v301_v2  ;;  %v7538_v8 = vpack.c.bf16 %v304_v7, %v303_v6  ;;  %v5527_v10 = vld [vmem:[%s10400_s3 + $0x30] sm:$0xff]  ;;  %v5528_v11 = vld [vmem:[%s10400_s3 + $0x38] sm:$0xff]  ;;  %v5529_v42 = vld [vmem:[%s10400_s3 + $0x40] sm:$0xff] }
  0x36   : > { %6742 = vmatprep.subr.bf16.mxu0 %v7515_v3  ;;  %6756 = vmatprep.subr.bf16.mxu1 %v7515_v3  ;;  %v7562_v12 = vld [vmem:[%s7548_s12 + $0xc] sm:$0xff]  ;;  %v7584_v19 = vpack.c.bf16 %v5528_v11, %v5527_v10  ;;  %v7614_v28 = vld [vmem:[%s7559_s25 + $0x3c] sm:$0xff]  ;;  %v7654_v45 = vld [vmem:[%s7559_s25 + $0x14] sm:$0xff] }
  0x37   : > { %6744 = vmatpush3.bf16.msra.mxu0 %v7515_v3  ;;  %6758 = vmatpush3.bf16.msra.mxu1 %v7515_v3  ;;  %v7567_v13 = vld [vmem:[%s7559_s25 + $0xc] sm:$0xff]  ;;  %v7593_v22 = vmul.f32 0.012889069, %v7562_v12  ;;  %v7617_v29 = vld [vmem:[%s7559_s25 + $0x3d] sm:$0xff]  ;;  %v273_v32 = vmul.f32 0.012889069, %v7614_v28 }
  0x38   : > { %6746 = vmatprep.subr.bf16.mxu0 %v7520_v5  ;;  %6760 = vmatprep.subr.bf16.mxu1 %v7520_v5  ;;  %v7570_v14 = vld [vmem:[%s7559_s25 + $0xd] sm:$0xff]  ;;  %v271_v16 = vmul.f32 0.012889069, %v7567_v13  ;;  %v7587_v20 = vmul.f32 0.13731514, %v7567_v13  ;;  %v7620_v30 = vld [vmem:[%s7559_s25 + $0x3e] sm:$0xff] }
  0x39   : > { %v7573_v15 = vld [vmem:[%s7559_s25 + $0xe] sm:$0xff]  ;;  %v279_v17 = vmul.f32 0.9742219, %v7570_v14  ;;  %v7590_v21 = vmul.f32 0.14691597, %v7570_v14  ;;  %v7660_v47 = vld [vmem:[%s7559_s25 + $0x16] sm:$0xff] }
  0x3a   : > { %v291_v18 = vmul.f32 0.012889069, %v7573_v15  ;;  %10406 = vst [vmem:[#allocation10_spill] sm:$0xff] %v7587_v20  ;;  %v7596_v24 = vmul.f32 0.13731514, %v7573_v15  ;;  %v5530_v43 = vld [vmem:[%s10400_s3 + $0x48] sm:$0xff] }
  0x3b   : > { %6748 = vmatpush3.bf16.msra.mxu0 %v7520_v5  ;;  %6762 = vmatpush3.bf16.msra.mxu1 %v7520_v5  ;;  %10407 = vst [vmem:[#allocation11_spill] sm:$0xff] %v7590_v21  ;;  %v283_v23 = vadd.f32 %v279_v17, %v271_v16  ;;  %v7599_v25 = vmul.f32 0.08817236, %v7567_v13  ;;  %v7602_v26 = vmul.f32 0.09045811, %v7570_v14  ;;  %v7657_v46 = vld [vmem:[%s7559_s25 + $0x15] sm:$0xff]  ;;  %v7697_v2 = vpack.c.bf16 %v5530_v43, %v5529_v42 }
  0x3c   : > { %6751 = vmatprep.subr.msk.bf16.mxu0 %vm7541_vm2, %v7538_v8  ;;  %6765 = vmatprep.subr.msk.bf16.mxu1 %vm7541_vm2, %v7538_v8  ;;  %10408 = vst [vmem:[#allocation12_spill] sm:$0xff] %v7596_v24  ;;  %v7611_v27 = vmul.f32 0.08817236, %v7573_v15  ;;  %v281_v33 = vmul.f32 0.9742219, %v7617_v29  ;;  %v7669_v53 = vld [vmem:[%s7559_s25 + $0x44] sm:$0xff] }
  0x3d   : > { %10409 = vst [vmem:[#allocation13_spill] sm:$0xff] %v7599_v25  ;;  %10410 = vst [vmem:[#allocation14_spill] sm:$0xff] %v7602_v26  ;;  %v295_v31 = vadd.f32 %v291_v18, %v283_v23  ;;  %v293_v34 = vmul.f32 0.012889069, %v7620_v30  ;;  %v7628_v35 = vmul.f32 0.13731514, %v7614_v28 }
  0x3e   : > { %10411 = vst [vmem:[#allocation15_spill] sm:$0xff] %v7611_v27  ;;  %v7631_v36 = vmul.f32 0.14691597, %v7617_v29  ;;  %v480_v37 = vmul.f32 0.19894268, %v7567_v13  ;;  %v285_v38 = vadd.f32 %v281_v33, %v273_v32  ;;  %v7672_v54 = vld [vmem:[%s7559_s25 + $0x45] sm:$0xff] }
  0x3f   : > { %6754 = vmatpush3.bf16.msk.msra.mxu0 %vm7541_vm2, %v7538_v8  ;;  %6768 = vmatpush3.bf16.msk.msra.mxu1 %vm7541_vm2, %v7538_v8  ;;  %10412 = vst [vmem:[#allocation16_spill] sm:$0xff] %v7628_v35  ;;  %v7636_v39 = vmul.f32 0.13731514, %v7620_v30  ;;  %v7639_v40 = vmul.f32 0.08817236, %v7614_v28  ;;  %v7679_v59 = vld [vmem:[%s7559_s25 + $0x46] sm:$0xff] }
  0x40   : > { %6770 = vmatprep.subr.bf16.mxu0 %v7584_v19  ;;  %6784 = vmatprep.subr.bf16.mxu1 %v7584_v19  ;;  %10413 = vst [vmem:[#allocation17_spill] sm:$0xff] %v7631_v36  ;;  %v7642_v41 = vmul.f32 0.09045811, %v7617_v29  ;;  %v7651_v44 = vmul.f32 0.08817236, %v7620_v30  ;;  %v297_v48 = vadd.f32 %v293_v34, %v285_v38  ;;  %v5531_v60 = vld [vmem:[%s10400_s3 + $0x50] sm:$0xff] }
  0x41   : > { %6243 = vmatprep.mubr.msk.f32.mxu0 %vm305_vm3, %v295_v31  ;;  %10414 = vst [vmem:[#allocation18_spill] sm:$0xff] %v7636_v39  ;;  %10415 = vst [vmem:[#allocation19_spill] sm:$0xff] %v7639_v40  ;;  %v272_v49 = vmul.f32 0.012889069, %v7654_v45  ;;  %v280_v50 = vmul.f32 0.9742219, %v7657_v46 }
  0x42   : > { %10416 = vst [vmem:[#allocation20_spill] sm:$0xff] %v7642_v41  ;;  %10417 = vst [vmem:[#allocation21_spill] sm:$0xff] %v7651_v44  ;;  %v292_v51 = vmul.f32 0.012889069, %v7660_v47  ;;  %v7666_v52 = vmul.f32 0.13731514, %v7660_v47  ;;  %6258 = vmatprep.mubr.msk.f32.mxu1 %vm305_vm3, %v297_v48 }
  0x43   : > { %v488_v55 = vmul.f32 0.5865933, %v7570_v14  ;;  %v284_v56 = vadd.f32 %v280_v50, %v272_v49  ;;  %v274_v57 = vmul.f32 0.012889069, %v7669_v53  ;;  %v282_v58 = vmul.f32 0.9742219, %v7672_v54 }
  0x44   : > { %10418 = vst [vmem:[#allocation22_spill] sm:$0xff] %v7666_v52  ;;  %v5532_v61 = vld [vmem:[%s10400_s3 + $0x58] sm:$0x3]  ;;  %v7688_v62 = vld [vmem:[%s7559_s25 + $0xb] sm:$0xff]  ;;  %v7691_v63 = vmul.f32 0.08817236, %v7660_v47 }
  0x45   : > { %v294_v0 = vmul.f32 0.012889069, %v7679_v59  ;;  %v7695_v1 = vmul.f32 0.13731514, %v7679_v59  ;;  %v296_v4 = vadd.f32 %v292_v51, %v284_v56  ;;  %v286_v6 = vadd.f32 %v282_v58, %v274_v57  ;;  %v7704_v11 = vld [vmem:[%s7559_s25 + $0xf] sm:$0xff]  ;;  %v7707_v16 = vld [vmem:[%s7559_s25 + $0x3b] sm:$0xff] }
  0x46   : > { %10419 = vst [vmem:[#allocation23_spill] sm:$0xff] %v7691_v63  ;;  %v7700_v7 = vmul.f32 0.08817236, %v7679_v59  ;;  %v476_v10 = vmul.f32 0.0077606966, %v7688_v62  ;;  %v7720_v38 = vld [vmem:[%s7559_s25 + $0x3f] sm:$0xff]  ;;  %v7726_v43 = vpack.c.bf16 %v5532_v61, %v5531_v60 }
  0x47   : > { %10420 = vst [vmem:[#allocation24_spill] sm:$0xff] %v7695_v1  ;;  %v496_v17 = vmul.f32 0.19894268, %v7573_v15  ;;  %v508_v18 = vmul.f32 0.0077606966, %v7704_v11  ;;  %6244 = vmatmul.mubr.msk.f32.vlgmr.msra.gmra.mrb[0].mxu0 %vm305_vm3, %v296_v4  ;;  %v298_v31 = vadd.f32 %v294_v0, %v286_v6  ;;  %v7723_v42 = vld [vmem:[%s7559_s25 + $0x13] sm:$0xff] }
  0x48   : > { %10421 = vst [vmem:[#allocation25_spill] sm:$0xff] %v7700_v7  ;;  %v7712_v23 = vmul.f32 0.11211578, %v7688_v62  ;;  %v484_v32 = vadd.f32 %v480_v37, %v476_v10  ;;  %v7716_v33 = vmul.f32 0.08165588, %v7688_v62  ;;  %6772 = vmatpush3.bf16.msra.mxu0 %v7584_v19  ;;  %v7747_v0 = vld [vmem:[%s7548_s12 + $0xd] sm:$0xff] }
  0x49   : > { %v478_v34 = vmul.f32 0.0077606966, %v7707_v16  ;;  %v7729_v48 = vmul.f32 0.08165588, %v7704_v11  ;;  %v482_v37 = vmul.f32 0.19894268, %v7614_v28  ;;  %6259 = vmatmul.mubr.msk.f32.vlgmr.msra.gmra.mrb[0].mxu1 %vm305_vm3, %v298_v31  ;;  %6774 = vmatprep.subr.bf16.mxu0 %v7697_v2 }
  0x4a   : > { %10422 = vst [vmem:[#allocation26_spill] sm:$0xff] %v7712_v23  ;;  %v490_v49 = vmul.f32 0.5865933, %v7617_v29  ;;  %v492_v50 = vadd.f32 %v488_v55, %v484_v32  ;;  %v498_v51 = vmul.f32 0.19894268, %v7620_v30  ;;  %6786 = vmatpush3.bf16.msra.mxu1 %v7584_v19  ;;  %v7750_v4 = vld [vmem:[%s7548_s12 + $0xe] sm:$0xff] }
  0x4b   : > { %10423 = vst [vmem:[#allocation27_spill] sm:$0xff] %v7729_v48  ;;  %v510_v56 = vmul.f32 0.0077606966, %v7720_v38  ;;  %v7738_v57 = vmul.f32 0.11211578, %v7707_v16  ;;  %v486_v58 = vadd.f32 %v482_v37, %v478_v34  ;;  %6788 = vmatprep.subr.bf16.mxu1 %v7697_v2  ;;  %v7758_v32 = vld [vmem:[%s7559_s25 + $0x17] sm:$0xff] }
  0x4c   : > { %v7742_v60 = vmul.f32 0.08165588, %v7707_v16  ;;  %v477_v61 = vmul.f32 0.0077606966, %v7723_v42  ;;  %v481_v55 = vmul.f32 0.19894268, %v7654_v45  ;;  %v500_v6 = vadd.f32 %v496_v17, %v492_v50  ;;  %6776 = vmatpush3.bf16.msra.mxu0 %v7697_v2 }
  0x4d   : > { %10424 = vst [vmem:[#allocation28_spill] sm:$0xff] %v7738_v57  ;;  %v7754_v10 = vmul.f32 0.08165588, %v7720_v38  ;;  %v489_v31 = vmul.f32 0.5865933, %v7657_v46  ;;  %v7761_v34 = vld [vmem:[%s7559_s25 + $0x43] sm:$0xff]  ;;  %v494_v37 = vadd.f32 %v490_v49, %v486_v58  ;;  %6779 = vmatprep.subr.msk.bf16.mxu0 %vm7541_vm2, %v7726_v43 }
  0x4e   : > { %10425 = vst [vmem:[#allocation29_spill] sm:$0xff] %v7742_v60  ;;  %v485_v39 = vadd.f32 %v481_v55, %v477_v61  ;;  %v497_v36 = vmul.f32 0.19894268, %v7660_v47  ;;  %v509_v35 = vmul.f32 0.0077606966, %v7758_v32  ;;  %v7767_v17 = vld [vmem:[%s7559_s25 + $0x47] sm:$0xff]  ;;  %v512_v57 = vadd.f32 %v508_v18, %v500_v6  ;;  %6790 = vmatpush3.bf16.msra.mxu1 %v7697_v2 }
  0x4f   : > { %10426 = vst [vmem:[#allocation30_spill] sm:$0xff] %v7754_v10  ;;  %v694_v50 = vld [vmem:[%s7548_s12 + $0x3c] sm:$0xff]  ;;  %v479_v1 = vmul.f32 0.0077606966, %v7761_v34  ;;  %v483_v24 = vmul.f32 0.19894268, %v7669_v53  ;;  %v502_v58 = vadd.f32 %v498_v51, %v494_v37  ;;  %6793 = vmatprep.subr.msk.bf16.mxu1 %vm7541_vm2, %v7726_v43 }
  0x50   : > { %v491_v49 = vmul.f32 0.5865933, %v7672_v54  ;;  %v493_v61 = vadd.f32 %v489_v31, %v485_v39  ;;  %v7778_v55 = vmul.f32 0.08165588, %v7758_v32  ;;  %v499_v21 = vmul.f32 0.19894268, %v7679_v59  ;;  %6273 = vmatprep.mubr.msk.f32.mxu0 %vm305_vm3, %v512_v57  ;;  %6782 = vmatpush3.bf16.msk.msra.mxu0 %vm7541_vm2, %v7726_v43 }
  0x51   : > { %v7782_v52 = vld [vmem:[%s7548_s12 + $0x3d] sm:$0xff]  ;;  %v487_v6 = vadd.f32 %v483_v24, %v479_v1  ;;  %v511_v39 = vmul.f32 0.0077606966, %v7767_v17  ;;  %v704_v51 = vmul.f32 0.9742219, %v7747_v0  ;;  %v514_v37 = vadd.f32 %v510_v56, %v502_v58  ;;  %v693_v57 = vld [vmem:[%s7548_s12 + $0x14] sm:$0xff]  ;;  %6798 = vmatprep.subr.bf16.mxu0 %v7515_v3 }
  0x52   : > { %10427 = vst [vmem:[#allocation31_spill] sm:$0xff] %v7778_v55  ;;  %v7785_v18 = vld [vmem:[%s7548_s12 + $0x3e] sm:$0xff]  ;;  %v716_v31 = vmul.f32 0.012889069, %v7750_v4  ;;  %v501_v20 = vadd.f32 %v497_v36, %v493_v61  ;;  %v7798_v23 = vmul.f32 0.08165588, %v7767_v17  ;;  %6796 = vmatpush3.bf16.msk.msra.mxu1 %vm7541_vm2, %v7726_v43 }
  0x53   : > { %v698_v7 = vmul.f32 0.012889069, %v694_v50  ;;  %v7802_v24 = vld [vmem:[%s7548_s12 + $0x15] sm:$0xff]  ;;  %v495_v1 = vadd.f32 %v491_v49, %v487_v6  ;;  %v708_v55 = vadd.f32 %v704_v51, %v7593_v22  ;;  %v706_v63 = vmul.f32 0.9742219, %v7782_v52  ;;  %v695_v56 = vld [vmem:[%s7548_s12 + $0x44] sm:$0xff]  ;;  %6288 = vmatprep.mubr.msk.f32.mxu1 %vm305_vm3, %v514_v37  ;;  %6812 = vmatprep.subr.bf16.mxu1 %v7515_v3 }
  0x54   : > { %10428 = vst [vmem:[#allocation32_spill] sm:$0xff] %v7798_v23  ;;  %v718_v10 = vmul.f32 0.012889069, %v7785_v18  ;;  %v7809_v44 = vld [vmem:[%s7548_s12 + $0x16] sm:$0xff]  ;;  %v513_v36 = vadd.f32 %v509_v35, %v501_v20  ;;  %v894_v49 = vmul.f32 0.19894268, %v7562_v12 }
  0x55   : > { %v697_v22 = vmul.f32 0.012889069, %v693_v57  ;;  %v705_v58 = vmul.f32 0.9742219, %v7802_v24  ;;  %v5552_v61 = vld [vmem:[%s10400_s3 + $0x60] sm:$0xff]  ;;  %v5553_v6 = vld [vmem:[%s10400_s3 + $0x68] sm:$0xff]  ;;  %v503_v12 = vadd.f32 %v499_v21, %v495_v1  ;;  %v720_v35 = vadd.f32 %v716_v31, %v708_v55 }
  0x56   : > { %v5554_v51 = vld [vmem:[%s10400_s3 + $0x70] sm:$0xff]  ;;  %v5555_v20 = vld [vmem:[%s10400_s3 + $0x78] sm:$0xff]  ;;  %v710_v37 = vadd.f32 %v706_v63, %v698_v7  ;;  %v896_v23 = vmul.f32 0.19894268, %v694_v50  ;;  %v703_v41 = vld [vmem:[%s7548_s12 + $0x45] sm:$0xff]  ;;  %6274 = vmatmul.mubr.msk.f32.vlgmr.msra.gmra.mrb[2].mxu0 %vm305_vm3, %v513_v36 }
  0x57   : > { %v7833_v40 = vld [vmem:[%s7548_s12 + $0x46] sm:$0xff]  ;;  %v709_v48 = vadd.f32 %v705_v58, %v697_v22  ;;  %v717_v27 = vmul.f32 0.012889069, %v7809_v44  ;;  %v895_v26 = vmul.f32 0.19894268, %v693_v57  ;;  %v515_v21 = vadd.f32 %v511_v39, %v503_v12  ;;  %6800 = vmatpush3.bf16.msra.mxu0 %v7515_v3  ;;  %6303 = vmatprep.mubr.msk.f32.mxu0 %vm305_vm3, %v720_v35  ;;  %v888_v55 = vld [vmem:[%s7548_s12 + $0x3b] sm:$0xff] }
  0x58   : > { %v886_v60 = vld [vmem:[%s7548_s12 + $0xb] sm:$0xff]  ;;  %v699_v25 = vmul.f32 0.012889069, %v695_v56  ;;  %v722_v63 = vadd.f32 %v718_v10, %v710_v37  ;;  %v707_v7 = vmul.f32 0.9742219, %v703_v41  ;;  %6802 = vmatprep.subr.bf16.mxu0 %v7520_v5  ;;  %v887_v36 = vld [vmem:[%s7548_s12 + $0x13] sm:$0xff]  ;;  %v7848_v12 = vpack.c.bf16 %v5553_v6, %v5552_v61 }
  0x59   : > { %v719_v50 = vmul.f32 0.012889069, %v7833_v40  ;;  %v890_v31 = vmul.f32 0.0077606966, %v886_v60  ;;  %v902_v1 = vmul.f32 0.5865933, %v7747_v0  ;;  %6289 = vmatmul.mubr.msk.f32.vlgmr.msra.gmra.mrb[2].mxu1 %vm305_vm3, %v515_v21  ;;  %v7850_v10 = vpack.c.bf16 %v5555_v20, %v5554_v51 }
  0x5a   : > { %v897_v57 = vmul.f32 0.19894268, %v695_v56  ;;  %v918_v39 = vld [vmem:[%s7548_s12 + $0xf] sm:$0xff]  ;;  %v892_v22 = vmul.f32 0.0077606966, %v888_v55  ;;  %v920_v58 = vld [vmem:[%s7548_s12 + $0x3f] sm:$0xff]  ;;  %6814 = vmatpush3.bf16.msra.mxu1 %v7515_v3  ;;  %6318 = vmatprep.mubr.msk.f32.mxu1 %vm305_vm3, %v722_v63  ;;  %v721_v60 = vadd.f32 %v717_v27, %v709_v48  ;;  %v711_v61 = vadd.f32 %v707_v7, %v699_v25 }
  0x5b   : > { %v898_v35 = vadd.f32 %v894_v49, %v890_v31  ;;  %v910_v0 = vmul.f32 0.19894268, %v7750_v4  ;;  %v904_v37 = vmul.f32 0.5865933, %v7782_v52  ;;  %v889_v21 = vld [vmem:[%s7548_s12 + $0x43] sm:$0xff]  ;;  %6816 = vmatprep.subr.bf16.mxu1 %v7520_v5  ;;  %6804 = vmatpush3.bf16.msra.mxu0 %v7520_v5  ;;  %v919_v49 = vld [vmem:[%s7548_s12 + $0x17] sm:$0xff] }
  0x5c   : > { %v5557_v56 = vld [vmem:[%s10400_s3 + $0x88] sm:$0x3]  ;;  %v900_v3 = vadd.f32 %v896_v23, %v892_v22  ;;  %v912_v27 = vmul.f32 0.19894268, %v7785_v18  ;;  %v891_v48 = vmul.f32 0.0077606966, %v887_v36  ;;  %6807 = vmatprep.subr.msk.bf16.mxu0 %vm7541_vm2, %v7538_v8 }
  0x5d   : > { %v5556_v52 = vld [vmem:[%s10400_s3 + $0x80] sm:$0xff]  ;;  %v906_v4 = vadd.f32 %v902_v1, %v898_v35  ;;  %v922_v6 = vmul.f32 0.0077606966, %v918_v39  ;;  %v924_v51 = vmul.f32 0.0077606966, %v920_v58  ;;  %v7874_v55 = vld [vmem:[%s7559_s25 + $0xa] sm:$0xff] }
  0x5e   : > { %v893_v20 = vmul.f32 0.0077606966, %v889_v21  ;;  %v908_v63 = vadd.f32 %v904_v37, %v900_v3  ;;  %v899_v25 = vadd.f32 %v895_v26, %v891_v48  ;;  %v903_v23 = vmul.f32 0.5865933, %v7802_v24  ;;  %v921_v7 = vld [vmem:[%s7548_s12 + $0x47] sm:$0xff]  ;;  %6818 = vmatpush3.bf16.msra.mxu1 %v7520_v5  ;;  %v7891_v24 = vld [vmem:[%s7559_s25 + $0x10] sm:$0xff] }
  0x5f   : > { %v911_v18 = vmul.f32 0.19894268, %v7809_v44  ;;  %v914_v31 = vadd.f32 %v910_v0, %v906_v4  ;;  %v7877_v36 = vmul.f32 0.0077606966, %v919_v49  ;;  %v905_v22 = vmul.f32 0.5865933, %v703_v41  ;;  %6821 = vmatprep.subr.msk.bf16.mxu1 %vm7541_vm2, %v7538_v8  ;;  %6810 = vmatpush3.bf16.msk.msra.mxu0 %vm7541_vm2, %v7538_v8 }
  0x60   : > { %v1147_v1 = vmul.f32 0.0051764394, %v7874_v55  ;;  %v916_v26 = vadd.f32 %v912_v27, %v908_v63  ;;  %v7886_v44 = vpack.c.bf16 %v5557_v56, %v5556_v52  ;;  %v1151_v5 = vmul.f32 0.057227775, %v7688_v62  ;;  %6826 = vmatprep.subr.bf16.mxu0 %v7584_v19  ;;  %v5606_v37 = vld [vmem:[%s10400_s3 + $0x90] sm:$0xff]  ;;  %v5607_v21 = vld [vmem:[%s10400_s3 + $0x98] sm:$0xff] }
  0x61   : > { %v1159_v41 = vmul.f32 0.24196488, %v7567_v13  ;;  %v926_v39 = vadd.f32 %v922_v6, %v914_v31  ;;  %v901_v58 = vadd.f32 %v897_v57, %v893_v20  ;;  %v913_v35 = vmul.f32 0.19894268, %v7833_v40  ;;  %v3672_v57 = vld [vmem:[%s7559_s25] sm:$0xff]  ;;  %v7925_v63 = vld [vmem:[%s7559_s25 + $0x8] sm:$0xff] }
  0x62   : > { %v7895_v0 = vmul.f32 0.0077606966, %v921_v7  ;;  %v723_v56 = vadd.f32 %v719_v50, %v711_v61  ;;  %v907_v13 = vadd.f32 %v903_v23, %v899_v25  ;;  %v1155_v3 = vadd.f32 %v1151_v5, %v1147_v1  ;;  %v3680_v40 = vld [vmem:[%s7559_s25 + $0x1] sm:$0xff]  ;;  %6824 = vmatpush3.bf16.msk.msra.mxu1 %vm7541_vm2, %v7538_v8  ;;  %6304 = vmatmul.mubr.msk.f32.vlgmr.msra.gmra.mrb[4].mxu0 %vm305_vm3, %v721_v60  ;;  %v7928_v25 = vld [vmem:[%s7559_s25 + $0x9] sm:$0xff]  ;;  %v5844_v9 = vld [vmem:[%s7548_s12 + $0x1b3] sm:$0xff] }
  0x63   : > { %v1167_v27 = vmul.f32 0.39126182, %v7570_v14  ;;  %v3692_v48 = vld [vmem:[%s7559_s25 + $0x2] sm:$0xff]  ;;  %v928_v49 = vadd.f32 %v924_v51, %v916_v26  ;;  %v1175_v50 = vmul.f32 0.24196488, %v7573_v15  ;;  %6840 = vmatprep.subr.bf16.mxu1 %v7584_v19  ;;  %6828 = vmatpush3.bf16.msra.mxu0 %v7584_v19  ;;  %v7920_v15 = vpack.c.bf16 %v5607_v21, %v5606_v37 }
  0x64   : > { %v1183_v61 = vmul.f32 0.057227775, %v7704_v11  ;;  %v1195_v14 = vmul.f32 0.0051764394, %v7891_v24  ;;  %v1163_v52 = vadd.f32 %v1159_v41, %v1155_v3  ;;  %v2693_v4 = vld [vmem:[%s7559_s25 + $0x5] sm:$0xff]  ;;  %6830 = vmatprep.subr.bf16.mxu0 %v7697_v2  ;;  %6333 = vmatprep.mubr.msk.f32.mxu0 %vm305_vm3, %v926_v39  ;;  %v909_v11 = vadd.f32 %v905_v22, %v901_v58  ;;  %v7939_v22 = vld [vmem:[%s7559_s25 + $0x3a] sm:$0xff] }
  0x65   : > { %v2701_v6 = vld [vmem:[%s7559_s25 + $0x6] sm:$0xff]  ;;  %v3676_v8 = vmul.f32 0.0011967713, %v3672_v57  ;;  %v3684_v20 = vmul.f32 0.002269271, %v3680_v40  ;;  %6319 = vmatmul.mubr.msk.f32.vlgmr.msra.gmra.mrb[4].mxu1 %vm305_vm3, %v723_v56  ;;  %v915_v58 = vadd.f32 %v911_v18, %v907_v13 }
  0x66   : > { %v3704_v60 = vld [vmem:[%s7559_s25 + $0x3] sm:$0xff]  ;;  %v7931_v23 = vmul.f32 0.079967566, %v7874_v55  ;;  %v7934_v7 = vmul.f32 0.079967566, %v7891_v24  ;;  %v1171_v1 = vadd.f32 %v1167_v27, %v1163_v52  ;;  %6842 = vmatpush3.bf16.msra.mxu1 %v7584_v19  ;;  %6348 = vmatprep.mubr.msk.f32.mxu1 %vm305_vm3, %v928_v49  ;;  %v917_v18 = vadd.f32 %v913_v35, %v909_v11 }
  0x67   : > { %v3716_v51 = vld [vmem:[%s7559_s25 + $0x4] sm:$0xff]  ;;  %v3696_v31 = vmul.f32 0.0040881946, %v3692_v48  ;;  %v3688_v5 = vadd.f32 %v3684_v20, %v3676_v8  ;;  %v3708_v41 = vmul.f32 0.006997561, %v3704_v60  ;;  %6844 = vmatprep.subr.bf16.mxu1 %v7697_v2  ;;  %6832 = vmatpush3.bf16.msra.mxu0 %v7697_v2  ;;  %v927_v35 = vadd.f32 %v7877_v36, %v915_v58 }
  0x68   : > { %10429 = vst [vmem:[#allocation33_spill] sm:$0xff] %v7931_v23  ;;  %10430 = vst [vmem:[#allocation34_spill] sm:$0xff] %v7934_v7  ;;  %v2713_v26 = vld [vmem:[%s7559_s25 + $0x7] sm:$0xff]  ;;  %v3720_v39 = vmul.f32 0.011379727, %v3716_v51  ;;  %v1179_v56 = vadd.f32 %v1175_v50, %v1171_v1  ;;  %6835 = vmatprep.subr.msk.bf16.mxu0 %vm7541_vm2, %v7726_v43 }
  0x69   : > { %v3728_v37 = vmul.f32 0.017582757, %v2693_v4  ;;  %v3736_v21 = vmul.f32 0.025811432, %v2701_v6  ;;  %v7943_v3 = vmul.f32 0.03600039, %v2713_v26  ;;  %v3700_v27 = vadd.f32 %v3696_v31, %v3688_v5 }
  0x6a   : > { %v7948_v57 = vmul.f32 0.047705922, %v7925_v63  ;;  %v7951_v40 = vmul.f32 0.06006305, %v7928_v25  ;;  %v7954_v48 = vld [vmem:[%s7559_s25 + $0x40] sm:$0xff]  ;;  %v1187_v52 = vadd.f32 %v1183_v61, %v1179_v56  ;;  %6846 = vmatpush3.bf16.msra.mxu1 %v7697_v2  ;;  %v3674_v61 = vld [vmem:[%s7559_s25 + $0x30] sm:$0xff] }
  0x6b   : > { %v1149_v13 = vmul.f32 0.0051764394, %v7939_v22  ;;  %v1153_v49 = vmul.f32 0.057227775, %v7707_v16  ;;  %v1161_v50 = vmul.f32 0.24196488, %v7614_v28  ;;  %v3712_v4 = vadd.f32 %v3708_v41, %v3700_v27  ;;  %6849 = vmatprep.subr.msk.bf16.mxu1 %vm7541_vm2, %v7726_v43  ;;  %6838 = vmatpush3.bf16.msk.msra.mxu0 %vm7541_vm2, %v7726_v43 }
  0x6c   : > { %v7963_v6 = vmul.f32 0.071847625, %v7874_v55  ;;  %v7966_v8 = vmul.f32 0.071847625, %v7891_v24  ;;  %v1169_v16 = vmul.f32 0.39126182, %v7617_v29  ;;  %v1199_v60 = vadd.f32 %v1195_v14, %v1187_v52  ;;  %6854 = vmatprep.subr.bf16.mxu0 %v7848_v12 }
  0x6d   : > { %v1157_v20 = vadd.f32 %v1153_v49, %v1149_v13  ;;  %v1177_v28 = vmul.f32 0.24196488, %v7620_v30  ;;  %v3724_v51 = vadd.f32 %v3720_v39, %v3712_v4  ;;  %v1185_v36 = vmul.f32 0.057227775, %v7720_v38  ;;  %v2695_v29 = vld [vmem:[%s7559_s25 + $0x35] sm:$0xff]  ;;  %v8162_v23 = vld [vmem:[%s7548_s12 + $0xa6] sm:$0xff] }
  0x6e   : > { %v1197_v11 = vmul.f32 0.0051764394, %v7954_v48  ;;  %v3682_v30 = vld [vmem:[%s7559_s25 + $0x31] sm:$0xff]  ;;  %v3678_v5 = vmul.f32 0.0011967713, %v3674_v61  ;;  %v929_v14 = vadd.f32 %v7895_v0, %v917_v18  ;;  %v7991_v56 = vld [vmem:[%s7559_s25 + $0x39] sm:$0xff]  ;;  %6852 = vmatpush3.bf16.msk.msra.mxu1 %vm7541_vm2, %v7726_v43  ;;  %6334 = vmatmul.mubr.msk.f32.vlgmr.msra.gmra.mrb[6].mxu0 %vm305_vm3, %v927_v35 }
  0x6f   : > { %v3694_v31 = vld [vmem:[%s7559_s25 + $0x32] sm:$0xff]  ;;  %v1165_v1 = vadd.f32 %v1161_v50, %v1157_v20  ;;  %v3686_v41 = vmul.f32 0.002269271, %v3682_v30  ;;  %v3732_v39 = vadd.f32 %v3728_v37, %v3724_v51  ;;  %v7994_v27 = vmul.f32 0.079967566, %v7939_v22  ;;  %6868 = vmatprep.subr.bf16.mxu1 %v7848_v12  ;;  %6856 = vmatpush3.bf16.msra.mxu0 %v7848_v12 }
  0x70   : > { %v2703_v26 = vld [vmem:[%s7559_s25 + $0x36] sm:$0xff]  ;;  %v3698_v58 = vmul.f32 0.0040881946, %v3694_v31  ;;  %v7997_v13 = vmul.f32 0.079967566, %v7954_v48  ;;  %6858 = vmatprep.subr.bf16.mxu0 %v7850_v10  ;;  %6363 = vmatprep.mubr.msk.f32.mxu0 %vm305_vm3, %v1199_v60 }
  0x71   : > { %v7988_v38 = vld [vmem:[%s7559_s25 + $0x38] sm:$0xff]  ;;  %10431 = vst [vmem:[#allocation35_spill] sm:$0xff] %v7994_v27  ;;  %v1173_v0 = vadd.f32 %v1169_v16, %v1165_v1  ;;  %v3690_v18 = vadd.f32 %v3686_v41, %v3678_v5  ;;  %v3730_v4 = vmul.f32 0.017582757, %v2695_v29  ;;  %v3740_v61 = vadd.f32 %v3736_v21, %v3732_v39  ;;  %6349 = vmatmul.mubr.msk.f32.vlgmr.msra.gmra.mrb[6].mxu1 %vm305_vm3, %v929_v14 }
  0x72   : > { %10432 = vst [vmem:[#allocation36_spill] sm:$0xff] %v7997_v13  ;;  %v3706_v49 = vld [vmem:[%s7559_s25 + $0x33] sm:$0xff]  ;;  %v3738_v30 = vmul.f32 0.025811432, %v2703_v26  ;;  %v8016_v29 = vmul.f32 0.047705922, %v7988_v38  ;;  %6870 = vmatpush3.bf16.msra.mxu1 %v7848_v12 }
  0x73   : > { %v3718_v50 = vld [vmem:[%s7559_s25 + $0x34] sm:$0xff]  ;;  %v3710_v52 = vmul.f32 0.006997561, %v3706_v49  ;;  %v1181_v35 = vadd.f32 %v1177_v28, %v1173_v0  ;;  %v3702_v16 = vadd.f32 %v3698_v58, %v3690_v18  ;;  %v8019_v1 = vmul.f32 0.06006305, %v7991_v56  ;;  %6872 = vmatprep.subr.bf16.mxu1 %v7850_v10  ;;  %6860 = vmatpush3.bf16.msra.mxu0 %v7850_v10  ;;  %v8122_v13 = vld [vmem:[%s7548_s12 + $0x9f] sm:$0xff] }
  0x74   : > { %v2715_v37 = vld [vmem:[%s7559_s25 + $0x37] sm:$0xff]  ;;  %v3722_v51 = vmul.f32 0.011379727, %v3718_v50  ;;  %v3748_v21 = vadd.f32 %v7943_v3, %v3740_v61  ;;  %v1152_v41 = vmul.f32 0.057227775, %v7723_v42  ;;  %v8037_v50 = vld [vmem:[%s7559_s25 + $0x42] sm:$0xff]  ;;  %6863 = vmatprep.subr.msk.bf16.mxu0 %vm7541_vm2, %v7886_v44 }
  0x75   : > { %v8007_v20 = vld [vmem:[%s7559_s25 + $0x12] sm:$0xff]  ;;  %v8011_v31 = vmul.f32 0.03600039, %v2715_v37  ;;  %v1160_v60 = vmul.f32 0.24196488, %v7654_v45  ;;  %v1189_v28 = vadd.f32 %v1185_v36, %v1181_v35  ;;  %v3714_v58 = vadd.f32 %v3710_v52, %v3702_v16 }
  0x76   : > { %v8022_v5 = vld [vmem:[%s7559_s25 + $0x18] sm:$0xff]  ;;  %v1148_v26 = vmul.f32 0.0051764394, %v8007_v20  ;;  %v8031_v39 = vmul.f32 0.071847625, %v7939_v22  ;;  %v3756_v45 = vadd.f32 %v7948_v57, %v3748_v21  ;;  %v8056_v16 = vld [vmem:[%s7548_s12 + $0x6b] sm:$0xff]  ;;  %6874 = vmatpush3.bf16.msra.mxu1 %v7850_v10 }
  0x77   : > { %v8034_v49 = vmul.f32 0.071847625, %v7954_v48  ;;  %v1168_v36 = vmul.f32 0.39126182, %v7657_v46  ;;  %v1176_v14 = vmul.f32 0.24196488, %v7660_v47  ;;  %v1201_v0 = vadd.f32 %v1197_v11, %v1189_v28  ;;  %6877 = vmatprep.subr.msk.bf16.mxu1 %vm7541_vm2, %v7886_v44  ;;  %6866 = vmatpush3.bf16.msk.msra.mxu0 %vm7541_vm2, %v7886_v44 }
  0x78   : > { %v1156_v3 = vadd.f32 %v1152_v41, %v1148_v26  ;;  %v3726_v37 = vadd.f32 %v3722_v51, %v3714_v58  ;;  %v1184_v18 = vmul.f32 0.057227775, %v7758_v32  ;;  %v1196_v52 = vmul.f32 0.0051764394, %v8022_v5  ;;  %v8053_v47 = vld [vmem:[%s7559_s25 + $0x48] sm:$0xff]  ;;  %6882 = vmatprep.subr.bf16.mxu0 %v7584_v19 }
  0x79   : > { %v3764_v61 = vadd.f32 %v7951_v40, %v3756_v45  ;;  %v1150_v57 = vmul.f32 0.0051764394, %v8037_v50  ;;  %v1154_v46 = vmul.f32 0.057227775, %v7761_v34  ;;  %10433 = vst [vmem:[#allocation37_spill] sm:$0xff] %v8053_v47  ;;  %6378 = vmatprep.mubr.msk.f32.mxu1 %vm305_vm3, %v1201_v0  ;;  %v8076_v41 = vld [vmem:[%s7548_s12 + $0x6c] sm:$0xff] }
  0x7a   : > { %v1164_v35 = vadd.f32 %v1160_v60, %v1156_v3  ;;  %v3734_v32 = vadd.f32 %v3730_v4, %v3726_v37  ;;  %v8061_v11 = vmul.f32 0.079967566, %v8022_v5  ;;  %v8064_v40 = vmul.f32 0.071847625, %v8022_v5  ;;  %v8088_v0 = vld [vmem:[%s7548_s12 + $0x6e] sm:$0xff]  ;;  %v5566_v37 = vld [vmem:[%s7548_s12 + $0x9b] sm:$0xff]  ;;  %6880 = vmatpush3.bf16.msk.msra.mxu1 %vm7541_vm2, %v7886_v44 }
  0x7b   : > { %v1162_v51 = vmul.f32 0.24196488, %v7669_v53  ;;  %v3772_v34 = vadd.f32 %v7963_v6, %v3764_v61  ;;  %v1158_v21 = vadd.f32 %v1154_v46, %v1150_v57  ;;  %v1170_v26 = vmul.f32 0.39126182, %v7672_v54  ;;  %v8079_v53 = vld [vmem:[%s7548_s12 + $0x6d] sm:$0xff]  ;;  %v10437_v61 = vld [vmem:[#allocation13_spill] sm:$0xff]  ;;  %6896 = vmatprep.subr.bf16.mxu1 %v7584_v19 }
  0x7c   : > { %10434 = vst [vmem:[#allocation38_spill] sm:$0xff] %v8061_v11  ;;  %10435 = vst [vmem:[#allocation39_spill] sm:$0xff] %v8064_v40  ;;  %v1172_v4 = vadd.f32 %v1168_v36, %v1164_v35  ;;  %v3742_v60 = vadd.f32 %v3738_v30, %v3734_v32  ;;  %v1178_v28 = vmul.f32 0.24196488, %v7679_v59  ;;  %v1186_v58 = vmul.f32 0.057227775, %v7767_v17 }
  0x7d   : > { %v1198_v45 = vmul.f32 0.0051764394, %v8053_v47  ;;  %v3780_v6 = vadd.f32 %v7716_v33, %v3772_v34  ;;  %v1166_v36 = vadd.f32 %v1162_v51, %v1158_v21  ;;  %v1384_v54 = vmul.f32 0.0077606966, %v8056_v16  ;;  %v8092_v30 = vld [vmem:[%s7548_s12 + $0x9c] sm:$0xff]  ;;  %v8109_v51 = vld [vmem:[%s7548_s12 + $0x6f] sm:$0xff] }
  0x7e   : > { %v1180_v3 = vadd.f32 %v1176_v14, %v1172_v4  ;;  %v3750_v59 = vadd.f32 %v8011_v31, %v3742_v60  ;;  %v8099_v33 = vmul.f32 0.079967566, %v8053_v47  ;;  %v1392_v17 = vmul.f32 0.19894268, %v8076_v41  ;;  %v8112_v31 = vld [vmem:[%s7548_s12 + $0x9d] sm:$0xff]  ;;  %v10440_v11 = vld [vmem:[#allocation15_spill] sm:$0xff] }
  0x7f   : > { %v1404_v14 = vmul.f32 0.5865933, %v8079_v53  ;;  %v3788_v35 = vadd.f32 %v10437_v61, %v3780_v6  ;;  %v1174_v46 = vadd.f32 %v1170_v26, %v1166_v36  ;;  %v8105_v32 = vmul.f32 0.071847625, %v8053_v47  ;;  %v8117_v6 = vld [vmem:[%s7548_s12 + $0x9e] sm:$0xff] }
  0x80   : > { %10436 = vst [vmem:[#allocation40_spill] sm:$0xff] %v8099_v33  ;;  %v1188_v57 = vadd.f32 %v1184_v18, %v1180_v3  ;;  %v3758_v34 = vadd.f32 %v8016_v29, %v3750_v59  ;;  %v1396_v4 = vadd.f32 %v1392_v17, %v1384_v54  ;;  %v1416_v21 = vmul.f32 0.19894268, %v8088_v0  ;;  %v10439_v18 = vld [vmem:[#allocation14_spill] sm:$0xff]  ;;  %v5565_v33 = vld [vmem:[%s7548_s12 + $0x73] sm:$0xff] }
  0x81   : > { %10438 = vst [vmem:[#allocation13_spill] sm:$0xff] %v8105_v32  ;;  %v1386_v60 = vmul.f32 0.0077606966, %v5566_v37  ;;  %v3796_v26 = vadd.f32 %v10439_v18, %v3788_v35  ;;  %v1182_v36 = vadd.f32 %v1178_v28, %v1174_v46  ;;  %v1394_v61 = vmul.f32 0.19894268, %v8092_v30  ;;  %v8129_v17 = vld [vmem:[%s7548_s12 + $0x74] sm:$0xff] }
  0x82   : > { %v1200_v3 = vadd.f32 %v1196_v52, %v1188_v57  ;;  %v3766_v7 = vadd.f32 %v8019_v1, %v3758_v34  ;;  %v1408_v29 = vadd.f32 %v1404_v14, %v1396_v4  ;;  %v1428_v54 = vmul.f32 0.0077606966, %v8109_v51  ;;  %v8135_v46 = vld [vmem:[%s7548_s12 + $0x75] sm:$0xff] }
  0x83   : > { %v1406_v59 = vmul.f32 0.5865933, %v8112_v31  ;;  %v3804_v35 = vadd.f32 %v10440_v11, %v3796_v26  ;;  %v1190_v52 = vadd.f32 %v1186_v58, %v1182_v36  ;;  %v1398_v28 = vadd.f32 %v1394_v61, %v1386_v60  ;;  %v8141_v4 = vld [vmem:[%s7548_s12 + $0x76] sm:$0xff]  ;;  %v10442_v36 = vld [vmem:[#allocation29_spill] sm:$0xff] }
  0x84   : > { %6364 = vmatmul.mubr.msk.f32.vlgmr.msra.gmra.mrb[8].mxu0 %vm305_vm3, %v1200_v3  ;;  %v1418_v57 = vmul.f32 0.19894268, %v8117_v6  ;;  %v3774_v1 = vadd.f32 %v8031_v39, %v3766_v7  ;;  %v1420_v14 = vadd.f32 %v1416_v21, %v1408_v29  ;;  %v1430_v34 = vmul.f32 0.0077606966, %v8122_v13  ;;  %v10441_v18 = vld [vmem:[#allocation27_spill] sm:$0xff]  ;;  %v5567_v7 = vld [vmem:[%s7548_s12 + $0xa3] sm:$0xff] }
  0x85   : > { %6884 = vmatpush3.bf16.msra.mxu0 %v7584_v19  ;;  %v1385_v11 = vmul.f32 0.0077606966, %v5565_v33  ;;  %v3812_v58 = vadd.f32 %v10441_v18, %v3804_v35  ;;  %v1202_v26 = vadd.f32 %v1198_v45, %v1190_v52  ;;  %v1410_v60 = vadd.f32 %v1406_v59, %v1398_v28  ;;  %v8148_v39 = vld [vmem:[%s7548_s12 + $0xa4] sm:$0xff]  ;;  %v8154_v35 = vld [vmem:[%s7548_s12 + $0x77] sm:$0xff] }
  0x86   : > { %6886 = vmatprep.subr.bf16.mxu0 %v7697_v2  ;;  %v1393_v3 = vmul.f32 0.19894268, %v8129_v17  ;;  %v3782_v21 = vadd.f32 %v10442_v36, %v3774_v1  ;;  %v1432_v61 = vadd.f32 %v1428_v54, %v1420_v14  ;;  %v1606_v29 = vmul.f32 0.057227775, %v8056_v16  ;;  %v8157_v45 = vld [vmem:[%s7548_s12 + $0xa5] sm:$0xff]  ;;  %v10443_v16 = vld [vmem:[#allocation19_spill] sm:$0xff] }
  0x87   : > { %v1405_v27 = vmul.f32 0.5865933, %v8135_v46  ;;  %6379 = vmatmul.mubr.msk.f32.vlgmr.msra.gmra.mrb[8].mxu1 %vm305_vm3, %v1202_v26  ;;  %v1422_v59 = vadd.f32 %v1418_v57, %v1410_v60  ;;  %v1608_v52 = vmul.f32 0.057227775, %v5566_v37  ;;  %v1417_v18 = vmul.f32 0.19894268, %v8141_v4 }
  0x88   : > { %v1397_v28 = vadd.f32 %v1393_v3, %v1385_v11  ;;  %v8165_v54 = vadd.f32 %v7966_v8, %v3812_v58  ;;  %v3790_v1 = vadd.f32 %v10443_v16, %v3782_v21  ;;  %6898 = vmatpush3.bf16.msra.mxu1 %v7584_v19  ;;  %v1387_v14 = vmul.f32 0.0077606966, %v5567_v7  ;;  %v8172_v57 = vld [vmem:[%s7548_s12 + $0xa7] sm:$0xff]  ;;  %v10444_v60 = vld [vmem:[#allocation20_spill] sm:$0xff]  ;;  %6393 = vmatprep.mubr.msk.f32.mxu0 %vm305_vm3, %v1432_v61 }
  0x89   : > { %6888 = vmatpush3.bf16.msra.mxu0 %v7697_v2  ;;  %v1395_v26 = vmul.f32 0.19894268, %v8148_v39  ;;  %v5590_v37 = vld [vmem:[%s7548_s12 + $0x6a] sm:$0xff]  ;;  %6900 = vmatprep.subr.bf16.mxu1 %v7697_v2  ;;  %v1434_v8 = vadd.f32 %v1430_v34, %v1422_v59  ;;  %v1429_v58 = vmul.f32 0.0077606966, %v8154_v35  ;;  %v5592_v32 = vld [vmem:[%s7548_s12 + $0x9a] sm:$0xff] }
  0x8a   : > { %6891 = vmatprep.subr.msk.bf16.mxu0 %vm7541_vm2, %v7726_v43  ;;  %v1409_v11 = vadd.f32 %v1405_v27, %v1397_v28  ;;  %v1407_v19 = vmul.f32 0.5865933, %v8157_v45  ;;  %v3798_v3 = vadd.f32 %v10444_v60, %v3790_v1  ;;  %v1607_v36 = vmul.f32 0.057227775, %v5565_v33  ;;  %v10445_v28 = vld [vmem:[#allocation21_spill] sm:$0xff] }
  0x8b   : > { %v1399_v21 = vadd.f32 %v1395_v26, %v1387_v14  ;;  %v1419_v16 = vmul.f32 0.19894268, %v8162_v23  ;;  %6408 = vmatprep.mubr.msk.f32.mxu1 %vm305_vm3, %v1434_v8  ;;  %v1431_v34 = vmul.f32 0.0077606966, %v8172_v57  ;;  %v1602_v27 = vmul.f32 0.0051764394, %v5590_v37 }
  0x8c   : > { %v1421_v47 = vadd.f32 %v1417_v18, %v1409_v11  ;;  %v1614_v59 = vmul.f32 0.24196488, %v8076_v41  ;;  %v3806_v40 = vadd.f32 %v10445_v28, %v3798_v3  ;;  %6902 = vmatpush3.bf16.msra.mxu1 %v7697_v2  ;;  %v1609_v61 = vmul.f32 0.057227775, %v5567_v7  ;;  %v5594_v14 = vld [vmem:[%s7548_s12 + $0x70] sm:$0xff] }
  0x8d   : > { %6894 = vmatpush3.bf16.msk.msra.mxu0 %vm7541_vm2, %v7726_v43  ;;  %v1411_v33 = vadd.f32 %v1407_v19, %v1399_v21  ;;  %v1622_v1 = vmul.f32 0.39126182, %v8079_v53  ;;  %6905 = vmatprep.subr.msk.bf16.mxu1 %vm7541_vm2, %v7726_v43  ;;  %v1610_v41 = vadd.f32 %v1606_v29, %v1602_v27  ;;  %v1630_v2 = vmul.f32 0.24196488, %v8088_v0  ;;  %v5591_v37 = vld [vmem:[%s7548_s12 + $0x72] sm:$0xff]  ;;  %v10446_v8 = vld [vmem:[#allocation30_spill] sm:$0xff] }
  0x8e   : > { %v1433_v18 = vadd.f32 %v1429_v58, %v1421_v47  ;;  %6910 = vmatprep.subr.bf16.mxu0 %v7848_v12  ;;  %v1604_v26 = vmul.f32 0.0051764394, %v5592_v32  ;;  %v3814_v11 = vadd.f32 %v10446_v8, %v3806_v40  ;;  %v1638_v53 = vmul.f32 0.057227775, %v8109_v51  ;;  %v5596_v29 = vld [vmem:[%s7548_s12 + $0xa0] sm:$0xff] }
  0x8f   : > { %v1423_v7 = vadd.f32 %v1419_v16, %v1411_v33  ;;  %v1616_v19 = vmul.f32 0.24196488, %v8092_v30  ;;  %v1618_v60 = vadd.f32 %v1614_v59, %v1610_v41  ;;  %v1650_v3 = vmul.f32 0.0051764394, %v5594_v14  ;;  %v5593_v21 = vld [vmem:[%s7548_s12 + $0xa2] sm:$0xff]  ;;  %v5595_v16 = vld [vmem:[%s7548_s12 + $0x78] sm:$0xff] }
  0x90   : > { %6394 = vmatmul.mubr.msk.f32.vlgmr.msra.gmra.mrb[10].mxu0 %vm305_vm3, %v1433_v18  ;;  %v1612_v47 = vadd.f32 %v1608_v52, %v1604_v26  ;;  %v1624_v58 = vmul.f32 0.39126182, %v8112_v31  ;;  %6908 = vmatpush3.bf16.msk.msra.mxu1 %vm7541_vm2, %v7726_v43  ;;  %v1632_v0 = vmul.f32 0.24196488, %v8117_v6  ;;  %v1640_v30 = vmul.f32 0.057227775, %v8122_v13 }
  0x91   : > { %v1435_v40 = vadd.f32 %v1431_v34, %v1423_v7  ;;  %6912 = vmatpush3.bf16.msra.mxu0 %v7848_v12  ;;  %v1603_v32 = vmul.f32 0.0051764394, %v5591_v37  ;;  %v8215_v51 = vadd.f32 %v8034_v49, %v3814_v11  ;;  %6924 = vmatprep.subr.bf16.mxu1 %v7848_v12  ;;  %v1626_v31 = vadd.f32 %v1622_v1, %v1618_v60  ;;  %v5597_v14 = vld [vmem:[%s7548_s12 + $0xa8] sm:$0xff] }
  0x92   : > { %6914 = vmatprep.subr.bf16.mxu0 %v7850_v10  ;;  %v1620_v52 = vadd.f32 %v1616_v19, %v1612_v47  ;;  %v1615_v43 = vmul.f32 0.24196488, %v8129_v17  ;;  %v1652_v34 = vmul.f32 0.0051764394, %v5596_v29  ;;  %v1623_v6 = vmul.f32 0.39126182, %v8135_v46 }
  0x93   : > { %v1611_v27 = vadd.f32 %v1607_v36, %v1603_v32  ;;  %v1631_v13 = vmul.f32 0.24196488, %v8141_v4  ;;  %6409 = vmatmul.mubr.msk.f32.vlgmr.msra.gmra.mrb[10].mxu1 %vm305_vm3, %v1435_v40  ;;  %v1634_v49 = vadd.f32 %v1630_v2, %v1626_v31  ;;  %v1605_v28 = vmul.f32 0.0051764394, %v5593_v21  ;;  %v8236_v2 = vld [vmem:[%s7559_s25 + $0x11] sm:$0xff] }
  0x94   : > { %v1628_v59 = vadd.f32 %v1624_v58, %v1620_v52  ;;  %v1617_v33 = vmul.f32 0.24196488, %v8148_v39  ;;  %6926 = vmatpush3.bf16.msra.mxu1 %v7848_v12  ;;  %v1639_v36 = vmul.f32 0.057227775, %v8154_v35  ;;  %v1651_v1 = vmul.f32 0.0051764394, %v5595_v16 }
  0x95   : > { %6916 = vmatpush3.bf16.msra.mxu0 %v7850_v10  ;;  %v1619_v17 = vadd.f32 %v1615_v43, %v1611_v27  ;;  %v1625_v46 = vmul.f32 0.39126182, %v8157_v45  ;;  %6928 = vmatprep.subr.bf16.mxu1 %v7850_v10  ;;  %v1642_v4 = vadd.f32 %v1638_v53, %v1634_v49  ;;  %v1613_v39 = vadd.f32 %v1609_v61, %v1605_v28  ;;  %v5608_v45 = vld [vmem:[%s10400_s3 + $0xa0] sm:$0xff]  ;;  %v5609_v61 = vld [vmem:[%s10400_s3 + $0xa8] sm:$0xff] }
  0x96   : > { %6919 = vmatprep.subr.msk.bf16.mxu0 %vm7541_vm2, %v7886_v44  ;;  %v1636_v18 = vadd.f32 %v1632_v0, %v1628_v59  ;;  %v1633_v41 = vmul.f32 0.24196488, %v8162_v23  ;;  %v1641_v37 = vmul.f32 0.057227775, %v8172_v57  ;;  %v1653_v35 = vmul.f32 0.0051764394, %v5597_v14 }
  0x97   : > { %v1627_v26 = vadd.f32 %v1623_v6, %v1619_v17  ;;  %v1874_v8 = vmul.f32 0.003107942, %v7925_v63  ;;  %v1654_v11 = vadd.f32 %v1650_v3, %v1642_v4  ;;  %v1621_v19 = vadd.f32 %v1617_v33, %v1613_v39  ;;  %v5610_v23 = vld [vmem:[%s10400_s3 + $0xb0] sm:$0xff]  ;;  %v5611_v57 = vld [vmem:[%s10400_s3 + $0xb8] sm:$0x3] }
  0x98   : > { %v1644_v7 = vadd.f32 %v1640_v30, %v1636_v18  ;;  %v1875_v53 = vmul.f32 0.003107942, %v7891_v24  ;;  %6930 = vmatpush3.bf16.msra.mxu1 %v7850_v10  ;;  %v1882_v3 = vmul.f32 0.014747214, %v7928_v25  ;;  %v8259_v47 = vmul.f32 0.014747214, %v8236_v2 }
  0x99   : > { %6922 = vmatpush3.bf16.msk.msra.mxu0 %vm7541_vm2, %v7886_v44  ;;  %v1635_v60 = vadd.f32 %v1631_v13, %v1627_v26  ;;  %v1890_v58 = vmul.f32 0.04950763, %v7874_v55  ;;  %6933 = vmatprep.subr.msk.bf16.mxu1 %vm7541_vm2, %v7886_v44  ;;  %v1629_v21 = vadd.f32 %v1625_v46, %v1621_v19  ;;  %v1891_v40 = vmul.f32 0.04950763, %v8007_v20  ;;  %v2694_v6 = vld [vmem:[%s7559_s25 + $0xd] sm:$0xff]  ;;  %v8290_v4 = vld [vmem:[%s7559_s25 + $0x15] sm:$0xff] }
  0x9a   : > { %6423 = vmatprep.mubr.msk.f32.mxu0 %vm305_vm3, %v1654_v11  ;;  %v1656_v29 = vadd.f32 %v1652_v34, %v1644_v7  ;;  %v1898_v0 = vmul.f32 0.11758703, %v7688_v62  ;;  %6938 = vmatprep.subr.bf16.mxu0 %v7920_v15  ;;  %v1886_v32 = vadd.f32 %v1882_v3, %v1874_v8  ;;  %v1887_v31 = vadd.f32 %v8259_v47, %v1875_v53  ;;  %v7294_v62 = vld [vmem:[%s7559_s25 + $0xc] sm:$0xff]  ;;  %v8282_v59 = vld [vmem:[%s7559_s25 + $0x14] sm:$0xff] }
  0x9b   : > { %v1643_v30 = vadd.f32 %v1639_v36, %v1635_v60  ;;  %v1899_v52 = vmul.f32 0.11758703, %v7723_v42  ;;  %v1637_v43 = vadd.f32 %v1633_v41, %v1629_v21  ;;  %v8272_v16 = vpack.c.bf16 %v5609_v61, %v5608_v45  ;;  %v2702_v33 = vld [vmem:[%s7559_s25 + $0xe] sm:$0xff] }
  0x9c   : > { %6438 = vmatprep.mubr.msk.f32.mxu1 %vm305_vm3, %v1656_v29  ;;  %v8274_v34 = vpack.c.bf16 %v5611_v57, %v5610_v23  ;;  %v1906_v27 = vmul.f32 0.1975931, %v7294_v62  ;;  %6936 = vmatpush3.bf16.msk.msra.mxu1 %vm7541_vm2, %v7886_v44  ;;  %v1894_v49 = vadd.f32 %v1890_v58, %v1886_v32  ;;  %v1895_v42 = vadd.f32 %v1891_v40, %v1887_v31  ;;  %v2714_v14 = vld [vmem:[%s7559_s25 + $0xf] sm:$0xff] }
  0x9d   : > { %v1655_v13 = vadd.f32 %v1651_v1, %v1643_v30  ;;  %v1907_v28 = vmul.f32 0.1975931, %v8282_v59  ;;  %v1645_v17 = vadd.f32 %v1641_v37, %v1637_v43  ;;  %6952 = vmatprep.subr.bf16.mxu1 %v7920_v15  ;;  %v7296_v36 = vld [vmem:[%s7559_s25 + $0xd] sm:$0xff]  ;;  %v1915_v18 = vmul.f32 0.23491417, %v8290_v4 }
  0x9e   : > { %v1914_v46 = vmul.f32 0.23491417, %v7296_v36  ;;  %v7298_v39 = vld [vmem:[%s7559_s25 + $0xe] sm:$0xff]  ;;  %v1902_v41 = vadd.f32 %v1898_v0, %v1894_v49  ;;  %v1903_v26 = vadd.f32 %v1899_v52, %v1895_v42  ;;  %v2698_v8 = vmul.f32 0.0019437153, %v2694_v6 }
  0x9f   : > { %v1922_v1 = vmul.f32 0.1975931, %v7298_v39  ;;  %6424 = vmatmul.mubr.msk.f32.vlgmr.msra.gmra.mrb[12].mxu0 %vm305_vm3, %v1655_v13  ;;  %v8296_v45 = vld [vmem:[%s7559_s25 + $0xf] sm:$0xff]  ;;  %v1657_v11 = vadd.f32 %v1653_v35, %v1645_v17  ;;  %v1938_v7 = vmul.f32 0.04950763, %v7891_v24 }
  0xa0   : > { %v1930_v37 = vmul.f32 0.11758703, %v8296_v45  ;;  %6940 = vmatpush3.bf16.msra.mxu0 %v7920_v15  ;;  %v2706_v19 = vmul.f32 0.0053566243, %v2702_v33  ;;  %v2718_v61 = vmul.f32 0.012895808, %v2714_v14  ;;  %v1910_v23 = vadd.f32 %v1906_v27, %v1902_v41 }
  0xa1   : > { %6942 = vmatprep.subr.bf16.mxu0 %v8272_v16  ;;  %v1911_v57 = vadd.f32 %v1907_v28, %v1903_v26  ;;  %v1958_v53 = vmul.f32 0.003107942, %v8007_v20  ;;  %v2726_v60 = vmul.f32 0.027120944, %v7891_v24  ;;  %v3705_v3 = vld [vmem:[%s7559_s25 + $0xb] sm:$0xff]  ;;  %6439 = vmatmul.mubr.msk.f32.vlgmr.msra.gmra.mrb[12].mxu1 %vm305_vm3, %v1657_v11  ;;  %v7300_v40 = vld [vmem:[%s7559_s25 + $0x13] sm:$0xff] }
  0xa2   : > { %v3717_v58 = vld [vmem:[%s7559_s25 + $0xc] sm:$0xff]  ;;  %v2710_v35 = vadd.f32 %v2706_v19, %v2698_v8  ;;  %v8308_v29 = vmul.f32 0.049826447, %v8236_v2  ;;  %v2742_v21 = vmul.f32 0.079967566, %v8007_v20  ;;  %6954 = vmatpush3.bf16.msra.mxu1 %v7920_v15  ;;  %v1918_v30 = vadd.f32 %v1914_v46, %v1910_v23 }
  0xa3   : > { %v2750_v0 = vmul.f32 0.11211578, %v7300_v40  ;;  %v2758_v32 = vmul.f32 0.13731514, %v8282_v59  ;;  %v8315_v31 = vmul.f32 0.14691597, %v8290_v4  ;;  %6956 = vmatprep.subr.bf16.mxu1 %v8272_v16  ;;  %v8320_v43 = vadd.f32 %v1915_v18, %v1911_v57 }
  0xa4   : > { %10447 = vst [vmem:[#allocation14_spill] sm:$0xff] %v8308_v29  ;;  %v3677_v52 = vmul.f32 0.0011967713, %v7925_v63  ;;  %6944 = vmatpush3.bf16.msra.mxu0 %v8272_v16  ;;  %v2722_v62 = vadd.f32 %v2718_v61, %v2710_v35  ;;  %v3685_v27 = vmul.f32 0.002269271, %v7928_v25  ;;  %v1926_v49 = vadd.f32 %v1922_v1, %v1918_v30 }
  0xa5   : > { %v3697_v13 = vmul.f32 0.0040881946, %v7874_v55  ;;  %6947 = vmatprep.subr.msk.bf16.mxu0 %vm7541_vm2, %v8274_v34  ;;  %v8328_v42 = vmul.f32 0.027120944, %v8007_v20  ;;  %v3709_v63 = vmul.f32 0.006997561, %v3705_v3 }
  0xa6   : > { %v3721_v28 = vmul.f32 0.011379727, %v3717_v58  ;;  %v2730_v17 = vadd.f32 %v2726_v60, %v2722_v62  ;;  %v3689_v36 = vadd.f32 %v3685_v27, %v3677_v52  ;;  %v3729_v46 = vmul.f32 0.017582757, %v2694_v6  ;;  %6958 = vmatpush3.bf16.msra.mxu1 %v8272_v16  ;;  %v8374_v52 = vld [vmem:[%s7559_s25 + $0x43] sm:$0xff] }
  0xa7   : > { %10448 = vst [vmem:[#allocation15_spill] sm:$0xff] %v8328_v42  ;;  %v3737_v18 = vmul.f32 0.025811432, %v2702_v33  ;;  %v1934_v25 = vadd.f32 %v1930_v37, %v1926_v49  ;;  %v3745_v39 = vmul.f32 0.03600039, %v2714_v14  ;;  %6961 = vmatprep.subr.msk.bf16.mxu1 %vm7541_vm2, %v8274_v34  ;;  %v7303_v49 = vld [vmem:[%s7559_s25 + $0x3c] sm:$0xff] }
  0xa8   : > { %v8332_v55 = vmul.f32 0.047705922, %v7891_v24  ;;  %v8335_v41 = vmul.f32 0.06006305, %v8236_v2  ;;  %6950 = vmatpush3.bf16.msk.msra.mxu0 %vm7541_vm2, %v8274_v34  ;;  %v2738_v6 = vadd.f32 %v8308_v29, %v2730_v17  ;;  %v3701_v33 = vadd.f32 %v3697_v13, %v3689_v36  ;;  %v8350_v24 = vld [vmem:[%s7559_s25 + $0x41] sm:$0xff] }
  0xa9   : > { %v8345_v1 = vmul.f32 0.071847625, %v8007_v20  ;;  %v8347_v14 = vmul.f32 0.08165588, %v7300_v40  ;;  %v1942_v2 = vadd.f32 %v1938_v7, %v1934_v25  ;;  %v3830_v37 = vmul.f32 0.047705922, %v8007_v20  ;;  %6966 = vmatprep.subr.bf16.mxu0 %v7848_v12 }
  0xaa   : > { %v3826_v26 = vadd.f32 %v8165_v54, %v8335_v41  ;;  %v1876_v8 = vmul.f32 0.003107942, %v7988_v38  ;;  %v2746_v11 = vadd.f32 %v2742_v21, %v2738_v6  ;;  %v3713_v19 = vadd.f32 %v3709_v63, %v3701_v33  ;;  %6964 = vmatpush3.bf16.msk.msra.mxu1 %vm7541_vm2, %v8274_v34  ;;  %v8386_v36 = vld [vmem:[%s7559_s25 + $0x44] sm:$0xff] }
  0xab   : > { %v1877_v61 = vmul.f32 0.003107942, %v7954_v48  ;;  %v1884_v23 = vmul.f32 0.014747214, %v7991_v56  ;;  %v1950_v54 = vadd.f32 %v1942_v2, %v8259_v47  ;;  %v8366_v20 = vmul.f32 0.014747214, %v8350_v24  ;;  %6980 = vmatprep.subr.bf16.mxu1 %v7848_v12 }
  0xac   : > { %v8363_v7 = vadd.f32 %v3830_v37, %v3826_v26  ;;  %v1892_v57 = vmul.f32 0.04950763, %v7939_v22  ;;  %v2754_v60 = vadd.f32 %v2750_v0, %v2746_v11  ;;  %v3725_v3 = vadd.f32 %v3721_v28, %v3713_v19  ;;  %v7301_v47 = vld [vmem:[%s7559_s25 + $0x3b] sm:$0xff]  ;;  %v8393_v37 = vld [vmem:[%s7559_s25 + $0x45] sm:$0xff] }
  0xad   : > { %v1888_v58 = vadd.f32 %v1884_v23, %v1876_v8  ;;  %v1893_v35 = vmul.f32 0.04950763, %v8037_v50  ;;  %v1962_v21 = vadd.f32 %v1958_v53, %v1950_v54  ;;  %v1889_v40 = vadd.f32 %v8366_v20, %v1877_v61  ;;  %v2704_v25 = vld [vmem:[%s7559_s25 + $0x3e] sm:$0xff] }
  0xae   : > { %v1900_v30 = vmul.f32 0.11758703, %v7301_v47  ;;  %v1901_v62 = vmul.f32 0.11758703, %v8374_v52  ;;  %v3733_v0 = vadd.f32 %v3729_v46, %v3725_v3  ;;  %v8378_v27 = vmul.f32 0.08817236, %v8282_v59 }
  0xaf   : > { %v1896_v13 = vadd.f32 %v1892_v57, %v1888_v58  ;;  %v1908_v53 = vmul.f32 0.1975931, %v7303_v49  ;;  %6453 = vmatprep.mubr.msk.f32.mxu0 %vm305_vm3, %v1962_v21  ;;  %v2762_v63 = vadd.f32 %v2758_v32, %v2754_v60  ;;  %v8383_v28 = vmul.f32 0.09045811, %v8290_v4  ;;  %v2696_v59 = vld [vmem:[%s7559_s25 + $0x3d] sm:$0xff] }
  0xb0   : > { %v1897_v17 = vadd.f32 %v1893_v35, %v1889_v40  ;;  %v1909_v46 = vmul.f32 0.1975931, %v8386_v36  ;;  %v3741_v6 = vadd.f32 %v3737_v18, %v3733_v0  ;;  %v7305_v2 = vld [vmem:[%s7559_s25 + $0x3d] sm:$0xff]  ;;  %v1917_v8 = vmul.f32 0.23491417, %v8393_v37 }
  0xb1   : > { %v1904_v33 = vadd.f32 %v1900_v30, %v1896_v13  ;;  %v1916_v26 = vmul.f32 0.23491417, %v7305_v2  ;;  %v2716_v32 = vld [vmem:[%s7559_s25 + $0x3f] sm:$0xff]  ;;  %v1940_v54 = vmul.f32 0.04950763, %v7954_v48 }
  0xb2   : > { %v1905_v11 = vadd.f32 %v1901_v62, %v1897_v17  ;;  %v7307_v4 = vld [vmem:[%s7559_s25 + $0x3e] sm:$0xff]  ;;  %v3749_v57 = vadd.f32 %v3745_v39, %v3741_v6  ;;  %v2700_v60 = vmul.f32 0.0019437153, %v2696_v59  ;;  %v2708_v3 = vmul.f32 0.0053566243, %v2704_v25 }
  0xb3   : > { %v1924_v19 = vmul.f32 0.1975931, %v7307_v4  ;;  %v8399_v61 = vld [vmem:[%s7559_s25 + $0x3f] sm:$0xff]  ;;  %v1912_v18 = vadd.f32 %v1908_v53, %v1904_v33  ;;  %v1960_v35 = vmul.f32 0.003107942, %v8037_v50  ;;  %v8411_v39 = vadd.f32 %v8315_v31, %v2762_v63  ;;  %v5675_v31 = vld [vmem:[%s10400_s3 + $0xc8] sm:$0xff] }
  0xb4   : > { %10449 = vst [vmem:[#allocation27_spill] sm:$0xff] %v8399_v61  ;;  %v1932_v23 = vmul.f32 0.11758703, %v8399_v61  ;;  %v1913_v58 = vadd.f32 %v1909_v46, %v1905_v11  ;;  %v2720_v21 = vmul.f32 0.012895808, %v2716_v32  ;;  %v3757_v47 = vadd.f32 %v8332_v55, %v3749_v57  ;;  %v3707_v13 = vld [vmem:[%s7559_s25 + $0x3b] sm:$0xff] }
  0xb5   : > { %v2728_v40 = vmul.f32 0.027120944, %v7954_v48  ;;  %v1920_v30 = vadd.f32 %v1916_v26, %v1912_v18  ;;  %v2712_v62 = vadd.f32 %v2708_v3, %v2700_v60  ;;  %v8407_v0 = vmul.f32 0.049826447, %v8350_v24  ;;  %10451 = vst [vmem:[#allocation19_spill] sm:$0xff] %v8411_v39  ;;  %v3719_v2 = vld [vmem:[%s7559_s25 + $0x3c] sm:$0xff] }
  0xb6   : > { %v2744_v49 = vmul.f32 0.079967566, %v8037_v50  ;;  %v2752_v53 = vmul.f32 0.11211578, %v8374_v52  ;;  %v2760_v17 = vmul.f32 0.13731514, %v8386_v36  ;;  %v3765_v46 = vadd.f32 %v8335_v41, %v3757_v47 }
  0xb7   : > { %10450 = vst [vmem:[#allocation29_spill] sm:$0xff] %v8407_v0  ;;  %v1928_v6 = vadd.f32 %v1924_v19, %v1920_v30  ;;  %v2724_v33 = vadd.f32 %v2720_v21, %v2712_v62  ;;  %v2768_v55 = vmul.f32 0.14691597, %v8393_v37  ;;  %v5674_v26 = vld [vmem:[%s10400_s3 + $0xc0] sm:$0xff]  ;;  %v8425_v63 = vadd.f32 %v1917_v8, %v1913_v58 }
  0xb8   : > { %v3679_v11 = vmul.f32 0.0011967713, %v7988_v38  ;;  %v3687_v4 = vmul.f32 0.002269271, %v7991_v56  ;;  %v3699_v41 = vmul.f32 0.0040881946, %v7939_v22  ;;  %v3773_v19 = vadd.f32 %v8345_v1, %v3765_v46 }
  0xb9   : > { %v1936_v57 = vadd.f32 %v1932_v23, %v1928_v6  ;;  %v2732_v18 = vadd.f32 %v2728_v40, %v2724_v33  ;;  %v8432_v60 = vmul.f32 0.027120944, %v8037_v50  ;;  %v3711_v21 = vmul.f32 0.006997561, %v3707_v13  ;;  %v1955_v33 = vld [vmem:[%s7559_s25 + $0x1a] sm:$0xff] }
  0xba   : > { %v3691_v3 = vadd.f32 %v3687_v4, %v3679_v11  ;;  %v3723_v47 = vmul.f32 0.011379727, %v3719_v2  ;;  %v8434_v30 = vpack.c.bf16 %v5675_v31, %v5674_v26  ;;  %v3781_v8 = vadd.f32 %v8347_v14, %v3773_v19  ;;  %v7309_v26 = vld [vmem:[%s7559_s25 + $0x16] sm:$0xff] }
  0xbb   : > { %10452 = vst [vmem:[#allocation20_spill] sm:$0xff] %v8432_v60  ;;  %v1944_v58 = vadd.f32 %v1940_v54, %v1936_v57  ;;  %v2740_v38 = vadd.f32 %v8407_v0, %v2732_v18  ;;  %v3731_v56 = vmul.f32 0.017582757, %v2696_v59  ;;  %v3739_v22 = vmul.f32 0.025811432, %v2704_v25  ;;  %v8461_v11 = vld [vmem:[%s7559_s25 + $0x17] sm:$0xff] }
  0xbc   : > { %v3703_v62 = vadd.f32 %v3699_v41, %v3691_v3  ;;  %v3747_v1 = vmul.f32 0.03600039, %v2716_v32  ;;  %v8439_v23 = vmul.f32 0.06006305, %v8350_v24  ;;  %v3789_v40 = vadd.f32 %v8378_v27, %v3781_v8  ;;  %10453 = vst [vmem:[#allocation21_spill] sm:$0xff] %v8461_v11  ;;  %v10454_v4 = vld [vmem:[#allocation23_spill] sm:$0xff] }
  0xbd   : > { %v1952_v13 = vadd.f32 %v1944_v58, %v8366_v20  ;;  %v2748_v46 = vadd.f32 %v2744_v49, %v2740_v38  ;;  %v3755_v14 = vmul.f32 0.047705922, %v7954_v48  ;;  %v8445_v59 = vmul.f32 0.071847625, %v8037_v50  ;;  %v1946_v49 = vld [vmem:[%s7559_s25 + $0x19] sm:$0xff]  ;;  %v1947_v38 = vld [vmem:[%s7559_s25 + $0x49] sm:$0xff] }
  0xbe   : > { %v3715_v54 = vadd.f32 %v3711_v21, %v3703_v62  ;;  %v8448_v25 = vmul.f32 0.08165588, %v8374_v52  ;;  %v3828_v24 = vadd.f32 %v8215_v51, %v8439_v23  ;;  %v3797_v32 = vadd.f32 %v8383_v28, %v3789_v40  ;;  %v10457_v3 = vld [vmem:[#allocation31_spill] sm:$0xff]  ;;  %v10466_v60 = vld [vmem:[#allocation25_spill] sm:$0xff] }
  0xbf   : > { %v1964_v27 = vadd.f32 %v1960_v35, %v1952_v13  ;;  %v2756_v6 = vadd.f32 %v2752_v53, %v2748_v46  ;;  %v3832_v20 = vmul.f32 0.047705922, %v8037_v50  ;;  %v8457_v48 = vmul.f32 0.08817236, %v8386_v36  ;;  %v10460_v62 = vld [vmem:[#allocation39_spill] sm:$0xff]  ;;  %v8485_v46 = vld [vmem:[%s7559_s25 + $0x47] sm:$0xff] }
  0xc0   : > { %v3727_v2 = vadd.f32 %v3723_v47, %v3715_v54  ;;  %v1923_v31 = vmul.f32 0.1975931, %v7309_v26  ;;  %v1931_v52 = vmul.f32 0.11758703, %v8461_v11  ;;  %v3805_v51 = vadd.f32 %v10454_v4, %v3797_v32  ;;  %10461 = vst [vmem:[#allocation39_spill] sm:$0xff] %v8485_v46  ;;  %v10462_v32 = vld [vmem:[#allocation37_spill] sm:$0xff] }
  0xc1   : > { %6468 = vmatprep.mubr.msk.f32.mxu1 %vm305_vm3, %v1964_v27  ;;  %v2764_v28 = vadd.f32 %v2760_v17, %v2756_v6  ;;  %v8467_v50 = vmul.f32 0.09045811, %v8393_v37  ;;  %v1939_v36 = vmul.f32 0.04950763, %v8022_v5  ;;  %v8470_v53 = vadd.f32 %v3832_v20, %v3828_v24  ;;  %v7311_v5 = vld [vmem:[%s7559_s25 + $0x46] sm:$0xff]  ;;  %v5657_v11 = vld [vmem:[%s7548_s12 + $0xd1] sm:$0xff] }
  0xc2   : > { %v3735_v35 = vadd.f32 %v3731_v56, %v3727_v2  ;;  %v1927_v41 = vadd.f32 %v1923_v31, %v8320_v43  ;;  %v1948_v19 = vmul.f32 0.014747214, %v1946_v49  ;;  %v1959_v57 = vmul.f32 0.003107942, %v1955_v33  ;;  %v1957_v56 = vld [vmem:[%s7559_s25 + $0x4a] sm:$0xff] }
  0xc3   : > { %10455 = vst [vmem:[#allocation30_spill] sm:$0xff] %v8470_v53  ;;  %v8473_v18 = vmul.f32 0.049826447, %v1946_v49  ;;  %v3813_v21 = vadd.f32 %v10457_v3, %v3805_v51  ;;  %v3824_v17 = vmul.f32 0.06006305, %v1946_v49  ;;  %v8476_v47 = vadd.f32 %v2768_v55, %v2764_v28  ;;  %v5618_v6 = vld [vmem:[%s7548_s12 + $0xca] sm:$0xff] }
  0xc4   : > { %v3743_v37 = vadd.f32 %v3739_v22, %v3735_v35  ;;  %v1935_v8 = vadd.f32 %v1931_v52, %v1927_v41  ;;  %v1925_v58 = vmul.f32 0.1975931, %v7311_v5  ;;  %v8481_v43 = vmul.f32 0.027120944, %v1955_v33  ;;  %v5622_v20 = vld [vmem:[%s7548_s12 + $0xcb] sm:$0xff]  ;;  %v5620_v5 = vld [vmem:[%s7548_s12 + $0xfa] sm:$0xff] }
  0xc5   : > { %10456 = vst [vmem:[#allocation23_spill] sm:$0xff] %v8473_v18  ;;  %10458 = vst [vmem:[#allocation31_spill] sm:$0xff] %v8476_v47  ;;  %v3821_v40 = vadd.f32 %v10460_v62, %v3813_v21  ;;  %v3831_v13 = vmul.f32 0.047705922, %v1955_v33  ;;  %v1933_v54 = vmul.f32 0.11758703, %v8485_v46 }
  0xc6   : > { %10459 = vst [vmem:[#allocation41_spill] sm:$0xff] %v8481_v43  ;;  %v3751_v55 = vadd.f32 %v3747_v1, %v3743_v37  ;;  %v1943_v22 = vadd.f32 %v1939_v36, %v1935_v8  ;;  %v1929_v24 = vadd.f32 %v1925_v58, %v8425_v63  ;;  %v1941_v27 = vmul.f32 0.04950763, %v10462_v32  ;;  %v5626_v49 = vld [vmem:[%s7548_s12 + $0xcc] sm:$0xff]  ;;  %v5624_v58 = vld [vmem:[%s7548_s12 + $0xfb] sm:$0xff] }
  0xc7   : > { %v3827_v2 = vadd.f32 %v3824_v17, %v3821_v40  ;;  %v1949_v26 = vmul.f32 0.014747214, %v1947_v38  ;;  %v1961_v31 = vmul.f32 0.003107942, %v1957_v56  ;;  %v8493_v33 = vmul.f32 0.049826447, %v1947_v38 }
  0xc8   : > { %v3759_v52 = vadd.f32 %v3755_v14, %v3751_v55  ;;  %v1951_v4 = vadd.f32 %v1948_v19, %v1943_v22  ;;  %v1937_v1 = vadd.f32 %v1933_v54, %v1929_v24  ;;  %v8495_v51 = vmul.f32 0.027120944, %v1957_v56  ;;  %v5630_v28 = vld [vmem:[%s7548_s12 + $0xcd] sm:$0xff]  ;;  %v5628_v22 = vld [vmem:[%s7548_s12 + $0xfc] sm:$0xff] }
  0xc9   : > { %10463 = vst [vmem:[#allocation37_spill] sm:$0xff] %v8493_v33  ;;  %v5634_v63 = vld [vmem:[%s7548_s12 + $0xce] sm:$0xff]  ;;  %v8500_v35 = vadd.f32 %v3831_v13, %v3827_v2  ;;  %v2147_v41 = vmul.f32 0.0051764394, %v5618_v6  ;;  %v2155_v3 = vmul.f32 0.057227775, %v5622_v20 }
  0xca   : > { %10464 = vst [vmem:[#allocation42_spill] sm:$0xff] %v8495_v51  ;;  %v5638_v36 = vld [vmem:[%s7548_s12 + $0xcf] sm:$0xff]  ;;  %v2167_v21 = vmul.f32 0.24196488, %v5626_v49  ;;  %v3767_v17 = vadd.f32 %v8439_v23, %v3759_v52  ;;  %v1963_v37 = vadd.f32 %v1959_v57, %v1951_v4  ;;  %v1945_v14 = vadd.f32 %v1941_v27, %v1937_v1  ;;  %v5632_v24 = vld [vmem:[%s7548_s12 + $0xfd] sm:$0xff] }
  0xcb   : > { %10465 = vst [vmem:[#allocation43_spill] sm:$0xff] %v8500_v35  ;;  %v8503_v8 = vmul.f32 0.06006305, %v1947_v38  ;;  %v8506_v19 = vld [vmem:[%s7548_s12 + $0xd0] sm:$0xff]  ;;  %v8510_v62 = vmul.f32 0.047705922, %v1957_v56  ;;  %v2159_v40 = vadd.f32 %v2155_v3, %v2147_v41 }
  0xcc   : > { %v2179_v13 = vmul.f32 0.39126182, %v5630_v28  ;;  %v2191_v54 = vmul.f32 0.24196488, %v5634_v63  ;;  %v3775_v55 = vadd.f32 %v8445_v59, %v3767_v17  ;;  %6454 = vmatmul.mubr.msk.f32.vlgmr.msra.gmra.mrb[14].mxu0 %vm305_vm3, %v1963_v37  ;;  %v1953_v23 = vadd.f32 %v1949_v26, %v1945_v14  ;;  %v5636_v1 = vld [vmem:[%s7548_s12 + $0xfe] sm:$0xff]  ;;  %v5656_v47 = vld [vmem:[%s7548_s12 + $0xc9] sm:$0xff] }
  0xcd   : > { %v2203_v57 = vmul.f32 0.057227775, %v5638_v36  ;;  %v2215_v38 = vmul.f32 0.0051764394, %v8506_v19  ;;  %6968 = vmatpush3.bf16.msra.mxu0 %v7848_v12  ;;  %v2171_v56 = vadd.f32 %v2167_v21, %v2159_v40  ;;  %v8518_v32 = vmul.f32 0.04950763, %v5618_v6 }
  0xce   : > { %v8520_v27 = vmul.f32 0.11758703, %v5622_v20  ;;  %v8522_v59 = vmul.f32 0.1975931, %v5626_v49  ;;  %v3783_v2 = vadd.f32 %v8448_v25, %v3775_v55  ;;  %v1965_v26 = vadd.f32 %v1961_v31, %v1953_v23  ;;  %6970 = vmatprep.subr.bf16.mxu0 %v7850_v10  ;;  %v5640_v41 = vld [vmem:[%s7548_s12 + $0xff] sm:$0xff]  ;;  %v8536_v49 = vld [vmem:[%s7548_s12 + $0xd2] sm:$0xff] }
  0xcf   : > { %v8526_v52 = vmul.f32 0.23491417, %v5630_v28  ;;  %v8528_v4 = vmul.f32 0.1975931, %v5634_v63  ;;  %v2183_v3 = vadd.f32 %v2179_v13, %v2171_v56  ;;  %v2149_v21 = vmul.f32 0.0051764394, %v5620_v5 }
  0xd0   : > { %v2157_v6 = vmul.f32 0.057227775, %v5624_v58  ;;  %v2169_v17 = vmul.f32 0.24196488, %v5628_v22  ;;  %v8533_v20 = vld [vmem:[%s7548_s12 + $0x100] sm:$0xff]  ;;  %v8539_v25 = vld [vmem:[%s7548_s12 + $0xd3] sm:$0xff]  ;;  %v3791_v31 = vadd.f32 %v8457_v48, %v3783_v2  ;;  %6469 = vmatmul.mubr.msk.f32.vlgmr.msra.gmra.mrb[14].mxu1 %vm305_vm3, %v1965_v26 }
  0xd1   : > { %v8543_v28 = vmul.f32 0.11758703, %v5638_v36  ;;  %v8546_v63 = vmul.f32 0.04950763, %v8506_v19  ;;  %v2181_v37 = vmul.f32 0.39126182, %v5632_v24  ;;  %6982 = vmatpush3.bf16.msra.mxu1 %v7848_v12  ;;  %6972 = vmatpush3.bf16.msra.mxu0 %v7850_v10  ;;  %v2195_v14 = vadd.f32 %v2191_v54, %v2183_v3 }
  0xd2   : > { %v2161_v40 = vadd.f32 %v2157_v6, %v2149_v21  ;;  %v2193_v13 = vmul.f32 0.24196488, %v5636_v1  ;;  %v2205_v55 = vmul.f32 0.057227775, %v5640_v41  ;;  %v8551_v48 = vld [vmem:[%s7548_s12 + $0xd4] sm:$0xff]  ;;  %v3799_v36 = vadd.f32 %v8467_v50, %v3791_v31  ;;  %6984 = vmatprep.subr.bf16.mxu1 %v7850_v10  ;;  %6975 = vmatprep.subr.msk.bf16.mxu0 %vm7541_vm2, %v7886_v44  ;;  %v10469_v33 = vld [vmem:[#allocation13_spill] sm:$0xff] }
  0xd3   : > { %v5631_v23 = vld [vmem:[%s7548_s12 + $0xd5] sm:$0xff]  ;;  %v2217_v12 = vmul.f32 0.0051764394, %v8533_v20  ;;  %v8560_v54 = vmul.f32 0.04950763, %v5620_v5  ;;  %v2207_v26 = vadd.f32 %v2203_v57, %v2195_v14  ;;  %v8577_v57 = vld [vmem:[%s7548_s12 + $0x102] sm:$0xff] }
  0xd4   : > { %v8562_v56 = vmul.f32 0.11758703, %v5624_v58  ;;  %v5635_v2 = vld [vmem:[%s7548_s12 + $0xd6] sm:$0xff]  ;;  %v2173_v3 = vadd.f32 %v2169_v17, %v2161_v40  ;;  %v8565_v21 = vmul.f32 0.1975931, %v5628_v22  ;;  %v3807_v0 = vadd.f32 %v10466_v60, %v3799_v36  ;;  %v8590_v14 = vld [vmem:[%s7548_s12 + $0x104] sm:$0xff] }
  0xd5   : > { %v8567_v50 = vmul.f32 0.23491417, %v5632_v24  ;;  %v5639_v6 = vld [vmem:[%s7548_s12 + $0xd7] sm:$0xff]  ;;  %v8572_v51 = vmul.f32 0.1975931, %v5636_v1  ;;  %6986 = vmatpush3.bf16.msra.mxu1 %v7850_v10  ;;  %6978 = vmatpush3.bf16.msk.msra.mxu0 %vm7541_vm2, %v7886_v44  ;;  %v2219_v22 = vadd.f32 %v2215_v38, %v2207_v26  ;;  %v8587_v1 = vld [vmem:[%s7548_s12 + $0x103] sm:$0xff] }
  0xd6   : > { %v5643_v31 = vld [vmem:[%s7548_s12 + $0xd8] sm:$0xff]  ;;  %v2148_v5 = vmul.f32 0.0051764394, %v8536_v49  ;;  %v2156_v58 = vmul.f32 0.057227775, %v8539_v25  ;;  %v2185_v24 = vadd.f32 %v2181_v37, %v2173_v3  ;;  %6989 = vmatprep.subr.msk.bf16.mxu1 %vm7541_vm2, %v7886_v44  ;;  %v5633_v37 = vld [vmem:[%s7548_s12 + $0x105] sm:$0xff]  ;;  %6994 = vmatprep.subr.bf16.mxu0 %v7920_v15 }
  0xd7   : > { %v8583_v17 = vmul.f32 0.11758703, %v5640_v41  ;;  %v2168_v60 = vmul.f32 0.24196488, %v8551_v48  ;;  %v10467_v40 = vld [vmem:[#allocation32_spill] sm:$0xff]  ;;  %v5637_v26 = vld [vmem:[%s7548_s12 + $0x106] sm:$0xff]  ;;  %6483 = vmatprep.mubr.msk.f32.mxu0 %vm305_vm3, %v2219_v22 }
  0xd8   : > { %v3815_v36 = vadd.f32 %v10467_v40, %v3807_v0  ;;  %v8597_v10 = vmul.f32 0.04950763, %v8533_v20  ;;  %v2160_v38 = vadd.f32 %v2156_v58, %v2148_v5  ;;  %v2180_v41 = vmul.f32 0.39126182, %v5631_v23  ;;  %v5641_v5 = vld [vmem:[%s7548_s12 + $0x107] sm:$0xff] }
  0xd9   : > { %v2197_v3 = vadd.f32 %v2193_v13, %v2185_v24  ;;  %v2192_v42 = vmul.f32 0.24196488, %v5635_v2  ;;  %v2204_v0 = vmul.f32 0.057227775, %v5639_v6  ;;  %v2216_v40 = vmul.f32 0.0051764394, %v5643_v31  ;;  %6992 = vmatpush3.bf16.msk.msra.mxu1 %vm7541_vm2, %v7886_v44 }
  0xda   : > { %10468 = vst [vmem:[#allocation25_spill] sm:$0xff] %v8597_v10  ;;  %v3823_v29 = vadd.f32 %v10469_v33, %v3815_v36  ;;  %v2172_v43 = vadd.f32 %v2168_v60, %v2160_v38  ;;  %v8604_v18 = vmul.f32 0.23491417, %v5631_v23  ;;  %v8606_v46 = vmul.f32 0.1975931, %v5635_v2  ;;  %v5645_v58 = vld [vmem:[%s7548_s12 + $0x108] sm:$0xff]  ;;  %7008 = vmatprep.subr.bf16.mxu1 %v7920_v15 }
  0xdb   : > { %v2209_v13 = vadd.f32 %v2205_v55, %v2197_v3  ;;  %v2150_v22 = vmul.f32 0.0051764394, %v8577_v57  ;;  %v2158_v24 = vmul.f32 0.057227775, %v8587_v1  ;;  %v2170_v33 = vmul.f32 0.24196488, %v8590_v14 }
  0xdc   : > { %v3829_v23 = vadd.f32 %v8503_v8, %v3823_v29  ;;  %v2184_v2 = vadd.f32 %v2180_v41, %v2172_v43  ;;  %v8617_v60 = vmul.f32 0.11758703, %v5639_v6  ;;  %v8619_v36 = vmul.f32 0.04950763, %v5643_v31  ;;  %v5652_v44 = vld [vmem:[%s7548_s12 + $0xc8] sm:$0xff]  ;;  %v5654_v6 = vld [vmem:[%s7548_s12 + $0xf8] sm:$0xff] }
  0xdd   : > { %v2221_v38 = vadd.f32 %v2217_v12, %v2209_v13  ;;  %v2162_v55 = vadd.f32 %v2158_v24, %v2150_v22  ;;  %v2182_v3 = vmul.f32 0.39126182, %v5633_v37  ;;  %v2194_v35 = vmul.f32 0.24196488, %v5637_v26  ;;  %v5658_v41 = vld [vmem:[%s7548_s12 + $0xf9] sm:$0xff]  ;;  %v5659_v22 = vld [vmem:[%s7548_s12 + $0x101] sm:$0xff] }
  0xde   : > { %v8626_v39 = vadd.f32 %v8510_v62, %v3829_v23  ;;  %v2196_v29 = vadd.f32 %v2192_v42, %v2184_v2  ;;  %v2206_v43 = vmul.f32 0.057227775, %v5641_v5  ;;  %v2218_v8 = vmul.f32 0.0051764394, %v5645_v58 }
  0xdf   : > { %6498 = vmatprep.mubr.msk.f32.mxu1 %vm305_vm3, %v2221_v38  ;;  %v2174_v31 = vadd.f32 %v2170_v33, %v2162_v55  ;;  %v8631_v53 = vmul.f32 0.23491417, %v5633_v37  ;;  %v8633_v12 = vmul.f32 0.1975931, %v5637_v26  ;;  %v2389_v13 = vmul.f32 0.003107942, %v5652_v44 }
  0xe0   : > { %v2208_v24 = vadd.f32 %v2204_v0, %v2196_v29  ;;  %v2390_v61 = vmul.f32 0.003107942, %v8506_v19  ;;  %v2397_v10 = vmul.f32 0.014747214, %v5656_v47  ;;  %v8637_v62 = vmul.f32 0.014747214, %v5657_v11 }
  0xe1   : > { %v2186_v42 = vadd.f32 %v2182_v3, %v2174_v31  ;;  %v8639_v23 = vmul.f32 0.11758703, %v5641_v5  ;;  %v2406_v2 = vmul.f32 0.04950763, %v8536_v49  ;;  %v2414_v38 = vmul.f32 0.11758703, %v8539_v25 }
  0xe2   : > { %v2220_v33 = vadd.f32 %v2216_v40, %v2208_v24  ;;  %v2401_v37 = vadd.f32 %v2397_v10, %v2389_v13  ;;  %v2402_v26 = vadd.f32 %v8637_v62, %v2390_v61  ;;  %v2422_v44 = vmul.f32 0.1975931, %v8551_v48  ;;  %v5660_v48 = vld [vmem:[%s7548_s12 + $0xd9] sm:$0xff] }
  0xe3   : > { %v2198_v0 = vadd.f32 %v2194_v35, %v2186_v42  ;;  %v2391_v55 = vmul.f32 0.003107942, %v5654_v6  ;;  %v2392_v47 = vmul.f32 0.003107942, %v8533_v20  ;;  %v2399_v11 = vmul.f32 0.014747214, %v5658_v41 }
  0xe4   : > { %6484 = vmatmul.mubr.msk.f32.vlgmr.msra.gmra.mrb[16].mxu0 %vm305_vm3, %v2220_v33  ;;  %v2409_v19 = vadd.f32 %v8518_v32, %v2401_v37  ;;  %v2410_v5 = vadd.f32 %v2406_v2, %v2402_v26  ;;  %v8648_v25 = vmul.f32 0.014747214, %v5659_v22  ;;  %v2408_v61 = vmul.f32 0.04950763, %v8577_v57  ;;  %v5663_v41 = vld [vmem:[%s7548_s12 + $0xda] sm:$0xff] }
  0xe5   : > { %v2210_v10 = vadd.f32 %v2206_v43, %v2198_v0  ;;  %v8651_v40 = vmul.f32 0.04950763, %v5645_v58  ;;  %6996 = vmatpush3.bf16.msra.mxu0 %v7920_v15  ;;  %v8655_v35 = vmul.f32 0.003107942, %v8536_v49  ;;  %v2403_v20 = vadd.f32 %v2399_v11, %v2391_v55  ;;  %v5661_v43 = vld [vmem:[%s7548_s12 + $0x109] sm:$0xff] }
  0xe6   : > { %6998 = vmatprep.subr.bf16.mxu0 %v8272_v16  ;;  %v2417_v32 = vadd.f32 %v8520_v27, %v2409_v19  ;;  %v2418_v3 = vadd.f32 %v2414_v38, %v2410_v5  ;;  %v2404_v29 = vadd.f32 %v8648_v25, %v2392_v47  ;;  %v2416_v6 = vmul.f32 0.11758703, %v8587_v1  ;;  %v5665_v58 = vld [vmem:[%s7548_s12 + $0x10a] sm:$0xff] }
  0xe7   : > { %v2222_v31 = vadd.f32 %v2218_v8, %v2210_v10  ;;  %v2411_v13 = vadd.f32 %v8560_v54, %v2403_v20  ;;  %v2424_v49 = vmul.f32 0.1975931, %v8590_v14  ;;  %v8668_v22 = vmul.f32 0.003107942, %v8577_v57  ;;  %v5676_v27 = vld [vmem:[%s10400_s3 + $0xd0] sm:$0xff]  ;;  %v5677_v8 = vld [vmem:[%s10400_s3 + $0xd8] sm:$0xff] }
  0xe8   : > { %v2425_v24 = vadd.f32 %v8522_v59, %v2417_v32  ;;  %v2426_v42 = vadd.f32 %v2422_v44, %v2418_v3  ;;  %v2412_v2 = vadd.f32 %v2408_v61, %v2404_v29  ;;  %v2463_v1 = vmul.f32 0.014747214, %v5660_v48  ;;  %v5678_v54 = vld [vmem:[%s10400_s3 + $0xe0] sm:$0xff]  ;;  %v5679_v57 = vld [vmem:[%s10400_s3 + $0xe8] sm:$0x3]  ;;  %v2811_v48 = vld [vmem:[%s7559_s25 + $0x13] sm:$0xff] }
  0xe9   : > { %6499 = vmatmul.mubr.msk.f32.vlgmr.msra.gmra.mrb[16].mxu1 %vm305_vm3, %v2222_v31  ;;  %7000 = vmatpush3.bf16.msra.mxu0 %v8272_v16  ;;  %v2419_v59 = vadd.f32 %v8562_v56, %v2411_v13  ;;  %v8686_v14 = vmul.f32 0.003107942, %v5663_v41  ;;  %v8688_v38 = vmul.f32 0.014747214, %v5661_v43  ;;  %v8690_v33 = vmul.f32 0.003107942, %v5665_v58 }
  0xea   : > { %7010 = vmatpush3.bf16.msra.mxu1 %v7920_v15  ;;  %7003 = vmatprep.subr.msk.bf16.mxu0 %vm7541_vm2, %v8274_v34  ;;  %v2433_v37 = vadd.f32 %v8526_v52, %v2425_v24  ;;  %v2434_v26 = vadd.f32 %v8604_v18, %v2426_v42  ;;  %v2420_v44 = vadd.f32 %v2416_v6, %v2412_v2  ;;  %v7313_v56 = vld [vmem:[%s7559_s25 + $0x5] sm:$0xff]  ;;  %v8722_v58 = vmul.f32 0.11211578, %v8296_v45  ;;  %v2835_v45 = vld [vmem:[%s7559_s25 + $0x15] sm:$0xff] }
  0xeb   : > { %v2697_v0 = vmul.f32 0.0019437153, %v7313_v56  ;;  %7012 = vmatprep.subr.bf16.mxu1 %v8272_v16  ;;  %v2427_v55 = vadd.f32 %v8565_v21, %v2419_v59  ;;  %v8701_v47 = vpack.c.bf16 %v5677_v8, %v5676_v27  ;;  %v7314_v11 = vld [vmem:[%s7559_s25 + $0x6] sm:$0xff]  ;;  %v8707_v20 = vpack.c.bf16 %v5679_v57, %v5678_v54 }
  0xec   : > { %v2705_v19 = vmul.f32 0.0053566243, %v7314_v11  ;;  %v7315_v5 = vld [vmem:[%s7559_s25 + $0x7] sm:$0xff]  ;;  %v2441_v52 = vadd.f32 %v8528_v4, %v2433_v37  ;;  %v2428_v10 = vadd.f32 %v2424_v49, %v2420_v44  ;;  %v2442_v18 = vadd.f32 %v8606_v46, %v2434_v26  ;;  %v7319_v26 = vld [vmem:[%s7559_s25 + $0x36] sm:$0xff] }
  0xed   : > { %v2717_v61 = vmul.f32 0.012895808, %v7315_v5  ;;  %7006 = vmatpush3.bf16.msk.msra.mxu0 %vm7541_vm2, %v8274_v34  ;;  %v2435_v21 = vadd.f32 %v8567_v50, %v2427_v55  ;;  %v7316_v3 = vld [vmem:[%s7559_s25 + $0x8] sm:$0xff]  ;;  %v8728_v13 = vmul.f32 0.012895808, %v2811_v48 }
  0xee   : > { %v2709_v32 = vadd.f32 %v2705_v19, %v2697_v0  ;;  %v2725_v29 = vmul.f32 0.027120944, %v7316_v3  ;;  %v7317_v6 = vld [vmem:[%s7559_s25 + $0x9] sm:$0xff]  ;;  %7014 = vmatpush3.bf16.msra.mxu1 %v8272_v16  ;;  %v2449_v46 = vadd.f32 %v8543_v28, %v2441_v52  ;;  %v2436_v4 = vadd.f32 %v8631_v53, %v2428_v10  ;;  %7022 = vmatprep.subr.bf16.mxu0 %v8434_v30  ;;  %v2823_v28 = vld [vmem:[%s7559_s25 + $0x14] sm:$0xff] }
  0xef   : > { %v2733_v41 = vmul.f32 0.049826447, %v7317_v6  ;;  %v2450_v43 = vadd.f32 %v8617_v60, %v2442_v18  ;;  %7017 = vmatprep.subr.msk.bf16.mxu1 %vm7541_vm2, %v8274_v34  ;;  %v2443_v50 = vadd.f32 %v8572_v51, %v2435_v21  ;;  %v3838_v49 = vmul.f32 0.03600039, %v2811_v48  ;;  %v10470_v59 = vld [vmem:[#allocation25_spill] sm:$0xff]  ;;  %v7321_v10 = vld [vmem:[%s7559_s25 + $0x38] sm:$0xff] }
  0xf0   : > { %v2721_v31 = vadd.f32 %v2717_v61, %v2709_v32  ;;  %v2457_v53 = vadd.f32 %v8546_v63, %v2449_v46  ;;  %v2444_v27 = vadd.f32 %v8633_v12, %v2436_v4  ;;  %v3846_v24 = vmul.f32 0.025811432, %v2823_v28  ;;  %v7318_v12 = vld [vmem:[%s7559_s25 + $0x35] sm:$0xff]  ;;  %v10471_v11 = vld [vmem:[#allocation33_spill] sm:$0xff]  ;;  %v10472_v21 = vld [vmem:[#allocation26_spill] sm:$0xff] }
  0xf1   : > { %v2458_v60 = vadd.f32 %v8619_v36, %v2450_v43  ;;  %v2451_v42 = vadd.f32 %v8583_v17, %v2443_v50  ;;  %v3842_v51 = vadd.f32 %v3838_v49, %v8363_v7  ;;  %v3854_v8 = vmul.f32 0.017582757, %v2835_v45  ;;  %v2813_v52 = vld [vmem:[%s7559_s25 + $0x43] sm:$0xff]  ;;  %v2812_v46 = vld [vmem:[%s7559_s25 + $0x1b] sm:$0xff]  ;;  %v10473_v4 = vld [vmem:[#allocation27_spill] sm:$0xff] }
  0xf2   : > { %v2729_v2 = vadd.f32 %v2725_v29, %v2721_v31  ;;  %7020 = vmatpush3.bf16.msk.msra.mxu1 %vm7541_vm2, %v8274_v34  ;;  %v2465_v63 = vadd.f32 %v2457_v53, %v8637_v62  ;;  %v2452_v36 = vadd.f32 %v8639_v23, %v2444_v27  ;;  %v2699_v57 = vmul.f32 0.0019437153, %v7318_v12  ;;  %v7320_v23 = vld [vmem:[%s7559_s25 + $0x37] sm:$0xff]  ;;  %v10474_v31 = vld [vmem:[#allocation10_spill] sm:$0xff] }
  0xf3   : > { %v2466_v54 = vadd.f32 %v2463_v1, %v2458_v60  ;;  %v2459_v37 = vadd.f32 %v10470_v59, %v2451_v42  ;;  %7036 = vmatprep.subr.bf16.mxu1 %v8434_v30  ;;  %v3850_v7 = vadd.f32 %v3846_v24, %v3842_v51  ;;  %v2707_v44 = vmul.f32 0.0053566243, %v7319_v26  ;;  %v7322_v29 = vld [vmem:[%s7559_s25 + $0x39] sm:$0xff] }
  0xf4   : > { %v2737_v17 = vadd.f32 %v2733_v41, %v2729_v2  ;;  %v2477_v56 = vadd.f32 %v8655_v35, %v2465_v63  ;;  %v2460_v1 = vadd.f32 %v8651_v40, %v2452_v36  ;;  %v2719_v0 = vmul.f32 0.012895808, %v7320_v23  ;;  %v2837_v41 = vld [vmem:[%s7559_s25 + $0x45] sm:$0xff]  ;;  %v10476_v42 = vld [vmem:[#allocation19_spill] sm:$0xff] }
  0xf5   : > { %v2478_v62 = vadd.f32 %v8686_v14, %v2466_v54  ;;  %v2467_v55 = vadd.f32 %v2459_v37, %v8648_v25  ;;  %v8752_v5 = vmul.f32 0.0053566243, %v2823_v28  ;;  %v2711_v61 = vadd.f32 %v2707_v44, %v2699_v57  ;;  %v2825_v25 = vld [vmem:[%s7559_s25 + $0x44] sm:$0xff]  ;;  %v10479_v54 = vld [vmem:[#allocation11_spill] sm:$0xff] }
  0xf6   : > { %v2745_v19 = vadd.f32 %v10471_v11, %v2737_v17  ;;  %6513 = vmatprep.mubr.msk.f32.mxu0 %vm305_vm3, %v2477_v56  ;;  %v2468_v35 = vadd.f32 %v8688_v38, %v2460_v1  ;;  %v8757_v14 = vmul.f32 0.0019437153, %v2835_v45  ;;  %v8759_v40 = vadd.f32 %v3854_v8, %v3850_v7  ;;  %v10475_v45 = vld [vmem:[#allocation30_spill] sm:$0xff]  ;;  %v10478_v8 = vld [vmem:[#allocation21_spill] sm:$0xff]  ;;  %v10480_v56 = vld [vmem:[#allocation12_spill] sm:$0xff] }
  0xf7   : > { %v2727_v18 = vmul.f32 0.027120944, %v7321_v10  ;;  %v2479_v48 = vadd.f32 %v8668_v22, %v2467_v55  ;;  %6514 = vmatmul.mubr.msk.f32.vlgmr.msra.gmra.mrb[18].mxu0 %vm305_vm3, %v2478_v62  ;;  %v2723_v3 = vadd.f32 %v2719_v0, %v2711_v61  ;;  %v2735_v6 = vmul.f32 0.049826447, %v7322_v29  ;;  %v10477_v2 = vld [vmem:[#allocation22_spill] sm:$0xff]  ;;  %v2836_v37 = vld [vmem:[%s7559_s25 + $0x1d] sm:$0xff] }
  0xf8   : > { %v2753_v32 = vadd.f32 %v10472_v21, %v2745_v19  ;;  %v2480_v38 = vadd.f32 %v8690_v33, %v2468_v35  ;;  %7024 = vmatpush3.bf16.msra.mxu0 %v8434_v30  ;;  %v8772_v43 = vmul.f32 0.11211578, %v10473_v4  ;;  %v8774_v50 = vmul.f32 0.012895808, %v2813_v52  ;;  %v2824_v33 = vld [vmem:[%s7559_s25 + $0x1c] sm:$0xff]  ;;  %v10481_v1 = vld [vmem:[#allocation35_spill] sm:$0xff] }
  0xf9   : > { %v3840_v22 = vmul.f32 0.03600039, %v2813_v52  ;;  %6528 = vmatprep.mubr.msk.f32.mxu1 %vm305_vm3, %v2479_v48  ;;  %7026 = vmatprep.subr.bf16.mxu0 %v8701_v47  ;;  %v2731_v49 = vadd.f32 %v2727_v18, %v2723_v3  ;;  %v8779_v53 = vmul.f32 0.0053566243, %v2825_v25  ;;  %v3848_v60 = vmul.f32 0.025811432, %v2825_v25 }
  0xfa   : > { %v2761_v28 = vadd.f32 %v10474_v31, %v2753_v32  ;;  %6529 = vmatmul.mubr.msk.f32.vlgmr.msra.gmra.mrb[18].mxu1 %vm305_vm3, %v2480_v38  ;;  %v8783_v27 = vmul.f32 0.0019437153, %v2837_v41  ;;  %v2778_v51 = vadd.f32 %v10477_v2, %v10476_v42  ;;  %v2782_v63 = vmul.f32 0.11211578, %v10478_v8  ;;  %v10482_v55 = vld [vmem:[#allocation31_spill] sm:$0xff]  ;;  %v10483_v11 = vld [vmem:[#allocation24_spill] sm:$0xff] }
  0xfb   : > { %v3844_v24 = vadd.f32 %v3840_v22, %v10475_v45  ;;  %7038 = vmatpush3.bf16.msra.mxu1 %v8434_v30  ;;  %v2739_v12 = vadd.f32 %v2735_v6, %v2731_v49  ;;  %v3856_v57 = vmul.f32 0.017582757, %v2837_v41  ;;  %v2816_v59 = vmul.f32 0.012895808, %v2812_v46  ;;  %v2814_v61 = vld [vmem:[%s7559_s25 + $0x4b] sm:$0xff]  ;;  %v10487_v29 = vld [vmem:[#allocation28_spill] sm:$0xff] }
  0xfc   : > { %v2769_v36 = vadd.f32 %v10479_v54, %v2761_v28  ;;  %7040 = vmatprep.subr.bf16.mxu1 %v8701_v47  ;;  %7028 = vmatpush3.bf16.msra.mxu0 %v8701_v47  ;;  %v2786_v7 = vadd.f32 %v2782_v63, %v2778_v51  ;;  %v2828_v26 = vmul.f32 0.0053566243, %v2824_v33  ;;  %v3839_v44 = vmul.f32 0.03600039, %v2812_v46  ;;  %v2826_v52 = vld [vmem:[%s7559_s25 + $0x4c] sm:$0xff]  ;;  %v10491_v45 = vld [vmem:[#allocation16_spill] sm:$0xff] }
  0xfd   : > { %v3852_v17 = vadd.f32 %v3848_v60, %v3844_v24  ;;  %7031 = vmatprep.subr.msk.bf16.mxu0 %vm7541_vm2, %v8707_v20  ;;  %v2747_v23 = vadd.f32 %v10481_v1, %v2739_v12  ;;  %v3847_v0 = vmul.f32 0.025811432, %v2824_v33  ;;  %v2780_v19 = vadd.f32 %v10483_v11, %v10482_v55  ;;  %v10484_v35 = vld [vmem:[#allocation38_spill] sm:$0xff]  ;;  %v10485_v25 = vld [vmem:[#allocation43_spill] sm:$0xff]  ;;  %v10492_v63 = vld [vmem:[#allocation41_spill] sm:$0xff] }
  0xfe   : > { %v2777_v62 = vadd.f32 %v10480_v56, %v2769_v36  ;;  %v2794_v10 = vadd.f32 %v10484_v35, %v2786_v7  ;;  %v8804_v18 = vmul.f32 0.0019437153, %v2836_v37  ;;  %v3843_v48 = vadd.f32 %v3839_v44, %v10485_v25  ;;  %v10486_v21 = vld [vmem:[#allocation39_spill] sm:$0xff]  ;;  %v8822_v49 = vld [vmem:[%s7548_s12 + $0x128] sm:$0xff]  ;;  %v10493_v36 = vld [vmem:[#allocation40_spill] sm:$0xff] }
  0xff   : > { %v2784_v32 = vmul.f32 0.11211578, %v10486_v21  ;;  %7042 = vmatpush3.bf16.msra.mxu1 %v8701_v47  ;;  %v2755_v6 = vadd.f32 %v10487_v29, %v2747_v23  ;;  %v8811_v41 = vadd.f32 %v3856_v57, %v3852_v17  ;;  %v3855_v46 = vmul.f32 0.017582757, %v2836_v37  ;;  %v2838_v38 = vld [vmem:[%s7559_s25 + $0x4d] sm:$0xff]  ;;  %v10495_v56 = vld [vmem:[#allocation17_spill] sm:$0xff] }
 0x100   : > { %v2785_v3 = vadd.f32 %v8722_v58, %v2777_v62  ;;  %7045 = vmatprep.subr.msk.bf16.mxu1 %vm7541_vm2, %v8707_v20  ;;  %7034 = vmatpush3.bf16.msk.msra.mxu0 %vm7541_vm2, %v8707_v20  ;;  %v10489_v4 = vld [vmem:[#allocation23_spill] sm:$0xff]  ;;  %v2818_v31 = vmul.f32 0.012895808, %v2814_v61  ;;  %v2830_v28 = vmul.f32 0.0053566243, %v2826_v52  ;;  %v10490_v60 = vld [vmem:[#allocation34_spill] sm:$0xff]  ;;  %v3851_v42 = vadd.f32 %v3847_v0, %v3843_v48 }
 0x101   : > { %10488 = vst [vmem:[#allocation32_spill] sm:$0xff] %v8811_v41  ;;  %v2800_v22 = vadd.f32 %v10489_v4, %v2794_v10  ;;  %v2788_v58 = vadd.f32 %v2784_v32, %v2780_v19  ;;  %v2763_v24 = vadd.f32 %v10491_v45, %v2755_v6  ;;  %v3841_v2 = vmul.f32 0.03600039, %v2814_v61  ;;  %7050 = vmatprep.subr.bf16.mxu0 %v7920_v15  ;;  %v8828_v51 = vld [vmem:[%s7548_s12 + $0x130] sm:$0xff]  ;;  %v10496_v11 = vld [vmem:[#allocation37_spill] sm:$0xff] }
 0x102   : > { %v2793_v33 = vadd.f32 %v10490_v60, %v2785_v3  ;;  %v8831_v8 = vld [vmem:[%s7548_s12 + $0x129] sm:$0xff]  ;;  %v8835_v57 = vmul.f32 0.0019437153, %v2838_v38  ;;  %v3849_v37 = vmul.f32 0.025811432, %v2826_v52  ;;  %v8838_v17 = vld [vmem:[%s7548_s12 + $0x131] sm:$0xff]  ;;  %v8856_v48 = vadd.f32 %v3855_v46, %v3851_v42 }
 0x103   : > { %v2808_v54 = vadd.f32 %v10492_v63, %v2800_v22  ;;  %v2796_v12 = vadd.f32 %v10493_v36, %v2788_v58  ;;  %7048 = vmatpush3.bf16.msk.msra.mxu1 %vm7541_vm2, %v8707_v20  ;;  %v10494_v7 = vld [vmem:[#allocation14_spill] sm:$0xff]  ;;  %v2771_v62 = vadd.f32 %v10495_v56, %v2763_v24  ;;  %v3845_v1 = vadd.f32 %v3841_v2, %v8626_v39  ;;  %v10497_v35 = vld [vmem:[#allocation15_spill] sm:$0xff] }
 0x104   : > { %v2799_v44 = vadd.f32 %v2793_v33, %v10494_v7  ;;  %v3028_v23 = vmul.f32 0.003107942, %v8822_v49  ;;  %v8848_v0 = vld [vmem:[%s7548_s12 + $0x12a] sm:$0xff]  ;;  %7064 = vmatprep.subr.bf16.mxu1 %v7920_v15  ;;  %v3029_v61 = vmul.f32 0.003107942, %v8828_v51  ;;  %10499 = vst [vmem:[#allocation13_spill] sm:$0xff] %v8856_v48 }
 0x105   : > { %v2820_v55 = vadd.f32 %v2816_v59, %v2808_v54  ;;  %v2802_v19 = vadd.f32 %v10496_v11, %v2796_v12  ;;  %v3036_v52 = vmul.f32 0.014747214, %v8831_v8  ;;  %v10498_v25 = vld [vmem:[#allocation18_spill] sm:$0xff]  ;;  %v8859_v21 = vmul.f32 0.014747214, %v8838_v17  ;;  %v8862_v59 = vld [vmem:[%s7548_s12 + $0x132] sm:$0xff] }
 0x106   : > { %v2807_v10 = vadd.f32 %v10497_v35, %v2799_v44  ;;  %v2779_v39 = vadd.f32 %v10498_v25, %v2771_v62  ;;  %v10500_v3 = vld [vmem:[#allocation42_spill] sm:$0xff]  ;;  %v3048_v4 = vmul.f32 0.04950763, %v8848_v0  ;;  %v8870_v58 = vld [vmem:[%s7548_s12 + $0x133] sm:$0xff]  ;;  %v3857_v33 = vmul.f32 0.017582757, %v2838_v38 }
 0x107   : > { %v2832_v32 = vadd.f32 %v2828_v26, %v2820_v55  ;;  %v2810_v29 = vadd.f32 %v10500_v3, %v2802_v19  ;;  %v3040_v6 = vadd.f32 %v3036_v52, %v3028_v23  ;;  %v8867_v22 = vld [vmem:[%s7548_s12 + $0x12b] sm:$0xff]  ;;  %v3041_v45 = vadd.f32 %v8859_v21, %v3029_v61  ;;  %v8879_v26 = vld [vmem:[%s7548_s12 + $0x134] sm:$0xff] }
 0x108   : > { %v2819_v60 = vadd.f32 %v8728_v13, %v2807_v10  ;;  %v2787_v46 = vadd.f32 %v8772_v43, %v2779_v39  ;;  %v8876_v24 = vld [vmem:[%s7548_s12 + $0x12c] sm:$0xff]  ;;  %v3853_v2 = vadd.f32 %v3849_v37, %v3845_v1  ;;  %v3049_v63 = vmul.f32 0.04950763, %v8862_v59  ;;  %v10501_v12 = vld [vmem:[#allocation36_spill] sm:$0xff]  ;;  %v10502_v1 = vld [vmem:[#allocation29_spill] sm:$0xff] }
 0x109   : > { %v2822_v42 = vadd.f32 %v2818_v31, %v2810_v29  ;;  %v3052_v54 = vadd.f32 %v3048_v4, %v3040_v6  ;;  %v3060_v43 = vmul.f32 0.11758703, %v8867_v22  ;;  %v3061_v38 = vmul.f32 0.11758703, %v8870_v58  ;;  %v8887_v7 = vld [vmem:[%s7548_s12 + $0x135] sm:$0xff]  ;;  %v8893_v62 = vld [vmem:[%s7548_s12 + $0x12d] sm:$0xff] }
 0x10a   : > { %v2831_v36 = vadd.f32 %v8752_v5, %v2819_v60  ;;  %v2795_v13 = vadd.f32 %v10501_v12, %v2787_v46  ;;  %v2844_v44 = vadd.f32 %v8804_v18, %v2832_v32  ;;  %v3053_v31 = vadd.f32 %v3049_v63, %v3041_v45  ;;  %v5730_v19 = vld [vmem:[%s7548_s12 + $0x125] sm:$0xff]  ;;  %v8903_v10 = vld [vmem:[%s7548_s12 + $0x12e] sm:$0xff] }
 0x10b   : > { %v3072_v37 = vmul.f32 0.1975931, %v8876_v24  ;;  %v3073_v56 = vmul.f32 0.1975931, %v8879_v26  ;;  %v3064_v55 = vadd.f32 %v3060_v43, %v3052_v54  ;;  %v3084_v11 = vmul.f32 0.23491417, %v8893_v62 }
 0x10c   : > { %v2843_v5 = vadd.f32 %v8757_v14, %v2831_v36  ;;  %v2801_v23 = vadd.f32 %v2795_v13, %v10502_v1  ;;  %v2834_v61 = vadd.f32 %v2830_v28, %v2822_v42  ;;  %v8899_v52 = vadd.f32 %v3857_v33, %v3853_v2  ;;  %v8906_v25 = vld [vmem:[%s7548_s12 + $0x12f] sm:$0xff]  ;;  %v5734_v39 = vld [vmem:[%s7548_s12 + $0x126] sm:$0xff]  ;;  %v10504_v14 = vld [vmem:[#allocation20_spill] sm:$0xff] }
 0x10d   : > { %v3065_v18 = vadd.f32 %v3061_v38, %v3053_v31  ;;  %v3085_v35 = vmul.f32 0.23491417, %v8887_v7  ;;  %v3076_v3 = vadd.f32 %v3072_v37, %v3064_v55  ;;  %v3096_v29 = vmul.f32 0.1975931, %v8903_v10  ;;  %v5738_v28 = vld [vmem:[%s7548_s12 + $0x127] sm:$0xff]  ;;  %v5762_v31 = vld [vmem:[%s10400_s3 + $0xf0] sm:$0xff] }
 0x10e   : > { %10503 = vst [vmem:[#allocation25_spill] sm:$0xff] %v8899_v52  ;;  %6543 = vmatprep.mubr.msk.f32.mxu0 %vm305_vm3, %v2843_v5  ;;  %v2809_v32 = vadd.f32 %v10504_v14, %v2801_v23  ;;  %v3108_v6 = vmul.f32 0.11758703, %v8906_v25  ;;  %v3118_v60 = vmul.f32 0.04950763, %v8828_v51  ;;  %v2846_v54 = vadd.f32 %v8835_v57, %v2834_v61  ;;  %v5763_v57 = vld [vmem:[%s10400_s3 + $0xf8] sm:$0xff] }
 0x10f   : > { %6544 = vmatmul.mubr.msk.f32.vlgmr.msra.gmra.mrb[20].mxu0 %vm305_vm3, %v2844_v44  ;;  %v3077_v4 = vadd.f32 %v3073_v56, %v3065_v18  ;;  %v3310_v46 = vmul.f32 0.0019437153, %v5730_v19  ;;  %v3311_v33 = vmul.f32 0.0019437153, %v8893_v62  ;;  %v3088_v42 = vadd.f32 %v3084_v11, %v3076_v3  ;;  %v8941_v11 = vld [vmem:[%s7548_s12 + $0x158] sm:$0xff]  ;;  %v8944_v19 = vld [vmem:[%s7548_s12 + $0x160] sm:$0xff] }
 0x110   : > { %v2821_v45 = vadd.f32 %v8774_v50, %v2809_v32  ;;  %7052 = vmatpush3.bf16.msra.mxu0 %v7920_v15  ;;  %v3318_v2 = vmul.f32 0.0053566243, %v5734_v39  ;;  %v3319_v63 = vmul.f32 0.0053566243, %v8903_v10  ;;  %v3330_v36 = vmul.f32 0.012895808, %v5738_v28 }
 0x111   : > { %7054 = vmatprep.subr.bf16.mxu0 %v8272_v16  ;;  %v3331_v12 = vmul.f32 0.012895808, %v8906_v25  ;;  %v3338_v13 = vmul.f32 0.027120944, %v8822_v49  ;;  %v3100_v50 = vadd.f32 %v3096_v29, %v3088_v42  ;;  %v8931_v37 = vadd.f32 %v3085_v35, %v3077_v4  ;;  %v5764_v61 = vld [vmem:[%s10400_s3 + $0x100] sm:$0xff] }
 0x112   : > { %v2833_v43 = vadd.f32 %v8779_v53, %v2821_v45  ;;  %v3322_v38 = vadd.f32 %v3318_v2, %v3310_v46  ;;  %v3323_v44 = vadd.f32 %v3319_v63, %v3311_v33  ;;  %v3136_v56 = vmul.f32 0.003107942, %v8862_v59  ;;  %v8959_v39 = vld [vmem:[%s7548_s12 + $0x159] sm:$0xff]  ;;  %v8966_v28 = vld [vmem:[%s7548_s12 + $0x161] sm:$0xff] }
 0x113   : > { %v3339_v49 = vmul.f32 0.027120944, %v8828_v51  ;;  %v8936_v53 = vmul.f32 0.049826447, %v8838_v17  ;;  %v3112_v1 = vadd.f32 %v3108_v6, %v3100_v50  ;;  %v3346_v17 = vmul.f32 0.049826447, %v8831_v8 }
 0x114   : > { %v2845_v5 = vadd.f32 %v8783_v27, %v2833_v43  ;;  %7056 = vmatpush3.bf16.msra.mxu0 %v8272_v16  ;;  %v3334_v23 = vadd.f32 %v3330_v36, %v3322_v38  ;;  %v3335_v55 = vadd.f32 %v3331_v12, %v3323_v44  ;;  %v5765_v27 = vld [vmem:[%s10400_s3 + $0x108] sm:$0xff]  ;;  %v3354_v18 = vmul.f32 0.079967566, %v8848_v0  ;;  %v8969_v8 = vld [vmem:[%s7548_s12 + $0x15a] sm:$0xff] }
 0x115   : > { %7059 = vmatprep.subr.msk.bf16.mxu0 %vm7541_vm2, %v8274_v34  ;;  %v3355_v35 = vmul.f32 0.079967566, %v8862_v59  ;;  %v8961_v14 = vpack.c.bf16 %v5763_v57, %v5762_v31  ;;  %v3122_v32 = vadd.f32 %v3118_v60, %v3112_v1  ;;  %v3362_v6 = vmul.f32 0.11211578, %v8867_v22  ;;  %v8972_v0 = vld [vmem:[%s7548_s12 + $0x162] sm:$0xff] }
 0x116   : > { %6558 = vmatprep.mubr.msk.f32.mxu1 %vm305_vm3, %v2845_v5  ;;  %v3342_v3 = vadd.f32 %v3338_v13, %v3334_v23  ;;  %v3343_v29 = vadd.f32 %v3339_v49, %v3335_v55  ;;  %v3363_v4 = vmul.f32 0.11211578, %v8870_v58  ;;  %v3370_v46 = vmul.f32 0.13731514, %v8876_v24  ;;  %v8989_v2 = vld [vmem:[%s7548_s12 + $0x15b] sm:$0xff]  ;;  %v8992_v63 = vld [vmem:[%s7548_s12 + $0x163] sm:$0xff] }
 0x117   : > { %10505 = vst [vmem:[#allocation33_spill] sm:$0xff] %v8961_v14  ;;  %6559 = vmatmul.mubr.msk.f32.vlgmr.msra.gmra.mrb[20].mxu1 %vm305_vm3, %v2846_v54  ;;  %v3371_v60 = vmul.f32 0.13731514, %v8879_v26  ;;  %v8978_v33 = vpack.c.bf16 %v5765_v27, %v5764_v61  ;;  %v3130_v22 = vadd.f32 %v3122_v32, %v8859_v21  ;;  %v3378_v42 = vmul.f32 0.14691597, %v8893_v62  ;;  %v9006_v50 = vld [vmem:[%s7548_s12 + $0x15c] sm:$0xff] }
 0x118   : > { %7066 = vmatpush3.bf16.msra.mxu1 %v7920_v15  ;;  %7062 = vmatpush3.bf16.msk.msra.mxu0 %vm7541_vm2, %v8274_v34  ;;  %v3351_v45 = vadd.f32 %v8936_v53, %v3343_v29  ;;  %v3379_v24 = vmul.f32 0.14691597, %v8887_v7  ;;  %v8996_v15 = vmul.f32 0.13731514, %v8903_v10  ;;  %v3030_v21 = vmul.f32 0.003107942, %v8941_v11 }
 0x119   : > { %10506 = vst [vmem:[#allocation26_spill] sm:$0xff] %v8978_v33  ;;  %7068 = vmatprep.subr.bf16.mxu1 %v8272_v16  ;;  %v3031_v54 = vmul.f32 0.003107942, %v8944_v19  ;;  %7078 = vmatprep.subr.bf16.mxu0 %v8434_v30  ;;  %v3350_v36 = vadd.f32 %v3346_v17, %v3342_v3  ;;  %v3140_v62 = vadd.f32 %v3136_v56, %v3130_v22  ;;  %v3038_v13 = vmul.f32 0.014747214, %v8959_v39  ;;  %v9009_v10 = vld [vmem:[%s7548_s12 + $0x164] sm:$0xff] }
 0x11a   : > { %v3359_v12 = vadd.f32 %v3355_v35, %v3351_v45  ;;  %v9003_v43 = vmul.f32 0.014747214, %v8966_v28  ;;  %v3050_v38 = vmul.f32 0.04950763, %v8969_v8  ;;  %v3051_v44 = vmul.f32 0.04950763, %v8972_v0 }
 0x11b   : > { %v3062_v31 = vmul.f32 0.11758703, %v8989_v2  ;;  %v5708_v57 = vld [vmem:[%s7548_s12 + $0x15d] sm:$0xff]  ;;  %v3358_v56 = vadd.f32 %v3354_v18, %v3350_v36  ;;  %6573 = vmatprep.mubr.msk.f32.mxu0 %vm305_vm3, %v3140_v62  ;;  %v3042_v5 = vadd.f32 %v3038_v13, %v3030_v21  ;;  %v3063_v23 = vmul.f32 0.11758703, %v8992_v63  ;;  %v9020_v55 = vld [vmem:[%s7548_s12 + $0x165] sm:$0xff] }
 0x11c   : > { %7070 = vmatpush3.bf16.msra.mxu1 %v8272_v16  ;;  %v3367_v49 = vadd.f32 %v3363_v4, %v3359_v12  ;;  %v3043_v1 = vadd.f32 %v9003_v43, %v3031_v54  ;;  %v5712_v61 = vld [vmem:[%s7548_s12 + $0x15e] sm:$0xff]  ;;  %v9028_v16 = vmul.f32 0.11211578, %v8906_v25  ;;  %v3074_v17 = vmul.f32 0.1975931, %v9006_v50  ;;  %v5732_v22 = vld [vmem:[%s7548_s12 + $0x155] sm:$0xff] }
 0x11d   : > { %v5716_v27 = vld [vmem:[%s7548_s12 + $0x15f] sm:$0xff]  ;;  %7073 = vmatprep.subr.msk.bf16.mxu1 %vm7541_vm2, %v8274_v34  ;;  %v3075_v18 = vmul.f32 0.1975931, %v9009_v10  ;;  %v3366_v35 = vadd.f32 %v3362_v6, %v3358_v56  ;;  %v3054_v3 = vadd.f32 %v3050_v38, %v3042_v5  ;;  %v3086_v4 = vmul.f32 0.23491417, %v5708_v57  ;;  %v5736_v45 = vld [vmem:[%s7548_s12 + $0x156] sm:$0xff] }
 0x11e   : > { %v3375_v32 = vadd.f32 %v3371_v60, %v3367_v49  ;;  %v3055_v29 = vadd.f32 %v3051_v44, %v3043_v1  ;;  %v5740_v21 = vld [vmem:[%s7548_s12 + $0x157] sm:$0xff]  ;;  %v3087_v54 = vmul.f32 0.23491417, %v9020_v55  ;;  %v3098_v36 = vmul.f32 0.1975931, %v5712_v61 }
 0x11f   : > { %v3110_v62 = vmul.f32 0.11758703, %v5716_v27  ;;  %v3374_v12 = vadd.f32 %v3370_v46, %v3366_v35  ;;  %v3066_v25 = vadd.f32 %v3062_v31, %v3054_v3  ;;  %v3120_v6 = vmul.f32 0.04950763, %v8944_v19 }
 0x120   : > { %7076 = vmatpush3.bf16.msk.msra.mxu1 %vm7541_vm2, %v8274_v34  ;;  %v3067_v13 = vadd.f32 %v3063_v23, %v3055_v29  ;;  %v9041_v60 = vmul.f32 0.003107942, %v8972_v0  ;;  %v9043_v38 = vadd.f32 %v3379_v24, %v3375_v32  ;;  %v3312_v44 = vmul.f32 0.0019437153, %v5732_v22 }
 0x121   : > { %v3313_v56 = vmul.f32 0.0019437153, %v5708_v57  ;;  %v3320_v49 = vmul.f32 0.0053566243, %v5736_v45  ;;  %7092 = vmatprep.subr.bf16.mxu1 %v8434_v30  ;;  %v3078_v46 = vadd.f32 %v3074_v17, %v3066_v25  ;;  %v3321_v5 = vmul.f32 0.0053566243, %v5712_v61 }
 0x122   : > { %v3332_v1 = vmul.f32 0.012895808, %v5740_v21  ;;  %v3382_v35 = vadd.f32 %v3378_v42, %v3374_v12  ;;  %v3079_v34 = vadd.f32 %v3075_v18, %v3067_v13  ;;  %v3333_v23 = vmul.f32 0.012895808, %v5716_v27  ;;  %v5711_v45 = vld [vmem:[%s7548_s12 + $0x136] sm:$0xff] }
 0x123   : > { %v3324_v31 = vadd.f32 %v3320_v49, %v3312_v44  ;;  %v3340_v3 = vmul.f32 0.027120944, %v8941_v11  ;;  %v3090_v29 = vadd.f32 %v3086_v4, %v3078_v46  ;;  %v3325_v24 = vadd.f32 %v3321_v5, %v3313_v56  ;;  %v5715_v12 = vld [vmem:[%s7548_s12 + $0x137] sm:$0xff] }
 0x124   : > { %v3341_v32 = vmul.f32 0.027120944, %v8944_v19  ;;  %v9049_v22 = vmul.f32 0.049826447, %v8959_v39  ;;  %v9053_v17 = vmul.f32 0.049826447, %v8966_v28  ;;  %v3091_v13 = vadd.f32 %v3087_v54, %v3079_v34 }
 0x125   : > { %v3336_v33 = vadd.f32 %v3332_v1, %v3324_v31  ;;  %v9056_v42 = vmul.f32 0.079967566, %v8969_v8  ;;  %v3357_v18 = vmul.f32 0.079967566, %v8972_v0  ;;  %v3102_v11 = vadd.f32 %v3098_v36, %v3090_v29  ;;  %v5718_v25 = vld [vmem:[%s7548_s12 + $0x138] sm:$0xff]  ;;  %v5713_v29 = vld [vmem:[%s7548_s12 + $0x166] sm:$0xff] }
 0x126   : > { %10507 = vst [vmem:[#allocation27_spill] sm:$0xff] %v9053_v17  ;;  %v3337_v4 = vadd.f32 %v3333_v23, %v3325_v24  ;;  %v9060_v21 = vmul.f32 0.11211578, %v8989_v2  ;;  %v3365_v39 = vmul.f32 0.11211578, %v8992_v63  ;;  %v5720_v46 = vld [vmem:[%s7548_s12 + $0x139] sm:$0xff] }
 0x127   : > { %v9066_v28 = vmul.f32 0.13731514, %v9006_v50  ;;  %v3373_v8 = vmul.f32 0.13731514, %v9009_v10  ;;  %v9069_v44 = vmul.f32 0.14691597, %v5708_v57  ;;  %v3114_v36 = vadd.f32 %v3110_v62, %v3102_v11 }
 0x128   : > { %v3345_v56 = vadd.f32 %v3341_v32, %v3337_v4  ;;  %v3381_v2 = vmul.f32 0.14691597, %v9020_v55  ;;  %v9072_v49 = vmul.f32 0.13731514, %v5712_v61  ;;  %v5722_v5 = vld [vmem:[%s7548_s12 + $0x13a] sm:$0xff]  ;;  %v3344_v1 = vadd.f32 %v3340_v3, %v3336_v33  ;;  %v5717_v62 = vld [vmem:[%s7548_s12 + $0x167] sm:$0xff] }
 0x129   : > { %v9076_v54 = vmul.f32 0.11211578, %v5716_v27  ;;  %v3097_v50 = vmul.f32 0.1975931, %v5711_v45  ;;  %v3109_v34 = vmul.f32 0.11758703, %v5715_v12  ;;  %v3124_v31 = vadd.f32 %v3120_v6, %v3114_v36 }
 0x12a   : > { %v3353_v57 = vadd.f32 %v9053_v17, %v3345_v56  ;;  %v3119_v23 = vmul.f32 0.04950763, %v5718_v25  ;;  %v5719_v24 = vld [vmem:[%s7548_s12 + $0x168] sm:$0xff]  ;;  %v3390_v32 = vadd.f32 %v8996_v15, %v3382_v35  ;;  %v3128_v11 = vmul.f32 0.014747214, %v5720_v46 }
 0x12b   : > { %10508 = vst [vmem:[#allocation10_spill] sm:$0xff] %v9076_v54  ;;  %v3101_v61 = vadd.f32 %v3097_v50, %v8931_v37  ;;  %v3137_v4 = vmul.f32 0.003107942, %v5722_v5  ;;  %v3387_v33 = vmul.f32 0.13731514, %v5711_v45  ;;  %v3132_v27 = vadd.f32 %v3124_v31, %v9003_v43  ;;  %v5721_v6 = vld [vmem:[%s7548_s12 + $0x169] sm:$0xff] }
 0x12c   : > { %v3361_v3 = vadd.f32 %v3357_v18, %v3353_v57  ;;  %v3395_v52 = vmul.f32 0.11211578, %v5715_v12  ;;  %v9085_v48 = vmul.f32 0.079967566, %v5718_v25  ;;  %v5723_v36 = vld [vmem:[%s7548_s12 + $0x16a] sm:$0xff] }
 0x12d   : > { %v3113_v56 = vadd.f32 %v3109_v34, %v3101_v61  ;;  %v9089_v17 = vmul.f32 0.049826447, %v5720_v46  ;;  %v3099_v54 = vmul.f32 0.1975931, %v5713_v29  ;;  %v3111_v41 = vmul.f32 0.11758703, %v5717_v62 }
 0x12e   : > { %v3142_v15 = vadd.f32 %v9041_v60, %v3132_v27  ;;  %v3369_v35 = vadd.f32 %v3365_v39, %v3361_v3  ;;  %v9092_v37 = vmul.f32 0.027120944, %v5722_v5  ;;  %v3121_v50 = vmul.f32 0.04950763, %v5719_v24 }
 0x12f   : > { %v3123_v45 = vadd.f32 %v3119_v23, %v3113_v56  ;;  %v3103_v14 = vadd.f32 %v3099_v54, %v3091_v13  ;;  %v3129_v43 = vmul.f32 0.014747214, %v5721_v6  ;;  %v3139_v18 = vmul.f32 0.003107942, %v5723_v36 }
 0x130   : > { %6588 = vmatprep.mubr.msk.f32.mxu1 %vm305_vm3, %v3142_v15  ;;  %v3377_v12 = vadd.f32 %v3373_v8, %v3369_v35  ;;  %v3389_v25 = vmul.f32 0.13731514, %v5713_v29  ;;  %v3397_v34 = vmul.f32 0.11211578, %v5717_v62  ;;  %v3405_v46 = vmul.f32 0.079967566, %v5719_v24 }
 0x131   : > { %v3131_v31 = vadd.f32 %v3128_v11, %v3123_v45  ;;  %v3115_v57 = vadd.f32 %v3111_v41, %v3103_v14  ;;  %v9095_v61 = vmul.f32 0.049826447, %v5721_v6  ;;  %v3398_v60 = vadd.f32 %v9028_v16, %v3390_v32  ;;  %v5743_v41 = vld [vmem:[%s7548_s12 + $0x13b] sm:$0xff]  ;;  %v5745_v11 = vld [vmem:[%s7548_s12 + $0x16b] sm:$0xff] }
 0x132   : > { %v3385_v39 = vadd.f32 %v3381_v2, %v3377_v12  ;;  %v9098_v5 = vmul.f32 0.027120944, %v5723_v36  ;;  %v3402_v13 = vmul.f32 0.079967566, %v8828_v51  ;;  %v3416_v54 = vmul.f32 0.027120944, %v8862_v59 }
 0x133   : > { %v3141_v8 = vadd.f32 %v3137_v4, %v3131_v31  ;;  %v3125_v23 = vadd.f32 %v3121_v50, %v3115_v57  ;;  %v3428_v29 = vmul.f32 0.012895808, %v8870_v58  ;;  %v3440_v62 = vmul.f32 0.0053566243, %v8879_v26  ;;  %v5747_v59 = vld [vmem:[%s7548_s12 + $0x13c] sm:$0xff]  ;;  %v3876_v31 = vld [vmem:[%s7559_s25 + $0x47] sm:$0xff] }
 0x134   : > { %v3406_v14 = vadd.f32 %v3402_v13, %v3398_v60  ;;  %v9106_v24 = vmul.f32 0.0019437153, %v8887_v7  ;;  %v3352_v16 = vadd.f32 %v9049_v22, %v3344_v1  ;;  %v9110_v51 = vmul.f32 0.079967566, %v8944_v19  ;;  %v5751_v2 = vld [vmem:[%s7548_s12 + $0x13d] sm:$0xff] }
 0x135   : > { %6574 = vmatmul.mubr.msk.f32.vlgmr.msra.gmra.mrb[22].mxu0 %vm305_vm3, %v3141_v8  ;;  %v3133_v58 = vadd.f32 %v3129_v43, %v3125_v23  ;;  %v9116_v26 = vmul.f32 0.027120944, %v8972_v0  ;;  %v9119_v32 = vmul.f32 0.012895808, %v8992_v63  ;;  %v9122_v7 = vmul.f32 0.0053566243, %v9009_v10 }
 0x136   : > { %7080 = vmatpush3.bf16.msra.mxu0 %v8434_v30  ;;  %v3412_v19 = vadd.f32 %v3406_v14, %v8936_v53  ;;  %v3360_v22 = vadd.f32 %v9056_v42, %v3352_v16  ;;  %v9128_v1 = vmul.f32 0.0019437153, %v9020_v55  ;;  %v3391_v0 = vadd.f32 %v3387_v33, %v9043_v38  ;;  %v5749_v63 = vld [vmem:[%s7548_s12 + $0x16c] sm:$0xff]  ;;  %v3862_v4 = vld [vmem:[%s7559_s25 + $0x16] sm:$0xff] }
 0x137   : > { %v3143_v27 = vadd.f32 %v3139_v18, %v3133_v58  ;;  %7082 = vmatprep.subr.bf16.mxu0 %v8701_v47  ;;  %v3429_v10 = vmul.f32 0.012895808, %v5743_v41  ;;  %v9135_v3 = vmul.f32 0.0053566243, %v5747_v59  ;;  %v3393_v53 = vadd.f32 %v3389_v25, %v3385_v39  ;;  %v3874_v6 = vld [vmem:[%s7559_s25 + $0x17] sm:$0xff]  ;;  %v5753_v38 = vld [vmem:[%s7548_s12 + $0x16d] sm:$0xff] }
 0x138   : > { %v3420_v42 = vadd.f32 %v3416_v54, %v3412_v19  ;;  %v3368_v36 = vadd.f32 %v9060_v21, %v3360_v22  ;;  %v3399_v55 = vadd.f32 %v3395_v52, %v3391_v0  ;;  %v9139_v56 = vmul.f32 0.0019437153, %v5751_v2  ;;  %v3886_v33 = vld [vmem:[%s7559_s25 + $0x18] sm:$0xff]  ;;  %v3864_v25 = vld [vmem:[%s7559_s25 + $0x46] sm:$0xff] }
 0x139   : > { %v3898_v15 = vld [vmem:[%s7559_s25 + $0x19] sm:$0xff]  ;;  %6589 = vmatmul.mubr.msk.f32.vlgmr.msra.gmra.mrb[22].mxu1 %vm305_vm3, %v3143_v27  ;;  %v3401_v35 = vadd.f32 %v3397_v34, %v3393_v53  ;;  %v3431_v50 = vmul.f32 0.012895808, %v5745_v11  ;;  %v9145_v45 = vmul.f32 0.0053566243, %v5749_v63  ;;  %v3888_v23 = vld [vmem:[%s7559_s25 + $0x48] sm:$0xff] }
 0x13a   : > { %v3866_v43 = vmul.f32 0.011379727, %v3862_v4  ;;  %7094 = vmatpush3.bf16.msra.mxu1 %v8434_v30  ;;  %7084 = vmatpush3.bf16.msra.mxu0 %v8701_v47  ;;  %v3432_v52 = vadd.f32 %v3428_v29, %v3420_v42  ;;  %v3376_v21 = vadd.f32 %v9066_v28, %v3368_v36  ;;  %v3407_v18 = vadd.f32 %v9085_v48, %v3399_v55  ;;  %v3910_v39 = vld [vmem:[%s7559_s25 + $0x1a] sm:$0xff]  ;;  %v10509_v58 = vld [vmem:[#allocation33_spill] sm:$0xff]  ;;  %v3912_v27 = vld [vmem:[%s7559_s25 + $0x4a] sm:$0xff] }
 0x13b   : > { %v3878_v12 = vmul.f32 0.006997561, %v3874_v6  ;;  %7096 = vmatprep.subr.bf16.mxu1 %v8701_v47  ;;  %7087 = vmatprep.subr.msk.bf16.mxu0 %vm7541_vm2, %v8707_v20  ;;  %v3409_v34 = vadd.f32 %v3405_v46, %v3401_v35  ;;  %v9157_v57 = vmul.f32 0.0019437153, %v5753_v38  ;;  %v3890_v28 = vmul.f32 0.0040881946, %v3886_v33 }
 0x13c   : > { %v3870_v60 = vadd.f32 %v3866_v43, %v8759_v40  ;;  %v3444_v13 = vadd.f32 %v3440_v62, %v3432_v52  ;;  %v3384_v48 = vadd.f32 %v9069_v44, %v3376_v21  ;;  %v3413_v54 = vadd.f32 %v9089_v17, %v3407_v18  ;;  %v3900_v46 = vld [vmem:[%s7559_s25 + $0x49] sm:$0xff]  ;;  %v3863_v59 = vld [vmem:[%s7559_s25 + $0x1e] sm:$0xff]  ;;  %v5767_v42 = vld [vmem:[%s10400_s3 + $0x118] sm:$0x3] }
 0x13d   : > { %v3902_v8 = vmul.f32 0.002269271, %v3898_v15  ;;  %v3415_v29 = vadd.f32 %v9095_v61, %v3409_v34  ;;  %v3868_v14 = vmul.f32 0.011379727, %v3864_v25  ;;  %v3880_v16 = vmul.f32 0.006997561, %v3876_v31 }
 0x13e   : > { %v3882_v41 = vadd.f32 %v3878_v12, %v3870_v60  ;;  %7098 = vmatpush3.bf16.msra.mxu1 %v8701_v47  ;;  %7090 = vmatpush3.bf16.msk.msra.mxu0 %vm7541_vm2, %v8707_v20  ;;  %v3456_v40 = vadd.f32 %v9106_v24, %v3444_v13  ;;  %v3392_v17 = vadd.f32 %v9072_v49, %v3384_v48  ;;  %v3914_v61 = vmul.f32 0.0011967713, %v3910_v39  ;;  %v3875_v62 = vld [vmem:[%s7559_s25 + $0x1f] sm:$0xff]  ;;  %v10511_v49 = vld [vmem:[#allocation10_spill] sm:$0xff] }
 0x13f   : > { %v3421_v44 = vadd.f32 %v9092_v37, %v3413_v54  ;;  %7101 = vmatprep.subr.msk.bf16.mxu1 %vm7541_vm2, %v8707_v20  ;;  %v3423_v2 = vadd.f32 %v9098_v5, %v3415_v29  ;;  %7106 = vmatprep.subr.bf16.mxu0 %v10509_v58  ;;  %v10510_v22 = vld [vmem:[#allocation32_spill] sm:$0xff]  ;;  %v3892_v24 = vmul.f32 0.0040881946, %v3888_v23  ;;  %v3904_v4 = vmul.f32 0.002269271, %v3900_v46  ;;  %v5766_v6 = vld [vmem:[%s10400_s3 + $0x110] sm:$0xff] }
 0x140   : > { %v3894_v19 = vadd.f32 %v3890_v28, %v3882_v41  ;;  %v3872_v0 = vadd.f32 %v3868_v14, %v10510_v22  ;;  %v3887_v11 = vld [vmem:[%s7559_s25 + $0x20] sm:$0xff]  ;;  %6603 = vmatprep.mubr.msk.f32.mxu0 %vm305_vm3, %v3456_v40  ;;  %v3400_v37 = vadd.f32 %v10511_v49, %v3392_v17  ;;  %v3867_v53 = vmul.f32 0.011379727, %v3863_v59  ;;  %v3865_v21 = vld [vmem:[%s7559_s25 + $0x4e] sm:$0xff]  ;;  %s5604_s3 = sld [smem:[#allocation2 + $0x1]] }
 0x141   : > { %v3433_v63 = vadd.f32 %v3429_v10, %v3421_v44  ;;  %v3435_v5 = vadd.f32 %v3431_v50, %v3423_v2  ;;  %v3879_v38 = vmul.f32 0.006997561, %v3875_v62  ;;  %v3899_v10 = vld [vmem:[%s7559_s25 + $0x21] sm:$0xff]  ;;  %v3891_v43 = vmul.f32 0.0040881946, %v3887_v11  ;;  %v3877_v18 = vld [vmem:[%s7559_s25 + $0x4f] sm:$0xff] }
 0x142   : > { %v3906_v36 = vadd.f32 %v3902_v8, %v3894_v19  ;;  %v3884_v55 = vadd.f32 %v3880_v16, %v3872_v0  ;;  %7104 = vmatpush3.bf16.msk.msra.mxu1 %vm7541_vm2, %v8707_v20  ;;  %v3408_v33 = vadd.f32 %v9110_v51, %v3400_v37  ;;  %v10512_v35 = vld [vmem:[#allocation13_spill] sm:$0xff]  ;;  %v3916_v34 = vmul.f32 0.0011967713, %v3912_v27  ;;  %v3889_v60 = vld [vmem:[%s7559_s25 + $0x50] sm:$0xff] }
 0x143   : > { %v3445_v15 = vadd.f32 %v9135_v3, %v3433_v63  ;;  %v3871_v50 = vadd.f32 %v3867_v53, %v10512_v35  ;;  %v3911_v52 = vld [vmem:[%s7559_s25 + $0x22] sm:$0xff]  ;;  %v3447_v12 = vadd.f32 %v9145_v45, %v3435_v5  ;;  %7120 = vmatprep.subr.bf16.mxu1 %v10509_v58  ;;  %v3901_v51 = vld [vmem:[%s7559_s25 + $0x51] sm:$0xff]  ;;  %v3903_v48 = vmul.f32 0.002269271, %v3899_v10 }
 0x144   : > { %v3918_v25 = vadd.f32 %v3914_v61, %v3906_v36  ;;  %v3896_v31 = vadd.f32 %v3892_v24, %v3884_v55  ;;  %v10513_v28 = vld [vmem:[#allocation27_spill] sm:$0xff]  ;;  %v9208_v54 = vld [vmem:[%s7548_s12 + $0x185] sm:$0xff]  ;;  %v9216_v23 = vpack.c.bf16 %v5767_v42, %v5766_v6  ;;  %v3915_v29 = vmul.f32 0.0011967713, %v3911_v52 }
 0x145   : > { %v3414_v3 = vadd.f32 %v3408_v33, %v10513_v28  ;;  %v3457_v39 = vadd.f32 %v9139_v56, %v3445_v15  ;;  %v3883_v13 = vadd.f32 %v3879_v38, %v3871_v50  ;;  %v9211_v45 = vld [vmem:[%s7548_s12 + $0x18d] sm:$0xff]  ;;  %v3869_v41 = vmul.f32 0.011379727, %v3865_v21 }
 0x146   : > { %v9214_v8 = vld [vmem:[%s7548_s12 + $0x186] sm:$0xff]  ;;  %10514 = vst [vmem:[#allocation30_spill] sm:$0xff] %v9216_v23  ;;  %v3881_v14 = vmul.f32 0.006997561, %v3877_v18  ;;  %v3459_v56 = vadd.f32 %v9157_v57, %v3447_v12  ;;  %v3908_v46 = vadd.f32 %v3904_v4, %v3896_v31  ;;  %v3913_v40 = vld [vmem:[%s7559_s25 + $0x52] sm:$0xff] }
 0x147   : > { %v3422_v16 = vadd.f32 %v9116_v26, %v3414_v3  ;;  %6604 = vmatmul.mubr.msk.f32.vlgmr.msra.gmra.mrb[24].mxu0 %vm305_vm3, %v3457_v39  ;;  %v3895_v59 = vadd.f32 %v3891_v43, %v3883_v13  ;;  %v9223_v17 = vld [vmem:[%s7548_s12 + $0x18e] sm:$0xff]  ;;  %v10515_v26 = vld [vmem:[#allocation25_spill] sm:$0xff]  ;;  %v3893_v2 = vmul.f32 0.0040881946, %v3889_v60  ;;  %v3905_v57 = vmul.f32 0.002269271, %v3901_v51 }
 0x148   : > { %v9226_v44 = vld [vmem:[%s7548_s12 + $0x187] sm:$0xff]  ;;  %v9229_v61 = vld [vmem:[%s7548_s12 + $0x18f] sm:$0xff]  ;;  %7108 = vmatpush3.bf16.msra.mxu0 %v10509_v58  ;;  %6633 = vmatprep.mubr.msk.f32.mxu0 %vm305_vm3, %v3918_v25  ;;  %v3873_v62 = vadd.f32 %v3869_v41, %v10515_v26  ;;  %v4103_v19 = vmul.f32 0.0019437153, %v9208_v54  ;;  %v4104_v11 = vmul.f32 0.0019437153, %v9211_v45  ;;  %v3920_v42 = vadd.f32 %v3916_v34, %v3908_v46 }
 0x149   : > { %v3434_v22 = vadd.f32 %v9119_v32, %v3422_v16  ;;  %v10516_v0 = vld [vmem:[#allocation26_spill] sm:$0xff]  ;;  %v3907_v24 = vadd.f32 %v3903_v48, %v3895_v59  ;;  %v4111_v49 = vmul.f32 0.0053566243, %v9214_v8  ;;  %v4112_v27 = vmul.f32 0.0053566243, %v9223_v17  ;;  %v9260_v33 = vld [vmem:[%s7548_s12 + $0x192] sm:$0xff] }
 0x14a   : > { %7110 = vmatprep.subr.bf16.mxu0 %v10516_v0  ;;  %v9240_v37 = vld [vmem:[%s7548_s12 + $0x188] sm:$0xff]  ;;  %v9243_v63 = vld [vmem:[%s7548_s12 + $0x190] sm:$0xff]  ;;  %v3885_v4 = vadd.f32 %v3881_v14, %v3873_v62  ;;  %v4123_v32 = vmul.f32 0.012895808, %v9226_v44  ;;  %v4124_v53 = vmul.f32 0.012895808, %v9229_v61 }
 0x14b   : > { %v9249_v5 = vld [vmem:[%s7548_s12 + $0x189] sm:$0xff]  ;;  %v3446_v6 = vadd.f32 %v9122_v7, %v3434_v22  ;;  %v4115_v36 = vadd.f32 %v4111_v49, %v4103_v19  ;;  %v4135_v55 = vmul.f32 0.027120944, %v9240_v37  ;;  %v9254_v38 = vld [vmem:[%s7548_s12 + $0x191] sm:$0xff]  ;;  %v3917_v35 = vmul.f32 0.0011967713, %v3913_v40 }
 0x14c   : > { %v9257_v10 = vld [vmem:[%s7548_s12 + $0x18a] sm:$0xff]  ;;  %7112 = vmatpush3.bf16.msra.mxu0 %v10516_v0  ;;  %v3897_v15 = vadd.f32 %v3893_v2, %v3885_v4  ;;  %v4116_v50 = vadd.f32 %v4112_v27, %v4104_v11  ;;  %v4136_v7 = vmul.f32 0.027120944, %v9243_v63  ;;  %v9268_v52 = vld [vmem:[%s7548_s12 + $0x193] sm:$0xff]  ;;  %v3919_v18 = vadd.f32 %v3915_v29, %v3907_v24  ;;  %v5830_v16 = vld [vmem:[%s7548_s12 + $0x180] sm:$0xff] }
 0x14d   : > { %v9265_v43 = vld [vmem:[%s7548_s12 + $0x18b] sm:$0xff]  ;;  %v3458_v21 = vadd.f32 %v9128_v1, %v3446_v6  ;;  %7115 = vmatprep.subr.msk.bf16.mxu0 %vm7541_vm2, %v9216_v23  ;;  %v4127_v12 = vadd.f32 %v4123_v32, %v4115_v36  ;;  %v4147_v25 = vmul.f32 0.049826447, %v9249_v5  ;;  %v9279_v34 = vld [vmem:[%s7548_s12 + $0x194] sm:$0xff]  ;;  %v9285_v3 = vmul.f32 0.049826447, %v9254_v38 }
 0x14e   : > { %v9276_v31 = vld [vmem:[%s7548_s12 + $0x18c] sm:$0xff]  ;;  %v9282_v60 = vld [vmem:[%s7548_s12 + $0x195] sm:$0xff]  ;;  %v3909_v51 = vadd.f32 %v3905_v57, %v3897_v15  ;;  %v4128_v28 = vadd.f32 %v4124_v53, %v4116_v50  ;;  %v4159_v1 = vmul.f32 0.079967566, %v9257_v10  ;;  %v4160_v29 = vmul.f32 0.079967566, %v9260_v33 }
 0x14f   : > { %v9289_v39 = vld [vmem:[%s7548_s12 + $0x196] sm:$0xff]  ;;  %6618 = vmatprep.mubr.msk.f32.mxu1 %vm305_vm3, %v3458_v21  ;;  %v4139_v48 = vadd.f32 %v4135_v55, %v4127_v12  ;;  %v4171_v41 = vmul.f32 0.11211578, %v9265_v43  ;;  %v4172_v14 = vmul.f32 0.11211578, %v9268_v52  ;;  %v5834_v62 = vld [vmem:[%s7548_s12 + $0x181] sm:$0xff] }
 0x150   : > { %v9292_v13 = vld [vmem:[%s7548_s12 + $0x197] sm:$0xff]  ;;  %6619 = vmatmul.mubr.msk.f32.vlgmr.msra.gmra.mrb[24].mxu1 %vm305_vm3, %v3459_v56  ;;  %7118 = vmatpush3.bf16.msk.msra.mxu0 %vm7541_vm2, %v9216_v23  ;;  %v9303_v46 = vadd.f32 %v3917_v35, %v3909_v51  ;;  %v4140_v59 = vadd.f32 %v4136_v7, %v4128_v28  ;;  %v4183_v40 = vmul.f32 0.13731514, %v9276_v31  ;;  %v4184_v26 = vmul.f32 0.13731514, %v9279_v34  ;;  %v5838_v2 = vld [vmem:[%s7548_s12 + $0x182] sm:$0xff] }
 0x151   : > { %7122 = vmatpush3.bf16.msra.mxu1 %v10509_v58  ;;  %6648 = vmatprep.mubr.msk.f32.mxu1 %vm305_vm3, %v3920_v42  ;;  %v4151_v57 = vadd.f32 %v4147_v25, %v4139_v48  ;;  %v4193_v56 = vmul.f32 0.14691597, %v9211_v45  ;;  %v4194_v19 = vmul.f32 0.14691597, %v9282_v60  ;;  %v4203_v22 = vmul.f32 0.13731514, %v9223_v17 }
 0x152   : > { %v5842_v24 = vld [vmem:[%s7548_s12 + $0x183] sm:$0xff]  ;;  %7124 = vmatprep.subr.bf16.mxu1 %v10516_v0  ;;  %7134 = vmatprep.subr.bf16.mxu0 %v8434_v30  ;;  %v4152_v11 = vadd.f32 %v9285_v3, %v4140_v59  ;;  %v4204_v49 = vmul.f32 0.13731514, %v9289_v39  ;;  %v4213_v4 = vmul.f32 0.11211578, %v9229_v61 }
 0x153   : > { %v4214_v27 = vmul.f32 0.11211578, %v9292_v13  ;;  %6634 = vmatmul.mubr.msk.f32.vlgmr.msra.gmra.mrb[26].mxu0 %vm305_vm3, %v3919_v18  ;;  %v4163_v32 = vadd.f32 %v4159_v1, %v4151_v57  ;;  %v4223_v53 = vmul.f32 0.079967566, %v9243_v63  ;;  %v9324_v6 = vmul.f32 0.027120944, %v9260_v33 }
 0x154   : > { %v9327_v42 = vmul.f32 0.012895808, %v9268_v52  ;;  %v5846_v36 = vld [vmem:[%s7548_s12 + $0x184] sm:$0xff]  ;;  %7136 = vmatpush3.bf16.msra.mxu0 %v8434_v30  ;;  %v4164_v55 = vadd.f32 %v4160_v29, %v4152_v11  ;;  %v4445_v15 = vmul.f32 0.0011967713, %v5830_v16 }
 0x155   : > { %v4446_v35 = vmul.f32 0.0011967713, %v9240_v37  ;;  %v4453_v50 = vmul.f32 0.002269271, %v5834_v62  ;;  %7126 = vmatpush3.bf16.msra.mxu1 %v10516_v0  ;;  %7138 = vmatprep.subr.bf16.mxu0 %v8701_v47  ;;  %v4175_v7 = vadd.f32 %v4171_v41, %v4163_v32  ;;  %v4454_v21 = vmul.f32 0.002269271, %v9249_v5 }
 0x156   : > { %v4465_v18 = vmul.f32 0.0040881946, %v5838_v2  ;;  %v4466_v12 = vmul.f32 0.0040881946, %v9257_v10  ;;  %7129 = vmatprep.subr.msk.bf16.mxu1 %vm7541_vm2, %v9216_v23  ;;  %v4176_v25 = vadd.f32 %v4172_v14, %v4164_v55  ;;  %v9340_v51 = vmul.f32 0.0053566243, %v9279_v34 }
 0x157   : > { %v4457_v28 = vadd.f32 %v4453_v50, %v4445_v15  ;;  %v4477_v1 = vmul.f32 0.006997561, %v5842_v24  ;;  %v4187_v48 = vadd.f32 %v4183_v40, %v4175_v7  ;;  %v9343_v29 = vmul.f32 0.0019437153, %v9282_v60 }
 0x158   : > { %v4458_v41 = vadd.f32 %v4454_v21, %v4446_v35  ;;  %v4478_v16 = vmul.f32 0.006997561, %v9265_v43  ;;  %7140 = vmatpush3.bf16.msra.mxu0 %v8701_v47  ;;  %v4188_v59 = vadd.f32 %v4184_v26, %v4176_v25  ;;  %v4489_v2 = vmul.f32 0.011379727, %v5846_v36  ;;  %v9386_v25 = vld [vmem:[%s7548_s12 + $0x1b5] sm:$0xff] }
 0x159   : > { %v4469_v62 = vadd.f32 %v4465_v18, %v4457_v28  ;;  %v4490_v57 = vmul.f32 0.011379727, %v9276_v31  ;;  %7132 = vmatpush3.bf16.msk.msra.mxu1 %vm7541_vm2, %v9216_v23  ;;  %7143 = vmatprep.subr.msk.bf16.mxu0 %vm7541_vm2, %v8707_v20  ;;  %v4197_v14 = vadd.f32 %v4193_v56, %v4187_v48  ;;  %v4497_v24 = vmul.f32 0.017582757, %v9208_v54  ;;  %v9389_v28 = vld [vmem:[%s7548_s12 + $0x1bd] sm:$0xff] }
 0x15a   : > { %v4470_v40 = vadd.f32 %v4466_v12, %v4458_v41  ;;  %v4498_v11 = vmul.f32 0.017582757, %v9211_v45  ;;  %7148 = vmatprep.subr.bf16.mxu1 %v8434_v30  ;;  %v4198_v26 = vadd.f32 %v4194_v19, %v4188_v59  ;;  %v4505_v36 = vmul.f32 0.025811432, %v9214_v8  ;;  %v9401_v48 = vld [vmem:[%s7548_s12 + $0x1b6] sm:$0xff]  ;;  %v9412_v59 = vld [vmem:[%s7548_s12 + $0x1be] sm:$0xff] }
 0x15b   : > { %v4481_v32 = vadd.f32 %v4477_v1, %v4469_v62  ;;  %v4506_v55 = vmul.f32 0.025811432, %v9223_v17  ;;  %v4207_v15 = vadd.f32 %v4203_v22, %v4197_v14  ;;  %v4513_v50 = vmul.f32 0.03600039, %v9226_v44  ;;  %v9415_v62 = vld [vmem:[%s7548_s12 + $0x1b7] sm:$0xff] }
 0x15c   : > { %v4482_v35 = vadd.f32 %v4478_v16, %v4470_v40  ;;  %v4514_v7 = vmul.f32 0.03600039, %v9229_v61  ;;  %6649 = vmatmul.mubr.msk.f32.vlgmr.msra.gmra.mrb[26].mxu1 %vm305_vm3, %v9303_v46  ;;  %7146 = vmatpush3.bf16.msk.msra.mxu0 %vm7541_vm2, %v8707_v20  ;;  %v4208_v54 = vadd.f32 %v4204_v49, %v4198_v26  ;;  %v4521_v19 = vmul.f32 0.047705922, %v9240_v37 }
 0x15d   : > { %v4493_v56 = vadd.f32 %v4489_v2, %v4481_v32  ;;  %v4522_v8 = vmul.f32 0.047705922, %v9243_v63  ;;  %7150 = vmatpush3.bf16.msra.mxu1 %v8434_v30  ;;  %v4217_v44 = vadd.f32 %v4213_v4, %v4207_v15  ;;  %v4529_v21 = vmul.f32 0.06006305, %v9249_v5  ;;  %7162 = vmatprep.subr.bf16.mxu0 %v10509_v58  ;;  %v9457_v15 = vld [vmem:[%s7548_s12 + $0x1c1] sm:$0xff] }
 0x15e   : > { %v4494_v22 = vadd.f32 %v4490_v57, %v4482_v35  ;;  %v9371_v46 = vmul.f32 0.06006305, %v9254_v38  ;;  %7152 = vmatprep.subr.bf16.mxu1 %v8701_v47  ;;  %v9375_v49 = vadd.f32 %v4214_v27, %v4208_v54  ;;  %v4537_v18 = vmul.f32 0.071847625, %v9257_v10 }
 0x15f   : > { %v4501_v37 = vadd.f32 %v4497_v24, %v4493_v56  ;;  %v4538_v30 = vmul.f32 0.071847625, %v9260_v33  ;;  %v4227_v12 = vadd.f32 %v4223_v53, %v4217_v44  ;;  %v9380_v5 = vmul.f32 0.08165588, %v9265_v43  ;;  %v9437_v24 = vld [vmem:[%s7548_s12 + $0x1bf] sm:$0xff] }
 0x160   : > { %v4502_v4 = vadd.f32 %v4498_v11, %v4494_v22  ;;  %v9383_v38 = vmul.f32 0.08165588, %v9268_v52  ;;  %v9392_v1 = vmul.f32 0.08817236, %v9276_v31  ;;  %v9395_v10 = vmul.f32 0.08817236, %v9279_v34 }
 0x161   : > { %v4509_v27 = vadd.f32 %v4505_v36, %v4501_v37  ;;  %v9398_v53 = vmul.f32 0.09045811, %v9211_v45  ;;  %7154 = vmatpush3.bf16.msra.mxu1 %v8701_v47  ;;  %v4235_v43 = vadd.f32 %v4227_v12, %v9285_v3  ;;  %v9406_v16 = vmul.f32 0.09045811, %v9282_v60  ;;  %v9440_v11 = vld [vmem:[%s7548_s12 + $0x1b8] sm:$0xff]  ;;  %v9472_v22 = vld [vmem:[%s7548_s12 + $0x1c2] sm:$0xff] }
 0x162   : > { %v4510_v41 = vadd.f32 %v4506_v55, %v4502_v4  ;;  %v9409_v31 = vmul.f32 0.08817236, %v9223_v17  ;;  %7157 = vmatprep.subr.msk.bf16.mxu1 %vm7541_vm2, %v8707_v20  ;;  %v9421_v45 = vmul.f32 0.08817236, %v9289_v39  ;;  %v9424_v3 = vmul.f32 0.08165588, %v9229_v61 }
 0x163   : > { %v4517_v47 = vadd.f32 %v4513_v50, %v4509_v27  ;;  %v9427_v2 = vmul.f32 0.08165588, %v9292_v13  ;;  %v4245_v17 = vadd.f32 %v9324_v6, %v4235_v43  ;;  %v9431_v14 = vmul.f32 0.071847625, %v9243_v63  ;;  %v9469_v44 = vld [vmem:[%s7548_s12 + $0x1ba] sm:$0xff] }
 0x164   : > { %v4518_v57 = vadd.f32 %v4514_v7, %v4510_v41  ;;  %v9434_v40 = vmul.f32 0.047705922, %v9260_v33  ;;  %v9443_v26 = vmul.f32 0.03600039, %v9268_v52  ;;  %v4105_v32 = vmul.f32 0.0019437153, %v9386_v25 }
 0x165   : > { %v4525_v61 = vadd.f32 %v4521_v19, %v4517_v47  ;;  %v4106_v6 = vmul.f32 0.0019437153, %v9389_v28  ;;  %7160 = vmatpush3.bf16.msk.msra.mxu1 %vm7541_vm2, %v8707_v20  ;;  %v4255_v63 = vadd.f32 %v9327_v42, %v4245_v17  ;;  %v4113_v36 = vmul.f32 0.0053566243, %v9401_v48  ;;  %v9454_v52 = vld [vmem:[%s7548_s12 + $0x1c0] sm:$0xff] }
 0x166   : > { %v4526_v33 = vadd.f32 %v4522_v8, %v4518_v57  ;;  %v4114_v55 = vmul.f32 0.0053566243, %v9412_v59  ;;  %v4125_v50 = vmul.f32 0.012895808, %v9415_v62  ;;  %v4126_v7 = vmul.f32 0.012895808, %v9437_v24  ;;  %7176 = vmatprep.subr.bf16.mxu1 %v10509_v58 }
 0x167   : > { %v4533_v35 = vadd.f32 %v4529_v21, %v4525_v61  ;;  %v4137_v20 = vmul.f32 0.027120944, %v9440_v11  ;;  %v4265_v42 = vadd.f32 %v9340_v51, %v4255_v63  ;;  %v4117_v56 = vadd.f32 %v4113_v36, %v4105_v32  ;;  %v9466_v8 = vld [vmem:[%s7548_s12 + $0x1b9] sm:$0xff]  ;;  %v9484_v17 = vld [vmem:[%s7548_s12 + $0x1c3] sm:$0xff]  ;;  %v9492_v61 = vpop.f32.mrb[0].mxu0  ;;  %v9494_v32 = vpop.f32.mrb[0].mxu1 }
 0x168   : > { %v4534_v54 = vadd.f32 %v9371_v46, %v4526_v33  ;;  %v4118_v19 = vadd.f32 %v4114_v55, %v4106_v6  ;;  %v4138_v37 = vmul.f32 0.027120944, %v9454_v52  ;;  %v4149_v12 = vmul.f32 0.049826447, %v9466_v8  ;;  %v9481_v47 = vld [vmem:[%s7548_s12 + $0x1bb] sm:$0xff]  ;;  %10517 = vst [vmem:[#allocation19_spill] sm:$0xff] %v9492_v61 }
 0x169   : > { %v4541_v21 = vadd.f32 %v4537_v18, %v4533_v35  ;;  %v9477_v51 = vmul.f32 0.049826447, %v9457_v15  ;;  %v4275_v4 = vadd.f32 %v9343_v29, %v4265_v42  ;;  %v4129_v43 = vadd.f32 %v4125_v50, %v4117_v56  ;;  %v9487_v57 = vld [vmem:[%s7548_s12 + $0x1bc] sm:$0xff]  ;;  %v9490_v18 = vld [vmem:[%s7548_s12 + $0x1c4] sm:$0xff]  ;;  %10518 = vst [vmem:[#allocation22_spill] sm:$0xff] %v9494_v32 }
 0x16a   : > { %v4542_v27 = vadd.f32 %v4538_v30, %v4534_v54  ;;  %v4130_v41 = vadd.f32 %v4126_v7, %v4118_v19  ;;  %v9498_v29 = vmul.f32 0.025811432, %v9279_v34  ;;  %v9501_v30 = vmul.f32 0.017582757, %v9282_v60  ;;  %v9508_v50 = vld [vmem:[%s7548_s12 + $0x1c5] sm:$0xff]  ;;  %v9513_v34 = vpop.f32.mrb[1].mxu0 }
 0x16b   : > { %v4549_v6 = vadd.f32 %v9380_v5, %v4541_v21  ;;  %v4161_v63 = vmul.f32 0.079967566, %v9469_v44  ;;  %6663 = vmatprep.mubr.msk.f32.mxu0 %vm305_vm3, %v4275_v4  ;;  %v4141_v36 = vadd.f32 %v4137_v20, %v4129_v43  ;;  %v4162_v35 = vmul.f32 0.079967566, %v9472_v22  ;;  %v9511_v5 = vld [vmem:[%s7548_s12 + $0x1c6] sm:$0xff]  ;;  %10521 = vst [vmem:[#allocation12_spill] sm:$0xff] %v9513_v34 }
 0x16c   : > { %10519 = vst [vmem:[#allocation21_spill] sm:$0xff] %v9498_v29  ;;  %10520 = vst [vmem:[#allocation11_spill] sm:$0xff] %v9501_v30  ;;  %v4550_v33 = vadd.f32 %v9383_v38, %v4542_v27  ;;  %v4142_v55 = vadd.f32 %v4138_v37, %v4130_v41  ;;  %v9515_v60 = vpop.f32.mrb[1].mxu1  ;;  %v4173_v42 = vmul.f32 0.11211578, %v9481_v47  ;;  %v9525_v37 = vld [vmem:[%s7548_s12 + $0x1c7] sm:$0xff] }
 0x16d   : > { %10522 = vst [vmem:[#allocation35_spill] sm:$0xff] %v9515_v60  ;;  %v4557_v7 = vadd.f32 %v9392_v1, %v4549_v6  ;;  %v4174_v38 = vmul.f32 0.11211578, %v9484_v17  ;;  %v4185_v20 = vmul.f32 0.13731514, %v9487_v57  ;;  %v4153_v56 = vadd.f32 %v4149_v12, %v4141_v36  ;;  %v5832_v4 = vld [vmem:[%s7548_s12 + $0x1b0] sm:$0xff] }
 0x16e   : > { %v4558_v54 = vadd.f32 %v9395_v10, %v4550_v33  ;;  %v4154_v19 = vadd.f32 %v9477_v51, %v4142_v55  ;;  %v4186_v21 = vmul.f32 0.13731514, %v9490_v18  ;;  %v9528_v27 = vpop.f32.mrb[2].mxu0  ;;  %v9530_v1 = vpop.f32.mrb[2].mxu1  ;;  %v4195_v41 = vmul.f32 0.14691597, %v9389_v28 }
 0x16f   : > { %10523 = vst [vmem:[#allocation31_spill] sm:$0xff] %v9528_v27  ;;  %10524 = vst [vmem:[#allocation24_spill] sm:$0xff] %v9530_v1  ;;  %v4565_v43 = vadd.f32 %v9398_v53, %v4557_v7  ;;  %v4196_v10 = vmul.f32 0.14691597, %v9508_v50  ;;  %v4205_v12 = vmul.f32 0.13731514, %v9412_v59  ;;  %v4165_v33 = vadd.f32 %v4161_v63, %v4153_v56 }
 0x170   : > { %v4566_v6 = vadd.f32 %v9406_v16, %v4558_v54  ;;  %v4166_v36 = vadd.f32 %v4162_v35, %v4154_v19  ;;  %v4206_v55 = vmul.f32 0.13731514, %v9511_v5  ;;  %v5836_v60 = vld [vmem:[%s7548_s12 + $0x1b1] sm:$0xff]  ;;  %v9540_v32 = vpop.f32.mrb[3].mxu0  ;;  %v9542_v1 = vpop.f32.mrb[3].mxu1 }
 0x171   : > { %v5840_v34 = vld [vmem:[%s7548_s12 + $0x1b2] sm:$0xff]  ;;  %10525 = vst [vmem:[#allocation38_spill] sm:$0xff] %v9540_v32  ;;  %10526 = vst [vmem:[#allocation43_spill] sm:$0xff] %v9542_v1  ;;  %v4573_v53 = vadd.f32 %v9409_v31, %v4565_v43  ;;  %v4215_v7 = vmul.f32 0.11211578, %v9437_v24  ;;  %v4177_v63 = vadd.f32 %v4173_v42, %v4165_v33  ;;  %v9554_v19 = vpop.f32.mrb[4].mxu0 }
 0x172   : > { %v4216_v61 = vmul.f32 0.11211578, %v9525_v37  ;;  %v4225_v16 = vmul.f32 0.079967566, %v9454_v52  ;;  %v4178_v35 = vadd.f32 %v4174_v38, %v4166_v36  ;;  %v9549_v54 = vmul.f32 0.027120944, %v9472_v22 }
 0x173   : > { %v9552_v56 = vmul.f32 0.012895808, %v9484_v17  ;;  %10527 = vst [vmem:[#allocation39_spill] sm:$0xff] %v9554_v19  ;;  %v9556_v1 = vpop.f32.mrb[4].mxu1  ;;  %v4574_v31 = vadd.f32 %v9421_v45, %v4566_v6  ;;  %v4581_v43 = vadd.f32 %v9424_v3, %v4573_v53  ;;  %v4447_v32 = vmul.f32 0.0011967713, %v5832_v4 }
 0x174   : > { %10528 = vst [vmem:[#allocation28_spill] sm:$0xff] %v9556_v1  ;;  %v4448_v27 = vmul.f32 0.0011967713, %v9440_v11  ;;  %v5848_v42 = vld [vmem:[%s7548_s12 + $0x1b4] sm:$0xff]  ;;  %v4189_v38 = vadd.f32 %v4185_v20, %v4177_v63  ;;  %v4190_v33 = vadd.f32 %v4186_v21, %v4178_v35  ;;  %v9564_v36 = vmul.f32 0.0053566243, %v9490_v18 }
 0x175   : > { %v4455_v23 = vmul.f32 0.002269271, %v5836_v60  ;;  %v9566_v30 = vpop.f32.mrb[5].mxu0  ;;  %v9568_v19 = vpop.f32.mrb[5].mxu1  ;;  %v4589_v1 = vadd.f32 %v9431_v14, %v4581_v43  ;;  %v4456_v45 = vmul.f32 0.002269271, %v9466_v8  ;;  %v9578_v60 = vadd.f32 %v9427_v2, %v4574_v31 }
 0x176   : > { %10529 = vst [vmem:[#allocation23_spill] sm:$0xff] %v9566_v30  ;;  %10530 = vst [vmem:[#allocation34_spill] sm:$0xff] %v9568_v19  ;;  %v4467_v3 = vmul.f32 0.0040881946, %v5840_v34  ;;  %v4468_v4 = vmul.f32 0.0040881946, %v9469_v44  ;;  %v4199_v6 = vadd.f32 %v4195_v41, %v4189_v38  ;;  %v4200_v53 = vadd.f32 %v4196_v10, %v4190_v33 }
 0x177   : > { %v4459_v29 = vadd.f32 %v4455_v23, %v4447_v32  ;;  %v4479_v20 = vmul.f32 0.006997561, %v5844_v9  ;;  %v9573_v21 = vpop.f32.mrb[6].mxu0  ;;  %v9575_v63 = vpop.f32.mrb[6].mxu1  ;;  %v9581_v35 = vmul.f32 0.0019437153, %v9508_v50  ;;  %v4460_v14 = vadd.f32 %v4456_v45, %v4448_v27 }
 0x178   : > { %v4480_v43 = vmul.f32 0.006997561, %v9481_v47  ;;  %v9584_v34 = vpop.f32.mrb[7].mxu0  ;;  %v9586_v19 = vpop.f32.mrb[7].mxu1  ;;  %v4209_v41 = vadd.f32 %v4205_v12, %v4199_v6  ;;  %v4210_v23 = vadd.f32 %v4206_v55, %v4200_v53  ;;  %v4491_v32 = vmul.f32 0.011379727, %v5848_v42 }
 0x179   : > { %10531 = vst [vmem:[#allocation16_spill] sm:$0xff] %v9584_v34  ;;  %10532 = vst [vmem:[#allocation41_spill] sm:$0xff] %v9586_v19  ;;  %v4471_v9 = vadd.f32 %v4467_v3, %v4459_v29  ;;  %v9588_v10 = vpop.f32.mrb[8].mxu0  ;;  %v9590_v38 = vpop.f32.mrb[8].mxu1  ;;  %v9593_v2 = vadd.f32 %v4589_v1, %v9371_v46  ;;  %v4472_v31 = vadd.f32 %v4468_v4, %v4460_v14  ;;  %v4492_v27 = vmul.f32 0.011379727, %v9487_v57 }
 0x17a   : > { %10533 = vst [vmem:[#allocation40_spill] sm:$0xff] %v9588_v10  ;;  %10534 = vst [vmem:[#allocation14_spill] sm:$0xff] %v9590_v38  ;;  %v4499_v33 = vmul.f32 0.017582757, %v9386_v25  ;;  %v4219_v45 = vadd.f32 %v4215_v7, %v4209_v41  ;;  %v4500_v19 = vmul.f32 0.017582757, %v9389_v28  ;;  %v9603_v42 = vadd.f32 %v4216_v61, %v4210_v23 }
 0x17b   : > { %v4483_v30 = vadd.f32 %v4479_v20, %v4471_v9  ;;  %v4507_v12 = vmul.f32 0.025811432, %v9401_v48  ;;  %v9599_v29 = vpop.f32.mrb[9].mxu0  ;;  %v9601_v55 = vpop.f32.mrb[9].mxu1  ;;  %v4484_v3 = vadd.f32 %v4480_v43, %v4472_v31  ;;  %v4508_v46 = vmul.f32 0.025811432, %v9412_v59 }
 0x17c   : > { %10535 = vst [vmem:[#allocation17_spill] sm:$0xff] %v9599_v29  ;;  %10536 = vst [vmem:[#allocation37_spill] sm:$0xff] %v9601_v55  ;;  %v4515_v1 = vmul.f32 0.03600039, %v9415_v62  ;;  %v4229_v4 = vadd.f32 %v4225_v16, %v4219_v45  ;;  %v4516_v25 = vmul.f32 0.03600039, %v9437_v24 }
 0x17d   : > { %v4495_v6 = vadd.f32 %v4491_v32, %v4483_v30  ;;  %v4523_v7 = vmul.f32 0.047705922, %v9440_v11  ;;  %v9609_v53 = vpop.f32.mrb[10].mxu0  ;;  %v9611_v48 = vpop.f32.mrb[10].mxu1  ;;  %v4496_v20 = vadd.f32 %v4492_v27, %v4484_v3  ;;  %v4524_v61 = vmul.f32 0.047705922, %v9454_v52 }
 0x17e   : > { %10537 = vst [vmem:[#allocation15_spill] sm:$0xff] %v9609_v53  ;;  %10538 = vst [vmem:[#allocation18_spill] sm:$0xff] %v9611_v48  ;;  %v4531_v14 = vmul.f32 0.06006305, %v9466_v8  ;;  %v9616_v43 = vmul.f32 0.06006305, %v9457_v15  ;;  %v4237_v62 = vadd.f32 %v4229_v4, %v9477_v51 }
 0x17f   : > { %v4503_v30 = vadd.f32 %v4499_v33, %v4495_v6  ;;  %v4539_v11 = vmul.f32 0.071847625, %v9469_v44  ;;  %v4540_v16 = vmul.f32 0.071847625, %v9472_v22  ;;  %v9621_v41 = vpop.f32.mrb[11].mxu0  ;;  %v9623_v23 = vpop.f32.mrb[11].mxu1  ;;  %v4504_v9 = vadd.f32 %v4500_v19, %v4496_v20 }
 0x180   : > { %10539 = vst [vmem:[#allocation42_spill] sm:$0xff] %v9621_v41  ;;  %10540 = vst [vmem:[#allocation36_spill] sm:$0xff] %v9623_v23  ;;  %v4547_v32 = vmul.f32 0.08165588, %v9481_v47  ;;  %v4548_v8 = vmul.f32 0.08165588, %v9484_v17  ;;  %v4247_v44 = vadd.f32 %v9549_v54, %v4237_v62 }
 0x181   : > { %v9628_v15 = vmul.f32 0.08817236, %v9487_v57  ;;  %v9631_v51 = vld [vmem:[%s7548_s12 + $0x198] sm:$0xff]  ;;  %v4511_v27 = vadd.f32 %v4507_v12, %v4503_v30  ;;  %v9638_v33 = vmul.f32 0.08817236, %v9490_v18  ;;  %v9646_v45 = vpop.f32.mrb[12].mxu0  ;;  %v4512_v57 = vadd.f32 %v4508_v46, %v4504_v9 }
 0x182   : > { %v9634_v31 = vld [vmem:[%s7548_s12 + $0x199] sm:$0xff]  ;;  %v9641_v19 = vmul.f32 0.09045811, %v9389_v28  ;;  %10541 = vst [vmem:[#allocation29_spill] sm:$0xff] %v9646_v45  ;;  %v9648_v3 = vpop.f32.mrb[12].mxu1  ;;  %v4257_v28 = vadd.f32 %v9552_v56, %v4247_v44  ;;  %v9667_v30 = vpop.f32.mrb[13].mxu0 }
 0x183   : > { %v9644_v47 = vld [vmem:[%s7548_s12 + $0x19a] sm:$0xff]  ;;  %10542 = vst [vmem:[#allocation20_spill] sm:$0xff] %v9648_v3  ;;  %v9651_v4 = vmul.f32 0.09045811, %v9508_v50  ;;  %v9654_v6 = vmul.f32 0.08817236, %v9412_v59  ;;  %v4519_v20 = vadd.f32 %v4515_v1, %v4511_v27  ;;  %v4520_v59 = vadd.f32 %v4516_v25, %v4512_v57 }
 0x184   : > { %v9657_v54 = vmul.f32 0.08817236, %v9511_v5  ;;  %v5818_v12 = vld [vmem:[%s7548_s12 + $0x19b] sm:$0xff]  ;;  %v9662_v62 = vmul.f32 0.08165588, %v9437_v24  ;;  %10543 = vst [vmem:[#allocation33_spill] sm:$0xff] %v9667_v30  ;;  %v4267_v24 = vadd.f32 %v9564_v36, %v4257_v28 }
 0x185   : > { %v9665_v46 = vmul.f32 0.08165588, %v9525_v37  ;;  %v9669_v9 = vpop.f32.mrb[13].mxu1  ;;  %v9672_v23 = vmul.f32 0.071847625, %v9454_v52  ;;  %v4527_v1 = vadd.f32 %v4523_v7, %v4519_v20  ;;  %v5822_v25 = vld [vmem:[%s7548_s12 + $0x19d] sm:$0xff]  ;;  %v4528_v57 = vadd.f32 %v4524_v61, %v4520_v59 }
 0x186   : > { %10544 = vst [vmem:[#allocation32_spill] sm:$0xff] %v9669_v9  ;;  %v9675_v41 = vmul.f32 0.047705922, %v9472_v22  ;;  %v9678_v56 = vmul.f32 0.03600039, %v9484_v17  ;;  %v5820_v9 = vld [vmem:[%s7548_s12 + $0x19c] sm:$0xff]  ;;  %v4277_v30 = vadd.f32 %v9581_v35, %v4267_v24 }
 0x187   : > { %v4224_v44 = vmul.f32 0.079967566, %v9631_v51  ;;  %v4233_v27 = vmul.f32 0.049826447, %v9634_v31  ;;  %v9686_v52 = vmul.f32 0.025811432, %v9490_v18  ;;  %v4535_v36 = vadd.f32 %v4531_v14, %v4527_v1 }
 0x188   : > { %v9689_v22 = vmul.f32 0.017582757, %v9508_v50  ;;  %v4242_v17 = vmul.f32 0.027120944, %v9644_v47  ;;  %v4252_v28 = vmul.f32 0.012895808, %v5818_v12  ;;  %v4536_v18 = vadd.f32 %v9616_v43, %v4528_v57  ;;  %6678 = vmatprep.mubr.msk.f32.mxu1 %vm305_vm3, %v4277_v30 }
 0x189   : > { %v4228_v7 = vadd.f32 %v4224_v44, %v9375_v49  ;;  %v9695_v20 = vld [vmem:[%s7548_s12 + $0x1c8] sm:$0xff]  ;;  %v4262_v61 = vmul.f32 0.0053566243, %v5820_v9  ;;  %v4586_v50 = vmul.f32 0.071847625, %v9631_v51  ;;  %v4543_v35 = vadd.f32 %v4539_v11, %v4535_v36 }
 0x18a   : > { %v9698_v48 = vld [vmem:[%s7548_s12 + $0x1c9] sm:$0xff]  ;;  %v4593_v59 = vmul.f32 0.06006305, %v9634_v31  ;;  %v4272_v24 = vmul.f32 0.0019437153, %v5822_v25  ;;  %v4544_v44 = vadd.f32 %v4540_v16, %v4536_v18 }
 0x18b   : > { %v4236_v14 = vadd.f32 %v4233_v27, %v4228_v7  ;;  %v4600_v49 = vmul.f32 0.047705922, %v9644_v47  ;;  %v9706_v1 = vld [vmem:[%s7548_s12 + $0x1ca] sm:$0xff]  ;;  %v4590_v3 = vadd.f32 %v4586_v50, %v9578_v60  ;;  %v4608_v57 = vmul.f32 0.03600039, %v5818_v12 }
 0x18c   : > { %v4226_v53 = vmul.f32 0.079967566, %v9695_v20  ;;  %v5819_v45 = vld [vmem:[%s7548_s12 + $0x1cb] sm:$0xff]  ;;  %v4551_v55 = vadd.f32 %v4547_v32, %v4543_v35  ;;  %v4616_v38 = vmul.f32 0.025811432, %v5820_v9  ;;  %v4552_v27 = vadd.f32 %v4548_v8, %v4544_v44  ;;  %v5855_v44 = vld [vmem:[%s7548_s12 + $0x19f] sm:$0xff] }
 0x18d   : > { %v4246_v29 = vadd.f32 %v4242_v17, %v4236_v14  ;;  %v4234_v30 = vmul.f32 0.049826447, %v9698_v48  ;;  %v5821_v11 = vld [vmem:[%s7548_s12 + $0x1cc] sm:$0xff]  ;;  %v4596_v36 = vadd.f32 %v4593_v59, %v4590_v3  ;;  %v4244_v10 = vmul.f32 0.027120944, %v9706_v1 }
 0x18e   : > { %v4230_v7 = vadd.f32 %v4226_v53, %v9603_v42  ;;  %v5823_v34 = vld [vmem:[%s7548_s12 + $0x1cd] sm:$0xff]  ;;  %v4559_v16 = vadd.f32 %v9628_v15, %v4551_v55  ;;  %v4624_v12 = vmul.f32 0.017582757, %v5822_v25  ;;  %v4254_v18 = vmul.f32 0.012895808, %v5819_v45 }
 0x18f   : > { %v4256_v60 = vadd.f32 %v4252_v28, %v4246_v29  ;;  %v4560_v50 = vadd.f32 %v9638_v33, %v4552_v27  ;;  %v4604_v32 = vadd.f32 %v4600_v49, %v4596_v36  ;;  %v4264_v9 = vmul.f32 0.0053566243, %v5821_v11  ;;  %v5867_v36 = vld [vmem:[%s7548_s12 + $0x1a2] sm:$0xff] }
 0x190   : > { %v4238_v17 = vadd.f32 %v4234_v30, %v4230_v7  ;;  %v4567_v35 = vadd.f32 %v9641_v19, %v4559_v16  ;;  %v4274_v8 = vmul.f32 0.0019437153, %v5823_v34  ;;  %v4588_v3 = vmul.f32 0.071847625, %v9695_v20  ;;  %v5853_v7 = vld [vmem:[%s7548_s12 + $0x1ce] sm:$0xff] }
 0x191   : > { %v4266_v14 = vadd.f32 %v4262_v61, %v4256_v60  ;;  %v4568_v42 = vadd.f32 %v9651_v4, %v4560_v50  ;;  %v4612_v53 = vadd.f32 %v4608_v57, %v4604_v32  ;;  %v4594_v55 = vmul.f32 0.06006305, %v9698_v48 }
 0x192   : > { %v4248_v59 = vadd.f32 %v4244_v10, %v4238_v17  ;;  %v4575_v29 = vadd.f32 %v9654_v6, %v4567_v35  ;;  %v4602_v33 = vmul.f32 0.047705922, %v9706_v1  ;;  %v4610_v25 = vmul.f32 0.03600039, %v5819_v45 }
 0x193   : > { %v4276_v15 = vadd.f32 %v4272_v24, %v4266_v14  ;;  %v4576_v28 = vadd.f32 %v9657_v54, %v4568_v42  ;;  %v4620_v49 = vadd.f32 %v4616_v38, %v4612_v53  ;;  %v4603_v61 = vadd.f32 %v9434_v40, %v9593_v2 }
 0x194   : > { %v4258_v19 = vadd.f32 %v4254_v18, %v4248_v59  ;;  %v4583_v4 = vadd.f32 %v9662_v62, %v4575_v29  ;;  %v9729_v10 = vmul.f32 0.025811432, %v5821_v11  ;;  %v9731_v6 = vmul.f32 0.017582757, %v5823_v34  ;;  %v10545_v11 = vld [vmem:[#allocation21_spill] sm:$0xff]  ;;  %v10546_v18 = vld [vmem:[#allocation11_spill] sm:$0xff] }
 0x195   : > { %6664 = vmatmul.mubr.msk.f32.vlgmr.msra.gmra.mrb[28].mxu0 %vm305_vm3, %v4276_v15  ;;  %v4635_v24 = vmul.f32 0.011379727, %v9289_v39  ;;  %v4584_v45 = vadd.f32 %v9665_v46, %v4576_v28  ;;  %v4611_v40 = vadd.f32 %v9443_v26, %v4603_v61  ;;  %v4647_v2 = vmul.f32 0.006997561, %v9292_v13  ;;  %v5851_v46 = vld [vmem:[%s7548_s12 + $0x19e] sm:$0xff]  ;;  %v9779_v29 = vld [vmem:[%s7548_s12 + $0x1e8] sm:$0xff] }
 0x196   : > { %v4268_v38 = vadd.f32 %v4264_v9, %v4258_v19  ;;  %7164 = vmatpush3.bf16.msra.mxu0 %v10509_v58  ;;  %v4591_v54 = vadd.f32 %v9672_v23, %v4583_v4  ;;  %v4628_v34 = vadd.f32 %v4624_v12, %v4620_v49  ;;  %v4659_v39 = vmul.f32 0.0040881946, %v9631_v51  ;;  %v5859_v13 = vld [vmem:[%s7548_s12 + $0x1a0] sm:$0xff]  ;;  %v5857_v51 = vld [vmem:[%s7548_s12 + $0x1cf] sm:$0xff] }
 0x197   : > { %7166 = vmatprep.subr.bf16.mxu0 %v10516_v0  ;;  %v9742_v62 = vmul.f32 0.002269271, %v9634_v31  ;;  %v4592_v30 = vadd.f32 %v4588_v3, %v4584_v45  ;;  %v4619_v26 = vadd.f32 %v10545_v11, %v4611_v40  ;;  %v9748_v27 = vmul.f32 0.0011967713, %v9644_v47  ;;  %v5863_v23 = vld [vmem:[%s7548_s12 + $0x1a1] sm:$0xff]  ;;  %v9783_v28 = vld [vmem:[%s7548_s12 + $0x1e9] sm:$0xff] }
 0x198   : > { %v4278_v57 = vadd.f32 %v4274_v8, %v4268_v38  ;;  %v4597_v31 = vadd.f32 %v4591_v54, %v9616_v43  ;;  %v4637_v16 = vmul.f32 0.011379727, %v9511_v5  ;;  %v9758_v60 = vmul.f32 0.006997561, %v9525_v37  ;;  %v5861_v43 = vld [vmem:[%s7548_s12 + $0x1d0] sm:$0xff]  ;;  %v5878_v9 = vld [vmem:[%s7548_s12 + $0x1e0] sm:$0xff] }
 0x199   : > { %v9761_v12 = vmul.f32 0.0040881946, %v9695_v20  ;;  %v4598_v47 = vadd.f32 %v4594_v55, %v4592_v30  ;;  %v4627_v50 = vadd.f32 %v10546_v18, %v4619_v26  ;;  %v4636_v32 = vmul.f32 0.011379727, %v5851_v46  ;;  %v5865_v5 = vld [vmem:[%s7548_s12 + $0x1d1] sm:$0xff]  ;;  %v5882_v15 = vld [vmem:[%s7548_s12 + $0x1e1] sm:$0xff] }
 0x19a   : > { %6679 = vmatmul.mubr.msk.f32.vlgmr.msra.gmra.mrb[28].mxu1 %vm305_vm3, %v4278_v57  ;;  %7168 = vmatpush3.bf16.msra.mxu0 %v10516_v0  ;;  %v4648_v17 = vmul.f32 0.006997561, %v5855_v44  ;;  %v10547_v37 = vld [vmem:[#allocation30_spill] sm:$0xff]  ;;  %v4605_v35 = vadd.f32 %v9675_v41, %v4597_v31  ;;  %v9775_v14 = vmul.f32 0.002269271, %v9698_v48  ;;  %v5886_v45 = vld [vmem:[%s7548_s12 + $0x1e2] sm:$0xff] }
 0x19b   : > { %7178 = vmatpush3.bf16.msra.mxu1 %v10509_v58  ;;  %7171 = vmatprep.subr.msk.bf16.mxu0 %vm7541_vm2, %v10547_v37  ;;  %v4660_v8 = vmul.f32 0.0040881946, %v5859_v13  ;;  %v4672_v3 = vmul.f32 0.002269271, %v5863_v23  ;;  %v4606_v42 = vadd.f32 %v4602_v33, %v4598_v47  ;;  %v4639_v53 = vadd.f32 %v4635_v24, %v4627_v50  ;;  %v9795_v38 = vld [vmem:[%s7548_s12 + $0x1ea] sm:$0xff]  ;;  %v5904_v20 = vld [vmem:[%s7548_s12 + $0x216] sm:$0xff] }
 0x19c   : > { %7180 = vmatprep.subr.bf16.mxu1 %v10516_v0  ;;  %v4640_v59 = vadd.f32 %v4636_v32, %v4628_v34  ;;  %v4684_v55 = vmul.f32 0.0011967713, %v5867_v36  ;;  %v4613_v41 = vadd.f32 %v9678_v56, %v4605_v35  ;;  %v4638_v49 = vmul.f32 0.011379727, %v5853_v7  ;;  %v5890_v57 = vld [vmem:[%s7548_s12 + $0x1e3] sm:$0xff]  ;;  %v9824_v50 = vld [vmem:[%s7548_s12 + $0x1ed] sm:$0xff] }
 0x19d   : > { %v4650_v48 = vmul.f32 0.006997561, %v5857_v51  ;;  %v9786_v19 = vmul.f32 0.0040881946, %v5861_v43  ;;  %v4614_v61 = vadd.f32 %v4610_v25, %v4606_v42  ;;  %v4651_v33 = vadd.f32 %v4647_v2, %v4639_v53  ;;  %v5894_v7 = vld [vmem:[%s7548_s12 + $0x1e4] sm:$0xff]  ;;  %v9816_v51 = vld [vmem:[%s7548_s12 + $0x1ec] sm:$0xff] }
 0x19e   : > { %7174 = vmatpush3.bf16.msk.msra.mxu0 %vm7541_vm2, %v10547_v37  ;;  %v4652_v4 = vadd.f32 %v4648_v17, %v4640_v59  ;;  %v9791_v24 = vmul.f32 0.002269271, %v5865_v5  ;;  %v4621_v56 = vadd.f32 %v9686_v52, %v4613_v41  ;;  %v4908_v25 = vmul.f32 0.0011967713, %v5878_v9  ;;  %v9808_v52 = vld [vmem:[%s7548_s12 + $0x1eb] sm:$0xff] }
 0x19f   : > { %7182 = vmatpush3.bf16.msra.mxu1 %v10516_v0  ;;  %7190 = vmatprep.subr.bf16.mxu0 %v10509_v58  ;;  %v4909_v40 = vmul.f32 0.0011967713, %v9779_v29  ;;  %v4916_v54 = vmul.f32 0.002269271, %v5882_v15  ;;  %v4622_v2 = vadd.f32 %v9729_v10, %v4614_v61  ;;  %v4663_v34 = vadd.f32 %v4659_v39, %v4651_v33  ;;  %v5898_v18 = vld [vmem:[%s7548_s12 + $0x1e5] sm:$0xff]  ;;  %v5869_v43 = vld [vmem:[%s7548_s12 + $0x1d2] sm:$0xff] }
 0x1a0   : > { %7185 = vmatprep.subr.msk.bf16.mxu1 %vm7541_vm2, %v10547_v37  ;;  %v4664_v46 = vadd.f32 %v4660_v8, %v4652_v4  ;;  %v4917_v44 = vmul.f32 0.002269271, %v9783_v28  ;;  %v4629_v30 = vadd.f32 %v9689_v22, %v4621_v56  ;;  %v4928_v26 = vmul.f32 0.0040881946, %v5886_v45  ;;  %v9833_v42 = vld [vmem:[%s7548_s12 + $0x1ee] sm:$0xff] }
 0x1a1   : > { %v4920_v11 = vadd.f32 %v4916_v54, %v4908_v25  ;;  %v4929_v10 = vmul.f32 0.0040881946, %v9795_v38  ;;  %v4630_v13 = vadd.f32 %v9731_v6, %v4622_v2  ;;  %v4675_v23 = vadd.f32 %v9742_v62, %v4663_v34  ;;  %v5906_v53 = vld [vmem:[%s7548_s12 + $0x1e7] sm:$0xff]  ;;  %v5907_v41 = vld [vmem:[%s7548_s12 + $0x1ef] sm:$0xff] }
 0x1a2   : > { %v4676_v39 = vadd.f32 %v4672_v3, %v4664_v46  ;;  %v4921_v36 = vadd.f32 %v4917_v44, %v4909_v40  ;;  %v4641_v22 = vadd.f32 %v4637_v16, %v4629_v30  ;;  %v4940_v47 = vmul.f32 0.006997561, %v5890_v57  ;;  %v5902_v16 = vld [vmem:[%s7548_s12 + $0x1e6] sm:$0xff]  ;;  %v5912_v45 = vld [vmem:[%s7548_s12 + $0x1f1] sm:$0xff] }
 0x1a3   : > { %7188 = vmatpush3.bf16.msk.msra.mxu1 %vm7541_vm2, %v10547_v37  ;;  %v4932_v31 = vadd.f32 %v4928_v26, %v4920_v11  ;;  %v4941_v6 = vmul.f32 0.006997561, %v9808_v52  ;;  %v4687_v62 = vadd.f32 %v9748_v27, %v4675_v23  ;;  %v4642_v17 = vadd.f32 %v4638_v49, %v4630_v13  ;;  %v9840_v49 = vld [vmem:[%s7548_s12 + $0x1f0] sm:$0xff] }
 0x1a4   : > { %v4688_v32 = vadd.f32 %v4684_v55, %v4676_v39  ;;  %7204 = vmatprep.subr.bf16.mxu1 %v10509_v58  ;;  %v4933_v5 = vadd.f32 %v4929_v10, %v4921_v36  ;;  %v4653_v9 = vadd.f32 %v9758_v60, %v4641_v22  ;;  %v4952_v8 = vmul.f32 0.011379727, %v5894_v7  ;;  %v5916_v44 = vld [vmem:[%s7548_s12 + $0x1f3] sm:$0xff] }
 0x1a5   : > { %v4944_v35 = vadd.f32 %v4940_v47, %v4932_v31  ;;  %v4953_v3 = vmul.f32 0.011379727, %v9816_v51  ;;  %6693 = vmatprep.mubr.msk.f32.mxu0 %vm305_vm3, %v4687_v62  ;;  %v4654_v27 = vadd.f32 %v4650_v48, %v4642_v17  ;;  %v4964_v55 = vmul.f32 0.017582757, %v5898_v18  ;;  %v9846_v48 = vpop.f32.mrb[14].mxu0  ;;  %v5918_v57 = vld [vmem:[%s7548_s12 + $0x1f4] sm:$0xff] }
 0x1a6   : > { %v4945_v59 = vadd.f32 %v4941_v6, %v4933_v5  ;;  %v4965_v15 = vmul.f32 0.017582757, %v9824_v50  ;;  %v4665_v60 = vadd.f32 %v9761_v12, %v4653_v9  ;;  %v4685_v61 = vmul.f32 0.0011967713, %v9706_v1  ;;  %6694 = vmatmul.mubr.msk.f32.vlgmr.msra.gmra.mrb[30].mxu0 %vm305_vm3, %v4688_v32  ;;  %v5914_v1 = vld [vmem:[%s7548_s12 + $0x1f2] sm:$0xff]  ;;  %v9852_v54 = vpop.f32.mrb[15].mxu0 }
 0x1a7   : > { %v4956_v33 = vadd.f32 %v4952_v8, %v4944_v35  ;;  %v4976_v4 = vmul.f32 0.025811432, %v5902_v16  ;;  %v4666_v56 = vadd.f32 %v9786_v19, %v4654_v27  ;;  %v4686_v25 = vmul.f32 0.0011967713, %v5869_v43  ;;  %7192 = vmatpush3.bf16.msra.mxu0 %v10509_v58  ;;  %v5920_v13 = vld [vmem:[%s7548_s12 + $0x1f5] sm:$0xff]  ;;  %v5936_v27 = vld [vmem:[%s7548_s12 + $0x1fd] sm:$0xff] }
 0x1a8   : > { %v4957_v40 = vadd.f32 %v4953_v3, %v4945_v59  ;;  %v4977_v12 = vmul.f32 0.025811432, %v9833_v42  ;;  %v4677_v2 = vadd.f32 %v9775_v14, %v4665_v60  ;;  %7194 = vmatprep.subr.bf16.mxu0 %v10516_v0  ;;  %v4988_v46 = vmul.f32 0.03600039, %v5906_v53  ;;  %v9863_v14 = vld [vmem:[%s7548_s12 + $0x1f6] sm:$0xff] }
 0x1a9   : > { %v4968_v34 = vadd.f32 %v4964_v55, %v4956_v33  ;;  %v4989_v19 = vmul.f32 0.03600039, %v5907_v41  ;;  %v4678_v30 = vadd.f32 %v9791_v24, %v4666_v56  ;;  %v4998_v26 = vmul.f32 0.047705922, %v9779_v29  ;;  %v5924_v22 = vld [vmem:[%s7548_s12 + $0x1f7] sm:$0xff]  ;;  %v9870_v24 = vpop.f32.mrb[14].mxu1 }
 0x1aa   : > { %v4969_v11 = vadd.f32 %v4965_v15, %v4957_v40  ;;  %v4999_v10 = vmul.f32 0.047705922, %v9840_v49  ;;  %v4689_v23 = vadd.f32 %v4685_v61, %v4677_v2  ;;  %v5008_v36 = vmul.f32 0.06006305, %v9783_v28  ;;  %v5926_v31 = vld [vmem:[%s7548_s12 + $0x1f8] sm:$0xff]  ;;  %v9880_v28 = vpop.f32.mrb[15].mxu1 }
 0x1ab   : > { %v4980_v39 = vadd.f32 %v4976_v4, %v4968_v34  ;;  %v9866_v7 = vmul.f32 0.06006305, %v5912_v45  ;;  %v4690_v47 = vadd.f32 %v4686_v25, %v4678_v30  ;;  %7196 = vmatpush3.bf16.msra.mxu0 %v10516_v0  ;;  %v5018_v6 = vmul.f32 0.071847625, %v9795_v38  ;;  %v9875_v62 = vld [vmem:[%s7548_s12 + $0x1f9] sm:$0xff]  ;;  %v5880_v60 = vld [vmem:[%s7548_s12 + $0x210] sm:$0xff] }
 0x1ac   : > { %v4981_v29 = vadd.f32 %v4977_v12, %v4969_v11  ;;  %v5019_v18 = vmul.f32 0.071847625, %v5914_v1  ;;  %v9878_v32 = vld [vmem:[%s7548_s12 + $0x1fa] sm:$0xff]  ;;  %6708 = vmatprep.mubr.msk.f32.mxu1 %vm305_vm3, %v4689_v23  ;;  %7199 = vmatprep.subr.msk.bf16.mxu0 %vm7541_vm2, %v10547_v37  ;;  %v5028_v43 = vmul.f32 0.08165588, %v9808_v52 }
 0x1ad   : > { %v4992_v17 = vadd.f32 %v4988_v46, %v4980_v39  ;;  %v5029_v5 = vmul.f32 0.08165588, %v5916_v44  ;;  %v5038_v38 = vmul.f32 0.08817236, %v9816_v51  ;;  %v5932_v16 = vld [vmem:[%s7548_s12 + $0x1fb] sm:$0xff]  ;;  %6709 = vmatmul.mubr.msk.f32.vlgmr.msra.gmra.mrb[30].mxu1 %vm305_vm3, %v4690_v47 }
 0x1ae   : > { %v4993_v9 = vadd.f32 %v4989_v19, %v4981_v29  ;;  %v5039_v35 = vmul.f32 0.08817236, %v5918_v57  ;;  %v9891_v8 = vmul.f32 0.09045811, %v9824_v50  ;;  %v9893_v3 = vmul.f32 0.09045811, %v5920_v13  ;;  %7206 = vmatpush3.bf16.msra.mxu1 %v10509_v58 }
 0x1af   : > { %v5934_v53 = vld [vmem:[%s7548_s12 + $0x1fc] sm:$0xff]  ;;  %v5002_v52 = vadd.f32 %v4998_v26, %v4992_v17  ;;  %v9899_v51 = vmul.f32 0.08817236, %v9833_v42  ;;  %v9902_v59 = vmul.f32 0.08817236, %v9863_v14  ;;  %7208 = vmatprep.subr.bf16.mxu1 %v10516_v0  ;;  %7202 = vmatpush3.bf16.msk.msra.mxu0 %vm7541_vm2, %v10547_v37  ;;  %v5896_v39 = vld [vmem:[%s7548_s12 + $0x214] sm:$0xff] }
 0x1b0   : > { %v9904_v55 = vmul.f32 0.08165588, %v5907_v41  ;;  %v5003_v50 = vadd.f32 %v4999_v10, %v4993_v9  ;;  %v9910_v58 = vmul.f32 0.08165588, %v5924_v22  ;;  %v9913_v42 = vmul.f32 0.071847625, %v9840_v49 }
 0x1b1   : > { %v9915_v15 = vmul.f32 0.071847625, %v5926_v31  ;;  %v9919_v61 = vld [vmem:[%s7548_s12 + $0x218] sm:$0xff]  ;;  %v5012_v33 = vadd.f32 %v5008_v36, %v5002_v52  ;;  %v9923_v4 = vmul.f32 0.06006305, %v9875_v62 }
 0x1b2   : > { %v5884_v41 = vld [vmem:[%s7548_s12 + $0x211] sm:$0xff]  ;;  %v9925_v45 = vmul.f32 0.047705922, %v5914_v1  ;;  %v9928_v56 = vmul.f32 0.047705922, %v9878_v32  ;;  %v9931_v25 = vld [vmem:[%s7548_s12 + $0x219] sm:$0xff]  ;;  %v5013_v12 = vadd.f32 %v9866_v7, %v5003_v50  ;;  %7210 = vmatpush3.bf16.msra.mxu1 %v10516_v0 }
 0x1b3   : > { %v5888_v49 = vld [vmem:[%s7548_s12 + $0x212] sm:$0xff]  ;;  %v9935_v40 = vld [vmem:[%s7548_s12 + $0x21a] sm:$0xff]  ;;  %v9938_v2 = vmul.f32 0.03600039, %v5916_v44  ;;  %v9940_v34 = vmul.f32 0.03600039, %v5932_v16  ;;  %v5022_v19 = vadd.f32 %v5018_v6, %v5012_v33  ;;  %7213 = vmatprep.subr.msk.bf16.mxu1 %vm7541_vm2, %v10547_v37 }
 0x1b4   : > { %v9942_v46 = vmul.f32 0.025811432, %v5918_v57  ;;  %v5892_v1 = vld [vmem:[%s7548_s12 + $0x213] sm:$0xff]  ;;  %v9946_v30 = vmul.f32 0.025811432, %v5934_v53  ;;  %v9953_v10 = vld [vmem:[%s7548_s12 + $0x21b] sm:$0xff]  ;;  %v5023_v44 = vadd.f32 %v5019_v18, %v5013_v12 }
 0x1b5   : > { %v9948_v11 = vmul.f32 0.017582757, %v5920_v13  ;;  %v9950_v26 = vmul.f32 0.017582757, %v5936_v27  ;;  %v9959_v57 = vmul.f32 0.011379727, %v9863_v14  ;;  %v5032_v36 = vadd.f32 %v5028_v43, %v5022_v19 }
 0x1b6   : > { %v9961_v23 = vmul.f32 0.006997561, %v5924_v22  ;;  %v9963_v0 = vmul.f32 0.0040881946, %v5926_v31  ;;  %v9967_v13 = vld [vmem:[%s7548_s12 + $0x21c] sm:$0xff]  ;;  %v5033_v17 = vadd.f32 %v5029_v5, %v5023_v44  ;;  %7216 = vmatpush3.bf16.msk.msra.mxu1 %vm7541_vm2, %v10547_v37 }
 0x1b7   : > { %v4910_v47 = vmul.f32 0.0011967713, %v5880_v60  ;;  %v4911_v29 = vmul.f32 0.0011967713, %v9919_v61  ;;  %v4918_v6 = vmul.f32 0.002269271, %v5884_v41  ;;  %v5042_v31 = vadd.f32 %v5038_v38, %v5032_v36 }
 0x1b8   : > { %v4919_v14 = vmul.f32 0.002269271, %v9931_v25  ;;  %v4930_v18 = vmul.f32 0.0040881946, %v5888_v49  ;;  %v4931_v22 = vmul.f32 0.0040881946, %v9935_v40  ;;  %v5043_v27 = vadd.f32 %v5039_v35, %v5033_v17 }
 0x1b9   : > { %v9976_v43 = vmul.f32 0.002269271, %v9875_v62  ;;  %v4922_v16 = vadd.f32 %v4918_v6, %v4910_v47  ;;  %v4942_v9 = vmul.f32 0.006997561, %v5892_v1  ;;  %v5900_v53 = vld [vmem:[%s7548_s12 + $0x215] sm:$0xff]  ;;  %v5901_v5 = vld [vmem:[%s7548_s12 + $0x21d] sm:$0xff]  ;;  %v5052_v38 = vadd.f32 %v9891_v8, %v5042_v31 }
 0x1ba   : > { %v9981_v52 = vmul.f32 0.0011967713, %v9878_v32  ;;  %v4923_v50 = vadd.f32 %v4919_v14, %v4911_v29  ;;  %v4943_v60 = vmul.f32 0.006997561, %v9953_v10  ;;  %v5905_v37 = vld [vmem:[%s7548_s12 + $0x21e] sm:$0xff]  ;;  %v5053_v35 = vadd.f32 %v9893_v3, %v5043_v27 }
 0x1bb   : > { %v4934_v62 = vadd.f32 %v4930_v18, %v4922_v16  ;;  %v4954_v41 = vmul.f32 0.011379727, %v5896_v39  ;;  %v4955_v33 = vmul.f32 0.011379727, %v9967_v13  ;;  %v5908_v49 = vld [vmem:[%s7548_s12 + $0x217] sm:$0xff]  ;;  %v5909_v12 = vld [vmem:[%s7548_s12 + $0x21f] sm:$0xff]  ;;  %v5062_v36 = vadd.f32 %v9899_v51, %v5052_v38 }
 0x1bc   : > { %v4935_v1 = vadd.f32 %v4931_v22, %v4923_v50  ;;  %v4966_v32 = vmul.f32 0.017582757, %v5900_v53  ;;  %v4967_v19 = vmul.f32 0.017582757, %v5901_v5  ;;  %v5911_v44 = vld [vmem:[%s7548_s12 + $0x220] sm:$0xff]  ;;  %v5063_v39 = vadd.f32 %v9902_v59, %v5053_v35  ;;  %v9999_v51 = vpop.f32.mrb[16].mxu0 }
 0x1bd   : > { %v4946_v47 = vadd.f32 %v4942_v9, %v4934_v62  ;;  %v4978_v29 = vmul.f32 0.025811432, %v5904_v20  ;;  %v4979_v6 = vmul.f32 0.025811432, %v5905_v37  ;;  %v5913_v8 = vld [vmem:[%s7548_s12 + $0x221] sm:$0xff]  ;;  %v5072_v3 = vadd.f32 %v9904_v55, %v5062_v36  ;;  %v10006_v38 = vpop.f32.mrb[17].mxu0 }
 0x1be   : > { %v4947_v17 = vadd.f32 %v4943_v60, %v4935_v1  ;;  %v4990_v14 = vmul.f32 0.03600039, %v5908_v49  ;;  %v4991_v18 = vmul.f32 0.03600039, %v5909_v12  ;;  %v5915_v31 = vld [vmem:[%s7548_s12 + $0x222] sm:$0xff]  ;;  %v5073_v9 = vadd.f32 %v9910_v58, %v5063_v39 }
 0x1bf   : > { %v4958_v22 = vadd.f32 %v4954_v41, %v4946_v47  ;;  %v5000_v16 = vmul.f32 0.047705922, %v9919_v61  ;;  %v5001_v53 = vmul.f32 0.047705922, %v5911_v44  ;;  %v5917_v27 = vld [vmem:[%s7548_s12 + $0x223] sm:$0xff]  ;;  %v5082_v55 = vadd.f32 %v9913_v42, %v5072_v3 }
 0x1c0   : > { %v4959_v50 = vadd.f32 %v4955_v33, %v4947_v17  ;;  %v5010_v59 = vmul.f32 0.06006305, %v9931_v25  ;;  %v10003_v60 = vmul.f32 0.06006305, %v5913_v8  ;;  %v5919_v20 = vld [vmem:[%s7548_s12 + $0x224] sm:$0xff]  ;;  %v5083_v35 = vadd.f32 %v9915_v15, %v5073_v9  ;;  %v10029_v17 = vpop.f32.mrb[16].mxu1 }
 0x1c1   : > { %v4970_v62 = vadd.f32 %v4966_v32, %v4958_v22  ;;  %v5020_v61 = vmul.f32 0.071847625, %v9935_v40  ;;  %v5021_v41 = vmul.f32 0.071847625, %v5915_v31  ;;  %v5921_v49 = vld [vmem:[%s7548_s12 + $0x225] sm:$0xff]  ;;  %v5090_v36 = vadd.f32 %v5082_v55, %v9866_v7 }
 0x1c2   : > { %v4971_v58 = vadd.f32 %v4967_v19, %v4959_v50  ;;  %v5030_v33 = vmul.f32 0.08165588, %v9953_v10  ;;  %v10013_v25 = vmul.f32 0.08165588, %v5917_v27  ;;  %v5923_v1 = vld [vmem:[%s7548_s12 + $0x226] sm:$0xff]  ;;  %v5091_v8 = vadd.f32 %v9923_v4, %v5083_v35  ;;  %v10037_v4 = vpop.f32.mrb[17].mxu1 }
 0x1c3   : > { %v4982_v47 = vadd.f32 %v4978_v29, %v4970_v62  ;;  %v10018_v42 = vmul.f32 0.08817236, %v9967_v13  ;;  %v10020_v32 = vmul.f32 0.08817236, %v5919_v20  ;;  %v5925_v40 = vld [vmem:[%s7548_s12 + $0x227] sm:$0xff]  ;;  %v5100_v7 = vadd.f32 %v9925_v45, %v5090_v36  ;;  %10549 = vst [vmem:[#allocation10_spill] sm:$0xff] %v10037_v4 }
 0x1c4   : > { %v4983_v15 = vadd.f32 %v4979_v6, %v4971_v58  ;;  %v10024_v19 = vmul.f32 0.09045811, %v5901_v5  ;;  %v10026_v10 = vmul.f32 0.09045811, %v5921_v49  ;;  %v5927_v39 = vld [vmem:[%s7548_s12 + $0x228] sm:$0xff]  ;;  %v5101_v5 = vadd.f32 %v9928_v56, %v5091_v8 }
 0x1c5   : > { %v4994_v29 = vadd.f32 %v4990_v14, %v4982_v47  ;;  %v10032_v13 = vmul.f32 0.08817236, %v5905_v37  ;;  %v10034_v3 = vmul.f32 0.08817236, %v5923_v1  ;;  %v5929_v22 = vld [vmem:[%s7548_s12 + $0x229] sm:$0xff]  ;;  %v5110_v45 = vadd.f32 %v9938_v2, %v5100_v7  ;;  %v5938_v7 = vld [vmem:[%s7548_s12 + $0x1fe] sm:$0xff] }
 0x1c6   : > { %v4995_v6 = vadd.f32 %v4991_v18, %v4983_v15  ;;  %v10040_v9 = vmul.f32 0.08165588, %v5909_v12  ;;  %v10042_v50 = vmul.f32 0.08165588, %v5925_v40  ;;  %v10045_v55 = vld [vmem:[%s7548_s12 + $0x22a] sm:$0xff]  ;;  %v5111_v58 = vadd.f32 %v9940_v34, %v5101_v5  ;;  %v5940_v5 = vld [vmem:[%s7548_s12 + $0x1ff] sm:$0xff] }
 0x1c7   : > { %10550 = vst [vmem:[#allocation13_spill] sm:$0xff] %v10045_v55  ;;  %v5004_v37 = vadd.f32 %v5000_v16, %v4994_v29  ;;  %v10048_v14 = vmul.f32 0.071847625, %v5911_v44  ;;  %v10050_v62 = vmul.f32 0.071847625, %v5927_v39  ;;  %v5933_v35 = vld [vmem:[%s7548_s12 + $0x22b] sm:$0xff]  ;;  %v5120_v47 = vadd.f32 %v9942_v46, %v5110_v45 }
 0x1c8   : > { %v5005_v56 = vadd.f32 %v5001_v53, %v4995_v6  ;;  %v10054_v18 = vmul.f32 0.06006305, %v5929_v22  ;;  %v10056_v12 = vmul.f32 0.047705922, %v5915_v31  ;;  %v5935_v36 = vld [vmem:[%s7548_s12 + $0x22c] sm:$0xff]  ;;  %v5121_v34 = vadd.f32 %v9946_v30, %v5111_v58  ;;  %v5944_v58 = vld [vmem:[%s7548_s12 + $0x201] sm:$0xff] }
 0x1c9   : > { %v5014_v2 = vadd.f32 %v5010_v59, %v5004_v37  ;;  %v10061_v44 = vmul.f32 0.047705922, %v10045_v55  ;;  %v10063_v16 = vmul.f32 0.03600039, %v5917_v27  ;;  %v5937_v8 = vld [vmem:[%s7548_s12 + $0x22d] sm:$0xff]  ;;  %v5130_v46 = vadd.f32 %v9948_v11, %v5120_v47  ;;  %v5946_v47 = vld [vmem:[%s7548_s12 + $0x202] sm:$0xff] }
 0x1ca   : > { %v5015_v53 = vadd.f32 %v10003_v60, %v5005_v56  ;;  %v10068_v31 = vmul.f32 0.03600039, %v5933_v35  ;;  %v10070_v15 = vmul.f32 0.025811432, %v5919_v20  ;;  %v10074_v29 = vmul.f32 0.025811432, %v5935_v36 }
 0x1cb   : > { %v5024_v59 = vadd.f32 %v5020_v61, %v5014_v2  ;;  %v10076_v27 = vmul.f32 0.017582757, %v5921_v49  ;;  %v5939_v30 = vld [vmem:[%s7548_s12 + $0x22e] sm:$0xff]  ;;  %v5131_v6 = vadd.f32 %v9950_v26, %v5121_v34  ;;  %v10081_v37 = vmul.f32 0.017582757, %v5937_v8  ;;  %v5942_v20 = vld [vmem:[%s7548_s12 + $0x200] sm:$0xff] }
 0x1cc   : > { %v5025_v45 = vadd.f32 %v5021_v41, %v5015_v53  ;;  %v10083_v35 = vmul.f32 0.011379727, %v5923_v1  ;;  %v5941_v11 = vld [vmem:[%s7548_s12 + $0x22f] sm:$0xff]  ;;  %v5140_v61 = vadd.f32 %v9959_v57, %v5130_v46  ;;  %v10089_v36 = vmul.f32 0.006997561, %v5925_v40 }
 0x1cd   : > { %v5034_v56 = vadd.f32 %v5030_v33, %v5024_v59  ;;  %v10091_v49 = vmul.f32 0.0040881946, %v5927_v39  ;;  %v5943_v2 = vld [vmem:[%s7548_s12 + $0x230] sm:$0xff]  ;;  %v10096_v41 = vmul.f32 0.002269271, %v5929_v22 }
 0x1ce   : > { %v5035_v26 = vadd.f32 %v10013_v25, %v5025_v45  ;;  %v5137_v8 = vmul.f32 0.011379727, %v5938_v7  ;;  %v5147_v1 = vmul.f32 0.006997561, %v5940_v5  ;;  %v5150_v34 = vadd.f32 %v9961_v23, %v5140_v61  ;;  %v5945_v57 = vld [vmem:[%s7548_s12 + $0x231] sm:$0xff] }
 0x1cf   : > { %v5044_v53 = vadd.f32 %v10018_v42, %v5034_v56  ;;  %v5157_v55 = vmul.f32 0.0040881946, %v5942_v20  ;;  %v5167_v4 = vmul.f32 0.002269271, %v5944_v58  ;;  %v5177_v39 = vmul.f32 0.0011967713, %v5946_v47 }
 0x1d0   : > { %v5045_v33 = vadd.f32 %v10020_v32, %v5035_v26  ;;  %v5141_v40 = vadd.f32 %v5137_v8, %v5131_v6  ;;  %v10102_v46 = vmul.f32 0.011379727, %v5939_v30  ;;  %v5160_v59 = vadd.f32 %v9963_v0, %v5150_v34  ;;  %v10551_v45 = vld [vmem:[#allocation31_spill] sm:$0xff]  ;;  %v10115_v6 = vpop.f32.mrb[18].mxu0  ;;  %v10553_v58 = vld [vmem:[#allocation24_spill] sm:$0xff]  ;;  %v10555_v61 = vld [vmem:[#allocation38_spill] sm:$0xff] }
 0x1d1   : > { %v5054_v25 = vadd.f32 %v10024_v19, %v5044_v53  ;;  %v10106_v22 = vmul.f32 0.006997561, %v5941_v11  ;;  %v10108_v7 = vmul.f32 0.0040881946, %v5943_v2  ;;  %v10111_v5 = vmul.f32 0.002269271, %v5945_v57 }
 0x1d2   : > { %v5055_v23 = vadd.f32 %v10026_v10, %v5045_v33  ;;  %v5151_v42 = vadd.f32 %v5147_v1, %v5141_v40  ;;  %v10552_v20 = vld [vmem:[#allocation19_spill] sm:$0xff]  ;;  %v5170_v30 = vadd.f32 %v9976_v43, %v5160_v59  ;;  %v10554_v19 = vld [vmem:[#allocation22_spill] sm:$0xff]  ;;  %v10556_v56 = vld [vmem:[#allocation12_spill] sm:$0xff]  ;;  %v10123_v2 = vpop.f32.mrb[19].mxu0 }
 0x1d3   : > { %v689_v32 = vsub.f32 %v10552_v20, %v10551_v45  ;;  %v5064_v0 = vadd.f32 %v10032_v13, %v5054_v25  ;;  %v691_v11 = vsub.f32 %v10554_v19, %v10553_v58  ;;  %v688_v47 = vsub.f32 %v10556_v56, %v10555_v61  ;;  %v10557_v8 = vld [vmem:[#allocation43_spill] sm:$0xff]  ;;  %v10560_v33 = vld [vmem:[#allocation28_spill] sm:$0xff]  ;;  %v10136_v19 = vpop.f32.mrb[18].mxu1  ;;  %v10564_v56 = vld [vmem:[#allocation34_spill] sm:$0xff] }
 0x1d4   : > { %v5065_v10 = vadd.f32 %v10034_v3, %v5055_v23  ;;  %v5161_v26 = vadd.f32 %v5157_v55, %v5151_v42  ;;  %v10558_v1 = vld [vmem:[#allocation35_spill] sm:$0xff]  ;;  %v5180_v43 = vadd.f32 %v9981_v52, %v5170_v30  ;;  %v1095_v40 = vsub.f32 %v10560_v33, %v9575_v63  ;;  %v10561_v59 = vld [vmem:[#allocation16_spill] sm:$0xff]  ;;  %v10563_v42 = vld [vmem:[#allocation41_spill] sm:$0xff] }
 0x1d5   : > { %v690_v34 = vsub.f32 %v10558_v1, %v10557_v8  ;;  %v10559_v53 = vld [vmem:[#allocation39_spill] sm:$0xff]  ;;  %v5074_v13 = vadd.f32 %v10040_v9, %v5064_v0  ;;  %v1094_v1 = vsub.f32 %v10564_v56, %v10563_v42  ;;  %v10572_v42 = vld [vmem:[#allocation18_spill] sm:$0xff] }
 0x1d6   : > { %v1093_v57 = vsub.f32 %v10559_v53, %v9573_v21  ;;  %v10562_v25 = vld [vmem:[#allocation23_spill] sm:$0xff]  ;;  %v5075_v3 = vadd.f32 %v10042_v50, %v5065_v10  ;;  %v5171_v55 = vadd.f32 %v5167_v4, %v5161_v26  ;;  %v10141_v21 = vpop.f32.mrb[19].mxu1  ;;  %6723 = vmatprep.mubr.msk.f32.mxu0 %vm305_vm3, %v5180_v43  ;;  %v1115_v9 = vsub.f32 %v1095_v40, %v691_v11  ;;  %v10565_v10 = vld [vmem:[#allocation40_spill] sm:$0xff] }
 0x1d7   : > { %v1092_v20 = vsub.f32 %v10562_v25, %v10561_v59  ;;  %v5084_v52 = vadd.f32 %v10048_v14, %v5074_v13  ;;  %v1114_v53 = vsub.f32 %v1094_v1, %v690_v34  ;;  %v1376_v26 = vsub.f32 %v10551_v45, %v10565_v10  ;;  %v10568_v13 = vld [vmem:[#allocation37_spill] sm:$0xff]  ;;  %v10574_v1 = vld [vmem:[#allocation42_spill] sm:$0xff] }
 0x1d8   : > { %v1097_v23 = vsub.f32 %v1093_v57, %v689_v32  ;;  %v5085_v30 = vadd.f32 %v10050_v62, %v5075_v3  ;;  %v5181_v0 = vadd.f32 %v5177_v39, %v5171_v55  ;;  %v1117_v50 = vmul.f32 %v1115_v9, %v1115_v9  ;;  %v10569_v3 = vld [vmem:[#allocation29_spill] sm:$0xff]  ;;  %v10576_v9 = vld [vmem:[#allocation36_spill] sm:$0xff] }
 0x1d9   : > { %v1096_v63 = vsub.f32 %v1092_v20, %v688_v47  ;;  %v5092_v4 = vadd.f32 %v5084_v52, %v10003_v60  ;;  %v1116_v14 = vmul.f32 %v1114_v53, %v1114_v53  ;;  %v10566_v47 = vld [vmem:[#allocation14_spill] sm:$0xff]  ;;  %v10567_v60 = vld [vmem:[#allocation17_spill] sm:$0xff]  ;;  %v1377_v45 = vsub.f32 %v10557_v8, %v10568_v13  ;;  %v10575_v52 = vld [vmem:[#allocation32_spill] sm:$0xff] }
 0x1da   : > { %v1099_v33 = vmul.f32 %v1097_v23, %v1097_v23  ;;  %v5093_v57 = vadd.f32 %v10054_v18, %v5085_v30  ;;  %6724 = vmatmul.mubr.msk.f32.vlgmr.msra.gmra.mrb[32].mxu0 %vm305_vm3, %v5181_v0  ;;  %v1378_v62 = vsub.f32 %v10553_v58, %v10566_v47  ;;  %v1375_v43 = vsub.f32 %v10555_v61, %v10567_v60  ;;  %v10571_v23 = vld [vmem:[#allocation20_spill] sm:$0xff]  ;;  %v10573_v8 = vld [vmem:[#allocation33_spill] sm:$0xff] }
 0x1db   : > { %v1098_v32 = vmul.f32 %v1096_v63, %v1096_v63  ;;  %v5102_v39 = vadd.f32 %v10056_v12, %v5092_v4  ;;  %v1118_v59 = vsel %vm1100_vm4, %v1116_v14, 0.0  ;;  %v1119_v25 = vsel %vm1100_vm4, %v1117_v50, 0.0  ;;  %v10570_v12 = vld [vmem:[#allocation15_spill] sm:$0xff] }
 0x1dc   : > { %v1102_v11 = vsel %vm1100_vm4, %v1099_v33, 0.0  ;;  %v5103_v18 = vadd.f32 %v10061_v44, %v5093_v57  ;;  %v1120_v58 = vadd.f32 %v1119_v25, %v1118_v59  ;;  %v1821_v55 = vsub.f32 %v10570_v12, %v10569_v3 }
 0x1dd   : > { %v1101_v34 = vsel %vm1100_vm4, %v1098_v32, 0.0  ;;  %v5112_v20 = vadd.f32 %v10063_v16, %v5102_v39  ;;  %v1823_v56 = vsub.f32 %v10572_v42, %v10571_v23  ;;  %v1820_v44 = vsub.f32 %v10574_v1, %v10573_v8 }
 0x1de   : > { %v1103_v40 = vadd.f32 %v1102_v11, %v1101_v34  ;;  %v5113_v61 = vadd.f32 %v10068_v31, %v5103_v18  ;;  %v1822_v63 = vsub.f32 %v10576_v9, %v10575_v52  ;;  %v2139_v30 = vsub.f32 %v10565_v10, %v9846_v48  ;;  %v5947_v18 = vld [vmem:[%s7548_s12 + $0x232] sm:$0xff] }
 0x1df   : > { %v5122_v16 = vadd.f32 %v10070_v15, %v5112_v20  ;;  %v1825_v0 = vsub.f32 %v1821_v55, %v1376_v26  ;;  %v1842_v53 = vsub.f32 %v1823_v56, %v1378_v62  ;;  %v2141_v33 = vsub.f32 %v10566_v47, %v9870_v24  ;;  %v10578_v20 = vld [vmem:[#allocation13_spill] sm:$0xff] }
 0x1e0   : > { %1104 = vadd.xlane.f32.xlu0 %v1103_v40  ;;  %v5123_v4 = vadd.f32 %v10074_v29, %v5113_v61  ;;  %v1824_v31 = vsub.f32 %v1820_v44, %v1375_v43  ;;  %v1841_v50 = vsub.f32 %v1822_v63, %v1377_v45  ;;  %v2138_v32 = vsub.f32 %v10567_v60, %v9852_v54 }
 0x1e1   : > { %v5132_v57 = vadd.f32 %v10076_v27, %v5122_v16  ;;  %v1844_v14 = vmul.f32 %v1842_v53, %v1842_v53  ;;  %v1827_v11 = vmul.f32 %v1825_v0, %v1825_v0  ;;  %v2140_v15 = vsub.f32 %v10568_v13, %v9880_v28 }
 0x1e2   : > { %v5133_v10 = vadd.f32 %v10081_v37, %v5123_v4  ;;  %v1843_v26 = vmul.f32 %v1841_v50, %v1841_v50  ;;  %v1826_v47 = vmul.f32 %v1824_v31, %v1824_v31  ;;  %v2644_v29 = vsub.f32 %v9999_v51, %v10115_v6 }
 0x1e3   : > { %v5142_v62 = vadd.f32 %v10083_v35, %v5132_v57  ;;  %v1829_v39 = vsel %vm1100_vm4, %v1827_v11, 0.0  ;;  %v1846_v27 = vsel %vm1100_vm4, %v1844_v14, 0.0  ;;  %v2646_v34 = vsub.f32 %v10029_v17, %v10136_v19  ;;  %v10577_v17 = vld [vmem:[#allocation10_spill] sm:$0xff] }
 0x1e4   : > { %1121 = vadd.xlane.f32.xlu0 %v1120_v58  ;;  %v5143_v60 = vadd.f32 %v10102_v46, %v5133_v10  ;;  %v1828_v43 = vsel %vm1100_vm4, %v1826_v47, 0.0  ;;  %v1845_v37 = vsel %vm1100_vm4, %v1843_v26, 0.0  ;;  %v2648_v13 = vsub.f32 %v2644_v29, %v2139_v30 }
 0x1e5   : > { %v5152_v45 = vadd.f32 %v10089_v36, %v5142_v62  ;;  %v1830_v51 = vadd.f32 %v1829_v39, %v1828_v43  ;;  %v1847_v6 = vadd.f32 %v1846_v27, %v1845_v37  ;;  %v2665_v35 = vsub.f32 %v2646_v34, %v2141_v33 }
 0x1e6   : > { %v5153_v40 = vadd.f32 %v10106_v22, %v5143_v60  ;;  %v2650_v59 = vmul.f32 %v2648_v13, %v2648_v13  ;;  %v2643_v25 = vsub.f32 %v10006_v38, %v10123_v2  ;;  %v2645_v46 = vsub.f32 %v10577_v17, %v10141_v21  ;;  %v10208_v2 = vpop.f32.mrb[20].mxu0 }
 0x1e7   : > { %v5162_v19 = vadd.f32 %v10091_v49, %v5152_v45  ;;  %v5178_v58 = vmul.f32 0.0011967713, %v10578_v20  ;;  %1831 = vadd.xlane.f32.xlu1 %v1830_v51  ;;  %v2667_v3 = vmul.f32 %v2665_v35, %v2665_v35  ;;  %v5179_v12 = vmul.f32 0.0011967713, %v5947_v18  ;;  %v10213_v8 = vpop.f32.mrb[21].mxu0 }
 0x1e8   : > { %v5163_v36 = vadd.f32 %v10108_v7, %v5153_v40  ;;  %v2647_v55 = vsub.f32 %v2643_v25, %v2138_v32  ;;  %v2664_v23 = vsub.f32 %v2645_v46, %v2140_v15  ;;  %v2652_v38 = vsel %vm1100_vm4, %v2650_v59, 0.0 }
 0x1e9   : > { %v5172_v22 = vadd.f32 %v10096_v41, %v5162_v19  ;;  %v2669_v42 = vsel %vm1100_vm4, %v2667_v3, 0.0  ;;  %v3020_v61 = vsub.f32 %v9846_v48, %v10208_v2  ;;  %v3019_v41 = vsub.f32 %v9852_v54, %v10213_v8 }
 0x1ea   : > { %v5173_v21 = vadd.f32 %v10111_v5, %v5163_v36  ;;  %v2649_v49 = vmul.f32 %v2647_v55, %v2647_v55  ;;  %v2666_v56 = vmul.f32 %v2664_v23, %v2664_v23  ;;  %v10221_v48 = vpop.f32.mrb[20].mxu1 }
 0x1eb   : > { %v5182_v7 = vadd.f32 %v5178_v58, %v5172_v22  ;;  %1848 = vadd.xlane.f32.xlu1 %v1847_v6  ;;  %v3022_v63 = vsub.f32 %v9870_v24, %v10221_v48  ;;  %v10225_v30 = vpop.f32.mrb[21].mxu1 }
 0x1ec   : > { %v5183_v1 = vadd.f32 %v5179_v12, %v5173_v21  ;;  %v2668_v44 = vsel %vm1100_vm4, %v2666_v56, 0.0  ;;  %v2651_v52 = vsel %vm1100_vm4, %v2649_v49, 0.0  ;;  %v3021_v54 = vsub.f32 %v9880_v28, %v10225_v30 }
 0x1ed   : > { %6738 = vmatprep.mubr.msk.f32.mxu1 %vm305_vm3, %v5182_v7  ;;  %v2670_v5 = vadd.f32 %v2669_v42, %v2668_v44  ;;  %v2653_v9 = vadd.f32 %v2652_v38, %v2651_v52 }
 0x1ee   : > { %6739 = vmatmul.mubr.msk.f32.vlgmr.msra.gmra.mrb[32].mxu1 %vm305_vm3, %v5183_v1 }
 0x1ef   : > { %2671 = vadd.xlane.f32.xlu1 %v2670_v5  ;;  %2654 = vadd.xlane.f32.xlu0 %v2653_v9 }
 0x208   : > { %v6575_v16 = vpop.f32.mrb[22].mxu0 }
 0x209   : > { %v3216_v0 = vpop.f32.mrb[23].mxu0 }
 0x20c   : > { %v6590_v53 = vpop.f32.mrb[22].mxu1 }
 0x20d   : > { %v3297_v33 = vpop.f32.mrb[23].mxu1 }
 0x21a   : > { %v6605_v4 = vpop.f32.mrb[24].mxu0 }
 0x21b   : > { %v3623_v31 = vsub.f32 %v6575_v16, %v6605_v4  ;;  %v3532_v50 = vpop.f32.mrb[25].mxu0 }
 0x21c   : > { %v3622_v32 = vsub.f32 %v3216_v0, %v3532_v50 }
 0x21d   : > { %v3627_v57 = vsub.f32 %v3623_v31, %v3020_v61 }
 0x21e   : > { %v3626_v14 = vsub.f32 %v3622_v32, %v3019_v41 }
 0x21f   : > { %v3629_v11 = vmul.f32 %v3627_v57, %v3627_v57 }
 0x220   : > { %v3628_v15 = vmul.f32 %v3626_v14, %v3626_v14 }
 0x221   : > { %v3631_v10 = vsel %vm1100_vm4, %v3629_v11, 0.0 }
 0x222   : > { %v3630_v24 = vsel %vm1100_vm4, %v3628_v15, 0.0 }
 0x223   : > { %v6620_v26 = vpop.f32.mrb[24].mxu1  ;;  %v3632_v47 = vadd.f32 %v3631_v10, %v3630_v24 }
 0x224   : > { %v3625_v29 = vsub.f32 %v6590_v53, %v6620_v26  ;;  %v3613_v28 = vpop.f32.mrb[25].mxu1 }
 0x225   : > { %v3624_v62 = vsub.f32 %v3297_v33, %v3613_v28  ;;  %3633 = vadd.xlane.f32.xlu0 %v3632_v47 }
 0x226   : > { %v3644_v39 = vsub.f32 %v3625_v29, %v3022_v63  ;;  %v10231_v27 = vpop.f32.mrb[26].mxu0 }
 0x227   : > { %v3643_v34 = vsub.f32 %v3624_v62, %v3021_v54  ;;  %v4095_v60 = vsub.f32 %v10208_v2, %v10231_v27  ;;  %v10235_v43 = vpop.f32.mrb[27].mxu0 }
 0x228   : > { %v3646_v37 = vmul.f32 %v3644_v39, %v3644_v39  ;;  %v4094_v13 = vsub.f32 %v10213_v8, %v10235_v43 }
 0x229   : > { %v3645_v45 = vmul.f32 %v3643_v34, %v3643_v34 }
 0x22a   : > { %v3648_v18 = vsel %vm1100_vm4, %v3646_v37, 0.0 }
 0x22b   : > { %v3647_v51 = vsel %vm1100_vm4, %v3645_v45, 0.0 }
 0x22c   : > { %v3649_v6 = vadd.f32 %v3648_v18, %v3647_v51 }
 0x22e   : > { %3650 = vadd.xlane.f32.xlu1 %v3649_v6 }
 0x22f   : > { %v10241_v35 = vpop.f32.mrb[26].mxu1 }
 0x230   : > { %v4097_v40 = vsub.f32 %v10221_v48, %v10241_v35  ;;  %v10245_v59 = vpop.f32.mrb[27].mxu1 }
 0x231   : > { %v4096_v25 = vsub.f32 %v10225_v30, %v10245_v59 }
 0x268   : > { %v6665_v17 = vpop.f32.mrb[28].mxu0 }
 0x269   : > { %v4351_v46 = vpop.f32.mrb[29].mxu0 }
 0x26d   : > { %v1105_v19 = vpop.xlane.xlu0 %1104  ;;  %v6680_v3 = vpop.f32.mrb[28].mxu1 }
 0x26e   : > { %v1106_v20 = vrot.slane %v1105_v19, 4  ;;  %v4432_v12 = vpop.f32.mrb[29].mxu1 }
 0x270   : > { %v1107_v58 = vadd.f32 %v1106_v20, %v1105_v19 }
 0x271   : > { %v1122_v36 = vpop.xlane.xlu0 %1121 }
 0x272   : > { %v1108_v55 = vrot.slane %v1107_v58, 2  ;;  %v1123_v23 = vrot.slane %v1122_v36, 4 }
 0x274   : > { %v1124_v22 = vadd.f32 %v1123_v23, %v1122_v36  ;;  %v1109_v42 = vadd.f32 %v1108_v55, %v1107_v58  ;;  %v1832_v21 = vpop.xlane.xlu1 %1831 }
 0x275   : > { %v1833_v49 = vrot.slane %v1832_v21, 4 }
 0x276   : > { %v1125_v38 = vrot.slane %v1124_v22, 2  ;;  %v1110_v2 = vrot.slane %v1109_v42, 1 }
 0x277   : > { %v1834_v8 = vadd.f32 %v1833_v49, %v1832_v21 }
 0x278   : > { %v1111_v56 = vadd.f32 %v1110_v2, %v1109_v42  ;;  %v1126_v61 = vadd.f32 %v1125_v38, %v1124_v22  ;;  %v1849_v41 = vpop.xlane.xlu1 %1848 }
 0x279   : > { %v1835_v1 = vrot.slane %v1834_v8, 2  ;;  %v1850_v44 = vrot.slane %v1849_v41, 4  ;;  %v6695_v63 = vpop.f32.mrb[30].mxu0 }
 0x27a   : > { %7219 = vpush %v1111_v56  ;;  %v1127_v7 = vrot.slane %v1126_v61, 1  ;;  %v4854_v16 = vsub.f32 %v6665_v17, %v6695_v63  ;;  %v4763_v0 = vpop.f32.mrb[31].mxu0 }
 0x27b   : > { %v1851_v5 = vadd.f32 %v1850_v44, %v1849_v41  ;;  %v1836_v9 = vadd.f32 %v1835_v1, %v1834_v8  ;;  %v4853_v50 = vsub.f32 %v4351_v46, %v4763_v0 }
 0x27c   : > { %v1128_v52 = vadd.f32 %v1127_v7, %v1126_v61  ;;  %v2672_v54 = vpop.xlane.xlu1 %2671  ;;  %v2655_v31 = vpop.xlane.xlu0 %2654  ;;  %v4858_v57 = vsub.f32 %v4854_v16, %v4095_v60 }
 0x27d   : > { %v1852_v53 = vrot.slane %v1851_v5, 2  ;;  %v1837_v33 = vrot.slane %v1836_v9, 1  ;;  %v2673_v4 = vrot.slane %v2672_v54, 4  ;;  %v2656_v32 = vrot.slane %v2655_v31, 4 }
 0x27e   : > { %7221 = vpush %v1128_v52  ;;  %v4857_v10 = vsub.f32 %v4853_v50, %v4094_v13  ;;  %v4860_v26 = vmul.f32 %v4858_v57, %v4858_v57 }
 0x27f   : > { %v1838_v14 = vadd.f32 %v1837_v33, %v1836_v9  ;;  %v1853_v11 = vadd.f32 %v1852_v53, %v1851_v5  ;;  %v2674_v15 = vadd.f32 %v2673_v4, %v2672_v54  ;;  %v2657_v24 = vadd.f32 %v2656_v32, %v2655_v31 }
 0x280   : > { %v4859_v28 = vmul.f32 %v4857_v10, %v4857_v10  ;;  %v6710_v39 = vpop.f32.mrb[30].mxu1  ;;  %v4862_v34 = vsel %vm1100_vm4, %v4860_v26, 0.0 }
 0x281   : > { %7223 = vpush %v1838_v14  ;;  %v1854_v47 = vrot.slane %v1853_v11, 1  ;;  %v2675_v29 = vrot.slane %v2674_v15, 2  ;;  %v2658_v62 = vrot.slane %v2657_v24, 2  ;;  %v4856_v18 = vsub.f32 %v6680_v3, %v6710_v39  ;;  %v4844_v51 = vpop.f32.mrb[31].mxu1 }
 0x282   : > { %v4861_v60 = vsel %vm1100_vm4, %v4859_v28, 0.0  ;;  %v4855_v17 = vsub.f32 %v4432_v12, %v4844_v51 }
 0x283   : > { %v1855_v37 = vadd.f32 %v1854_v47, %v1853_v11  ;;  %v2676_v45 = vadd.f32 %v2675_v29, %v2674_v15  ;;  %v2659_v6 = vadd.f32 %v2658_v62, %v2657_v24  ;;  %v4863_v46 = vadd.f32 %v4862_v34, %v4861_v60 }
 0x284   : > { %v4875_v19 = vsub.f32 %v4856_v18, %v4097_v40  ;;  %v4874_v58 = vsub.f32 %v4855_v17, %v4096_v25 }
 0x285   : > { %7225 = vpush %v1855_v37  ;;  %v2677_v13 = vrot.slane %v2676_v45, 1  ;;  %v2660_v20 = vrot.slane %v2659_v6, 1  ;;  %4864 = vadd.xlane.f32.xlu0 %v4863_v46 }
 0x286   : > { %v4877_v3 = vmul.f32 %v4875_v19, %v4875_v19  ;;  %v4876_v23 = vmul.f32 %v4874_v58, %v4874_v58 }
 0x287   : > { %v2678_v36 = vadd.f32 %v2677_v13, %v2676_v45  ;;  %v2661_v55 = vadd.f32 %v2660_v20, %v2659_v6 }
 0x288   : > { %v4879_v22 = vsel %vm1100_vm4, %v4877_v3, 0.0  ;;  %v4878_v12 = vsel %vm1100_vm4, %v4876_v23, 0.0 }
 0x289   : > { %7227 = vpush %v2661_v55  ;;  %v4880_v42 = vadd.f32 %v4879_v22, %v4878_v12  ;;  %v1141_v22 = vstv %s1136_s23  ;;  %s10290_s23 = sld [smem:[#allocation2 + $0x4]] }
 0x28a   : > { %7229 = vpush %v2678_v36 }
 0x28b   : > { %4881 = vadd.xlane.f32.xlu1 %v4880_v42 }
 0x2ab   : > { %s7220_s12 = spop %7219 }
 0x2ad   : > { %v6725_v48 = vpop.f32.mrb[32].mxu0 }
 0x2ae   : > { %v5347_v40 = vsub.f32 %v6725_v48, %v10231_v27  ;;  %v5256_v38 = vpop.f32.mrb[33].mxu0 }
 0x2af   : > { %v5346_v30 = vsub.f32 %v5256_v38, %v10235_v43  ;;  %s7222_s25 = spop %7221  ;;  %v265_v38 = vlaneseq }
 0x2b0   : > { %v5349_v25 = vmul.f32 %v5347_v40, %v5347_v40  ;;  %s1130_s11 = sadd.f32 %s7222_s25, %s7220_s12  ;;  %v1868_v40 = vstv %s5604_s3 }
 0x2b1   : > { %v5348_v2 = vmul.f32 %v5346_v30, %v5346_v30 }
 0x2b2   : > { %v5351_v21 = vsel %vm1100_vm4, %v5349_v25, 0.0  ;;  %v3634_v61 = vpop.xlane.xlu0 %3633  ;;  %s7224_s9 = spop %7223  ;;  %s10267_s17 = smul.f32 0.001953125, %s1130_s11 }
 0x2b3   : > { %v5350_v49 = vsel %vm1100_vm4, %v5348_v2, 0.0  ;;  %v3635_v8 = vrot.slane %v3634_v61, 4 }
 0x2b4   : > { %v5352_v56 = vadd.f32 %v5351_v21, %v5350_v49  ;;  %s1138_s8 = smul.f32 %s5551_s13, %s10267_s17  ;;  %v266_v21 = vand.u32 127, %v265_v38 }
 0x2b5   : > { %v3636_v7 = vadd.f32 %v3635_v8, %v3634_v61 }
 0x2b6   : > { %5353 = vadd.xlane.f32.xlu0 %v5352_v56  ;;  %s7226_s10 = spop %7225  ;;  %v1139_v23 = vstv %s1138_s8  ;;  %vm1859_vm5 = vcmp.eq.s32.totalorder %v266_v21, 1  ;;  %vm1132_vm6 = vcmp.eq.s32.totalorder %v266_v21, 0  ;;  %vm2682_vm7 = vcmp.eq.s32.totalorder %v266_v21, 2 }
 0x2b7   : > { %v3637_v41 = vrot.slane %v3636_v7, 2  ;;  %s1857_s14 = sadd.f32 %s7226_s10, %s7224_s9  ;;  %s5761_s9 = sld [smem:[#allocation2 + $0x83]]  ;;  %v1142_v42 = vadd.f32 %v1141_v22, %v1139_v23  ;;  %vm3661_vm8 = vcmp.eq.s32.totalorder %v266_v21, 3  ;;  %vm4892_vm9 = vcmp.eq.s32.totalorder %v266_v21, 4 }
 0x2b8   : > { %vm5381_vm10 = vcmp.eq.s32.totalorder %v266_v21, 5 }
 0x2b9   : > { %v3638_v1 = vadd.f32 %v3637_v41, %v3636_v7  ;;  %s10269_s30 = smul.f32 0.001953125, %s1857_s14  ;;  %s5672_s14 = sld [smem:[#allocation2 + $0x2]]  ;;  %v1133_v7 = vstv %s10267_s17 }
 0x2ba   : > { %s7228_s16 = spop %7227  ;;  %s10298_s17 = sld [smem:[#allocation2 + $0x5]] }
 0x2bb   : > { %v3651_v52 = vpop.xlane.xlu1 %3650  ;;  %v3639_v5 = vrot.slane %v3638_v1, 1  ;;  %s7230_s26 = spop %7229  ;;  %s1865_s2 = smul.f32 %s5605_s15, %s10269_s30  ;;  %v1860_v56 = vstv %s10269_s30 }
 0x2bc   : > { %v3652_v43 = vrot.slane %v3651_v52, 4  ;;  %s2680_s0 = sadd.f32 %s7230_s26, %s7228_s16  ;;  %s10278_s15 = sld [smem:[#allocation2 + $0x84]] }
 0x2bd   : > { %v3640_v54 = vadd.f32 %v3639_v5, %v3638_v1  ;;  %v1866_v12 = vstv %s1865_s2  ;;  %s10281_s2 = sld [smem:[#allocation2 + $0x3]]  ;;  %v1861_v1 = vsel %vm1859_vm5, %v1860_v56, 0.0  ;;  %s10294_s26 = sld [smem:[#allocation2 + $0x85]] }
 0x2be   : > { %v3653_v0 = vadd.f32 %v3652_v43, %v3651_v52  ;;  %s10273_s12 = smul.f32 0.001953125, %s2680_s0  ;;  %v1867_v48 = vadd.f32 %v1866_v12, %v1142_v42 }
 0x2bf   : > { %7231 = vpush %v3640_v54  ;;  %v2691_v49 = vstv %s5672_s14 }
 0x2c0   : > { %v3654_v4 = vrot.slane %v3653_v0, 2  ;;  %s2688_s11 = smul.f32 %s5673_s6, %s10273_s12  ;;  %v1869_v25 = vadd.f32 %v1868_v40, %v1867_v48  ;;  %v2683_v41 = vstv %s10273_s12  ;;  %s250_s6 = sand.u32 1, %s7396_s19  }
 0x2c1   : > { %v6740_v44 = vpop.f32.mrb[32].mxu1 }
 0x2c2   : > { %v5364_v27 = vsub.f32 %v6740_v44, %v10241_v35  ;;  %v5337_v9 = vpop.f32.mrb[33].mxu1  ;;  %v3655_v32 = vadd.f32 %v3654_v4, %v3653_v0  ;;  %v2689_v30 = vstv %s2688_s11 }
 0x2c3   : > { %v5363_v63 = vsub.f32 %v5337_v9, %v10245_v59  ;;  %v2690_v2 = vadd.f32 %v2689_v30, %v1869_v25  ;;  %v3670_v5 = vstv %s10281_s2  ;;  %v2684_v9 = vsel %vm2682_vm7, %v2683_v41, 0.0  ;;  %s5400_s2 = scalar_lea.sflag [#allocation3], %s250_s6 }
 0x2c4   : > { %v5366_v16 = vmul.f32 %v5364_v27, %v5364_v27  ;;  %v3656_v57 = vrot.slane %v3655_v32, 1  ;;  %v1134_v27 = vsel %vm1132_vm6, %v1133_v7, 0.0 }
 0x2c5   : > { %v5365_v53 = vmul.f32 %v5363_v63, %v5363_v63  ;;  %v2692_v8 = vadd.f32 %v2691_v49, %v2690_v2  ;;  %v1862_v43 = vadd.f32 %v1861_v1, %v1134_v27 }
 0x2c6   : > { %v5368_v33 = vsel %vm1100_vm4, %v5366_v16, 0.0  ;;  %v3657_v14 = vadd.f32 %v3656_v57, %v3655_v32 }
 0x2c7   : > { %v5367_v31 = vsel %vm1100_vm4, %v5365_v53, 0.0  ;;  %v2685_v53 = vadd.f32 %v2684_v9, %v1862_v43 }
 0x2c8   : > { %v5369_v50 = vadd.f32 %v5368_v33, %v5367_v31  ;;  %7233 = vpush %v3657_v14 }
 0x2ca   : > { %5370 = vadd.xlane.f32.xlu1 %v5369_v50  ;;  %v4901_v50 = vstv %s10290_s23 }
 0x2f0   : > { %s7232_s1 = spop %7231 }
 0x2f9   : > { %s7234_s27 = spop %7233 }
 0x2fa   : > { %s3659_s25 = sadd.f32 %s7234_s27, %s7232_s1 }
 0x2fc   : > { %s10276_s16 = smul.f32 0.001953125, %s3659_s25 }
 0x2fe   : > { %s3667_s1 = smul.f32 %s5761_s9, %s10276_s16  ;;  %v3662_v52 = vstv %s10276_s16  ;;  %s5956_s9 = sshll.u32 %s7460_s22, 4 }
 0x2ff   : > { %v3663_v16 = vsel %vm3661_vm8, %v3662_v52, 0.0 }
 0x300   : > { %v3668_v61 = vstv %s3667_s1  ;;  %v3664_v31 = vadd.f32 %v3663_v16, %v2685_v53  ;;  %s264_s1 = scalar_lea.vmem %s10367_s4, %s7529_s7 }
 0x301   : > { %v3669_v44 = vadd.f32 %v3668_v61, %v2692_v8 }
 0x303   : > { %v3671_v0 = vadd.f32 %v3670_v5, %v3669_v44 }
 0x312   : > { %v4865_v35 = vpop.xlane.xlu0 %4864 }
 0x313   : > { %v4866_v11 = vrot.slane %v4865_v35, 4 }
 0x315   : > { %v4867_v15 = vadd.f32 %v4866_v11, %v4865_v35 }
 0x317   : > { %v4868_v59 = vrot.slane %v4867_v15, 2 }
 0x318   : > { %v4882_v10 = vpop.xlane.xlu1 %4881 }
 0x319   : > { %v4869_v24 = vadd.f32 %v4868_v59, %v4867_v15  ;;  %v4883_v26 = vrot.slane %v4882_v10, 4  ;;  %v5390_v59 = vstv %s10298_s17 }
 0x31b   : > { %v4870_v47 = vrot.slane %v4869_v24, 1  ;;  %v4884_v29 = vadd.f32 %v4883_v26, %v4882_v10 }
 0x31d   : > { %v4871_v28 = vadd.f32 %v4870_v47, %v4869_v24  ;;  %v4885_v62 = vrot.slane %v4884_v29, 2 }
 0x31f   : > { %7235 = vpush %v4871_v28  ;;  %v4886_v39 = vadd.f32 %v4885_v62, %v4884_v29 }
 0x321   : > { %v4887_v34 = vrot.slane %v4886_v39, 1 }
 0x323   : > { %v4888_v37 = vadd.f32 %v4887_v34, %v4886_v39 }
 0x325   : > { %7237 = vpush %v4888_v37 }
 0x343   : > { %v5354_v45 = vpop.xlane.xlu0 %5353 }
 0x344   : > { %v5355_v18 = vrot.slane %v5354_v45, 4 }
 0x346   : > { %v5356_v51 = vadd.f32 %v5355_v18, %v5354_v45 }
 0x348   : > { %v5357_v60 = vrot.slane %v5356_v51, 2 }
 0x34a   : > { %v5358_v6 = vadd.f32 %v5357_v60, %v5356_v51 }
 0x34c   : > { %v5359_v17 = vrot.slane %v5358_v6, 1 }
 0x34e   : > { %v5360_v46 = vadd.f32 %v5359_v17, %v5358_v6 }
 0x350   : > { %7239 = vpush %v5360_v46  ;;  %s7236_s10 = spop %7235 }
 0x356   : > { %s7238_s13 = spop %7237 }
 0x357   : > { %v5371_v13 = vpop.xlane.xlu1 %5370  ;;  %s4890_s0 = sadd.f32 %s7238_s13, %s7236_s10  ;;  %s251_s10 = scalar_lea.vmem [#allocation5], %s250_s6 }
 0x358   : > { %v5372_v19 = vrot.slane %v5371_v13, 4  ;;  %s5415_s11 = sshll.u32 %s251_s10, 4  ;;  %s10311_s11 = int_to_ptr.vmem [resolvable:$true] %s5415_s11 }
 0x359   : > { %s10283_s3 = smul.f32 0.001953125, %s4890_s0  ;;  %s10309_s0 = scalar_lea.hbm %s10368_s5, %s5956_s9 }
 0x35a   : > { %v5373_v20 = vadd.f32 %v5372_v19, %v5371_v13 }
 0x35b   : > { %s4898_s27 = smul.f32 %s10278_s15, %s10283_s3  ;;  %v4893_v63 = vstv %s10283_s3  ;;  %s7338_s3 = scalar_lea.vmem %s10311_s11, 16 }
 0x35c   : > { %v5374_v58 = vrot.slane %v5373_v20, 2  ;;  %v4894_v33 = vsel %vm4892_vm9, %v4893_v63, 0.0  ;;  %p7339_p9 = scmp.ne.s32.totalorder %s10311_s11, %s7338_s3 }
 0x35d   : > { %v4899_v54 = vstv %s4898_s27  ;;  %v4895_v32 = vadd.f32 %v4894_v33, %v3664_v31  ;;  %s7408_s27 = smov [#allocation5]  }
 0x35e   : > { %v5375_v36 = vadd.f32 %v5374_v58, %v5373_v20  ;;  %v4900_v4 = vadd.f32 %v4899_v54, %v3671_v0  ;;  %p7340_p11 = pnand %p7339_p9, %p7477_p5  ;;  %s7342_s23 = sshll.u32 %s7408_s27, 4  ;;  %s7343_s23 = int_to_ptr.vmem [resolvable:$false] %s7342_s23 }
 0x35f   : > { %p7345_p13 = scmp.lt.s32.totalorder %s10311_s11, %s7343_s23 }
 0x360   : > { %v5376_v3 = vrot.slane %v5375_v36, 1  ;;  %v4902_v14 = vadd.f32 %v4901_v50, %v4900_v4  ;;  %p7341_p12 = pneg %p7340_p11 }
 0x362   : > { %v5377_v55 = vadd.f32 %v5376_v3, %v5375_v36 }
 0x364   : > { %7241 = vpush %v5377_v55 }
 0x381   : > { %s7240_s30 = spop %7239 }
 0x395   : > { %s7242_s8 = spop %7241 }
 0x396   : > { %s5379_s12 = sadd.f32 %s7242_s8, %s7240_s30 }
 0x398   : > { %s5380_s25 = smul.f32 0.001953125, %s5379_s12 }
 0x39a   : > { %v5382_v57 = vstv %s5380_s25  ;;  %s5387_s14 = smul.f32 %s10294_s26, %s5380_s25  ;;  %s7344_s26 = scalar_lea.vmem %s7343_s23, 32 }
 0x39b   : > { %v5383_v35 = vsel %vm5381_vm10, %v5382_v57, 0.0  ;;  %p7346_p0 = scmp.lt.s32.totalorder %s7344_s26, %s7338_s3 }
 0x39c   : > { %v5384_v11 = vadd.f32 %v5383_v35, %v4895_v32  ;;  %v5388_v15 = vstv %s5387_s14 }
 0x39d   : > { %v5389_v10 = vadd.f32 %v5388_v15, %v4902_v14  ;;  %p7347_p1 = por %p7346_p0, %p7345_p13 }
 0x39e   : > { %5395 = vst.msk [vmem:[%s251_s10] sm:$0x1] %vm5394_vm11, %v5384_v11 }
 0x39f   : > { %v5391_v24 = vadd.f32 %v5390_v59, %v5389_v10  ;;  %p7348_p2 = pnand %p7347_p1, %p7341_p12 }
 0x3a1   : > { %7351 = shalt.err (!%p7348_p2)
}
 0x3a2   : > { %s7352_s30 = scalar_lea.hbm %s10309_s0, 16  ;;  %s7356_s8 = scalar_lea.hbm %s10368_s5, 32 }
 0x3a3   : > { %p7353_p3 = scmp.ne.s32.totalorder %s10309_s0, %s7352_s30  ;;  %p7357_p8 = scmp.lt.u32.totalorder %s10309_s0, %s10368_s5 }
 0x3a4   : > { %p7358_p10 = scmp.lt.u32.totalorder %s7356_s8, %s7352_s30  ;;  %p7360_p11 = scmp.lt.u32.totalorder %s7352_s30, %s10309_s0 }
 0x3a5   : > { %p7354_p4 = pnand %p7353_p3, %p7477_p5 }
 0x3a6   : > { %p7359_p9 = por %p7358_p10, %p7357_p8 }
 0x3a7   : > { %p7355_p7 = pneg %p7354_p4 }
 0x3a8   : > { %p7361_p12 = por %p7360_p11, %p7359_p9 }
 0x3aa   : > { %p7362_p13 = pnand %p7361_p12, %p7355_p7 }
 0x3ac   : > { %7365 = shalt.err (!%p7362_p13)
}
 0x3ad   : > { %7247 = dma.vmem_to_hbm [thread:$0]  (%p7477_p5), %s10311_s11, 16, %s10309_s0, %s5400_s2   ;;  %5393 = vst.msk [vmem:[%s264_s1] sm:$0x1] %vm5392_vm12, %v5391_v24 }
 0x3ae PF: > { %p7259_p0 = scmp.ge.s32.totalorder %s7404_s21, 2  ;;  %s5433_s14 = sand.u32 1, %s7392_s18  }
 0x3af   : > { %s5434_s13 = scalar_lea.sflag [#allocation3], %s5433_s14 }
 0x3b0   : > { %p7254_p1 = pnand %p7259_p0, %p7481_p6 }
 0x3b2   : > { %7387 = dma.done.wait (!%p7254_p1), %s5434_s13, 16  }
 0x3b3   : > { %7389 = vsyncadd (!%p7254_p1), %s5434_s13, 4294967280  ;;  %s10579_s28 = sld [smem:[#allocation8_spill]]  ;;  %p17_p5 = scmp.ge.s32.totalorder %s7464_s24, 4  }
 0x3b4   : > { %s10580_s18 = smov %s7396_s19  ;;  %s10581_s19 = smov %s7400_s20 }
 0x3b5   : > { %s10583_s21 = smov %s7464_s24  ;;  %19 = sbr.rel (!%p17_p5) target bundleno = 9 (0x9), region = 101 }
 0x3b9   : > { %s10582_s20 = smov %s10579_s28 }
 0x3bc   :  { %5438 = vsyncpa [#allocation3], 1 }
 0x3bd   :  { %5440 = vsyncpa [#allocation3 + $0x1], 1 }
 0x3be   :  { %5441 = vsyncpa [#allocation4], 1 }
 0x3bf   :  { %5443 = vsyncpa [#allocation4 + $0x1], 1 }

</bundles_post_ra>
